<compile_context>
chip_gen: v5e
topology: v5e:2x2
jax: 0.10.0
libtpu: 0.0.40
codegen_flags: <defaults>
</compile_context>

<pallas_src>
import math

import jax
import jax.numpy as jnp
from jax.experimental import pallas as pl
from jax.experimental.pallas import tpu as pltpu  # noqa: F401  (TPU backend)

# ------------------------- small, module-consistent config -------------------
B = 2                     # batch
IMG = 16                  # image_size
PATCH = 4                 # patch_size
IN_CH = 3
GH = IMG // PATCH
GW = IMG // PATCH
NUM_PATCHES = GH * GW     # 16
N_TOK = NUM_PATCHES + 1   # 17  (patch_dim in Attention)
BT = B * N_TOK            # 34  (both samples stacked on sublanes)
PP = IN_CH * PATCH * PATCH  # 48 flattened patch pixels
EMB = 32                  # emb_dim
HEADS = 4
HEAD_DIM = EMB // HEADS   # 8
SEQ_LEN = 8               # kw_dim in Attention
MLP_HIDDEN = int(EMB * 4.0)   # 128
NUM_LAYERS = 2
NUM_CLASSES = 10
LANES = 128               # lane-dense classifier output; sliced outside kernel
EPS = 1e-5                # torch LayerNorm default
SCALE = HEAD_DIM ** (-0.5)

# ----------------------------- packed-slab layouts ----------------------------
# Slab A: 128-lane weights.
A_QKVW = 0                       # EMB rows; lanes 0:96 = [q|k|v]; q pre-scaled by SCALE
A_MLPW1 = 32                     # EMB rows
A_CLSW = 64                      # EMB rows; lanes 0:NUM_CLASSES
A_MLPB1 = 96                     # 1 row
A_CLSB = 97                      # 1 row; lanes 0:NUM_CLASSES
A_ROWS = 98

# Slab B: 32-lane (EMB-wide) weights.  Section starts are 8-aligned where it matters.
B_TOKB = 0                       # BT rows: cls/pos/conv-bias token bias, tiled over batch
B_PEW = 40                       # PP rows: patch-embed weight (x@W form)
B_MLPW2 = 88                     # MLP_HIDDEN rows
B_AFC2B = 216                    # BT rows: attn fc2 bias broadcast to EMB, tiled over batch
B_FCIW2 = 256                    # EMB//4 rows
B_MLPB2 = 264                    # single rows below
B_NORMG = 265
B_NORMB = 266
B_LN = 267                       # + 4*layer: [f_ln_g, f_ln_b, g_ln_g, g_ln_b]
B_ROWS = B_LN + 4 * NUM_LAYERS   # 275

# Slab C: 8-lane (SEQ_LEN-wide) weights.
C_AFCW = 0                       # N_TOK rows: attn fc   (x@W form)
C_AFC2W = 24                     # N_TOK rows: attn fc2  (torch (out,in) form)
C_FCIW1 = 48                     # EMB rows
C_AFCB = 80                      # single rows below
C_ALNG = 81
C_ALNB = 82
C_ROWS = 83


# ------------------------------ fused Pallas kernel --------------------------
def _fused_forward_kernel(xp_ref, a_ref, b_ref, c_ref, logits_ref):
    # xp_ref:     (BT, PP)       patch pixels, both samples stacked; CLS rows zero
    # a_ref:      (A_ROWS, 128)  qkv / mlp_w1 / classifier slab
    # b_ref:      (B_ROWS, 32)   EMB-wide slab (tok bias, pe_w, mlp_w2, LN vecs, ...)
    # c_ref:      (C_ROWS, 8)    SEQ_LEN-wide slab (attn fc/fc2/LN, fci_w1)
    # logits_ref: OUT (B, 128)
    f32 = jnp.float32
    inv_sqrt2 = 1.0 / math.sqrt(2.0)

    def layer_norm(x, g, beta):
        mu = jnp.mean(x, axis=-1, keepdims=True)
        var = jnp.mean((x - mu) ** 2, axis=-1, keepdims=True)
        return (x - mu) * jax.lax.rsqrt(var + EPS) * g + beta

    def brow(i):      # (1, EMB) vector row from slab B
        return b_ref[i:i + 1, :]

    def crow(i):      # (1, SEQ_LEN) vector row from slab C
        return c_ref[i:i + 1, :]

    # ---- PatchEmbed + pos_embed + cls token, both samples in ONE matmul -------
    x0 = (jnp.dot(xp_ref[...], b_ref[B_PEW:B_PEW + PP, :],
                  preferred_element_type=f32)
          + b_ref[B_TOKB:B_TOKB + BT, :])                                  # (34, 32)

    # reversible FLSVIR blocks (Attention / Mlp weights shared across layers)
    x1 = x0
    x2 = x0
    for layer in range(NUM_LAYERS):
        # ------------------- Attention( LN_f(x2) ) -----------------------------
        h = layer_norm(x2, brow(B_LN + 4 * layer + 0), brow(B_LN + 4 * layer + 1))
        # fused qkv projection for BOTH samples (scale already folded into Wq);
        # lanes 96:128 of the result are unused zero-padding.
        qkv = jnp.dot(h, a_ref[A_QKVW:A_QKVW + EMB, :],
                      preferred_element_type=f32)                          # (34, 128)

        afc_w = c_ref[C_AFCW:C_AFCW + N_TOK, :]                            # (17, 8)
        afc_b = crow(C_AFCB)
        aln_g = crow(C_ALNG)
        aln_b = crow(C_ALNB)

        bm_cols = []
        for b in range(B):
            qkv_b = qkv[b * N_TOK:(b + 1) * N_TOK, :]                      # (17, 128)
            head_cols = []
            for hh in range(HEADS):
                q = qkv_b[:, hh * HEAD_DIM:(hh + 1) * HEAD_DIM]            # (17, 8)
                k = qkv_b[:, EMB + hh * HEAD_DIM:EMB + (hh + 1) * HEAD_DIM]
                v = qkv_b[:, 2 * EMB + hh * HEAD_DIM:2 * EMB + (hh + 1) * HEAD_DIM]
                s = jnp.dot(q, k.T, preferred_element_type=f32)            # (17, 17), scaled
                s = jnp.dot(s, afc_w, preferred_element_type=f32) + afc_b  # (17, 8)
                s = layer_norm(s, aln_g, aln_b)                            # LN(kw_dim)
                s = s - jnp.max(s, axis=-1, keepdims=True)                 # softmax(S)
                e = jnp.exp(s)
                p = e * pl.reciprocal(jnp.sum(e, axis=-1, keepdims=True), approx=True)
                head_cols.append(jnp.dot(p.T, v, preferred_element_type=f32))  # (S, d)
            bm_cols.append(jnp.concatenate(head_cols, axis=1))             # (S, EMB)
        bm_all = jnp.concatenate(bm_cols, axis=1)                          # (S, B*EMB)

        # fc2 along S for both samples at once; bias (broadcast over EMB) is tiled
        # over the batch on the host and added with the residual below.
        afc2_w = c_ref[C_AFC2W:C_AFC2W + N_TOK, :]                         # (17, 8)
        attn_out = jnp.dot(afc2_w, bm_all, preferred_element_type=f32)     # (17, 64)
        attn_stacked = jnp.concatenate(
            [attn_out[:, 0:EMB], attn_out[:, EMB:2 * EMB]], axis=0)        # (34, 32)
        x1 = x1 + attn_stacked + b_ref[B_AFC2B:B_AFC2B + BT, :]

        # ------------------- Mlp( LN_g(x1) ) -----------------------------------
        hm = layer_norm(x1, brow(B_LN + 4 * layer + 2), brow(B_LN + 4 * layer + 3))
        hdn = (jnp.dot(hm, a_ref[A_MLPW1:A_MLPW1 + EMB, :],
                       preferred_element_type=f32)
               + a_ref[A_MLPB1:A_MLPB1 + 1, :])                            # (34, 128)
        # exact (erf-based) GELU, matching torch.nn.GELU default
        hdn = 0.5 * hdn * (1.0 + jax.lax.erf(hdn * inv_sqrt2))
        mlp_out = (jnp.dot(hdn, b_ref[B_MLPW2:B_MLPW2 + MLP_HIDDEN, :],
                           preferred_element_type=f32)
                   + brow(B_MLPB2))                                        # (34, 32)
        x2 = x2 + mlp_out

    xm = 0.5 * (x1 + x2)                                                   # mean of halves

    # ---- head: new_fc_i -> LayerNorm -> classifier, only on the two CLS rows --
    # (these are per-token ops, so restricting to the CLS rows is exact)
    cls = jnp.concatenate([xm[0:1, :], xm[N_TOK:N_TOK + 1, :]], axis=0)    # (2, 32)
    h1 = jnp.maximum(jnp.dot(cls, c_ref[C_FCIW1:C_FCIW1 + EMB, :],
                             preferred_element_type=f32), 0.0)             # (2, 8)
    h2 = jnp.maximum(jnp.dot(h1, b_ref[B_FCIW2:B_FCIW2 + EMB // 4, :],
                             preferred_element_type=f32), 0.0)             # (2, 32)
    xn = layer_norm(h2, brow(B_NORMG), brow(B_NORMB))
    logits = (jnp.dot(xn, a_ref[A_CLSW:A_CLSW + EMB, :],
                      preferred_element_type=f32)
              + a_ref[A_CLSB:A_CLSB + 1, :])                               # (2, 128)
    logits_ref[...] = logits.astype(logits_ref.dtype)                     # one full store


# ------------------------------- params & wrapper -----------------------------
def init_params(key):
    ks = jax.random.split(key, 12)
    std = 0.02
    p = {}
    # PatchEmbed: Conv2d(3, EMB, PATCH, stride=PATCH) as a matmul over patches
    p["pe_w"] = jax.random.normal(ks[0], (PP, EMB), jnp.float32) * std
    p["pe_b"] = jnp.zeros((EMB,), jnp.float32)
    # Positional / cls params: zeros, exactly like the torch __init__
    p["pos_embed"] = jnp.zeros((1, N_TOK, EMB), jnp.float32)
    p["cls_token"] = jnp.zeros((1, 1, EMB), jnp.float32)
    # Attention (ONE instance shared across all layers, as in the torch module)
    p["qkv_w"] = jax.random.normal(ks[1], (EMB, 3 * EMB), jnp.float32) * std   # qkv_bias=False
    p["attn_fc_w"] = jax.random.normal(ks[2], (N_TOK, SEQ_LEN), jnp.float32) * std  # x@W form
    p["attn_fc_b"] = jnp.zeros((SEQ_LEN,), jnp.float32)
    p["attn_ln_g"] = jnp.ones((SEQ_LEN,), jnp.float32)
    p["attn_ln_b"] = jnp.zeros((SEQ_LEN,), jnp.float32)
    p["attn_fc2_w"] = jax.random.normal(ks[3], (N_TOK, SEQ_LEN), jnp.float32) * std  # (out,in)
    p["attn_fc2_b"] = jnp.zeros((N_TOK,), jnp.float32)
    # Mlp (ONE instance shared across all layers)
    p["mlp_w1"] = jax.random.normal(ks[4], (EMB, MLP_HIDDEN), jnp.float32) * std
    p["mlp_b1"] = jnp.zeros((MLP_HIDDEN,), jnp.float32)
    p["mlp_w2"] = jax.random.normal(ks[5], (MLP_HIDDEN, EMB), jnp.float32) * std
    p["mlp_b2"] = jnp.zeros((EMB,), jnp.float32)
    # per-layer PreNorm LayerNorms (fresh per layer in torch; init 1/0)
    p["f_ln_g"] = jnp.ones((NUM_LAYERS, EMB), jnp.float32)
    p["f_ln_b"] = jnp.zeros((NUM_LAYERS, EMB), jnp.float32)
    p["g_ln_g"] = jnp.ones((NUM_LAYERS, EMB), jnp.float32)
    p["g_ln_b"] = jnp.zeros((NUM_LAYERS, EMB), jnp.float32)
    # head
    p["fci_w1"] = jax.random.normal(ks[6], (EMB, EMB // 4), jnp.float32) * std
    p["fci_w2"] = jax.random.normal(ks[7], (EMB // 4, EMB), jnp.float32) * std
    p["norm_g"] = jnp.ones((EMB,), jnp.float32)
    p["norm_b"] = jnp.zeros((EMB,), jnp.float32)
    p["cls_w"] = jax.random.normal(ks[8], (EMB, NUM_CLASSES), jnp.float32) * std
    p["cls_b"] = jnp.zeros((NUM_CLASSES,), jnp.float32)
    return p


def forward(p, x):
    """x: (B, IN_CH, IMG, IMG) NCHW, like PyTorch.  Returns (B, NUM_CLASSES)."""
    assert x.shape[0] == B
    f32 = jnp.float32

    # ---- one-time layout prep (tiny XLA ops; everything else is ONE fused kernel) ----
    # patch extraction: NCHW strided conv == per-patch matmul over (C, ph, pw)
    xp = x.reshape(B, IN_CH, GH, PATCH, GW, PATCH)
    xp = xp.transpose(0, 2, 4, 1, 3, 5).reshape(B, NUM_PATCHES, PP)
    xp_full = jnp.pad(xp, ((0, 0), (1, 0), (0, 0))).reshape(BT, PP)  # zero "pixels" for CLS

    # token bias: row0 = cls_token + pos[0]; rows 1.. = pos[1:] + conv bias; tiled over batch
    tokb = jnp.concatenate(
        [p["cls_token"].reshape(1, EMB) + p["pos_embed"][0, :1, :],
         p["pos_embed"][0, 1:, :] + p["pe_b"].reshape(1, EMB)], axis=0)
    tokb = jnp.tile(tokb, (B, 1))                                           # (34, 32)

    # attn fc2 bias broadcast over EMB and tiled over batch (added with the residual)
    afc2_b = jnp.tile(jnp.tile(p["attn_fc2_b"].reshape(N_TOK, 1), (1, EMB)), (B, 1))

    # ---- slab A: 128-lane weights ---------------------------------------------
    qkvw = p["qkv_w"].at[:, :EMB].multiply(SCALE)        # fold softmax scale into Wq
    slab_a = jnp.zeros((A_ROWS, LANES), f32)
    slab_a = slab_a.at[A_QKVW:A_QKVW + EMB, 0:3 * EMB].set(qkvw)
    slab_a = slab_a.at[A_MLPW1:A_MLPW1 + EMB, :].set(p["mlp_w1"])
    slab_a = slab_a.at[A_CLSW:A_CLSW + EMB, 0:NUM_CLASSES].set(p["cls_w"])
    slab_a = slab_a.at[A_MLPB1, :].set(p["mlp_b1"])
    slab_a = slab_a.at[A_CLSB, 0:NUM_CLASSES].set(p["cls_b"])

    # ---- slab B: EMB(=32)-lane weights ----------------------------------------
    slab_b = jnp.zeros((B_ROWS, EMB), f32)
    slab_b = slab_b.at[B_TOKB:B_TOKB + BT, :].set(tokb)
    slab_b = slab_b.at[B_PEW:B_PEW + PP, :].set(p["pe_w"])
    slab_b = slab_b.at[B_MLPW2:B_MLPW2 + MLP_HIDDEN, :].set(p["mlp_w2"])
    slab_b = slab_b.at[B_AFC2B:B_AFC2B + BT, :].set(afc2_b)
    slab_b = slab_b.at[B_FCIW2:B_FCIW2 + EMB // 4, :].set(p["fci_w2"])
    slab_b = slab_b.at[B_MLPB2, :].set(p["mlp_b2"])
    slab_b = slab_b.at[B_NORMG, :].set(p["norm_g"])
    slab_b = slab_b.at[B_NORMB, :].set(p["norm_b"])
    for l in range(NUM_LAYERS):
        slab_b = slab_b.at[B_LN + 4 * l + 0, :].set(p["f_ln_g"][l])
        slab_b = slab_b.at[B_LN + 4 * l + 1, :].set(p["f_ln_b"][l])
        slab_b = slab_b.at[B_LN + 4 * l + 2, :].set(p["g_ln_g"][l])
        slab_b = slab_b.at[B_LN + 4 * l + 3, :].set(p["g_ln_b"][l])

    # ---- slab C: SEQ_LEN(=8)-lane weights -------------------------------------
    slab_c = jnp.zeros((C_ROWS, SEQ_LEN), f32)
    slab_c = slab_c.at[C_AFCW:C_AFCW + N_TOK, :].set(p["attn_fc_w"])
    slab_c = slab_c.at[C_AFC2W:C_AFC2W + N_TOK, :].set(p["attn_fc2_w"])
    slab_c = slab_c.at[C_FCIW1:C_FCIW1 + EMB, :].set(p["fci_w1"])
    slab_c = slab_c.at[C_AFCB, :].set(p["attn_fc_b"])
    slab_c = slab_c.at[C_ALNG, :].set(p["attn_ln_g"])
    slab_c = slab_c.at[C_ALNB, :].set(p["attn_ln_b"])

    # Gridless single fused kernel: all operands (<1 MiB) live in VMEM; only
    # the (2,128) logits go back to HBM.  (A grid=(B,) split across v7x's two
    # TensorCores was considered but would undo the sublane batching and
    # duplicate the prologue DMAs; kept single-core.)
    logits_pad = pl.pallas_call(
        _fused_forward_kernel,
        out_shape=jax.ShapeDtypeStruct((B, LANES), f32),
    )(xp_full, slab_a, slab_b, slab_c)
    return logits_pad[:, :NUM_CLASSES]

# TODO(synk): Dropout / DropPath (p=0.7, 0.1) are identity in eval mode and are
# intentionally not implemented as stochastic ops.


if __name__ == "__main__":
    key = jax.random.PRNGKey(0)
    pkey, xkey = jax.random.split(key)
    params = init_params(pkey)
    x = jax.random.normal(xkey, (B, IN_CH, IMG, IMG), dtype=jnp.float32)  # NCHW, like PyTorch

    logits = jax.jit(forward)(params, x)
    jax.block_until_ready(logits)
    assert logits.shape == (B, NUM_CLASSES)
    print("KERNEL_OK")
</pallas_src>

<mosaic_0001>
module attributes {stable_mosaic.version = 11 : i64} {
  func.func @_fused_forward_kernel(%arg0: memref<34x48xf32, #tpu.memory_space<vmem>>, %arg1: memref<98x128xf32, #tpu.memory_space<vmem>>, %arg2: memref<275x32xf32, #tpu.memory_space<vmem>>, %arg3: memref<83x8xf32, #tpu.memory_space<vmem>>, %arg4: memref<2x128xf32, #tpu.memory_space<vmem>>) attributes {dimension_semantics = [], scalar_prefetch = 0 : i64, scratch_operands = 0 : i64, tpu.core_type = #tpu.core_type<tc>} {
    %c0 = arith.constant 0 : index
    %c0_0 = arith.constant 0 : index
    %0 = vector.load %arg0[%c0, %c0_0] : memref<34x48xf32, #tpu.memory_space<vmem>>, vector<34x48xf32>
    %c40 = arith.constant 40 : index
    %c0_1 = arith.constant 0 : index
    %1 = vector.load %arg2[%c40, %c0_1] : memref<275x32xf32, #tpu.memory_space<vmem>>, vector<48x32xf32>
    %cst = arith.constant dense<0.000000e+00> : vector<34x32xf32>
    %2 = tpu.matmul %0, %1, %cst {dimension_numbers = #tpu.dot_dimension_numbers<[1], [0], [0], [1], [0, 0, 1, 1], [], []>} : vector<34x48xf32>, vector<48x32xf32>, vector<34x32xf32> -> vector<34x32xf32>
    %c0_2 = arith.constant 0 : index
    %c0_3 = arith.constant 0 : index
    %3 = vector.load %arg2[%c0_2, %c0_3] : memref<275x32xf32, #tpu.memory_space<vmem>>, vector<34x32xf32>
    %4 = arith.addf %2, %3 : vector<34x32xf32>
    %c267 = arith.constant 267 : index
    %c0_4 = arith.constant 0 : index
    %5 = vector.load %arg2[%c267, %c0_4] : memref<275x32xf32, #tpu.memory_space<vmem>>, vector<1x32xf32>
    %c268 = arith.constant 268 : index
    %c0_5 = arith.constant 0 : index
    %6 = vector.load %arg2[%c268, %c0_5] : memref<275x32xf32, #tpu.memory_space<vmem>>, vector<1x32xf32>
    %cst_6 = arith.constant dense<0.000000e+00> : vector<34xf32>
    %7 = vector.multi_reduction <add>, %4, %cst_6 [1] : vector<34x32xf32> to vector<34xf32>
    %8 = vector.shape_cast %7 : vector<34xf32> to vector<34x1xf32>
    %cst_7 = arith.constant 3.200000e+01 : f32
    %9 = vector.broadcast %cst_7 : f32 to vector<34x1xf32>
    %10 = arith.divf %8, %9 : vector<34x1xf32>
    %11 = vector.broadcast %10 : vector<34x1xf32> to vector<34x32xf32>
    %12 = arith.subf %4, %11 : vector<34x32xf32>
    %13 = arith.mulf %12, %12 : vector<34x32xf32>
    %cst_8 = arith.constant dense<0.000000e+00> : vector<34xf32>
    %14 = vector.multi_reduction <add>, %13, %cst_8 [1] : vector<34x32xf32> to vector<34xf32>
    %15 = vector.shape_cast %14 : vector<34xf32> to vector<34x1xf32>
    %cst_9 = arith.constant 3.200000e+01 : f32
    %16 = vector.broadcast %cst_9 : f32 to vector<34x1xf32>
    %17 = arith.divf %15, %16 : vector<34x1xf32>
    %18 = vector.broadcast %10 : vector<34x1xf32> to vector<34x32xf32>
    %19 = arith.subf %4, %18 : vector<34x32xf32>
    %cst_10 = arith.constant 9.99999974E-6 : f32
    %20 = vector.broadcast %cst_10 : f32 to vector<34x1xf32>
    %21 = arith.addf %17, %20 : vector<34x1xf32>
    %22 = math.rsqrt %21 : vector<34x1xf32>
    %23 = vector.broadcast %22 : vector<34x1xf32> to vector<34x32xf32>
    %24 = arith.mulf %19, %23 : vector<34x32xf32>
    %25 = vector.broadcast %5 : vector<1x32xf32> to vector<34x32xf32>
    %26 = arith.mulf %24, %25 : vector<34x32xf32>
    %27 = vector.broadcast %6 : vector<1x32xf32> to vector<34x32xf32>
    %28 = arith.addf %26, %27 : vector<34x32xf32>
    %c0_11 = arith.constant 0 : index
    %c0_12 = arith.constant 0 : index
    %29 = vector.load %arg1[%c0_11, %c0_12] : memref<98x128xf32, #tpu.memory_space<vmem>>, vector<32x128xf32>
    %cst_13 = arith.constant dense<0.000000e+00> : vector<34x128xf32>
    %30 = tpu.matmul %28, %29, %cst_13 {dimension_numbers = #tpu.dot_dimension_numbers<[1], [0], [0], [1], [0, 0, 1, 1], [], []>} : vector<34x32xf32>, vector<32x128xf32>, vector<34x128xf32> -> vector<34x128xf32>
    %c0_14 = arith.constant 0 : index
    %c0_15 = arith.constant 0 : index
    %31 = vector.load %arg3[%c0_14, %c0_15] : memref<83x8xf32, #tpu.memory_space<vmem>>, vector<17x8xf32>
    %c80 = arith.constant 80 : index
    %c0_16 = arith.constant 0 : index
    %32 = vector.load %arg3[%c80, %c0_16] : memref<83x8xf32, #tpu.memory_space<vmem>>, vector<1x8xf32>
    %c81 = arith.constant 81 : index
    %c0_17 = arith.constant 0 : index
    %33 = vector.load %arg3[%c81, %c0_17] : memref<83x8xf32, #tpu.memory_space<vmem>>, vector<1x8xf32>
    %c82 = arith.constant 82 : index
    %c0_18 = arith.constant 0 : index
    %34 = vector.load %arg3[%c82, %c0_18] : memref<83x8xf32, #tpu.memory_space<vmem>>, vector<1x8xf32>
    %35 = vector.extract_strided_slice %30 {offsets = [0, 0], sizes = [17, 128], strides = [1, 1]} : vector<34x128xf32> to vector<17x128xf32>
    %36 = vector.extract_strided_slice %35 {offsets = [0, 0], sizes = [17, 8], strides = [1, 1]} : vector<17x128xf32> to vector<17x8xf32>
    %37 = vector.extract_strided_slice %35 {offsets = [0, 32], sizes = [17, 8], strides = [1, 1]} : vector<17x128xf32> to vector<17x8xf32>
    %38 = vector.extract_strided_slice %35 {offsets = [0, 64], sizes = [17, 8], strides = [1, 1]} : vector<17x128xf32> to vector<17x8xf32>
    %39 = tpu.transpose %37, [1, 0] : vector<17x8xf32> -> vector<8x17xf32>
    %cst_19 = arith.constant dense<0.000000e+00> : vector<17x17xf32>
    %40 = tpu.matmul %36, %39, %cst_19 {dimension_numbers = #tpu.dot_dimension_numbers<[1], [0], [0], [1], [0, 0, 1, 1], [], []>} : vector<17x8xf32>, vector<8x17xf32>, vector<17x17xf32> -> vector<17x17xf32>
    %cst_20 = arith.constant dense<0.000000e+00> : vector<17x8xf32>
    %41 = tpu.matmul %40, %31, %cst_20 {dimension_numbers = #tpu.dot_dimension_numbers<[1], [0], [0], [1], [0, 0, 1, 1], [], []>} : vector<17x17xf32>, vector<17x8xf32>, vector<17x8xf32> -> vector<17x8xf32>
    %42 = vector.broadcast %32 : vector<1x8xf32> to vector<17x8xf32>
    %43 = arith.addf %41, %42 : vector<17x8xf32>
    %cst_21 = arith.constant dense<0.000000e+00> : vector<17xf32>
    %44 = vector.multi_reduction <add>, %43, %cst_21 [1] : vector<17x8xf32> to vector<17xf32>
    %45 = vector.shape_cast %44 : vector<17xf32> to vector<17x1xf32>
    %cst_22 = arith.constant 8.000000e+00 : f32
    %46 = vector.broadcast %cst_22 : f32 to vector<17x1xf32>
    %47 = arith.divf %45, %46 : vector<17x1xf32>
    %48 = vector.broadcast %47 : vector<17x1xf32> to vector<17x8xf32>
    %49 = arith.subf %43, %48 : vector<17x8xf32>
    %50 = arith.mulf %49, %49 : vector<17x8xf32>
    %cst_23 = arith.constant dense<0.000000e+00> : vector<17xf32>
    %51 = vector.multi_reduction <add>, %50, %cst_23 [1] : vector<17x8xf32> to vector<17xf32>
    %52 = vector.shape_cast %51 : vector<17xf32> to vector<17x1xf32>
    %cst_24 = arith.constant 8.000000e+00 : f32
    %53 = vector.broadcast %cst_24 : f32 to vector<17x1xf32>
    %54 = arith.divf %52, %53 : vector<17x1xf32>
    %55 = vector.broadcast %47 : vector<17x1xf32> to vector<17x8xf32>
    %56 = arith.subf %43, %55 : vector<17x8xf32>
    %cst_25 = arith.constant 9.99999974E-6 : f32
    %57 = vector.broadcast %cst_25 : f32 to vector<17x1xf32>
    %58 = arith.addf %54, %57 : vector<17x1xf32>
    %59 = math.rsqrt %58 : vector<17x1xf32>
    %60 = vector.broadcast %59 : vector<17x1xf32> to vector<17x8xf32>
    %61 = arith.mulf %56, %60 : vector<17x8xf32>
    %62 = vector.broadcast %33 : vector<1x8xf32> to vector<17x8xf32>
    %63 = arith.mulf %61, %62 : vector<17x8xf32>
    %64 = vector.broadcast %34 : vector<1x8xf32> to vector<17x8xf32>
    %65 = arith.addf %63, %64 : vector<17x8xf32>
    %cst_26 = arith.constant dense<0xFF800000> : vector<17xf32>
    %66 = vector.multi_reduction <maximumf>, %65, %cst_26 [1] : vector<17x8xf32> to vector<17xf32>
    %67 = vector.shape_cast %66 : vector<17xf32> to vector<17x1xf32>
    %68 = vector.broadcast %67 : vector<17x1xf32> to vector<17x8xf32>
    %69 = arith.subf %65, %68 : vector<17x8xf32>
    %70 = math.exp %69 : vector<17x8xf32>
    %cst_27 = arith.constant dense<0.000000e+00> : vector<17xf32>
    %71 = vector.multi_reduction <add>, %70, %cst_27 [1] : vector<17x8xf32> to vector<17xf32>
    %72 = vector.shape_cast %71 : vector<17xf32> to vector<17x1xf32>
    %73 = tpu.reciprocal %72 {approx = true} : vector<17x1xf32> -> vector<17x1xf32>
    %74 = vector.broadcast %73 : vector<17x1xf32> to vector<17x8xf32>
    %75 = arith.mulf %70, %74 : vector<17x8xf32>
    %76 = tpu.transpose %75, [1, 0] : vector<17x8xf32> -> vector<8x17xf32>
    %cst_28 = arith.constant dense<0.000000e+00> : vector<8x8xf32>
    %77 = tpu.matmul %76, %38, %cst_28 {dimension_numbers = #tpu.dot_dimension_numbers<[1], [0], [0], [1], [0, 0, 1, 1], [], []>} : vector<8x17xf32>, vector<17x8xf32>, vector<8x8xf32> -> vector<8x8xf32>
    %78 = vector.extract_strided_slice %35 {offsets = [0, 8], sizes = [17, 8], strides = [1, 1]} : vector<17x128xf32> to vector<17x8xf32>
    %79 = vector.extract_strided_slice %35 {offsets = [0, 40], sizes = [17, 8], strides = [1, 1]} : vector<17x128xf32> to vector<17x8xf32>
    %80 = vector.extract_strided_slice %35 {offsets = [0, 72], sizes = [17, 8], strides = [1, 1]} : vector<17x128xf32> to vector<17x8xf32>
    %81 = tpu.transpose %79, [1, 0] : vector<17x8xf32> -> vector<8x17xf32>
    %cst_29 = arith.constant dense<0.000000e+00> : vector<17x17xf32>
    %82 = tpu.matmul %78, %81, %cst_29 {dimension_numbers = #tpu.dot_dimension_numbers<[1], [0], [0], [1], [0, 0, 1, 1], [], []>} : vector<17x8xf32>, vector<8x17xf32>, vector<17x17xf32> -> vector<17x17xf32>
    %cst_30 = arith.constant dense<0.000000e+00> : vector<17x8xf32>
    %83 = tpu.matmul %82, %31, %cst_30 {dimension_numbers = #tpu.dot_dimension_numbers<[1], [0], [0], [1], [0, 0, 1, 1], [], []>} : vector<17x17xf32>, vector<17x8xf32>, vector<17x8xf32> -> vector<17x8xf32>
    %84 = vector.broadcast %32 : vector<1x8xf32> to vector<17x8xf32>
    %85 = arith.addf %83, %84 : vector<17x8xf32>
    %cst_31 = arith.constant dense<0.000000e+00> : vector<17xf32>
    %86 = vector.multi_reduction <add>, %85, %cst_31 [1] : vector<17x8xf32> to vector<17xf32>
    %87 = vector.shape_cast %86 : vector<17xf32> to vector<17x1xf32>
    %cst_32 = arith.constant 8.000000e+00 : f32
    %88 = vector.broadcast %cst_32 : f32 to vector<17x1xf32>
    %89 = arith.divf %87, %88 : vector<17x1xf32>
    %90 = vector.broadcast %89 : vector<17x1xf32> to vector<17x8xf32>
    %91 = arith.subf %85, %90 : vector<17x8xf32>
    %92 = arith.mulf %91, %91 : vector<17x8xf32>
    %cst_33 = arith.constant dense<0.000000e+00> : vector<17xf32>
    %93 = vector.multi_reduction <add>, %92, %cst_33 [1] : vector<17x8xf32> to vector<17xf32>
    %94 = vector.shape_cast %93 : vector<17xf32> to vector<17x1xf32>
    %cst_34 = arith.constant 8.000000e+00 : f32
    %95 = vector.broadcast %cst_34 : f32 to vector<17x1xf32>
    %96 = arith.divf %94, %95 : vector<17x1xf32>
    %97 = vector.broadcast %89 : vector<17x1xf32> to vector<17x8xf32>
    %98 = arith.subf %85, %97 : vector<17x8xf32>
    %cst_35 = arith.constant 9.99999974E-6 : f32
    %99 = vector.broadcast %cst_35 : f32 to vector<17x1xf32>
    %100 = arith.addf %96, %99 : vector<17x1xf32>
    %101 = math.rsqrt %100 : vector<17x1xf32>
    %102 = vector.broadcast %101 : vector<17x1xf32> to vector<17x8xf32>
    %103 = arith.mulf %98, %102 : vector<17x8xf32>
    %104 = vector.broadcast %33 : vector<1x8xf32> to vector<17x8xf32>
    %105 = arith.mulf %103, %104 : vector<17x8xf32>
    %106 = vector.broadcast %34 : vector<1x8xf32> to vector<17x8xf32>
    %107 = arith.addf %105, %106 : vector<17x8xf32>
    %cst_36 = arith.constant dense<0xFF800000> : vector<17xf32>
    %108 = vector.multi_reduction <maximumf>, %107, %cst_36 [1] : vector<17x8xf32> to vector<17xf32>
    %109 = vector.shape_cast %108 : vector<17xf32> to vector<17x1xf32>
    %110 = vector.broadcast %109 : vector<17x1xf32> to vector<17x8xf32>
    %111 = arith.subf %107, %110 : vector<17x8xf32>
    %112 = math.exp %111 : vector<17x8xf32>
    %cst_37 = arith.constant dense<0.000000e+00> : vector<17xf32>
    %113 = vector.multi_reduction <add>, %112, %cst_37 [1] : vector<17x8xf32> to vector<17xf32>
    %114 = vector.shape_cast %113 : vector<17xf32> to vector<17x1xf32>
    %115 = tpu.reciprocal %114 {approx = true} : vector<17x1xf32> -> vector<17x1xf32>
    %116 = vector.broadcast %115 : vector<17x1xf32> to vector<17x8xf32>
    %117 = arith.mulf %112, %116 : vector<17x8xf32>
    %118 = tpu.transpose %117, [1, 0] : vector<17x8xf32> -> vector<8x17xf32>
    %cst_38 = arith.constant dense<0.000000e+00> : vector<8x8xf32>
    %119 = tpu.matmul %118, %80, %cst_38 {dimension_numbers = #tpu.dot_dimension_numbers<[1], [0], [0], [1], [0, 0, 1, 1], [], []>} : vector<8x17xf32>, vector<17x8xf32>, vector<8x8xf32> -> vector<8x8xf32>
    %120 = vector.extract_strided_slice %35 {offsets = [0, 16], sizes = [17, 8], strides = [1, 1]} : vector<17x128xf32> to vector<17x8xf32>
    %121 = vector.extract_strided_slice %35 {offsets = [0, 48], sizes = [17, 8], strides = [1, 1]} : vector<17x128xf32> to vector<17x8xf32>
    %122 = vector.extract_strided_slice %35 {offsets = [0, 80], sizes = [17, 8], strides = [1, 1]} : vector<17x128xf32> to vector<17x8xf32>
    %123 = tpu.transpose %121, [1, 0] : vector<17x8xf32> -> vector<8x17xf32>
    %cst_39 = arith.constant dense<0.000000e+00> : vector<17x17xf32>
    %124 = tpu.matmul %120, %123, %cst_39 {dimension_numbers = #tpu.dot_dimension_numbers<[1], [0], [0], [1], [0, 0, 1, 1], [], []>} : vector<17x8xf32>, vector<8x17xf32>, vector<17x17xf32> -> vector<17x17xf32>
    %cst_40 = arith.constant dense<0.000000e+00> : vector<17x8xf32>
    %125 = tpu.matmul %124, %31, %cst_40 {dimension_numbers = #tpu.dot_dimension_numbers<[1], [0], [0], [1], [0, 0, 1, 1], [], []>} : vector<17x17xf32>, vector<17x8xf32>, vector<17x8xf32> -> vector<17x8xf32>
    %126 = vector.broadcast %32 : vector<1x8xf32> to vector<17x8xf32>
    %127 = arith.addf %125, %126 : vector<17x8xf32>
    %cst_41 = arith.constant dense<0.000000e+00> : vector<17xf32>
    %128 = vector.multi_reduction <add>, %127, %cst_41 [1] : vector<17x8xf32> to vector<17xf32>
    %129 = vector.shape_cast %128 : vector<17xf32> to vector<17x1xf32>
    %cst_42 = arith.constant 8.000000e+00 : f32
    %130 = vector.broadcast %cst_42 : f32 to vector<17x1xf32>
    %131 = arith.divf %129, %130 : vector<17x1xf32>
    %132 = vector.broadcast %131 : vector<17x1xf32> to vector<17x8xf32>
    %133 = arith.subf %127, %132 : vector<17x8xf32>
    %134 = arith.mulf %133, %133 : vector<17x8xf32>
    %cst_43 = arith.constant dense<0.000000e+00> : vector<17xf32>
    %135 = vector.multi_reduction <add>, %134, %cst_43 [1] : vector<17x8xf32> to vector<17xf32>
    %136 = vector.shape_cast %135 : vector<17xf32> to vector<17x1xf32>
    %cst_44 = arith.constant 8.000000e+00 : f32
    %137 = vector.broadcast %cst_44 : f32 to vector<17x1xf32>
    %138 = arith.divf %136, %137 : vector<17x1xf32>
    %139 = vector.broadcast %131 : vector<17x1xf32> to vector<17x8xf32>
    %140 = arith.subf %127, %139 : vector<17x8xf32>
    %cst_45 = arith.constant 9.99999974E-6 : f32
    %141 = vector.broadcast %cst_45 : f32 to vector<17x1xf32>
    %142 = arith.addf %138, %141 : vector<17x1xf32>
    %143 = math.rsqrt %142 : vector<17x1xf32>
    %144 = vector.broadcast %143 : vector<17x1xf32> to vector<17x8xf32>
    %145 = arith.mulf %140, %144 : vector<17x8xf32>
    %146 = vector.broadcast %33 : vector<1x8xf32> to vector<17x8xf32>
    %147 = arith.mulf %145, %146 : vector<17x8xf32>
    %148 = vector.broadcast %34 : vector<1x8xf32> to vector<17x8xf32>
    %149 = arith.addf %147, %148 : vector<17x8xf32>
    %cst_46 = arith.constant dense<0xFF800000> : vector<17xf32>
    %150 = vector.multi_reduction <maximumf>, %149, %cst_46 [1] : vector<17x8xf32> to vector<17xf32>
    %151 = vector.shape_cast %150 : vector<17xf32> to vector<17x1xf32>
    %152 = vector.broadcast %151 : vector<17x1xf32> to vector<17x8xf32>
    %153 = arith.subf %149, %152 : vector<17x8xf32>
    %154 = math.exp %153 : vector<17x8xf32>
    %cst_47 = arith.constant dense<0.000000e+00> : vector<17xf32>
    %155 = vector.multi_reduction <add>, %154, %cst_47 [1] : vector<17x8xf32> to vector<17xf32>
    %156 = vector.shape_cast %155 : vector<17xf32> to vector<17x1xf32>
    %157 = tpu.reciprocal %156 {approx = true} : vector<17x1xf32> -> vector<17x1xf32>
    %158 = vector.broadcast %157 : vector<17x1xf32> to vector<17x8xf32>
    %159 = arith.mulf %154, %158 : vector<17x8xf32>
    %160 = tpu.transpose %159, [1, 0] : vector<17x8xf32> -> vector<8x17xf32>
    %cst_48 = arith.constant dense<0.000000e+00> : vector<8x8xf32>
    %161 = tpu.matmul %160, %122, %cst_48 {dimension_numbers = #tpu.dot_dimension_numbers<[1], [0], [0], [1], [0, 0, 1, 1], [], []>} : vector<8x17xf32>, vector<17x8xf32>, vector<8x8xf32> -> vector<8x8xf32>
    %162 = vector.extract_strided_slice %35 {offsets = [0, 24], sizes = [17, 8], strides = [1, 1]} : vector<17x128xf32> to vector<17x8xf32>
    %163 = vector.extract_strided_slice %35 {offsets = [0, 56], sizes = [17, 8], strides = [1, 1]} : vector<17x128xf32> to vector<17x8xf32>
    %164 = vector.extract_strided_slice %35 {offsets = [0, 88], sizes = [17, 8], strides = [1, 1]} : vector<17x128xf32> to vector<17x8xf32>
    %165 = tpu.transpose %163, [1, 0] : vector<17x8xf32> -> vector<8x17xf32>
    %cst_49 = arith.constant dense<0.000000e+00> : vector<17x17xf32>
    %166 = tpu.matmul %162, %165, %cst_49 {dimension_numbers = #tpu.dot_dimension_numbers<[1], [0], [0], [1], [0, 0, 1, 1], [], []>} : vector<17x8xf32>, vector<8x17xf32>, vector<17x17xf32> -> vector<17x17xf32>
    %cst_50 = arith.constant dense<0.000000e+00> : vector<17x8xf32>
    %167 = tpu.matmul %166, %31, %cst_50 {dimension_numbers = #tpu.dot_dimension_numbers<[1], [0], [0], [1], [0, 0, 1, 1], [], []>} : vector<17x17xf32>, vector<17x8xf32>, vector<17x8xf32> -> vector<17x8xf32>
    %168 = vector.broadcast %32 : vector<1x8xf32> to vector<17x8xf32>
    %169 = arith.addf %167, %168 : vector<17x8xf32>
    %cst_51 = arith.constant dense<0.000000e+00> : vector<17xf32>
    %170 = vector.multi_reduction <add>, %169, %cst_51 [1] : vector<17x8xf32> to vector<17xf32>
    %171 = vector.shape_cast %170 : vector<17xf32> to vector<17x1xf32>
    %cst_52 = arith.constant 8.000000e+00 : f32
    %172 = vector.broadcast %cst_52 : f32 to vector<17x1xf32>
    %173 = arith.divf %171, %172 : vector<17x1xf32>
    %174 = vector.broadcast %173 : vector<17x1xf32> to vector<17x8xf32>
    %175 = arith.subf %169, %174 : vector<17x8xf32>
    %176 = arith.mulf %175, %175 : vector<17x8xf32>
    %cst_53 = arith.constant dense<0.000000e+00> : vector<17xf32>
    %177 = vector.multi_reduction <add>, %176, %cst_53 [1] : vector<17x8xf32> to vector<17xf32>
    %178 = vector.shape_cast %177 : vector<17xf32> to vector<17x1xf32>
    %cst_54 = arith.constant 8.000000e+00 : f32
    %179 = vector.broadcast %cst_54 : f32 to vector<17x1xf32>
    %180 = arith.divf %178, %179 : vector<17x1xf32>
    %181 = vector.broadcast %173 : vector<17x1xf32> to vector<17x8xf32>
    %182 = arith.subf %169, %181 : vector<17x8xf32>
    %cst_55 = arith.constant 9.99999974E-6 : f32
    %183 = vector.broadcast %cst_55 : f32 to vector<17x1xf32>
    %184 = arith.addf %180, %183 : vector<17x1xf32>
    %185 = math.rsqrt %184 : vector<17x1xf32>
    %186 = vector.broadcast %185 : vector<17x1xf32> to vector<17x8xf32>
    %187 = arith.mulf %182, %186 : vector<17x8xf32>
    %188 = vector.broadcast %33 : vector<1x8xf32> to vector<17x8xf32>
    %189 = arith.mulf %187, %188 : vector<17x8xf32>
    %190 = vector.broadcast %34 : vector<1x8xf32> to vector<17x8xf32>
    %191 = arith.addf %189, %190 : vector<17x8xf32>
    %cst_56 = arith.constant dense<0xFF800000> : vector<17xf32>
    %192 = vector.multi_reduction <maximumf>, %191, %cst_56 [1] : vector<17x8xf32> to vector<17xf32>
    %193 = vector.shape_cast %192 : vector<17xf32> to vector<17x1xf32>
    %194 = vector.broadcast %193 : vector<17x1xf32> to vector<17x8xf32>
    %195 = arith.subf %191, %194 : vector<17x8xf32>
    %196 = math.exp %195 : vector<17x8xf32>
    %cst_57 = arith.constant dense<0.000000e+00> : vector<17xf32>
    %197 = vector.multi_reduction <add>, %196, %cst_57 [1] : vector<17x8xf32> to vector<17xf32>
    %198 = vector.shape_cast %197 : vector<17xf32> to vector<17x1xf32>
    %199 = tpu.reciprocal %198 {approx = true} : vector<17x1xf32> -> vector<17x1xf32>
    %200 = vector.broadcast %199 : vector<17x1xf32> to vector<17x8xf32>
    %201 = arith.mulf %196, %200 : vector<17x8xf32>
    %202 = tpu.transpose %201, [1, 0] : vector<17x8xf32> -> vector<8x17xf32>
    %cst_58 = arith.constant dense<0.000000e+00> : vector<8x8xf32>
    %203 = tpu.matmul %202, %164, %cst_58 {dimension_numbers = #tpu.dot_dimension_numbers<[1], [0], [0], [1], [0, 0, 1, 1], [], []>} : vector<8x17xf32>, vector<17x8xf32>, vector<8x8xf32> -> vector<8x8xf32>
    %204 = tpu.concatenate %77, %119, %161, %203 in 1 : vector<8x8xf32>, vector<8x8xf32>, vector<8x8xf32>, vector<8x8xf32> -> vector<8x32xf32>
    %205 = vector.extract_strided_slice %30 {offsets = [17, 0], sizes = [17, 128], strides = [1, 1]} : vector<34x128xf32> to vector<17x128xf32>
    %206 = vector.extract_strided_slice %205 {offsets = [0, 0], sizes = [17, 8], strides = [1, 1]} : vector<17x128xf32> to vector<17x8xf32>
    %207 = vector.extract_strided_slice %205 {offsets = [0, 32], sizes = [17, 8], strides = [1, 1]} : vector<17x128xf32> to vector<17x8xf32>
    %208 = vector.extract_strided_slice %205 {offsets = [0, 64], sizes = [17, 8], strides = [1, 1]} : vector<17x128xf32> to vector<17x8xf32>
    %209 = tpu.transpose %207, [1, 0] : vector<17x8xf32> -> vector<8x17xf32>
    %cst_59 = arith.constant dense<0.000000e+00> : vector<17x17xf32>
    %210 = tpu.matmul %206, %209, %cst_59 {dimension_numbers = #tpu.dot_dimension_numbers<[1], [0], [0], [1], [0, 0, 1, 1], [], []>} : vector<17x8xf32>, vector<8x17xf32>, vector<17x17xf32> -> vector<17x17xf32>
    %cst_60 = arith.constant dense<0.000000e+00> : vector<17x8xf32>
    %211 = tpu.matmul %210, %31, %cst_60 {dimension_numbers = #tpu.dot_dimension_numbers<[1], [0], [0], [1], [0, 0, 1, 1], [], []>} : vector<17x17xf32>, vector<17x8xf32>, vector<17x8xf32> -> vector<17x8xf32>
    %212 = vector.broadcast %32 : vector<1x8xf32> to vector<17x8xf32>
    %213 = arith.addf %211, %212 : vector<17x8xf32>
    %cst_61 = arith.constant dense<0.000000e+00> : vector<17xf32>
    %214 = vector.multi_reduction <add>, %213, %cst_61 [1] : vector<17x8xf32> to vector<17xf32>
    %215 = vector.shape_cast %214 : vector<17xf32> to vector<17x1xf32>
    %cst_62 = arith.constant 8.000000e+00 : f32
    %216 = vector.broadcast %cst_62 : f32 to vector<17x1xf32>
    %217 = arith.divf %215, %216 : vector<17x1xf32>
    %218 = vector.broadcast %217 : vector<17x1xf32> to vector<17x8xf32>
    %219 = arith.subf %213, %218 : vector<17x8xf32>
    %220 = arith.mulf %219, %219 : vector<17x8xf32>
    %cst_63 = arith.constant dense<0.000000e+00> : vector<17xf32>
    %221 = vector.multi_reduction <add>, %220, %cst_63 [1] : vector<17x8xf32> to vector<17xf32>
    %222 = vector.shape_cast %221 : vector<17xf32> to vector<17x1xf32>
    %cst_64 = arith.constant 8.000000e+00 : f32
    %223 = vector.broadcast %cst_64 : f32 to vector<17x1xf32>
    %224 = arith.divf %222, %223 : vector<17x1xf32>
    %225 = vector.broadcast %217 : vector<17x1xf32> to vector<17x8xf32>
    %226 = arith.subf %213, %225 : vector<17x8xf32>
    %cst_65 = arith.constant 9.99999974E-6 : f32
    %227 = vector.broadcast %cst_65 : f32 to vector<17x1xf32>
    %228 = arith.addf %224, %227 : vector<17x1xf32>
    %229 = math.rsqrt %228 : vector<17x1xf32>
    %230 = vector.broadcast %229 : vector<17x1xf32> to vector<17x8xf32>
    %231 = arith.mulf %226, %230 : vector<17x8xf32>
    %232 = vector.broadcast %33 : vector<1x8xf32> to vector<17x8xf32>
    %233 = arith.mulf %231, %232 : vector<17x8xf32>
    %234 = vector.broadcast %34 : vector<1x8xf32> to vector<17x8xf32>
    %235 = arith.addf %233, %234 : vector<17x8xf32>
    %cst_66 = arith.constant dense<0xFF800000> : vector<17xf32>
    %236 = vector.multi_reduction <maximumf>, %235, %cst_66 [1] : vector<17x8xf32> to vector<17xf32>
    %237 = vector.shape_cast %236 : vector<17xf32> to vector<17x1xf32>
    %238 = vector.broadcast %237 : vector<17x1xf32> to vector<17x8xf32>
    %239 = arith.subf %235, %238 : vector<17x8xf32>
    %240 = math.exp %239 : vector<17x8xf32>
    %cst_67 = arith.constant dense<0.000000e+00> : vector<17xf32>
    %241 = vector.multi_reduction <add>, %240, %cst_67 [1] : vector<17x8xf32> to vector<17xf32>
    %242 = vector.shape_cast %241 : vector<17xf32> to vector<17x1xf32>
    %243 = tpu.reciprocal %242 {approx = true} : vector<17x1xf32> -> vector<17x1xf32>
    %244 = vector.broadcast %243 : vector<17x1xf32> to vector<17x8xf32>
    %245 = arith.mulf %240, %244 : vector<17x8xf32>
    %246 = tpu.transpose %245, [1, 0] : vector<17x8xf32> -> vector<8x17xf32>
    %cst_68 = arith.constant dense<0.000000e+00> : vector<8x8xf32>
    %247 = tpu.matmul %246, %208, %cst_68 {dimension_numbers = #tpu.dot_dimension_numbers<[1], [0], [0], [1], [0, 0, 1, 1], [], []>} : vector<8x17xf32>, vector<17x8xf32>, vector<8x8xf32> -> vector<8x8xf32>
    %248 = vector.extract_strided_slice %205 {offsets = [0, 8], sizes = [17, 8], strides = [1, 1]} : vector<17x128xf32> to vector<17x8xf32>
    %249 = vector.extract_strided_slice %205 {offsets = [0, 40], sizes = [17, 8], strides = [1, 1]} : vector<17x128xf32> to vector<17x8xf32>
    %250 = vector.extract_strided_slice %205 {offsets = [0, 72], sizes = [17, 8], strides = [1, 1]} : vector<17x128xf32> to vector<17x8xf32>
    %251 = tpu.transpose %249, [1, 0] : vector<17x8xf32> -> vector<8x17xf32>
    %cst_69 = arith.constant dense<0.000000e+00> : vector<17x17xf32>
    %252 = tpu.matmul %248, %251, %cst_69 {dimension_numbers = #tpu.dot_dimension_numbers<[1], [0], [0], [1], [0, 0, 1, 1], [], []>} : vector<17x8xf32>, vector<8x17xf32>, vector<17x17xf32> -> vector<17x17xf32>
    %cst_70 = arith.constant dense<0.000000e+00> : vector<17x8xf32>
    %253 = tpu.matmul %252, %31, %cst_70 {dimension_numbers = #tpu.dot_dimension_numbers<[1], [0], [0], [1], [0, 0, 1, 1], [], []>} : vector<17x17xf32>, vector<17x8xf32>, vector<17x8xf32> -> vector<17x8xf32>
    %254 = vector.broadcast %32 : vector<1x8xf32> to vector<17x8xf32>
    %255 = arith.addf %253, %254 : vector<17x8xf32>
    %cst_71 = arith.constant dense<0.000000e+00> : vector<17xf32>
    %256 = vector.multi_reduction <add>, %255, %cst_71 [1] : vector<17x8xf32> to vector<17xf32>
    %257 = vector.shape_cast %256 : vector<17xf32> to vector<17x1xf32>
    %cst_72 = arith.constant 8.000000e+00 : f32
    %258 = vector.broadcast %cst_72 : f32 to vector<17x1xf32>
    %259 = arith.divf %257, %258 : vector<17x1xf32>
    %260 = vector.broadcast %259 : vector<17x1xf32> to vector<17x8xf32>
    %261 = arith.subf %255, %260 : vector<17x8xf32>
    %262 = arith.mulf %261, %261 : vector<17x8xf32>
    %cst_73 = arith.constant dense<0.000000e+00> : vector<17xf32>
    %263 = vector.multi_reduction <add>, %262, %cst_73 [1] : vector<17x8xf32> to vector<17xf32>
    %264 = vector.shape_cast %263 : vector<17xf32> to vector<17x1xf32>
    %cst_74 = arith.constant 8.000000e+00 : f32
    %265 = vector.broadcast %cst_74 : f32 to vector<17x1xf32>
    %266 = arith.divf %264, %265 : vector<17x1xf32>
    %267 = vector.broadcast %259 : vector<17x1xf32> to vector<17x8xf32>
    %268 = arith.subf %255, %267 : vector<17x8xf32>
    %cst_75 = arith.constant 9.99999974E-6 : f32
    %269 = vector.broadcast %cst_75 : f32 to vector<17x1xf32>
    %270 = arith.addf %266, %269 : vector<17x1xf32>
    %271 = math.rsqrt %270 : vector<17x1xf32>
    %272 = vector.broadcast %271 : vector<17x1xf32> to vector<17x8xf32>
    %273 = arith.mulf %268, %272 : vector<17x8xf32>
    %274 = vector.broadcast %33 : vector<1x8xf32> to vector<17x8xf32>
    %275 = arith.mulf %273, %274 : vector<17x8xf32>
    %276 = vector.broadcast %34 : vector<1x8xf32> to vector<17x8xf32>
    %277 = arith.addf %275, %276 : vector<17x8xf32>
    %cst_76 = arith.constant dense<0xFF800000> : vector<17xf32>
    %278 = vector.multi_reduction <maximumf>, %277, %cst_76 [1] : vector<17x8xf32> to vector<17xf32>
    %279 = vector.shape_cast %278 : vector<17xf32> to vector<17x1xf32>
    %280 = vector.broadcast %279 : vector<17x1xf32> to vector<17x8xf32>
    %281 = arith.subf %277, %280 : vector<17x8xf32>
    %282 = math.exp %281 : vector<17x8xf32>
    %cst_77 = arith.constant dense<0.000000e+00> : vector<17xf32>
    %283 = vector.multi_reduction <add>, %282, %cst_77 [1] : vector<17x8xf32> to vector<17xf32>
    %284 = vector.shape_cast %283 : vector<17xf32> to vector<17x1xf32>
    %285 = tpu.reciprocal %284 {approx = true} : vector<17x1xf32> -> vector<17x1xf32>
    %286 = vector.broadcast %285 : vector<17x1xf32> to vector<17x8xf32>
    %287 = arith.mulf %282, %286 : vector<17x8xf32>
    %288 = tpu.transpose %287, [1, 0] : vector<17x8xf32> -> vector<8x17xf32>
    %cst_78 = arith.constant dense<0.000000e+00> : vector<8x8xf32>
    %289 = tpu.matmul %288, %250, %cst_78 {dimension_numbers = #tpu.dot_dimension_numbers<[1], [0], [0], [1], [0, 0, 1, 1], [], []>} : vector<8x17xf32>, vector<17x8xf32>, vector<8x8xf32> -> vector<8x8xf32>
    %290 = vector.extract_strided_slice %205 {offsets = [0, 16], sizes = [17, 8], strides = [1, 1]} : vector<17x128xf32> to vector<17x8xf32>
    %291 = vector.extract_strided_slice %205 {offsets = [0, 48], sizes = [17, 8], strides = [1, 1]} : vector<17x128xf32> to vector<17x8xf32>
    %292 = vector.extract_strided_slice %205 {offsets = [0, 80], sizes = [17, 8], strides = [1, 1]} : vector<17x128xf32> to vector<17x8xf32>
    %293 = tpu.transpose %291, [1, 0] : vector<17x8xf32> -> vector<8x17xf32>
    %cst_79 = arith.constant dense<0.000000e+00> : vector<17x17xf32>
    %294 = tpu.matmul %290, %293, %cst_79 {dimension_numbers = #tpu.dot_dimension_numbers<[1], [0], [0], [1], [0, 0, 1, 1], [], []>} : vector<17x8xf32>, vector<8x17xf32>, vector<17x17xf32> -> vector<17x17xf32>
    %cst_80 = arith.constant dense<0.000000e+00> : vector<17x8xf32>
    %295 = tpu.matmul %294, %31, %cst_80 {dimension_numbers = #tpu.dot_dimension_numbers<[1], [0], [0], [1], [0, 0, 1, 1], [], []>} : vector<17x17xf32>, vector<17x8xf32>, vector<17x8xf32> -> vector<17x8xf32>
    %296 = vector.broadcast %32 : vector<1x8xf32> to vector<17x8xf32>
    %297 = arith.addf %295, %296 : vector<17x8xf32>
    %cst_81 = arith.constant dense<0.000000e+00> : vector<17xf32>
    %298 = vector.multi_reduction <add>, %297, %cst_81 [1] : vector<17x8xf32> to vector<17xf32>
    %299 = vector.shape_cast %298 : vector<17xf32> to vector<17x1xf32>
    %cst_82 = arith.constant 8.000000e+00 : f32
    %300 = vector.broadcast %cst_82 : f32 to vector<17x1xf32>
    %301 = arith.divf %299, %300 : vector<17x1xf32>
    %302 = vector.broadcast %301 : vector<17x1xf32> to vector<17x8xf32>
    %303 = arith.subf %297, %302 : vector<17x8xf32>
    %304 = arith.mulf %303, %303 : vector<17x8xf32>
    %cst_83 = arith.constant dense<0.000000e+00> : vector<17xf32>
    %305 = vector.multi_reduction <add>, %304, %cst_83 [1] : vector<17x8xf32> to vector<17xf32>
    %306 = vector.shape_cast %305 : vector<17xf32> to vector<17x1xf32>
    %cst_84 = arith.constant 8.000000e+00 : f32
    %307 = vector.broadcast %cst_84 : f32 to vector<17x1xf32>
    %308 = arith.divf %306, %307 : vector<17x1xf32>
    %309 = vector.broadcast %301 : vector<17x1xf32> to vector<17x8xf32>
    %310 = arith.subf %297, %309 : vector<17x8xf32>
    %cst_85 = arith.constant 9.99999974E-6 : f32
    %311 = vector.broadcast %cst_85 : f32 to vector<17x1xf32>
    %312 = arith.addf %308, %311 : vector<17x1xf32>
    %313 = math.rsqrt %312 : vector<17x1xf32>
    %314 = vector.broadcast %313 : vector<17x1xf32> to vector<17x8xf32>
    %315 = arith.mulf %310, %314 : vector<17x8xf32>
    %316 = vector.broadcast %33 : vector<1x8xf32> to vector<17x8xf32>
    %317 = arith.mulf %315, %316 : vector<17x8xf32>
    %318 = vector.broadcast %34 : vector<1x8xf32> to vector<17x8xf32>
    %319 = arith.addf %317, %318 : vector<17x8xf32>
    %cst_86 = arith.constant dense<0xFF800000> : vector<17xf32>
    %320 = vector.multi_reduction <maximumf>, %319, %cst_86 [1] : vector<17x8xf32> to vector<17xf32>
    %321 = vector.shape_cast %320 : vector<17xf32> to vector<17x1xf32>
    %322 = vector.broadcast %321 : vector<17x1xf32> to vector<17x8xf32>
    %323 = arith.subf %319, %322 : vector<17x8xf32>
    %324 = math.exp %323 : vector<17x8xf32>
    %cst_87 = arith.constant dense<0.000000e+00> : vector<17xf32>
    %325 = vector.multi_reduction <add>, %324, %cst_87 [1] : vector<17x8xf32> to vector<17xf32>
    %326 = vector.shape_cast %325 : vector<17xf32> to vector<17x1xf32>
    %327 = tpu.reciprocal %326 {approx = true} : vector<17x1xf32> -> vector<17x1xf32>
    %328 = vector.broadcast %327 : vector<17x1xf32> to vector<17x8xf32>
    %329 = arith.mulf %324, %328 : vector<17x8xf32>
    %330 = tpu.transpose %329, [1, 0] : vector<17x8xf32> -> vector<8x17xf32>
    %cst_88 = arith.constant dense<0.000000e+00> : vector<8x8xf32>
    %331 = tpu.matmul %330, %292, %cst_88 {dimension_numbers = #tpu.dot_dimension_numbers<[1], [0], [0], [1], [0, 0, 1, 1], [], []>} : vector<8x17xf32>, vector<17x8xf32>, vector<8x8xf32> -> vector<8x8xf32>
    %332 = vector.extract_strided_slice %205 {offsets = [0, 24], sizes = [17, 8], strides = [1, 1]} : vector<17x128xf32> to vector<17x8xf32>
    %333 = vector.extract_strided_slice %205 {offsets = [0, 56], sizes = [17, 8], strides = [1, 1]} : vector<17x128xf32> to vector<17x8xf32>
    %334 = vector.extract_strided_slice %205 {offsets = [0, 88], sizes = [17, 8], strides = [1, 1]} : vector<17x128xf32> to vector<17x8xf32>
    %335 = tpu.transpose %333, [1, 0] : vector<17x8xf32> -> vector<8x17xf32>
    %cst_89 = arith.constant dense<0.000000e+00> : vector<17x17xf32>
    %336 = tpu.matmul %332, %335, %cst_89 {dimension_numbers = #tpu.dot_dimension_numbers<[1], [0], [0], [1], [0, 0, 1, 1], [], []>} : vector<17x8xf32>, vector<8x17xf32>, vector<17x17xf32> -> vector<17x17xf32>
    %cst_90 = arith.constant dense<0.000000e+00> : vector<17x8xf32>
    %337 = tpu.matmul %336, %31, %cst_90 {dimension_numbers = #tpu.dot_dimension_numbers<[1], [0], [0], [1], [0, 0, 1, 1], [], []>} : vector<17x17xf32>, vector<17x8xf32>, vector<17x8xf32> -> vector<17x8xf32>
    %338 = vector.broadcast %32 : vector<1x8xf32> to vector<17x8xf32>
    %339 = arith.addf %337, %338 : vector<17x8xf32>
    %cst_91 = arith.constant dense<0.000000e+00> : vector<17xf32>
    %340 = vector.multi_reduction <add>, %339, %cst_91 [1] : vector<17x8xf32> to vector<17xf32>
    %341 = vector.shape_cast %340 : vector<17xf32> to vector<17x1xf32>
    %cst_92 = arith.constant 8.000000e+00 : f32
    %342 = vector.broadcast %cst_92 : f32 to vector<17x1xf32>
    %343 = arith.divf %341, %342 : vector<17x1xf32>
    %344 = vector.broadcast %343 : vector<17x1xf32> to vector<17x8xf32>
    %345 = arith.subf %339, %344 : vector<17x8xf32>
    %346 = arith.mulf %345, %345 : vector<17x8xf32>
    %cst_93 = arith.constant dense<0.000000e+00> : vector<17xf32>
    %347 = vector.multi_reduction <add>, %346, %cst_93 [1] : vector<17x8xf32> to vector<17xf32>
    %348 = vector.shape_cast %347 : vector<17xf32> to vector<17x1xf32>
    %cst_94 = arith.constant 8.000000e+00 : f32
    %349 = vector.broadcast %cst_94 : f32 to vector<17x1xf32>
    %350 = arith.divf %348, %349 : vector<17x1xf32>
    %351 = vector.broadcast %343 : vector<17x1xf32> to vector<17x8xf32>
    %352 = arith.subf %339, %351 : vector<17x8xf32>
    %cst_95 = arith.constant 9.99999974E-6 : f32
    %353 = vector.broadcast %cst_95 : f32 to vector<17x1xf32>
    %354 = arith.addf %350, %353 : vector<17x1xf32>
    %355 = math.rsqrt %354 : vector<17x1xf32>
    %356 = vector.broadcast %355 : vector<17x1xf32> to vector<17x8xf32>
    %357 = arith.mulf %352, %356 : vector<17x8xf32>
    %358 = vector.broadcast %33 : vector<1x8xf32> to vector<17x8xf32>
    %359 = arith.mulf %357, %358 : vector<17x8xf32>
    %360 = vector.broadcast %34 : vector<1x8xf32> to vector<17x8xf32>
    %361 = arith.addf %359, %360 : vector<17x8xf32>
    %cst_96 = arith.constant dense<0xFF800000> : vector<17xf32>
    %362 = vector.multi_reduction <maximumf>, %361, %cst_96 [1] : vector<17x8xf32> to vector<17xf32>
    %363 = vector.shape_cast %362 : vector<17xf32> to vector<17x1xf32>
    %364 = vector.broadcast %363 : vector<17x1xf32> to vector<17x8xf32>
    %365 = arith.subf %361, %364 : vector<17x8xf32>
    %366 = math.exp %365 : vector<17x8xf32>
    %cst_97 = arith.constant dense<0.000000e+00> : vector<17xf32>
    %367 = vector.multi_reduction <add>, %366, %cst_97 [1] : vector<17x8xf32> to vector<17xf32>
    %368 = vector.shape_cast %367 : vector<17xf32> to vector<17x1xf32>
    %369 = tpu.reciprocal %368 {approx = true} : vector<17x1xf32> -> vector<17x1xf32>
    %370 = vector.broadcast %369 : vector<17x1xf32> to vector<17x8xf32>
    %371 = arith.mulf %366, %370 : vector<17x8xf32>
    %372 = tpu.transpose %371, [1, 0] : vector<17x8xf32> -> vector<8x17xf32>
    %cst_98 = arith.constant dense<0.000000e+00> : vector<8x8xf32>
    %373 = tpu.matmul %372, %334, %cst_98 {dimension_numbers = #tpu.dot_dimension_numbers<[1], [0], [0], [1], [0, 0, 1, 1], [], []>} : vector<8x17xf32>, vector<17x8xf32>, vector<8x8xf32> -> vector<8x8xf32>
    %374 = tpu.concatenate %247, %289, %331, %373 in 1 : vector<8x8xf32>, vector<8x8xf32>, vector<8x8xf32>, vector<8x8xf32> -> vector<8x32xf32>
    %375 = tpu.concatenate %204, %374 in 1 : vector<8x32xf32>, vector<8x32xf32> -> vector<8x64xf32>
    %c24 = arith.constant 24 : index
    %c0_99 = arith.constant 0 : index
    %376 = vector.load %arg3[%c24, %c0_99] : memref<83x8xf32, #tpu.memory_space<vmem>>, vector<17x8xf32>
    %cst_100 = arith.constant dense<0.000000e+00> : vector<17x64xf32>
    %377 = tpu.matmul %376, %375, %cst_100 {dimension_numbers = #tpu.dot_dimension_numbers<[1], [0], [0], [1], [0, 0, 1, 1], [], []>} : vector<17x8xf32>, vector<8x64xf32>, vector<17x64xf32> -> vector<17x64xf32>
    %378 = vector.extract_strided_slice %377 {offsets = [0, 0], sizes = [17, 32], strides = [1, 1]} : vector<17x64xf32> to vector<17x32xf32>
    %379 = vector.extract_strided_slice %377 {offsets = [0, 32], sizes = [17, 32], strides = [1, 1]} : vector<17x64xf32> to vector<17x32xf32>
    %380 = tpu.concatenate %378, %379 in 0 : vector<17x32xf32>, vector<17x32xf32> -> vector<34x32xf32>
    %381 = arith.addf %4, %380 : vector<34x32xf32>
    %c216 = arith.constant 216 : index
    %c0_101 = arith.constant 0 : index
    %382 = vector.load %arg2[%c216, %c0_101] : memref<275x32xf32, #tpu.memory_space<vmem>>, vector<34x32xf32>
    %383 = arith.addf %381, %382 : vector<34x32xf32>
    %c269 = arith.constant 269 : index
    %c0_102 = arith.constant 0 : index
    %384 = vector.load %arg2[%c269, %c0_102] : memref<275x32xf32, #tpu.memory_space<vmem>>, vector<1x32xf32>
    %c270 = arith.constant 270 : index
    %c0_103 = arith.constant 0 : index
    %385 = vector.load %arg2[%c270, %c0_103] : memref<275x32xf32, #tpu.memory_space<vmem>>, vector<1x32xf32>
    %cst_104 = arith.constant dense<0.000000e+00> : vector<34xf32>
    %386 = vector.multi_reduction <add>, %383, %cst_104 [1] : vector<34x32xf32> to vector<34xf32>
    %387 = vector.shape_cast %386 : vector<34xf32> to vector<34x1xf32>
    %cst_105 = arith.constant 3.200000e+01 : f32
    %388 = vector.broadcast %cst_105 : f32 to vector<34x1xf32>
    %389 = arith.divf %387, %388 : vector<34x1xf32>
    %390 = vector.broadcast %389 : vector<34x1xf32> to vector<34x32xf32>
    %391 = arith.subf %383, %390 : vector<34x32xf32>
    %392 = arith.mulf %391, %391 : vector<34x32xf32>
    %cst_106 = arith.constant dense<0.000000e+00> : vector<34xf32>
    %393 = vector.multi_reduction <add>, %392, %cst_106 [1] : vector<34x32xf32> to vector<34xf32>
    %394 = vector.shape_cast %393 : vector<34xf32> to vector<34x1xf32>
    %cst_107 = arith.constant 3.200000e+01 : f32
    %395 = vector.broadcast %cst_107 : f32 to vector<34x1xf32>
    %396 = arith.divf %394, %395 : vector<34x1xf32>
    %397 = vector.broadcast %389 : vector<34x1xf32> to vector<34x32xf32>
    %398 = arith.subf %383, %397 : vector<34x32xf32>
    %cst_108 = arith.constant 9.99999974E-6 : f32
    %399 = vector.broadcast %cst_108 : f32 to vector<34x1xf32>
    %400 = arith.addf %396, %399 : vector<34x1xf32>
    %401 = math.rsqrt %400 : vector<34x1xf32>
    %402 = vector.broadcast %401 : vector<34x1xf32> to vector<34x32xf32>
    %403 = arith.mulf %398, %402 : vector<34x32xf32>
    %404 = vector.broadcast %384 : vector<1x32xf32> to vector<34x32xf32>
    %405 = arith.mulf %403, %404 : vector<34x32xf32>
    %406 = vector.broadcast %385 : vector<1x32xf32> to vector<34x32xf32>
    %407 = arith.addf %405, %406 : vector<34x32xf32>
    %c32 = arith.constant 32 : index
    %c0_109 = arith.constant 0 : index
    %408 = vector.load %arg1[%c32, %c0_109] : memref<98x128xf32, #tpu.memory_space<vmem>>, vector<32x128xf32>
    %cst_110 = arith.constant dense<0.000000e+00> : vector<34x128xf32>
    %409 = tpu.matmul %407, %408, %cst_110 {dimension_numbers = #tpu.dot_dimension_numbers<[1], [0], [0], [1], [0, 0, 1, 1], [], []>} : vector<34x32xf32>, vector<32x128xf32>, vector<34x128xf32> -> vector<34x128xf32>
    %c96 = arith.constant 96 : index
    %c0_111 = arith.constant 0 : index
    %410 = vector.load %arg1[%c96, %c0_111] : memref<98x128xf32, #tpu.memory_space<vmem>>, vector<1x128xf32>
    %411 = vector.broadcast %410 : vector<1x128xf32> to vector<34x128xf32>
    %412 = arith.addf %409, %411 : vector<34x128xf32>
    %cst_112 = arith.constant 5.000000e-01 : f32
    %413 = vector.broadcast %cst_112 : f32 to vector<34x128xf32>
    %414 = arith.mulf %413, %412 : vector<34x128xf32>
    %cst_113 = arith.constant 0.707106769 : f32
    %415 = vector.broadcast %cst_113 : f32 to vector<34x128xf32>
    %416 = arith.mulf %412, %415 : vector<34x128xf32>
    %417 = math.erf %416 : vector<34x128xf32>
    %cst_114 = arith.constant 1.000000e+00 : f32
    %418 = vector.broadcast %cst_114 : f32 to vector<34x128xf32>
    %419 = arith.addf %418, %417 : vector<34x128xf32>
    %420 = arith.mulf %414, %419 : vector<34x128xf32>
    %c88 = arith.constant 88 : index
    %c0_115 = arith.constant 0 : index
    %421 = vector.load %arg2[%c88, %c0_115] : memref<275x32xf32, #tpu.memory_space<vmem>>, vector<128x32xf32>
    %cst_116 = arith.constant dense<0.000000e+00> : vector<34x32xf32>
    %422 = tpu.matmul %420, %421, %cst_116 {dimension_numbers = #tpu.dot_dimension_numbers<[1], [0], [0], [1], [0, 0, 1, 1], [], []>} : vector<34x128xf32>, vector<128x32xf32>, vector<34x32xf32> -> vector<34x32xf32>
    %c264 = arith.constant 264 : index
    %c0_117 = arith.constant 0 : index
    %423 = vector.load %arg2[%c264, %c0_117] : memref<275x32xf32, #tpu.memory_space<vmem>>, vector<1x32xf32>
    %424 = vector.broadcast %423 : vector<1x32xf32> to vector<34x32xf32>
    %425 = arith.addf %422, %424 : vector<34x32xf32>
    %426 = arith.addf %4, %425 : vector<34x32xf32>
    %c271 = arith.constant 271 : index
    %c0_118 = arith.constant 0 : index
    %427 = vector.load %arg2[%c271, %c0_118] : memref<275x32xf32, #tpu.memory_space<vmem>>, vector<1x32xf32>
    %c272 = arith.constant 272 : index
    %c0_119 = arith.constant 0 : index
    %428 = vector.load %arg2[%c272, %c0_119] : memref<275x32xf32, #tpu.memory_space<vmem>>, vector<1x32xf32>
    %cst_120 = arith.constant dense<0.000000e+00> : vector<34xf32>
    %429 = vector.multi_reduction <add>, %426, %cst_120 [1] : vector<34x32xf32> to vector<34xf32>
    %430 = vector.shape_cast %429 : vector<34xf32> to vector<34x1xf32>
    %cst_121 = arith.constant 3.200000e+01 : f32
    %431 = vector.broadcast %cst_121 : f32 to vector<34x1xf32>
    %432 = arith.divf %430, %431 : vector<34x1xf32>
    %433 = vector.broadcast %432 : vector<34x1xf32> to vector<34x32xf32>
    %434 = arith.subf %426, %433 : vector<34x32xf32>
    %435 = arith.mulf %434, %434 : vector<34x32xf32>
    %cst_122 = arith.constant dense<0.000000e+00> : vector<34xf32>
    %436 = vector.multi_reduction <add>, %435, %cst_122 [1] : vector<34x32xf32> to vector<34xf32>
    %437 = vector.shape_cast %436 : vector<34xf32> to vector<34x1xf32>
    %cst_123 = arith.constant 3.200000e+01 : f32
    %438 = vector.broadcast %cst_123 : f32 to vector<34x1xf32>
    %439 = arith.divf %437, %438 : vector<34x1xf32>
    %440 = vector.broadcast %432 : vector<34x1xf32> to vector<34x32xf32>
    %441 = arith.subf %426, %440 : vector<34x32xf32>
    %cst_124 = arith.constant 9.99999974E-6 : f32
    %442 = vector.broadcast %cst_124 : f32 to vector<34x1xf32>
    %443 = arith.addf %439, %442 : vector<34x1xf32>
    %444 = math.rsqrt %443 : vector<34x1xf32>
    %445 = vector.broadcast %444 : vector<34x1xf32> to vector<34x32xf32>
    %446 = arith.mulf %441, %445 : vector<34x32xf32>
    %447 = vector.broadcast %427 : vector<1x32xf32> to vector<34x32xf32>
    %448 = arith.mulf %446, %447 : vector<34x32xf32>
    %449 = vector.broadcast %428 : vector<1x32xf32> to vector<34x32xf32>
    %450 = arith.addf %448, %449 : vector<34x32xf32>
    %c0_125 = arith.constant 0 : index
    %c0_126 = arith.constant 0 : index
    %451 = vector.load %arg1[%c0_125, %c0_126] : memref<98x128xf32, #tpu.memory_space<vmem>>, vector<32x128xf32>
    %cst_127 = arith.constant dense<0.000000e+00> : vector<34x128xf32>
    %452 = tpu.matmul %450, %451, %cst_127 {dimension_numbers = #tpu.dot_dimension_numbers<[1], [0], [0], [1], [0, 0, 1, 1], [], []>} : vector<34x32xf32>, vector<32x128xf32>, vector<34x128xf32> -> vector<34x128xf32>
    %c0_128 = arith.constant 0 : index
    %c0_129 = arith.constant 0 : index
    %453 = vector.load %arg3[%c0_128, %c0_129] : memref<83x8xf32, #tpu.memory_space<vmem>>, vector<17x8xf32>
    %c80_130 = arith.constant 80 : index
    %c0_131 = arith.constant 0 : index
    %454 = vector.load %arg3[%c80_130, %c0_131] : memref<83x8xf32, #tpu.memory_space<vmem>>, vector<1x8xf32>
    %c81_132 = arith.constant 81 : index
    %c0_133 = arith.constant 0 : index
    %455 = vector.load %arg3[%c81_132, %c0_133] : memref<83x8xf32, #tpu.memory_space<vmem>>, vector<1x8xf32>
    %c82_134 = arith.constant 82 : index
    %c0_135 = arith.constant 0 : index
    %456 = vector.load %arg3[%c82_134, %c0_135] : memref<83x8xf32, #tpu.memory_space<vmem>>, vector<1x8xf32>
    %457 = vector.extract_strided_slice %452 {offsets = [0, 0], sizes = [17, 128], strides = [1, 1]} : vector<34x128xf32> to vector<17x128xf32>
    %458 = vector.extract_strided_slice %457 {offsets = [0, 0], sizes = [17, 8], strides = [1, 1]} : vector<17x128xf32> to vector<17x8xf32>
    %459 = vector.extract_strided_slice %457 {offsets = [0, 32], sizes = [17, 8], strides = [1, 1]} : vector<17x128xf32> to vector<17x8xf32>
    %460 = vector.extract_strided_slice %457 {offsets = [0, 64], sizes = [17, 8], strides = [1, 1]} : vector<17x128xf32> to vector<17x8xf32>
    %461 = tpu.transpose %459, [1, 0] : vector<17x8xf32> -> vector<8x17xf32>
    %cst_136 = arith.constant dense<0.000000e+00> : vector<17x17xf32>
    %462 = tpu.matmul %458, %461, %cst_136 {dimension_numbers = #tpu.dot_dimension_numbers<[1], [0], [0], [1], [0, 0, 1, 1], [], []>} : vector<17x8xf32>, vector<8x17xf32>, vector<17x17xf32> -> vector<17x17xf32>
    %cst_137 = arith.constant dense<0.000000e+00> : vector<17x8xf32>
    %463 = tpu.matmul %462, %453, %cst_137 {dimension_numbers = #tpu.dot_dimension_numbers<[1], [0], [0], [1], [0, 0, 1, 1], [], []>} : vector<17x17xf32>, vector<17x8xf32>, vector<17x8xf32> -> vector<17x8xf32>
    %464 = vector.broadcast %454 : vector<1x8xf32> to vector<17x8xf32>
    %465 = arith.addf %463, %464 : vector<17x8xf32>
    %cst_138 = arith.constant dense<0.000000e+00> : vector<17xf32>
    %466 = vector.multi_reduction <add>, %465, %cst_138 [1] : vector<17x8xf32> to vector<17xf32>
    %467 = vector.shape_cast %466 : vector<17xf32> to vector<17x1xf32>
    %cst_139 = arith.constant 8.000000e+00 : f32
    %468 = vector.broadcast %cst_139 : f32 to vector<17x1xf32>
    %469 = arith.divf %467, %468 : vector<17x1xf32>
    %470 = vector.broadcast %469 : vector<17x1xf32> to vector<17x8xf32>
    %471 = arith.subf %465, %470 : vector<17x8xf32>
    %472 = arith.mulf %471, %471 : vector<17x8xf32>
    %cst_140 = arith.constant dense<0.000000e+00> : vector<17xf32>
    %473 = vector.multi_reduction <add>, %472, %cst_140 [1] : vector<17x8xf32> to vector<17xf32>
    %474 = vector.shape_cast %473 : vector<17xf32> to vector<17x1xf32>
    %cst_141 = arith.constant 8.000000e+00 : f32
    %475 = vector.broadcast %cst_141 : f32 to vector<17x1xf32>
    %476 = arith.divf %474, %475 : vector<17x1xf32>
    %477 = vector.broadcast %469 : vector<17x1xf32> to vector<17x8xf32>
    %478 = arith.subf %465, %477 : vector<17x8xf32>
    %cst_142 = arith.constant 9.99999974E-6 : f32
    %479 = vector.broadcast %cst_142 : f32 to vector<17x1xf32>
    %480 = arith.addf %476, %479 : vector<17x1xf32>
    %481 = math.rsqrt %480 : vector<17x1xf32>
    %482 = vector.broadcast %481 : vector<17x1xf32> to vector<17x8xf32>
    %483 = arith.mulf %478, %482 : vector<17x8xf32>
    %484 = vector.broadcast %455 : vector<1x8xf32> to vector<17x8xf32>
    %485 = arith.mulf %483, %484 : vector<17x8xf32>
    %486 = vector.broadcast %456 : vector<1x8xf32> to vector<17x8xf32>
    %487 = arith.addf %485, %486 : vector<17x8xf32>
    %cst_143 = arith.constant dense<0xFF800000> : vector<17xf32>
    %488 = vector.multi_reduction <maximumf>, %487, %cst_143 [1] : vector<17x8xf32> to vector<17xf32>
    %489 = vector.shape_cast %488 : vector<17xf32> to vector<17x1xf32>
    %490 = vector.broadcast %489 : vector<17x1xf32> to vector<17x8xf32>
    %491 = arith.subf %487, %490 : vector<17x8xf32>
    %492 = math.exp %491 : vector<17x8xf32>
    %cst_144 = arith.constant dense<0.000000e+00> : vector<17xf32>
    %493 = vector.multi_reduction <add>, %492, %cst_144 [1] : vector<17x8xf32> to vector<17xf32>
    %494 = vector.shape_cast %493 : vector<17xf32> to vector<17x1xf32>
    %495 = tpu.reciprocal %494 {approx = true} : vector<17x1xf32> -> vector<17x1xf32>
    %496 = vector.broadcast %495 : vector<17x1xf32> to vector<17x8xf32>
    %497 = arith.mulf %492, %496 : vector<17x8xf32>
    %498 = tpu.transpose %497, [1, 0] : vector<17x8xf32> -> vector<8x17xf32>
    %cst_145 = arith.constant dense<0.000000e+00> : vector<8x8xf32>
    %499 = tpu.matmul %498, %460, %cst_145 {dimension_numbers = #tpu.dot_dimension_numbers<[1], [0], [0], [1], [0, 0, 1, 1], [], []>} : vector<8x17xf32>, vector<17x8xf32>, vector<8x8xf32> -> vector<8x8xf32>
    %500 = vector.extract_strided_slice %457 {offsets = [0, 8], sizes = [17, 8], strides = [1, 1]} : vector<17x128xf32> to vector<17x8xf32>
    %501 = vector.extract_strided_slice %457 {offsets = [0, 40], sizes = [17, 8], strides = [1, 1]} : vector<17x128xf32> to vector<17x8xf32>
    %502 = vector.extract_strided_slice %457 {offsets = [0, 72], sizes = [17, 8], strides = [1, 1]} : vector<17x128xf32> to vector<17x8xf32>
    %503 = tpu.transpose %501, [1, 0] : vector<17x8xf32> -> vector<8x17xf32>
    %cst_146 = arith.constant dense<0.000000e+00> : vector<17x17xf32>
    %504 = tpu.matmul %500, %503, %cst_146 {dimension_numbers = #tpu.dot_dimension_numbers<[1], [0], [0], [1], [0, 0, 1, 1], [], []>} : vector<17x8xf32>, vector<8x17xf32>, vector<17x17xf32> -> vector<17x17xf32>
    %cst_147 = arith.constant dense<0.000000e+00> : vector<17x8xf32>
    %505 = tpu.matmul %504, %453, %cst_147 {dimension_numbers = #tpu.dot_dimension_numbers<[1], [0], [0], [1], [0, 0, 1, 1], [], []>} : vector<17x17xf32>, vector<17x8xf32>, vector<17x8xf32> -> vector<17x8xf32>
    %506 = vector.broadcast %454 : vector<1x8xf32> to vector<17x8xf32>
    %507 = arith.addf %505, %506 : vector<17x8xf32>
    %cst_148 = arith.constant dense<0.000000e+00> : vector<17xf32>
    %508 = vector.multi_reduction <add>, %507, %cst_148 [1] : vector<17x8xf32> to vector<17xf32>
    %509 = vector.shape_cast %508 : vector<17xf32> to vector<17x1xf32>
    %cst_149 = arith.constant 8.000000e+00 : f32
    %510 = vector.broadcast %cst_149 : f32 to vector<17x1xf32>
    %511 = arith.divf %509, %510 : vector<17x1xf32>
    %512 = vector.broadcast %511 : vector<17x1xf32> to vector<17x8xf32>
    %513 = arith.subf %507, %512 : vector<17x8xf32>
    %514 = arith.mulf %513, %513 : vector<17x8xf32>
    %cst_150 = arith.constant dense<0.000000e+00> : vector<17xf32>
    %515 = vector.multi_reduction <add>, %514, %cst_150 [1] : vector<17x8xf32> to vector<17xf32>
    %516 = vector.shape_cast %515 : vector<17xf32> to vector<17x1xf32>
    %cst_151 = arith.constant 8.000000e+00 : f32
    %517 = vector.broadcast %cst_151 : f32 to vector<17x1xf32>
    %518 = arith.divf %516, %517 : vector<17x1xf32>
    %519 = vector.broadcast %511 : vector<17x1xf32> to vector<17x8xf32>
    %520 = arith.subf %507, %519 : vector<17x8xf32>
    %cst_152 = arith.constant 9.99999974E-6 : f32
    %521 = vector.broadcast %cst_152 : f32 to vector<17x1xf32>
    %522 = arith.addf %518, %521 : vector<17x1xf32>
    %523 = math.rsqrt %522 : vector<17x1xf32>
    %524 = vector.broadcast %523 : vector<17x1xf32> to vector<17x8xf32>
    %525 = arith.mulf %520, %524 : vector<17x8xf32>
    %526 = vector.broadcast %455 : vector<1x8xf32> to vector<17x8xf32>
    %527 = arith.mulf %525, %526 : vector<17x8xf32>
    %528 = vector.broadcast %456 : vector<1x8xf32> to vector<17x8xf32>
    %529 = arith.addf %527, %528 : vector<17x8xf32>
    %cst_153 = arith.constant dense<0xFF800000> : vector<17xf32>
    %530 = vector.multi_reduction <maximumf>, %529, %cst_153 [1] : vector<17x8xf32> to vector<17xf32>
    %531 = vector.shape_cast %530 : vector<17xf32> to vector<17x1xf32>
    %532 = vector.broadcast %531 : vector<17x1xf32> to vector<17x8xf32>
    %533 = arith.subf %529, %532 : vector<17x8xf32>
    %534 = math.exp %533 : vector<17x8xf32>
    %cst_154 = arith.constant dense<0.000000e+00> : vector<17xf32>
    %535 = vector.multi_reduction <add>, %534, %cst_154 [1] : vector<17x8xf32> to vector<17xf32>
    %536 = vector.shape_cast %535 : vector<17xf32> to vector<17x1xf32>
    %537 = tpu.reciprocal %536 {approx = true} : vector<17x1xf32> -> vector<17x1xf32>
    %538 = vector.broadcast %537 : vector<17x1xf32> to vector<17x8xf32>
    %539 = arith.mulf %534, %538 : vector<17x8xf32>
    %540 = tpu.transpose %539, [1, 0] : vector<17x8xf32> -> vector<8x17xf32>
    %cst_155 = arith.constant dense<0.000000e+00> : vector<8x8xf32>
    %541 = tpu.matmul %540, %502, %cst_155 {dimension_numbers = #tpu.dot_dimension_numbers<[1], [0], [0], [1], [0, 0, 1, 1], [], []>} : vector<8x17xf32>, vector<17x8xf32>, vector<8x8xf32> -> vector<8x8xf32>
    %542 = vector.extract_strided_slice %457 {offsets = [0, 16], sizes = [17, 8], strides = [1, 1]} : vector<17x128xf32> to vector<17x8xf32>
    %543 = vector.extract_strided_slice %457 {offsets = [0, 48], sizes = [17, 8], strides = [1, 1]} : vector<17x128xf32> to vector<17x8xf32>
    %544 = vector.extract_strided_slice %457 {offsets = [0, 80], sizes = [17, 8], strides = [1, 1]} : vector<17x128xf32> to vector<17x8xf32>
    %545 = tpu.transpose %543, [1, 0] : vector<17x8xf32> -> vector<8x17xf32>
    %cst_156 = arith.constant dense<0.000000e+00> : vector<17x17xf32>
    %546 = tpu.matmul %542, %545, %cst_156 {dimension_numbers = #tpu.dot_dimension_numbers<[1], [0], [0], [1], [0, 0, 1, 1], [], []>} : vector<17x8xf32>, vector<8x17xf32>, vector<17x17xf32> -> vector<17x17xf32>
    %cst_157 = arith.constant dense<0.000000e+00> : vector<17x8xf32>
    %547 = tpu.matmul %546, %453, %cst_157 {dimension_numbers = #tpu.dot_dimension_numbers<[1], [0], [0], [1], [0, 0, 1, 1], [], []>} : vector<17x17xf32>, vector<17x8xf32>, vector<17x8xf32> -> vector<17x8xf32>
    %548 = vector.broadcast %454 : vector<1x8xf32> to vector<17x8xf32>
    %549 = arith.addf %547, %548 : vector<17x8xf32>
    %cst_158 = arith.constant dense<0.000000e+00> : vector<17xf32>
    %550 = vector.multi_reduction <add>, %549, %cst_158 [1] : vector<17x8xf32> to vector<17xf32>
    %551 = vector.shape_cast %550 : vector<17xf32> to vector<17x1xf32>
    %cst_159 = arith.constant 8.000000e+00 : f32
    %552 = vector.broadcast %cst_159 : f32 to vector<17x1xf32>
    %553 = arith.divf %551, %552 : vector<17x1xf32>
    %554 = vector.broadcast %553 : vector<17x1xf32> to vector<17x8xf32>
    %555 = arith.subf %549, %554 : vector<17x8xf32>
    %556 = arith.mulf %555, %555 : vector<17x8xf32>
    %cst_160 = arith.constant dense<0.000000e+00> : vector<17xf32>
    %557 = vector.multi_reduction <add>, %556, %cst_160 [1] : vector<17x8xf32> to vector<17xf32>
    %558 = vector.shape_cast %557 : vector<17xf32> to vector<17x1xf32>
    %cst_161 = arith.constant 8.000000e+00 : f32
    %559 = vector.broadcast %cst_161 : f32 to vector<17x1xf32>
    %560 = arith.divf %558, %559 : vector<17x1xf32>
    %561 = vector.broadcast %553 : vector<17x1xf32> to vector<17x8xf32>
    %562 = arith.subf %549, %561 : vector<17x8xf32>
    %cst_162 = arith.constant 9.99999974E-6 : f32
    %563 = vector.broadcast %cst_162 : f32 to vector<17x1xf32>
    %564 = arith.addf %560, %563 : vector<17x1xf32>
    %565 = math.rsqrt %564 : vector<17x1xf32>
    %566 = vector.broadcast %565 : vector<17x1xf32> to vector<17x8xf32>
    %567 = arith.mulf %562, %566 : vector<17x8xf32>
    %568 = vector.broadcast %455 : vector<1x8xf32> to vector<17x8xf32>
    %569 = arith.mulf %567, %568 : vector<17x8xf32>
    %570 = vector.broadcast %456 : vector<1x8xf32> to vector<17x8xf32>
    %571 = arith.addf %569, %570 : vector<17x8xf32>
    %cst_163 = arith.constant dense<0xFF800000> : vector<17xf32>
    %572 = vector.multi_reduction <maximumf>, %571, %cst_163 [1] : vector<17x8xf32> to vector<17xf32>
    %573 = vector.shape_cast %572 : vector<17xf32> to vector<17x1xf32>
    %574 = vector.broadcast %573 : vector<17x1xf32> to vector<17x8xf32>
    %575 = arith.subf %571, %574 : vector<17x8xf32>
    %576 = math.exp %575 : vector<17x8xf32>
    %cst_164 = arith.constant dense<0.000000e+00> : vector<17xf32>
    %577 = vector.multi_reduction <add>, %576, %cst_164 [1] : vector<17x8xf32> to vector<17xf32>
    %578 = vector.shape_cast %577 : vector<17xf32> to vector<17x1xf32>
    %579 = tpu.reciprocal %578 {approx = true} : vector<17x1xf32> -> vector<17x1xf32>
    %580 = vector.broadcast %579 : vector<17x1xf32> to vector<17x8xf32>
    %581 = arith.mulf %576, %580 : vector<17x8xf32>
    %582 = tpu.transpose %581, [1, 0] : vector<17x8xf32> -> vector<8x17xf32>
    %cst_165 = arith.constant dense<0.000000e+00> : vector<8x8xf32>
    %583 = tpu.matmul %582, %544, %cst_165 {dimension_numbers = #tpu.dot_dimension_numbers<[1], [0], [0], [1], [0, 0, 1, 1], [], []>} : vector<8x17xf32>, vector<17x8xf32>, vector<8x8xf32> -> vector<8x8xf32>
    %584 = vector.extract_strided_slice %457 {offsets = [0, 24], sizes = [17, 8], strides = [1, 1]} : vector<17x128xf32> to vector<17x8xf32>
    %585 = vector.extract_strided_slice %457 {offsets = [0, 56], sizes = [17, 8], strides = [1, 1]} : vector<17x128xf32> to vector<17x8xf32>
    %586 = vector.extract_strided_slice %457 {offsets = [0, 88], sizes = [17, 8], strides = [1, 1]} : vector<17x128xf32> to vector<17x8xf32>
    %587 = tpu.transpose %585, [1, 0] : vector<17x8xf32> -> vector<8x17xf32>
    %cst_166 = arith.constant dense<0.000000e+00> : vector<17x17xf32>
    %588 = tpu.matmul %584, %587, %cst_166 {dimension_numbers = #tpu.dot_dimension_numbers<[1], [0], [0], [1], [0, 0, 1, 1], [], []>} : vector<17x8xf32>, vector<8x17xf32>, vector<17x17xf32> -> vector<17x17xf32>
    %cst_167 = arith.constant dense<0.000000e+00> : vector<17x8xf32>
    %589 = tpu.matmul %588, %453, %cst_167 {dimension_numbers = #tpu.dot_dimension_numbers<[1], [0], [0], [1], [0, 0, 1, 1], [], []>} : vector<17x17xf32>, vector<17x8xf32>, vector<17x8xf32> -> vector<17x8xf32>
    %590 = vector.broadcast %454 : vector<1x8xf32> to vector<17x8xf32>
    %591 = arith.addf %589, %590 : vector<17x8xf32>
    %cst_168 = arith.constant dense<0.000000e+00> : vector<17xf32>
    %592 = vector.multi_reduction <add>, %591, %cst_168 [1] : vector<17x8xf32> to vector<17xf32>
    %593 = vector.shape_cast %592 : vector<17xf32> to vector<17x1xf32>
    %cst_169 = arith.constant 8.000000e+00 : f32
    %594 = vector.broadcast %cst_169 : f32 to vector<17x1xf32>
    %595 = arith.divf %593, %594 : vector<17x1xf32>
    %596 = vector.broadcast %595 : vector<17x1xf32> to vector<17x8xf32>
    %597 = arith.subf %591, %596 : vector<17x8xf32>
    %598 = arith.mulf %597, %597 : vector<17x8xf32>
    %cst_170 = arith.constant dense<0.000000e+00> : vector<17xf32>
    %599 = vector.multi_reduction <add>, %598, %cst_170 [1] : vector<17x8xf32> to vector<17xf32>
    %600 = vector.shape_cast %599 : vector<17xf32> to vector<17x1xf32>
    %cst_171 = arith.constant 8.000000e+00 : f32
    %601 = vector.broadcast %cst_171 : f32 to vector<17x1xf32>
    %602 = arith.divf %600, %601 : vector<17x1xf32>
    %603 = vector.broadcast %595 : vector<17x1xf32> to vector<17x8xf32>
    %604 = arith.subf %591, %603 : vector<17x8xf32>
    %cst_172 = arith.constant 9.99999974E-6 : f32
    %605 = vector.broadcast %cst_172 : f32 to vector<17x1xf32>
    %606 = arith.addf %602, %605 : vector<17x1xf32>
    %607 = math.rsqrt %606 : vector<17x1xf32>
    %608 = vector.broadcast %607 : vector<17x1xf32> to vector<17x8xf32>
    %609 = arith.mulf %604, %608 : vector<17x8xf32>
    %610 = vector.broadcast %455 : vector<1x8xf32> to vector<17x8xf32>
    %611 = arith.mulf %609, %610 : vector<17x8xf32>
    %612 = vector.broadcast %456 : vector<1x8xf32> to vector<17x8xf32>
    %613 = arith.addf %611, %612 : vector<17x8xf32>
    %cst_173 = arith.constant dense<0xFF800000> : vector<17xf32>
    %614 = vector.multi_reduction <maximumf>, %613, %cst_173 [1] : vector<17x8xf32> to vector<17xf32>
    %615 = vector.shape_cast %614 : vector<17xf32> to vector<17x1xf32>
    %616 = vector.broadcast %615 : vector<17x1xf32> to vector<17x8xf32>
    %617 = arith.subf %613, %616 : vector<17x8xf32>
    %618 = math.exp %617 : vector<17x8xf32>
    %cst_174 = arith.constant dense<0.000000e+00> : vector<17xf32>
    %619 = vector.multi_reduction <add>, %618, %cst_174 [1] : vector<17x8xf32> to vector<17xf32>
    %620 = vector.shape_cast %619 : vector<17xf32> to vector<17x1xf32>
    %621 = tpu.reciprocal %620 {approx = true} : vector<17x1xf32> -> vector<17x1xf32>
    %622 = vector.broadcast %621 : vector<17x1xf32> to vector<17x8xf32>
    %623 = arith.mulf %618, %622 : vector<17x8xf32>
    %624 = tpu.transpose %623, [1, 0] : vector<17x8xf32> -> vector<8x17xf32>
    %cst_175 = arith.constant dense<0.000000e+00> : vector<8x8xf32>
    %625 = tpu.matmul %624, %586, %cst_175 {dimension_numbers = #tpu.dot_dimension_numbers<[1], [0], [0], [1], [0, 0, 1, 1], [], []>} : vector<8x17xf32>, vector<17x8xf32>, vector<8x8xf32> -> vector<8x8xf32>
    %626 = tpu.concatenate %499, %541, %583, %625 in 1 : vector<8x8xf32>, vector<8x8xf32>, vector<8x8xf32>, vector<8x8xf32> -> vector<8x32xf32>
    %627 = vector.extract_strided_slice %452 {offsets = [17, 0], sizes = [17, 128], strides = [1, 1]} : vector<34x128xf32> to vector<17x128xf32>
    %628 = vector.extract_strided_slice %627 {offsets = [0, 0], sizes = [17, 8], strides = [1, 1]} : vector<17x128xf32> to vector<17x8xf32>
    %629 = vector.extract_strided_slice %627 {offsets = [0, 32], sizes = [17, 8], strides = [1, 1]} : vector<17x128xf32> to vector<17x8xf32>
    %630 = vector.extract_strided_slice %627 {offsets = [0, 64], sizes = [17, 8], strides = [1, 1]} : vector<17x128xf32> to vector<17x8xf32>
    %631 = tpu.transpose %629, [1, 0] : vector<17x8xf32> -> vector<8x17xf32>
    %cst_176 = arith.constant dense<0.000000e+00> : vector<17x17xf32>
    %632 = tpu.matmul %628, %631, %cst_176 {dimension_numbers = #tpu.dot_dimension_numbers<[1], [0], [0], [1], [0, 0, 1, 1], [], []>} : vector<17x8xf32>, vector<8x17xf32>, vector<17x17xf32> -> vector<17x17xf32>
    %cst_177 = arith.constant dense<0.000000e+00> : vector<17x8xf32>
    %633 = tpu.matmul %632, %453, %cst_177 {dimension_numbers = #tpu.dot_dimension_numbers<[1], [0], [0], [1], [0, 0, 1, 1], [], []>} : vector<17x17xf32>, vector<17x8xf32>, vector<17x8xf32> -> vector<17x8xf32>
    %634 = vector.broadcast %454 : vector<1x8xf32> to vector<17x8xf32>
    %635 = arith.addf %633, %634 : vector<17x8xf32>
    %cst_178 = arith.constant dense<0.000000e+00> : vector<17xf32>
    %636 = vector.multi_reduction <add>, %635, %cst_178 [1] : vector<17x8xf32> to vector<17xf32>
    %637 = vector.shape_cast %636 : vector<17xf32> to vector<17x1xf32>
    %cst_179 = arith.constant 8.000000e+00 : f32
    %638 = vector.broadcast %cst_179 : f32 to vector<17x1xf32>
    %639 = arith.divf %637, %638 : vector<17x1xf32>
    %640 = vector.broadcast %639 : vector<17x1xf32> to vector<17x8xf32>
    %641 = arith.subf %635, %640 : vector<17x8xf32>
    %642 = arith.mulf %641, %641 : vector<17x8xf32>
    %cst_180 = arith.constant dense<0.000000e+00> : vector<17xf32>
    %643 = vector.multi_reduction <add>, %642, %cst_180 [1] : vector<17x8xf32> to vector<17xf32>
    %644 = vector.shape_cast %643 : vector<17xf32> to vector<17x1xf32>
    %cst_181 = arith.constant 8.000000e+00 : f32
    %645 = vector.broadcast %cst_181 : f32 to vector<17x1xf32>
    %646 = arith.divf %644, %645 : vector<17x1xf32>
    %647 = vector.broadcast %639 : vector<17x1xf32> to vector<17x8xf32>
    %648 = arith.subf %635, %647 : vector<17x8xf32>
    %cst_182 = arith.constant 9.99999974E-6 : f32
    %649 = vector.broadcast %cst_182 : f32 to vector<17x1xf32>
    %650 = arith.addf %646, %649 : vector<17x1xf32>
    %651 = math.rsqrt %650 : vector<17x1xf32>
    %652 = vector.broadcast %651 : vector<17x1xf32> to vector<17x8xf32>
    %653 = arith.mulf %648, %652 : vector<17x8xf32>
    %654 = vector.broadcast %455 : vector<1x8xf32> to vector<17x8xf32>
    %655 = arith.mulf %653, %654 : vector<17x8xf32>
    %656 = vector.broadcast %456 : vector<1x8xf32> to vector<17x8xf32>
    %657 = arith.addf %655, %656 : vector<17x8xf32>
    %cst_183 = arith.constant dense<0xFF800000> : vector<17xf32>
    %658 = vector.multi_reduction <maximumf>, %657, %cst_183 [1] : vector<17x8xf32> to vector<17xf32>
    %659 = vector.shape_cast %658 : vector<17xf32> to vector<17x1xf32>
    %660 = vector.broadcast %659 : vector<17x1xf32> to vector<17x8xf32>
    %661 = arith.subf %657, %660 : vector<17x8xf32>
    %662 = math.exp %661 : vector<17x8xf32>
    %cst_184 = arith.constant dense<0.000000e+00> : vector<17xf32>
    %663 = vector.multi_reduction <add>, %662, %cst_184 [1] : vector<17x8xf32> to vector<17xf32>
    %664 = vector.shape_cast %663 : vector<17xf32> to vector<17x1xf32>
    %665 = tpu.reciprocal %664 {approx = true} : vector<17x1xf32> -> vector<17x1xf32>
    %666 = vector.broadcast %665 : vector<17x1xf32> to vector<17x8xf32>
    %667 = arith.mulf %662, %666 : vector<17x8xf32>
    %668 = tpu.transpose %667, [1, 0] : vector<17x8xf32> -> vector<8x17xf32>
    %cst_185 = arith.constant dense<0.000000e+00> : vector<8x8xf32>
    %669 = tpu.matmul %668, %630, %cst_185 {dimension_numbers = #tpu.dot_dimension_numbers<[1], [0], [0], [1], [0, 0, 1, 1], [], []>} : vector<8x17xf32>, vector<17x8xf32>, vector<8x8xf32> -> vector<8x8xf32>
    %670 = vector.extract_strided_slice %627 {offsets = [0, 8], sizes = [17, 8], strides = [1, 1]} : vector<17x128xf32> to vector<17x8xf32>
    %671 = vector.extract_strided_slice %627 {offsets = [0, 40], sizes = [17, 8], strides = [1, 1]} : vector<17x128xf32> to vector<17x8xf32>
    %672 = vector.extract_strided_slice %627 {offsets = [0, 72], sizes = [17, 8], strides = [1, 1]} : vector<17x128xf32> to vector<17x8xf32>
    %673 = tpu.transpose %671, [1, 0] : vector<17x8xf32> -> vector<8x17xf32>
    %cst_186 = arith.constant dense<0.000000e+00> : vector<17x17xf32>
    %674 = tpu.matmul %670, %673, %cst_186 {dimension_numbers = #tpu.dot_dimension_numbers<[1], [0], [0], [1], [0, 0, 1, 1], [], []>} : vector<17x8xf32>, vector<8x17xf32>, vector<17x17xf32> -> vector<17x17xf32>
    %cst_187 = arith.constant dense<0.000000e+00> : vector<17x8xf32>
    %675 = tpu.matmul %674, %453, %cst_187 {dimension_numbers = #tpu.dot_dimension_numbers<[1], [0], [0], [1], [0, 0, 1, 1], [], []>} : vector<17x17xf32>, vector<17x8xf32>, vector<17x8xf32> -> vector<17x8xf32>
    %676 = vector.broadcast %454 : vector<1x8xf32> to vector<17x8xf32>
    %677 = arith.addf %675, %676 : vector<17x8xf32>
    %cst_188 = arith.constant dense<0.000000e+00> : vector<17xf32>
    %678 = vector.multi_reduction <add>, %677, %cst_188 [1] : vector<17x8xf32> to vector<17xf32>
    %679 = vector.shape_cast %678 : vector<17xf32> to vector<17x1xf32>
    %cst_189 = arith.constant 8.000000e+00 : f32
    %680 = vector.broadcast %cst_189 : f32 to vector<17x1xf32>
    %681 = arith.divf %679, %680 : vector<17x1xf32>
    %682 = vector.broadcast %681 : vector<17x1xf32> to vector<17x8xf32>
    %683 = arith.subf %677, %682 : vector<17x8xf32>
    %684 = arith.mulf %683, %683 : vector<17x8xf32>
    %cst_190 = arith.constant dense<0.000000e+00> : vector<17xf32>
    %685 = vector.multi_reduction <add>, %684, %cst_190 [1] : vector<17x8xf32> to vector<17xf32>
    %686 = vector.shape_cast %685 : vector<17xf32> to vector<17x1xf32>
    %cst_191 = arith.constant 8.000000e+00 : f32
    %687 = vector.broadcast %cst_191 : f32 to vector<17x1xf32>
    %688 = arith.divf %686, %687 : vector<17x1xf32>
    %689 = vector.broadcast %681 : vector<17x1xf32> to vector<17x8xf32>
    %690 = arith.subf %677, %689 : vector<17x8xf32>
    %cst_192 = arith.constant 9.99999974E-6 : f32
    %691 = vector.broadcast %cst_192 : f32 to vector<17x1xf32>
    %692 = arith.addf %688, %691 : vector<17x1xf32>
    %693 = math.rsqrt %692 : vector<17x1xf32>
    %694 = vector.broadcast %693 : vector<17x1xf32> to vector<17x8xf32>
    %695 = arith.mulf %690, %694 : vector<17x8xf32>
    %696 = vector.broadcast %455 : vector<1x8xf32> to vector<17x8xf32>
    %697 = arith.mulf %695, %696 : vector<17x8xf32>
    %698 = vector.broadcast %456 : vector<1x8xf32> to vector<17x8xf32>
    %699 = arith.addf %697, %698 : vector<17x8xf32>
    %cst_193 = arith.constant dense<0xFF800000> : vector<17xf32>
    %700 = vector.multi_reduction <maximumf>, %699, %cst_193 [1] : vector<17x8xf32> to vector<17xf32>
    %701 = vector.shape_cast %700 : vector<17xf32> to vector<17x1xf32>
    %702 = vector.broadcast %701 : vector<17x1xf32> to vector<17x8xf32>
    %703 = arith.subf %699, %702 : vector<17x8xf32>
    %704 = math.exp %703 : vector<17x8xf32>
    %cst_194 = arith.constant dense<0.000000e+00> : vector<17xf32>
    %705 = vector.multi_reduction <add>, %704, %cst_194 [1] : vector<17x8xf32> to vector<17xf32>
    %706 = vector.shape_cast %705 : vector<17xf32> to vector<17x1xf32>
    %707 = tpu.reciprocal %706 {approx = true} : vector<17x1xf32> -> vector<17x1xf32>
    %708 = vector.broadcast %707 : vector<17x1xf32> to vector<17x8xf32>
    %709 = arith.mulf %704, %708 : vector<17x8xf32>
    %710 = tpu.transpose %709, [1, 0] : vector<17x8xf32> -> vector<8x17xf32>
    %cst_195 = arith.constant dense<0.000000e+00> : vector<8x8xf32>
    %711 = tpu.matmul %710, %672, %cst_195 {dimension_numbers = #tpu.dot_dimension_numbers<[1], [0], [0], [1], [0, 0, 1, 1], [], []>} : vector<8x17xf32>, vector<17x8xf32>, vector<8x8xf32> -> vector<8x8xf32>
    %712 = vector.extract_strided_slice %627 {offsets = [0, 16], sizes = [17, 8], strides = [1, 1]} : vector<17x128xf32> to vector<17x8xf32>
    %713 = vector.extract_strided_slice %627 {offsets = [0, 48], sizes = [17, 8], strides = [1, 1]} : vector<17x128xf32> to vector<17x8xf32>
    %714 = vector.extract_strided_slice %627 {offsets = [0, 80], sizes = [17, 8], strides = [1, 1]} : vector<17x128xf32> to vector<17x8xf32>
    %715 = tpu.transpose %713, [1, 0] : vector<17x8xf32> -> vector<8x17xf32>
    %cst_196 = arith.constant dense<0.000000e+00> : vector<17x17xf32>
    %716 = tpu.matmul %712, %715, %cst_196 {dimension_numbers = #tpu.dot_dimension_numbers<[1], [0], [0], [1], [0, 0, 1, 1], [], []>} : vector<17x8xf32>, vector<8x17xf32>, vector<17x17xf32> -> vector<17x17xf32>
    %cst_197 = arith.constant dense<0.000000e+00> : vector<17x8xf32>
    %717 = tpu.matmul %716, %453, %cst_197 {dimension_numbers = #tpu.dot_dimension_numbers<[1], [0], [0], [1], [0, 0, 1, 1], [], []>} : vector<17x17xf32>, vector<17x8xf32>, vector<17x8xf32> -> vector<17x8xf32>
    %718 = vector.broadcast %454 : vector<1x8xf32> to vector<17x8xf32>
    %719 = arith.addf %717, %718 : vector<17x8xf32>
    %cst_198 = arith.constant dense<0.000000e+00> : vector<17xf32>
    %720 = vector.multi_reduction <add>, %719, %cst_198 [1] : vector<17x8xf32> to vector<17xf32>
    %721 = vector.shape_cast %720 : vector<17xf32> to vector<17x1xf32>
    %cst_199 = arith.constant 8.000000e+00 : f32
    %722 = vector.broadcast %cst_199 : f32 to vector<17x1xf32>
    %723 = arith.divf %721, %722 : vector<17x1xf32>
    %724 = vector.broadcast %723 : vector<17x1xf32> to vector<17x8xf32>
    %725 = arith.subf %719, %724 : vector<17x8xf32>
    %726 = arith.mulf %725, %725 : vector<17x8xf32>
    %cst_200 = arith.constant dense<0.000000e+00> : vector<17xf32>
    %727 = vector.multi_reduction <add>, %726, %cst_200 [1] : vector<17x8xf32> to vector<17xf32>
    %728 = vector.shape_cast %727 : vector<17xf32> to vector<17x1xf32>
    %cst_201 = arith.constant 8.000000e+00 : f32
    %729 = vector.broadcast %cst_201 : f32 to vector<17x1xf32>
    %730 = arith.divf %728, %729 : vector<17x1xf32>
    %731 = vector.broadcast %723 : vector<17x1xf32> to vector<17x8xf32>
    %732 = arith.subf %719, %731 : vector<17x8xf32>
    %cst_202 = arith.constant 9.99999974E-6 : f32
    %733 = vector.broadcast %cst_202 : f32 to vector<17x1xf32>
    %734 = arith.addf %730, %733 : vector<17x1xf32>
    %735 = math.rsqrt %734 : vector<17x1xf32>
    %736 = vector.broadcast %735 : vector<17x1xf32> to vector<17x8xf32>
    %737 = arith.mulf %732, %736 : vector<17x8xf32>
    %738 = vector.broadcast %455 : vector<1x8xf32> to vector<17x8xf32>
    %739 = arith.mulf %737, %738 : vector<17x8xf32>
    %740 = vector.broadcast %456 : vector<1x8xf32> to vector<17x8xf32>
    %741 = arith.addf %739, %740 : vector<17x8xf32>
    %cst_203 = arith.constant dense<0xFF800000> : vector<17xf32>
    %742 = vector.multi_reduction <maximumf>, %741, %cst_203 [1] : vector<17x8xf32> to vector<17xf32>
    %743 = vector.shape_cast %742 : vector<17xf32> to vector<17x1xf32>
    %744 = vector.broadcast %743 : vector<17x1xf32> to vector<17x8xf32>
    %745 = arith.subf %741, %744 : vector<17x8xf32>
    %746 = math.exp %745 : vector<17x8xf32>
    %cst_204 = arith.constant dense<0.000000e+00> : vector<17xf32>
    %747 = vector.multi_reduction <add>, %746, %cst_204 [1] : vector<17x8xf32> to vector<17xf32>
    %748 = vector.shape_cast %747 : vector<17xf32> to vector<17x1xf32>
    %749 = tpu.reciprocal %748 {approx = true} : vector<17x1xf32> -> vector<17x1xf32>
    %750 = vector.broadcast %749 : vector<17x1xf32> to vector<17x8xf32>
    %751 = arith.mulf %746, %750 : vector<17x8xf32>
    %752 = tpu.transpose %751, [1, 0] : vector<17x8xf32> -> vector<8x17xf32>
    %cst_205 = arith.constant dense<0.000000e+00> : vector<8x8xf32>
    %753 = tpu.matmul %752, %714, %cst_205 {dimension_numbers = #tpu.dot_dimension_numbers<[1], [0], [0], [1], [0, 0, 1, 1], [], []>} : vector<8x17xf32>, vector<17x8xf32>, vector<8x8xf32> -> vector<8x8xf32>
    %754 = vector.extract_strided_slice %627 {offsets = [0, 24], sizes = [17, 8], strides = [1, 1]} : vector<17x128xf32> to vector<17x8xf32>
    %755 = vector.extract_strided_slice %627 {offsets = [0, 56], sizes = [17, 8], strides = [1, 1]} : vector<17x128xf32> to vector<17x8xf32>
    %756 = vector.extract_strided_slice %627 {offsets = [0, 88], sizes = [17, 8], strides = [1, 1]} : vector<17x128xf32> to vector<17x8xf32>
    %757 = tpu.transpose %755, [1, 0] : vector<17x8xf32> -> vector<8x17xf32>
    %cst_206 = arith.constant dense<0.000000e+00> : vector<17x17xf32>
    %758 = tpu.matmul %754, %757, %cst_206 {dimension_numbers = #tpu.dot_dimension_numbers<[1], [0], [0], [1], [0, 0, 1, 1], [], []>} : vector<17x8xf32>, vector<8x17xf32>, vector<17x17xf32> -> vector<17x17xf32>
    %cst_207 = arith.constant dense<0.000000e+00> : vector<17x8xf32>
    %759 = tpu.matmul %758, %453, %cst_207 {dimension_numbers = #tpu.dot_dimension_numbers<[1], [0], [0], [1], [0, 0, 1, 1], [], []>} : vector<17x17xf32>, vector<17x8xf32>, vector<17x8xf32> -> vector<17x8xf32>
    %760 = vector.broadcast %454 : vector<1x8xf32> to vector<17x8xf32>
    %761 = arith.addf %759, %760 : vector<17x8xf32>
    %cst_208 = arith.constant dense<0.000000e+00> : vector<17xf32>
    %762 = vector.multi_reduction <add>, %761, %cst_208 [1] : vector<17x8xf32> to vector<17xf32>
    %763 = vector.shape_cast %762 : vector<17xf32> to vector<17x1xf32>
    %cst_209 = arith.constant 8.000000e+00 : f32
    %764 = vector.broadcast %cst_209 : f32 to vector<17x1xf32>
    %765 = arith.divf %763, %764 : vector<17x1xf32>
    %766 = vector.broadcast %765 : vector<17x1xf32> to vector<17x8xf32>
    %767 = arith.subf %761, %766 : vector<17x8xf32>
    %768 = arith.mulf %767, %767 : vector<17x8xf32>
    %cst_210 = arith.constant dense<0.000000e+00> : vector<17xf32>
    %769 = vector.multi_reduction <add>, %768, %cst_210 [1] : vector<17x8xf32> to vector<17xf32>
    %770 = vector.shape_cast %769 : vector<17xf32> to vector<17x1xf32>
    %cst_211 = arith.constant 8.000000e+00 : f32
    %771 = vector.broadcast %cst_211 : f32 to vector<17x1xf32>
    %772 = arith.divf %770, %771 : vector<17x1xf32>
    %773 = vector.broadcast %765 : vector<17x1xf32> to vector<17x8xf32>
    %774 = arith.subf %761, %773 : vector<17x8xf32>
    %cst_212 = arith.constant 9.99999974E-6 : f32
    %775 = vector.broadcast %cst_212 : f32 to vector<17x1xf32>
    %776 = arith.addf %772, %775 : vector<17x1xf32>
    %777 = math.rsqrt %776 : vector<17x1xf32>
    %778 = vector.broadcast %777 : vector<17x1xf32> to vector<17x8xf32>
    %779 = arith.mulf %774, %778 : vector<17x8xf32>
    %780 = vector.broadcast %455 : vector<1x8xf32> to vector<17x8xf32>
    %781 = arith.mulf %779, %780 : vector<17x8xf32>
    %782 = vector.broadcast %456 : vector<1x8xf32> to vector<17x8xf32>
    %783 = arith.addf %781, %782 : vector<17x8xf32>
    %cst_213 = arith.constant dense<0xFF800000> : vector<17xf32>
    %784 = vector.multi_reduction <maximumf>, %783, %cst_213 [1] : vector<17x8xf32> to vector<17xf32>
    %785 = vector.shape_cast %784 : vector<17xf32> to vector<17x1xf32>
    %786 = vector.broadcast %785 : vector<17x1xf32> to vector<17x8xf32>
    %787 = arith.subf %783, %786 : vector<17x8xf32>
    %788 = math.exp %787 : vector<17x8xf32>
    %cst_214 = arith.constant dense<0.000000e+00> : vector<17xf32>
    %789 = vector.multi_reduction <add>, %788, %cst_214 [1] : vector<17x8xf32> to vector<17xf32>
    %790 = vector.shape_cast %789 : vector<17xf32> to vector<17x1xf32>
    %791 = tpu.reciprocal %790 {approx = true} : vector<17x1xf32> -> vector<17x1xf32>
    %792 = vector.broadcast %791 : vector<17x1xf32> to vector<17x8xf32>
    %793 = arith.mulf %788, %792 : vector<17x8xf32>
    %794 = tpu.transpose %793, [1, 0] : vector<17x8xf32> -> vector<8x17xf32>
    %cst_215 = arith.constant dense<0.000000e+00> : vector<8x8xf32>
    %795 = tpu.matmul %794, %756, %cst_215 {dimension_numbers = #tpu.dot_dimension_numbers<[1], [0], [0], [1], [0, 0, 1, 1], [], []>} : vector<8x17xf32>, vector<17x8xf32>, vector<8x8xf32> -> vector<8x8xf32>
    %796 = tpu.concatenate %669, %711, %753, %795 in 1 : vector<8x8xf32>, vector<8x8xf32>, vector<8x8xf32>, vector<8x8xf32> -> vector<8x32xf32>
    %797 = tpu.concatenate %626, %796 in 1 : vector<8x32xf32>, vector<8x32xf32> -> vector<8x64xf32>
    %c24_216 = arith.constant 24 : index
    %c0_217 = arith.constant 0 : index
    %798 = vector.load %arg3[%c24_216, %c0_217] : memref<83x8xf32, #tpu.memory_space<vmem>>, vector<17x8xf32>
    %cst_218 = arith.constant dense<0.000000e+00> : vector<17x64xf32>
    %799 = tpu.matmul %798, %797, %cst_218 {dimension_numbers = #tpu.dot_dimension_numbers<[1], [0], [0], [1], [0, 0, 1, 1], [], []>} : vector<17x8xf32>, vector<8x64xf32>, vector<17x64xf32> -> vector<17x64xf32>
    %800 = vector.extract_strided_slice %799 {offsets = [0, 0], sizes = [17, 32], strides = [1, 1]} : vector<17x64xf32> to vector<17x32xf32>
    %801 = vector.extract_strided_slice %799 {offsets = [0, 32], sizes = [17, 32], strides = [1, 1]} : vector<17x64xf32> to vector<17x32xf32>
    %802 = tpu.concatenate %800, %801 in 0 : vector<17x32xf32>, vector<17x32xf32> -> vector<34x32xf32>
    %803 = arith.addf %383, %802 : vector<34x32xf32>
    %c216_219 = arith.constant 216 : index
    %c0_220 = arith.constant 0 : index
    %804 = vector.load %arg2[%c216_219, %c0_220] : memref<275x32xf32, #tpu.memory_space<vmem>>, vector<34x32xf32>
    %805 = arith.addf %803, %804 : vector<34x32xf32>
    %c273 = arith.constant 273 : index
    %c0_221 = arith.constant 0 : index
    %806 = vector.load %arg2[%c273, %c0_221] : memref<275x32xf32, #tpu.memory_space<vmem>>, vector<1x32xf32>
    %c274 = arith.constant 274 : index
    %c0_222 = arith.constant 0 : index
    %807 = vector.load %arg2[%c274, %c0_222] : memref<275x32xf32, #tpu.memory_space<vmem>>, vector<1x32xf32>
    %cst_223 = arith.constant dense<0.000000e+00> : vector<34xf32>
    %808 = vector.multi_reduction <add>, %805, %cst_223 [1] : vector<34x32xf32> to vector<34xf32>
    %809 = vector.shape_cast %808 : vector<34xf32> to vector<34x1xf32>
    %cst_224 = arith.constant 3.200000e+01 : f32
    %810 = vector.broadcast %cst_224 : f32 to vector<34x1xf32>
    %811 = arith.divf %809, %810 : vector<34x1xf32>
    %812 = vector.broadcast %811 : vector<34x1xf32> to vector<34x32xf32>
    %813 = arith.subf %805, %812 : vector<34x32xf32>
    %814 = arith.mulf %813, %813 : vector<34x32xf32>
    %cst_225 = arith.constant dense<0.000000e+00> : vector<34xf32>
    %815 = vector.multi_reduction <add>, %814, %cst_225 [1] : vector<34x32xf32> to vector<34xf32>
    %816 = vector.shape_cast %815 : vector<34xf32> to vector<34x1xf32>
    %cst_226 = arith.constant 3.200000e+01 : f32
    %817 = vector.broadcast %cst_226 : f32 to vector<34x1xf32>
    %818 = arith.divf %816, %817 : vector<34x1xf32>
    %819 = vector.broadcast %811 : vector<34x1xf32> to vector<34x32xf32>
    %820 = arith.subf %805, %819 : vector<34x32xf32>
    %cst_227 = arith.constant 9.99999974E-6 : f32
    %821 = vector.broadcast %cst_227 : f32 to vector<34x1xf32>
    %822 = arith.addf %818, %821 : vector<34x1xf32>
    %823 = math.rsqrt %822 : vector<34x1xf32>
    %824 = vector.broadcast %823 : vector<34x1xf32> to vector<34x32xf32>
    %825 = arith.mulf %820, %824 : vector<34x32xf32>
    %826 = vector.broadcast %806 : vector<1x32xf32> to vector<34x32xf32>
    %827 = arith.mulf %825, %826 : vector<34x32xf32>
    %828 = vector.broadcast %807 : vector<1x32xf32> to vector<34x32xf32>
    %829 = arith.addf %827, %828 : vector<34x32xf32>
    %c32_228 = arith.constant 32 : index
    %c0_229 = arith.constant 0 : index
    %830 = vector.load %arg1[%c32_228, %c0_229] : memref<98x128xf32, #tpu.memory_space<vmem>>, vector<32x128xf32>
    %cst_230 = arith.constant dense<0.000000e+00> : vector<34x128xf32>
    %831 = tpu.matmul %829, %830, %cst_230 {dimension_numbers = #tpu.dot_dimension_numbers<[1], [0], [0], [1], [0, 0, 1, 1], [], []>} : vector<34x32xf32>, vector<32x128xf32>, vector<34x128xf32> -> vector<34x128xf32>
    %c96_231 = arith.constant 96 : index
    %c0_232 = arith.constant 0 : index
    %832 = vector.load %arg1[%c96_231, %c0_232] : memref<98x128xf32, #tpu.memory_space<vmem>>, vector<1x128xf32>
    %833 = vector.broadcast %832 : vector<1x128xf32> to vector<34x128xf32>
    %834 = arith.addf %831, %833 : vector<34x128xf32>
    %cst_233 = arith.constant 5.000000e-01 : f32
    %835 = vector.broadcast %cst_233 : f32 to vector<34x128xf32>
    %836 = arith.mulf %835, %834 : vector<34x128xf32>
    %cst_234 = arith.constant 0.707106769 : f32
    %837 = vector.broadcast %cst_234 : f32 to vector<34x128xf32>
    %838 = arith.mulf %834, %837 : vector<34x128xf32>
    %839 = math.erf %838 : vector<34x128xf32>
    %cst_235 = arith.constant 1.000000e+00 : f32
    %840 = vector.broadcast %cst_235 : f32 to vector<34x128xf32>
    %841 = arith.addf %840, %839 : vector<34x128xf32>
    %842 = arith.mulf %836, %841 : vector<34x128xf32>
    %c88_236 = arith.constant 88 : index
    %c0_237 = arith.constant 0 : index
    %843 = vector.load %arg2[%c88_236, %c0_237] : memref<275x32xf32, #tpu.memory_space<vmem>>, vector<128x32xf32>
    %cst_238 = arith.constant dense<0.000000e+00> : vector<34x32xf32>
    %844 = tpu.matmul %842, %843, %cst_238 {dimension_numbers = #tpu.dot_dimension_numbers<[1], [0], [0], [1], [0, 0, 1, 1], [], []>} : vector<34x128xf32>, vector<128x32xf32>, vector<34x32xf32> -> vector<34x32xf32>
    %c264_239 = arith.constant 264 : index
    %c0_240 = arith.constant 0 : index
    %845 = vector.load %arg2[%c264_239, %c0_240] : memref<275x32xf32, #tpu.memory_space<vmem>>, vector<1x32xf32>
    %846 = vector.broadcast %845 : vector<1x32xf32> to vector<34x32xf32>
    %847 = arith.addf %844, %846 : vector<34x32xf32>
    %848 = arith.addf %426, %847 : vector<34x32xf32>
    %849 = arith.addf %805, %848 : vector<34x32xf32>
    %cst_241 = arith.constant 5.000000e-01 : f32
    %850 = vector.broadcast %cst_241 : f32 to vector<34x32xf32>
    %851 = arith.mulf %850, %849 : vector<34x32xf32>
    %852 = vector.extract_strided_slice %851 {offsets = [0, 0], sizes = [1, 32], strides = [1, 1]} : vector<34x32xf32> to vector<1x32xf32>
    %853 = vector.extract_strided_slice %851 {offsets = [17, 0], sizes = [1, 32], strides = [1, 1]} : vector<34x32xf32> to vector<1x32xf32>
    %854 = tpu.concatenate %852, %853 in 0 : vector<1x32xf32>, vector<1x32xf32> -> vector<2x32xf32>
    %c48 = arith.constant 48 : index
    %c0_242 = arith.constant 0 : index
    %855 = vector.load %arg3[%c48, %c0_242] : memref<83x8xf32, #tpu.memory_space<vmem>>, vector<32x8xf32>
    %cst_243 = arith.constant dense<0.000000e+00> : vector<2x8xf32>
    %856 = tpu.matmul %854, %855, %cst_243 {dimension_numbers = #tpu.dot_dimension_numbers<[1], [0], [0], [1], [0, 0, 1, 1], [], []>} : vector<2x32xf32>, vector<32x8xf32>, vector<2x8xf32> -> vector<2x8xf32>
    %cst_244 = arith.constant 0.000000e+00 : f32
    %857 = vector.broadcast %cst_244 : f32 to vector<2x8xf32>
    %858 = arith.maximumf %856, %857 : vector<2x8xf32>
    %c256 = arith.constant 256 : index
    %c0_245 = arith.constant 0 : index
    %859 = vector.load %arg2[%c256, %c0_245] : memref<275x32xf32, #tpu.memory_space<vmem>>, vector<8x32xf32>
    %cst_246 = arith.constant dense<0.000000e+00> : vector<2x32xf32>
    %860 = tpu.matmul %858, %859, %cst_246 {dimension_numbers = #tpu.dot_dimension_numbers<[1], [0], [0], [1], [0, 0, 1, 1], [], []>} : vector<2x8xf32>, vector<8x32xf32>, vector<2x32xf32> -> vector<2x32xf32>
    %cst_247 = arith.constant 0.000000e+00 : f32
    %861 = vector.broadcast %cst_247 : f32 to vector<2x32xf32>
    %862 = arith.maximumf %860, %861 : vector<2x32xf32>
    %c265 = arith.constant 265 : index
    %c0_248 = arith.constant 0 : index
    %863 = vector.load %arg2[%c265, %c0_248] : memref<275x32xf32, #tpu.memory_space<vmem>>, vector<1x32xf32>
    %c266 = arith.constant 266 : index
    %c0_249 = arith.constant 0 : index
    %864 = vector.load %arg2[%c266, %c0_249] : memref<275x32xf32, #tpu.memory_space<vmem>>, vector<1x32xf32>
    %cst_250 = arith.constant dense<0.000000e+00> : vector<2xf32>
    %865 = vector.multi_reduction <add>, %862, %cst_250 [1] : vector<2x32xf32> to vector<2xf32>
    %866 = vector.shape_cast %865 : vector<2xf32> to vector<2x1xf32>
    %cst_251 = arith.constant 3.200000e+01 : f32
    %867 = vector.broadcast %cst_251 : f32 to vector<2x1xf32>
    %868 = arith.divf %866, %867 : vector<2x1xf32>
    %869 = vector.broadcast %868 : vector<2x1xf32> to vector<2x32xf32>
    %870 = arith.subf %862, %869 : vector<2x32xf32>
    %871 = arith.mulf %870, %870 : vector<2x32xf32>
    %cst_252 = arith.constant dense<0.000000e+00> : vector<2xf32>
    %872 = vector.multi_reduction <add>, %871, %cst_252 [1] : vector<2x32xf32> to vector<2xf32>
    %873 = vector.shape_cast %872 : vector<2xf32> to vector<2x1xf32>
    %cst_253 = arith.constant 3.200000e+01 : f32
    %874 = vector.broadcast %cst_253 : f32 to vector<2x1xf32>
    %875 = arith.divf %873, %874 : vector<2x1xf32>
    %876 = vector.broadcast %868 : vector<2x1xf32> to vector<2x32xf32>
    %877 = arith.subf %862, %876 : vector<2x32xf32>
    %cst_254 = arith.constant 9.99999974E-6 : f32
    %878 = vector.broadcast %cst_254 : f32 to vector<2x1xf32>
    %879 = arith.addf %875, %878 : vector<2x1xf32>
    %880 = math.rsqrt %879 : vector<2x1xf32>
    %881 = vector.broadcast %880 : vector<2x1xf32> to vector<2x32xf32>
    %882 = arith.mulf %877, %881 : vector<2x32xf32>
    %883 = vector.broadcast %863 : vector<1x32xf32> to vector<2x32xf32>
    %884 = arith.mulf %882, %883 : vector<2x32xf32>
    %885 = vector.broadcast %864 : vector<1x32xf32> to vector<2x32xf32>
    %886 = arith.addf %884, %885 : vector<2x32xf32>
    %c64 = arith.constant 64 : index
    %c0_255 = arith.constant 0 : index
    %887 = vector.load %arg1[%c64, %c0_255] : memref<98x128xf32, #tpu.memory_space<vmem>>, vector<32x128xf32>
    %cst_256 = arith.constant dense<0.000000e+00> : vector<2x128xf32>
    %888 = tpu.matmul %886, %887, %cst_256 {dimension_numbers = #tpu.dot_dimension_numbers<[1], [0], [0], [1], [0, 0, 1, 1], [], []>} : vector<2x32xf32>, vector<32x128xf32>, vector<2x128xf32> -> vector<2x128xf32>
    %c97 = arith.constant 97 : index
    %c0_257 = arith.constant 0 : index
    %889 = vector.load %arg1[%c97, %c0_257] : memref<98x128xf32, #tpu.memory_space<vmem>>, vector<1x128xf32>
    %890 = vector.broadcast %889 : vector<1x128xf32> to vector<2x128xf32>
    %891 = arith.addf %888, %890 : vector<2x128xf32>
    %c0_258 = arith.constant 0 : index
    %c0_259 = arith.constant 0 : index
    %892 = vector.load %arg4[%c0_258, %c0_259] : memref<2x128xf32, #tpu.memory_space<vmem>>, vector<2x128xf32>
    tpu.vector_store %arg4[%c0_258, %c0_259], %891 {strides = array<i32>} : memref<2x128xf32, #tpu.memory_space<vmem>>, vector<2x128xf32>,
    return
  }
}

</mosaic_0001>

<bundles_post_ra>
// kernel: forward.1
= control target key start
LH: loop header
LB: loop body
LE: loop exit
PB: predicated region body
PF: predicated region fallthrough
CT: control target
= control target key end

     0   :  { %s8610_s0 = inlined_call_operand.vmem [shape: f32[34,48], index: 0, kind: input, shape index: {}]   ;;  %s8611_s1 = inlined_call_operand.vmem [shape: f32[98,128], index: 1, kind: input, shape index: {}]   ;;  %s8612_s2 = inlined_call_operand.vmem [shape: f32[275,32], index: 2, kind: input, shape index: {}]   ;;  %s8613_s3 = inlined_call_operand.vmem [shape: f32[83,8], index: 3, kind: input, shape index: {}]   ;;  %s8614_s4 = inlined_call_operand.hbm [shape: f32[2,128], index: 4, kind: output, shape index: {}]  }
   0x1   :  { %v28_v0 = vld [vmem:[%s8612_s2 + $0x50] sm:$0xff]  ;;  %v27_v1 = vld [vmem:[%s8612_s2 + $0x48] sm:$0xff]  ;;  %v26_v2 = vld [vmem:[%s8612_s2 + $0x40] sm:$0xff] }
   0x2   :  { %60 = vmatpush.msra.mxu0 %v28_v0  ;;  %v25_v3 = vld [vmem:[%s8612_s2 + $0x38] sm:$0xff]  ;;  %v24_v4 = vld [vmem:[%s8612_s2 + $0x30] sm:$0xff]  ;;  %v23_v5 = vld [vmem:[%s8612_s2 + $0x28] sm:$0xff] }
   0x4   :  { %61 = vmatpush.msra.mxu0 %v27_v1 }
   0x6   :  { %62 = vmatpush.msra.mxu0 %v26_v2 }
   0x8   :  { %63 = vmatpush.msra.mxu0 %v25_v3 }
   0x9   :  { %9 = vsyncpa [#allocation3], 0  ;;  %v18_v6 = vld [vmem:[%s8610_s0] sm:$0xff]  ;;  %vm34_vm0 = vcmask 392192   ;;  %v19_v7 = vld [vmem:[%s8610_s0 + $0x8] sm:$0xff]  ;;  %vm84_vm1 = vcmask 261120  }
   0xa   :  { %64 = vmatpush.msra.mxu0 %v24_v4  ;;  %v20_v8 = vld [vmem:[%s8610_s0 + $0x10] sm:$0xff]  ;;  %v29_v9 = vld [vmem:[%s8612_s2] sm:$0xff]  ;;  %v30_v13 = vld [vmem:[%s8612_s2 + $0x8] sm:$0xff]  ;;  %v6535_v21 = vmov 32.0   ;;  %s6536_s25 = smov 96   ;;  %vm331_vm12 = vcmask 1040384  }
   0xb   :  { %v31_v17 = vld [vmem:[%s8612_s2 + $0x10] sm:$0xff]  ;;  %6094 = vrcp.f32 %v6535_v21  ;;  %v218_v43 = vld [vmem:[%s8611_s1 + $0x18] sm:$0xff]  ;;  %v216_v45 = vld [vmem:[%s8611_s1 + $0x8] sm:$0xff]  ;;  %vm281_vm13 = vcmask 64512   ;;  %vm321_vm14 = vcmask 138240   ;;  %vm367_vm15 = vcmask 57344  }
   0xc   :  { %65 = vmatpush.msra.mxu0 %v23_v5  ;;  %246 = vmatpush.msra.mxu1 %v218_v43  ;;  %v217_v44 = vld [vmem:[%s8611_s1 + $0x10] sm:$0xff]  ;;  %v215_v46 = vld [vmem:[%s8611_s1] sm:$0xff]  ;;  %v6662_v0 = vld [vmem:[%s8612_s2 + $0x10b] ss:$0 sm:$0xff]  ;;  %s6537_s11 = smov 88   ;;  %s6539_s12 = smov 120  }
   0xd   :  { %5740 = vmatmul.msk.f32.vlgmr.msra.gmra.mxu0 %vm34_vm0, %v18_v6  ;;  %v6667_v4 = vld [vmem:[%s8612_s2 + $0x10c] ss:$0 sm:$0xff]  ;;  %s6540_s17 = smov 64   ;;  %s6541_s18 = smov 80  }
   0xe   :  { %247 = vmatpush.msra.mxu1 %v217_v44  ;;  %v6741_v44 = vld [vmem:[%s8613_s3 + $0x50] ss:$0 sm:$0xff]  ;;  %s6542_s19 = smov 112   ;;  %s6543_s24 = smov 56  }
   0xf   :  { %s6544_s26 = smov 72   ;;  %s6545_s27 = smov 104  }
  0x10   :  { %248 = vmatpush.msra.mxu1 %v216_v45  ;;  %s6546_s28 = smov 48   ;;  %s6547_s16 = smov 40  }
  0x11   :  { %v6095_v22 = vpop.eup %6094  ;;  %s6548_s10 = smov 8   ;;  %s6549_s13 = smov 16  }
  0x12   :  { %v102_v23 = vmul.f32 32.0, %v6095_v22  ;;  %vm106_vm2 = vweird.f32 %v6095_v22  ;;  %249 = vmatpush.msra.mxu1 %v215_v46  ;;  %s6550_s5 = smov 24   ;;  %s6551_s6 = smov 32  }
  0x13   :  { %s5731_s9 = sshll.u32 %s8614_s4, 4  ;;  %s5732_s9 = int_to_ptr.hbm [resolvable:$true] %s5731_s9 }
  0x14   :  { %v103_v24 = vsub.f32 1.0, %v102_v23 }
  0x15   :  { %5741 = vmatmul.msk.f32.gmra.mxu0 %vm34_vm0, %v19_v7 }
  0x16   :  { %v104_v25 = vmul.f32 %v6095_v22, %v103_v24 }
  0x18   :  { %v105_v26 = vadd.f32 %v6095_v22, %v104_v25 }
  0x1a   :  { %v6629_v27 = vsel %vm106_vm2, %v6095_v22, %v105_v26 }
  0x1d   :  { %5742 = vmatmul.msk.f32.gmra.mxu0 %vm34_vm0, %v20_v8 }
  0x8a   :  { %v67_v10 = vpop.f32.mrf.mxu0 }
  0x8b   :  { %v6611_v11 = vadd.f32 %v67_v10, %v29_v9 }
  0x8d   :  { %v85_v12 = vsel %vm84_vm1, %v6611_v11, 0.0 }
  0x8e   :  { %86 = vadd.xlane.f32.xlu0 %v85_v12 }
  0x92   :  { %v70_v14 = vpop.f32.mrf.mxu0 }
  0x93   :  { %v6618_v15 = vadd.f32 %v70_v14, %v30_v13 }
  0x95   :  { %v88_v16 = vsel %vm84_vm1, %v6618_v15, 0.0 }
  0x96   :  { %89 = vadd.xlane.f32.xlu0 %v88_v16 }
  0x9a   :  { %v73_v18 = vpop.f32.mrf.mxu0 }
  0x9b   :  { %v6625_v19 = vadd.f32 %v73_v18, %v31_v17 }
  0x9d   :  { %v91_v20 = vsel %vm84_vm1, %v6625_v19, 0.0 }
  0x9e   :  { %92 = vadd.xlane.f32.xlu1 %v91_v20 }
 0x101   :  { %v87_v28 = vpop.xlane.xlu0 %86 }
 0x102   :  { %v108_v29 = vmul.f32 %v6629_v27, %v87_v28 }
 0x104   :  { %v113_v30 = vsub.f32 %v6611_v11, %v108_v29 }
 0x106   :  { %v118_v31 = vmul.f32 %v113_v30, %v113_v30 }
 0x108   :  { %v123_v32 = vsel %vm84_vm1, %v118_v31, 0.0  ;;  %v21_v31 = vld [vmem:[%s8610_s0 + $0x18] sm:$0xff] }
 0x109   :  { %124 = vadd.xlane.f32.xlu1 %v123_v32  ;;  %v90_v33 = vpop.xlane.xlu0 %89  ;;  %v6697_v32 = vld [vmem:[%s8613_s3 + $0x10] sm:$0x1]  ;;  %5743 = vmatmul.msk.f32.gmra.mxu0 %vm34_vm0, %v21_v31 }
 0x10a   :  { %v109_v34 = vmul.f32 %v6629_v27, %v90_v33  ;;  %v6703_v33 = vld [vmem:[%s8613_s3 + $0x8] sm:$0xff]  ;;  %5976 = vmatpush.msk.msra.mxu3 %vm331_vm12, %v6697_v32  ;;  %5756 = vmatpush.msk.msrb.mxu0 %vm331_vm12, %v6697_v32 }
 0x10c   :  { %v114_v35 = vsub.f32 %v6618_v15, %v109_v34  ;;  %5977 = vmatpush.msra.mxu3 %v6703_v33  ;;  %349 = vmatpush.msrb.mxu0 %v6703_v33 }
 0x10e   :  { %v119_v36 = vmul.f32 %v114_v35, %v114_v35 }
 0x110   :  { %v126_v37 = vsel %vm84_vm1, %v119_v36, 0.0 }
 0x111   :  { %v93_v38 = vpop.xlane.xlu1 %92  ;;  %127 = vadd.xlane.f32.xlu2 %v126_v37 }
 0x112   :  { %v110_v39 = vmul.f32 %v6629_v27, %v93_v38  ;;  %v6727_v38 = vld [vmem:[%s8613_s3] sm:$0xff] }
 0x113   :  { %350 = vmatpush.msrb.mxu0 %v6727_v38  ;;  %5978 = vmatpush.msra.mxu3 %v6727_v38 }
 0x114   :  { %v6639_v40 = vsub.f32 %v6625_v19, %v110_v39 }
 0x116   :  { %v120_v41 = vmul.f32 %v6639_v40, %v6639_v40 }
 0x118   :  { %v129_v42 = vsel %vm84_vm1, %v120_v41, 0.0 }
 0x119   :  { %130 = vadd.xlane.f32.xlu2 %v129_v42 }
 0x17c   :  { %v125_v47 = vpop.xlane.xlu1 %124 }
 0x17d   :  { %v138_v48 = vmul.f32 %v125_v47, %v6629_v27 }
 0x17f   :  { %v143_v49 = vadd.f32 1e-05, %v138_v48 }
 0x181   :  { %6096 = vrsqrt.f32 %v143_v49  ;;  %vm154_vm4 = vweird.f32 %v143_v49 }
 0x184   :  { %v128_v50 = vpop.xlane.xlu2 %127 }
 0x185   :  { %v139_v51 = vmul.f32 %v128_v50, %v6629_v27 }
 0x186   :  { %v6734_v42 = vpop.f32.mrf.mxu0 }
 0x187   :  { %v6097_v52 = vpop.eup %6096  ;;  %v144_v53 = vadd.f32 1e-05, %v139_v51 }
 0x188   :  { %v149_v54 = vmul.f32 %v6097_v52, %v143_v49  ;;  %vm155_vm3 = vweird.f32 %v6097_v52 }
 0x189   :  { %6098 = vrsqrt.f32 %v144_v53  ;;  %vm156_vm5 = vmor %vm154_vm4, %vm155_vm3  ;;  %vm164_vm7 = vweird.f32 %v144_v53 }
 0x18a   :  { %v150_v55 = vmul.f32 %v6097_v52, %v149_v54  ;;  %v6538_v54 = vmov 8.0  }
 0x18c   :  { %v151_v56 = vmul.f32 0.5, %v150_v55  ;;  %v131_v57 = vpop.xlane.xlu2 %130 }
 0x18d   :  { %v140_v58 = vmul.f32 %v131_v57, %v6629_v27 }
 0x18e   :  { %v152_v59 = vsub.f32 1.5, %v151_v56 }
 0x18f   :  { %v6099_v60 = vpop.eup %6098  ;;  %v145_v61 = vadd.f32 1e-05, %v140_v58 }
 0x190   :  { %v153_v62 = vmul.f32 %v6097_v52, %v152_v59  ;;  %v159_v63 = vmul.f32 %v6099_v60, %v144_v53  ;;  %vm165_vm6 = vweird.f32 %v6099_v60 }
 0x191   :  { %6100 = vrsqrt.f32 %v145_v61  ;;  %vm166_vm8 = vmor %vm164_vm7, %vm165_vm6  ;;  %vm174_vm10 = vweird.f32 %v145_v61 }
 0x192   :  { %v160_v1 = vmul.f32 %v6099_v60, %v159_v63  ;;  %v157_v2 = vsel %vm156_vm5, %v6097_v52, %v153_v62  ;;  %6102 = vrcp.f32 %v6538_v54 }
 0x193   :  { %v198_v3 = vmul.f32 %v157_v2, %v113_v30 }
 0x194   :  { %v161_v5 = vmul.f32 0.5, %v160_v1 }
 0x195   :  { %v204_v6 = vmul.f32 %v6662_v0, %v198_v3 }
 0x196   :  { %v162_v7 = vsub.f32 1.5, %v161_v5 }
 0x197   :  { %v6101_v8 = vpop.eup %6100  ;;  %v210_v9 = vadd.f32 %v6667_v4, %v204_v6 }
 0x198   :  { %v163_v10 = vmul.f32 %v6099_v60, %v162_v7  ;;  %v169_v12 = vmul.f32 %v6101_v8, %v145_v61  ;;  %vm175_vm9 = vweird.f32 %v6101_v8  ;;  %v6103_v55 = vpop.eup %6102 }
 0x199   :  { %5745 = vmatmul.msk.f32.vlgmr.msra.gmra.mxu1 %vm84_vm1, %v210_v9  ;;  %vm176_vm11 = vmor %vm174_vm10, %vm175_vm9  ;;  %v372_v56 = vmul.f32 8.0, %v6103_v55 }
 0x19a   :  { %v170_v13 = vmul.f32 %v6101_v8, %v169_v12  ;;  %v167_v14 = vsel %vm166_vm8, %v6099_v60, %v163_v10 }
 0x19b   :  { %v199_v16 = vmul.f32 %v167_v14, %v114_v35  ;;  %v22_v35 = vld [vmem:[%s8610_s0 + $0x20] sm:$0x3]  ;;  %v373_v57 = vsub.f32 1.0, %v372_v56 }
 0x19c   :  { %v171_v17 = vmul.f32 0.5, %v170_v13  ;;  %5744 = vmatmul.msk.f32.gmra.mxu0 %vm34_vm0, %v22_v35  ;;  %vm376_vm0 = vweird.f32 %v6103_v55 }
 0x19d   :  { %v205_v18 = vmul.f32 %v6662_v0, %v199_v16  ;;  %v374_v58 = vmul.f32 %v6103_v55, %v373_v57 }
 0x19e   :  { %v172_v20 = vsub.f32 1.5, %v171_v17 }
 0x19f   :  { %v211_v21 = vadd.f32 %v6667_v4, %v205_v18  ;;  %v375_v59 = vadd.f32 %v6103_v55, %v374_v58 }
 0x1a0   :  { %v173_v22 = vmul.f32 %v6101_v8, %v172_v20 }
 0x1a1   :  { %5746 = vmatmul.msk.f32.gmra.mxu1 %vm84_vm1, %v211_v21  ;;  %v6753_v60 = vsel %vm376_vm0, %v6103_v55, %v375_v59 }
 0x1a2   :  { %v177_v23 = vsel %vm176_vm11, %v6101_v8, %v173_v22  ;;  %vm97_vm11 = vcmask 254976  }
 0x1a3   :  { %v200_v24 = vmul.f32 %v177_v23, %v6639_v40 }
 0x1a5   :  { %v206_v25 = vmul.f32 %v6662_v0, %v200_v24 }
 0x1a7   :  { %v212_v26 = vadd.f32 %v6667_v4, %v206_v25 }
 0x1a9   :  { %5747 = vmatmul.msk.f32.gmra.mxu1 %vm84_vm1, %v212_v26 }
 0x216   :  { %v6679_v28 = vpop.f32.mrf.mxu1 }
 0x217   :  { %275 = vrot.lane.b32.xlu2 %v6679_v28, %s6536_s25 }
 0x219   :  { %v6736_v43 = vpop.f32.mrf.mxu0 }
 0x21e   :  { %v6683_v29 = vpop.f32.mrf.mxu1 }
 0x21f   :  { %277 = vrot.lane.b32.xlu1 %v6683_v29, %s6536_s25 }
 0x226   :  { %v6687_v30 = vpop.f32.mrf.mxu1 }
 0x227   :  { %279 = vrot.lane.b32.xlu0 %v6687_v30, %s6536_s25 }
 0x271   :  { %v276_v37 = vpop.permute.xlu2 %275 }
 0x291   :  { %v278_v36 = vpop.permute.xlu1 %277 }
 0x299   :  { %v280_v34 = vpop.permute.xlu0 %279 }
 0x29a   :  { %5750 = vmatpush.xpose.msk.msra.mxu2 %vm281_vm13, %v280_v34 }
 0x29e   :  { %5751 = vmatpush.xpose.msk.msra.mxu2 %vm281_vm13, %v278_v36 }
 0x2a2   :  { %5752 = vmatpush.xpose.msk.msra.mxu2 %vm281_vm13, %v276_v37 }
 0x2a5   :  { %5753 = vmatmul.msk.f32.vlgmr.msra.gmra.mxu2 %vm281_vm13, %v6679_v28 }
 0x2ad   :  { %5754 = vmatmul.msk.f32.gmra.mxu2 %vm281_vm13, %v6683_v29 }
 0x2b5   :  { %5755 = vmatmul.msk.f32.gmra.mxu2 %vm281_vm13, %v6687_v30 }
 0x328   :  { %v311_v39 = vpop.f32.mrf.mxu2 }
 0x329   :  { %5757 = vmatmul.msk.f32.vlgmr.msrb.gmra.mxu0 %vm321_vm14, %v311_v39 }
 0x330   :  { %v314_v40 = vpop.f32.mrf.mxu2 }
 0x331   :  { %5758 = vmatmul.msk.f32.gmra.mxu0 %vm321_vm14, %v314_v40  ;;  %v6780_v40 = vld [vmem:[%s8613_s3 + $0x51] ss:$0 sm:$0xff] }
 0x338   :  { %v317_v41 = vpop.f32.mrf.mxu2 }
 0x339   :  { %5759 = vmatmul.msk.f32.vlgmr.msra.gmra.mxu3 %vm321_vm14, %v317_v41 }
 0x3a6   :  { %v352_v45 = vpop.f32.mrf.mxu0 }
 0x3a7   :  { %v353_v46 = vadd.f32 %v6741_v44, %v352_v45 }
 0x3a9   :  { %v361_v47 = vsel %vm281_vm13, %v353_v46, 0.0 }
 0x3aa   :  { %362 = vadd.xlane.f32.xlu0 %v361_v47 }
 0x3ae   :  { %v355_v48 = vpop.f32.mrf.mxu0 }
 0x3af   :  { %v356_v49 = vadd.f32 %v6741_v44, %v355_v48 }
 0x3b1   :  { %v364_v50 = vsel %vm281_vm13, %v356_v49, 0.0 }
 0x3b2   :  { %365 = vadd.xlane.f32.xlu2 %v364_v50 }
 0x3bc   :  { %v358_v51 = vpop.f32.mrf.mxu3 }
 0x3bd   :  { %v359_v52 = vadd.f32 %v6741_v44, %v358_v51 }
 0x3be   :  { %551 = vrot.lane.b32.xlu0 %v6687_v30, %s6537_s11 }
 0x3bf   :  { %v368_v53 = vsel %vm367_vm15, %v359_v52, 0.0 }
 0x3c0   :  { %369 = vadd.xlane.f32.xlu1 %v368_v53 }
 0x3ca   :  { %549 = vrot.lane.b32.xlu2 %v6683_v29, %s6537_s11 }
 0x41d   :  { %v363_v61 = vpop.xlane.xlu0 %362 }
 0x41e   :  { %v378_v62 = vmul.f32 %v6753_v60, %v363_v61 }
 0x420   :  { %v381_v63 = vsub.f32 %v353_v46, %v378_v62 }
 0x422   :  { %v384_v1 = vmul.f32 %v381_v63, %v381_v63 }
 0x424   :  { %v387_v2 = vsel %vm281_vm13, %v384_v1, 0.0 }
 0x425   :  { %388 = vadd.xlane.f32.xlu0 %v387_v2  ;;  %v366_v3 = vpop.xlane.xlu2 %365 }
 0x426   :  { %v379_v5 = vmul.f32 %v6753_v60, %v366_v3 }
 0x428   :  { %v382_v6 = vsub.f32 %v356_v49, %v379_v5  ;;  %v6786_v49 = vld [vmem:[%s8613_s3 + $0x52] ss:$0 sm:$0xff] }
 0x42a   :  { %v385_v7 = vmul.f32 %v382_v6, %v382_v6 }
 0x42c   :  { %v390_v8 = vsel %vm281_vm13, %v385_v7, 0.0 }
 0x42d   :  { %391 = vadd.xlane.f32.xlu2 %v390_v8  ;;  %v550_v12 = vpop.permute.xlu2 %549 }
 0x430   :  { %v552_v9 = vpop.permute.xlu0 %551 }
 0x431   :  { %5762 = vmatpush.xpose.msk.msrb.mxu2 %vm281_vm13, %v552_v9 }
 0x433   :  { %v370_v10 = vpop.xlane.xlu1 %369 }
 0x434   :  { %v380_v13 = vmul.f32 %v6753_v60, %v370_v10 }
 0x435   :  { %5763 = vmatpush.xpose.msk.msrb.mxu2 %vm281_vm13, %v550_v12 }
 0x436   :  { %v6762_v14 = vsub.f32 %v359_v52, %v380_v13 }
 0x438   :  { %v386_v16 = vmul.f32 %v6762_v14, %v6762_v14 }
 0x439   :  { %541 = vrot.lane.b32.xlu0 %v6679_v28, %s6539_s12 }
 0x43a   :  { %v393_v17 = vsel %vm367_vm15, %v386_v16, 0.0 }
 0x43b   :  { %394 = vadd.xlane.f32.xlu1 %v393_v17 }
 0x441   :  { %545 = vrot.lane.b32.xlu0 %v6687_v30, %s6539_s12 }
 0x445   :  { %543 = vrot.lane.b32.xlu2 %v6683_v29, %s6539_s12 }
 0x454   :  { %547 = vrot.lane.b32.xlu1 %v6679_v28, %s6537_s11 }
 0x498   :  { %v389_v18 = vpop.xlane.xlu0 %388 }
 0x499   :  { %v396_v20 = vmul.f32 %v389_v18, %v6753_v60 }
 0x49b   :  { %v399_v21 = vadd.f32 1e-05, %v396_v20 }
 0x49d   :  { %6104 = vrsqrt.f32 %v399_v21  ;;  %vm408_vm3 = vweird.f32 %v399_v21 }
 0x4a0   :  { %v392_v22 = vpop.xlane.xlu2 %391 }
 0x4a1   :  { %v397_v23 = vmul.f32 %v392_v22, %v6753_v60 }
 0x4a3   :  { %v6105_v24 = vpop.eup %6104  ;;  %v400_v25 = vadd.f32 1e-05, %v397_v23 }
 0x4a4   :  { %v403_v26 = vmul.f32 %v6105_v24, %v399_v21  ;;  %vm409_vm2 = vweird.f32 %v6105_v24 }
 0x4a5   :  { %6106 = vrsqrt.f32 %v400_v25  ;;  %vm410_vm4 = vmor %vm408_vm3, %vm409_vm2  ;;  %vm418_vm6 = vweird.f32 %v400_v25 }
 0x4a6   :  { %v404_v31 = vmul.f32 %v6105_v24, %v403_v26 }
 0x4a8   :  { %v405_v34 = vmul.f32 0.5, %v404_v31  ;;  %v544_v17 = vpop.permute.xlu2 %543 }
 0x4aa   :  { %v406_v35 = vsub.f32 1.5, %v405_v34 }
 0x4ab   :  { %v6107_v36 = vpop.eup %6106  ;;  %v542_v12 = vpop.permute.xlu0 %541 }
 0x4ac   :  { %v407_v37 = vmul.f32 %v6105_v24, %v406_v35  ;;  %v413_v39 = vmul.f32 %v6107_v36, %v400_v25  ;;  %vm419_vm5 = vweird.f32 %v6107_v36 }
 0x4ad   :  { %vm420_vm7 = vmor %vm418_vm6, %vm419_vm5 }
 0x4ae   :  { %v414_v41 = vmul.f32 %v6107_v36, %v413_v39  ;;  %v395_v45 = vpop.xlane.xlu1 %394  ;;  %v411_v46 = vsel %vm410_vm4, %v6105_v24, %v407_v37 }
 0x4af   :  { %v398_v47 = vmul.f32 %v395_v45, %v6753_v60  ;;  %v432_v48 = vmul.f32 %v411_v46, %v381_v63  ;;  %v6809_v45 = vpack.i.bf16 %v6679_v28, %v6683_v29 }
 0x4b0   :  { %v415_v50 = vmul.f32 0.5, %v414_v41 }
 0x4b1   :  { %v401_v51 = vadd.f32 1e-05, %v398_v47  ;;  %v436_v52 = vmul.f32 %v6780_v40, %v432_v48 }
 0x4b2   :  { %v416_v53 = vsub.f32 1.5, %v415_v50 }
 0x4b3   :  { %6108 = vrsqrt.f32 %v401_v51  ;;  %v440_v54 = vadd.f32 %v6786_v49, %v436_v52  ;;  %vm428_vm9 = vweird.f32 %v401_v51  ;;  %v546_v18 = vpop.permute.xlu0 %545 }
 0x4b4   :  { %v417_v55 = vmul.f32 %v6107_v36, %v416_v53 }
 0x4b5   :  { %v443_v56 = vsel %vm281_vm13, %v440_v54, -inf }
 0x4b6   :  { %444 = vmax.xlane.f32.xlu1 %v443_v56  ;;  %v421_v57 = vsel %vm420_vm7, %v6107_v36, %v417_v55 }
 0x4b7   :  { %v433_v58 = vmul.f32 %v421_v57, %v382_v6 }
 0x4b9   :  { %v6109_v59 = vpop.eup %6108  ;;  %v437_v61 = vmul.f32 %v6780_v40, %v433_v58 }
 0x4ba   :  { %v423_v62 = vmul.f32 %v6109_v59, %v401_v51  ;;  %vm429_vm8 = vweird.f32 %v6109_v59 }
 0x4bb   :  { %v441_v63 = vadd.f32 %v6786_v49, %v437_v61  ;;  %vm430_vm10 = vmor %vm428_vm9, %vm429_vm8 }
 0x4bc   :  { %v424_v1 = vmul.f32 %v6109_v59, %v423_v62 }
 0x4bd   :  { %v446_v2 = vsel %vm281_vm13, %v441_v63, -inf }
 0x4be   :  { %v425_v3 = vmul.f32 0.5, %v424_v1  ;;  %447 = vmax.xlane.f32.xlu2 %v446_v2 }
 0x4c0   :  { %v426_v5 = vsub.f32 1.5, %v425_v3 }
 0x4c2   :  { %v427_v7 = vmul.f32 %v6109_v59, %v426_v5 }
 0x4c4   :  { %v431_v8 = vsel %vm430_vm10, %v6109_v59, %v427_v7 }
 0x4c5   :  { %v434_v9 = vmul.f32 %v431_v8, %v6762_v14 }
 0x4c6   :  { %v548_v6 = vpop.permute.xlu1 %547 }
 0x4c7   :  { %5764 = vmatpush.xpose.msk.msrb.mxu2 %vm281_vm13, %v548_v6  ;;  %v438_v10 = vmul.f32 %v6780_v40, %v434_v9 }
 0x4c9   :  { %v442_v13 = vadd.f32 %v6786_v49, %v438_v10 }
 0x4ca   :  { %5765 = vmatmul.msk.f32.vlgmr.msrb.gmra.mxu2 %vm281_vm13, %v542_v12 }
 0x4cb   :  { %v449_v16 = vsel %vm367_vm15, %v442_v13, -inf }
 0x4cc   :  { %450 = vmax.xlane.f32.xlu0 %v449_v16 }
 0x4d2   :  { %5766 = vmatmul.msk.f32.gmra.mxu2 %vm281_vm13, %v544_v17 }
 0x4da   :  { %5767 = vmatmul.msk.f32.gmra.mxu2 %vm281_vm13, %v546_v18 }
 0x529   :  { %v445_v14 = vpop.xlane.xlu1 %444 }
 0x52a   :  { %v452_v20 = vsub.f32 %v440_v54, %v445_v14 }
 0x52c   :  { %v455_v21 = vmul.f32 1.442695, %v452_v20 }
 0x52e   :  { %6110 = vpow2.f32 %v455_v21 }
 0x531   :  { %v448_v22 = vpop.xlane.xlu2 %447 }
 0x532   :  { %v453_v23 = vsub.f32 %v441_v63, %v448_v22 }
 0x534   :  { %v6111_v24 = vpop.eup %6110  ;;  %v457_v25 = vmul.f32 1.442695, %v453_v23 }
 0x535   :  { %v461_v26 = vsel %vm281_vm13, %v6111_v24, 0.0 }
 0x536   :  { %6112 = vpow2.f32 %v457_v25  ;;  %462 = vadd.xlane.f32.xlu1 %v461_v26 }
 0x53c   :  { %v6113_v31 = vpop.eup %6112 }
 0x53d   :  { %v464_v34 = vsel %vm281_vm13, %v6113_v31, 0.0 }
 0x53e   :  { %465 = vadd.xlane.f32.xlu2 %v464_v34 }
 0x53f   :  { %v451_v35 = vpop.xlane.xlu0 %450 }
 0x540   :  { %v454_v36 = vsub.f32 %v442_v13, %v451_v35 }
 0x542   :  { %v459_v37 = vmul.f32 1.442695, %v454_v36 }
 0x544   :  { %6114 = vpow2.f32 %v459_v37 }
 0x54a   :  { %v6115_v39 = vpop.eup %6114 }
 0x54b   :  { %v467_v41 = vsel %vm367_vm15, %v6115_v39, 0.0 }
 0x54c   :  { %468 = vadd.xlane.f32.xlu0 %v467_v41 }
 0x54d   :  { %v582_v62 = vpop.f32.mrf.mxu2 }
 0x54f   :  { %512 = vrot.lane.b32.xlu1 %v6687_v30, %s6540_s17 }
 0x555   :  { %v585_v63 = vpop.f32.mrf.mxu2 }
 0x556   :  { %5999 = vrot.lane.b32.xlu2 %v6809_v45, %s6540_s17 }
 0x55d   :  { %v588_v1 = vpop.f32.mrf.mxu2 }
 0x5a9   :  { %v463_v46 = vpop.xlane.xlu1 %462 }
 0x5aa   :  { %6116 = vrcp.f32 %v463_v46 }
 0x5b0   :  { %v6117_v47 = vpop.eup %6116 }
 0x5b1   :  { %v466_v48 = vpop.xlane.xlu2 %465  ;;  %v473_v50 = vmul.f32 %v6117_v47, %v6111_v24  ;;  %v32_v47 = vld [vmem:[%s8612_s2 + $0x18] sm:$0xff] }
 0x5b2   :  { %6118 = vrcp.f32 %v466_v48  ;;  %v6868_v48 = vadd.f32 %v6734_v42, %v32_v47 }
 0x5b3   :  { %476 = vxpose.xlu0.b32.start [1/3] (short) (narrow) %v473_v50, 8 }
 0x5b4   :  { %v94_v50 = vsel %vm84_vm1, %v6868_v48, 0.0 }
 0x5b8   :  { %v6119_v51 = vpop.eup %6118 }
 0x5b9   :  { %v474_v52 = vmul.f32 %v6119_v51, %v6113_v31  ;;  %v6000_v53 = vpop.permute.xlu2 %5999  ;;  %v33_v51 = vld [vmem:[%s8612_s2 + $0x20] sm:$0x3] }
 0x5ba   :  { %v6001_v56 = vunpack.i.l.bf16 %v6000_v53  ;;  %v6002_v57 = vunpack.i.h.bf16 %v6000_v53 }
 0x5bb   :  { %477 = vxpose.xlu0.b32.cont [2/3] (short) (narrow) %v474_v52, 8  ;;  %v6876_v52 = vadd.f32 %v6736_v43, %v33_v51 }
 0x5bd   :  { %v98_v53 = vsel %vm97_vm11, %v6876_v52, 0.0 }
 0x5bf   :  { %v469_v54 = vpop.xlane.xlu0 %468 }
 0x5c0   :  { %6120 = vrcp.f32 %v469_v54 }
 0x5c1   :  { %v513_v55 = vpop.permute.xlu1 %512 }
 0x5c2   :  { %5760 = vmatpush.msk.msrb.mxu3 %vm331_vm12, %v513_v55 }
 0x5c4   :  { %535 = vmatpush.msrb.mxu3 %v6001_v56 }
 0x5c6   :  { %v6121_v58 = vpop.eup %6120  ;;  %536 = vmatpush.msrb.mxu3 %v6002_v57 }
 0x5c7   :  { %v475_v59 = vmul.f32 %v6121_v58, %v6115_v39 }
 0x5c8   :  { %5768 = vmatpush.msk.msra.mxu3 %vm331_vm12, %v6697_v32 }
 0x5c9   :  { %478 = vxpose.xlu0.b32.end [3/3] (short) (narrow) %v475_v59, 8 }
 0x5ca   :  { %614 = vmatpush.msra.mxu3 %v6703_v33 }
 0x5cc   :  { %615 = vmatpush.msra.mxu3 %v6727_v38 }
 0x65d   :  { %v492_v61 = vpop.trf.xlu0 }
 0x65e   :  { %5761 = vmatmul.msk.f32.vlgmr.msrb.gmra.mxu3 %vm321_vm14, %v492_v61 }
 0x666   :  { %5769 = vmatmul.msk.f32.vlgmr.msra.gmra.mxu3 %vm321_vm14, %v582_v62 }
 0x66e   :  { %5770 = vmatmul.msk.f32.gmra.mxu3 %vm321_vm14, %v585_v63 }
 0x676   :  { %5771 = vmatmul.msk.f32.gmra.mxu3 %vm321_vm14, %v588_v1 }
 0x6e1   :  { %v6822_v2 = vpop.f32.mrf.mxu3 }
 0x6e9   :  { %v617_v3 = vpop.f32.mrf.mxu3 }
 0x6ea   :  { %v618_v5 = vadd.f32 %v6741_v44, %v617_v3 }
 0x6ec   :  { %v626_v7 = vsel %vm281_vm13, %v618_v5, 0.0 }
 0x6ed   :  { %627 = vadd.xlane.f32.xlu1 %v626_v7 }
 0x6f1   :  { %v620_v8 = vpop.f32.mrf.mxu3 }
 0x6f2   :  { %v621_v9 = vadd.f32 %v6741_v44, %v620_v8 }
 0x6f4   :  { %v629_v6 = vsel %vm281_vm13, %v621_v9, 0.0 }
 0x6f5   :  { %630 = vadd.xlane.f32.xlu2 %v629_v6 }
 0x6f9   :  { %v623_v10 = vpop.f32.mrf.mxu3 }
 0x6fa   :  { %v624_v12 = vadd.f32 %v6741_v44, %v623_v10 }
 0x6fc   :  { %v632_v13 = vsel %vm367_vm15, %v624_v12, 0.0 }
 0x6fd   :  { %633 = vadd.xlane.f32.xlu0 %v632_v13 }
 0x706   :  { %804 = vrot.lane.b32.xlu1 %v6683_v29, %s6541_s18 }
 0x70d   :  { %806 = vrot.lane.b32.xlu2 %v6687_v30, %s6541_s18 }
 0x70e   :  { %796 = vrot.lane.b32.xlu1 %v6679_v28, %s6542_s19 }
 0x715   :  { %802 = vrot.lane.b32.xlu2 %v6679_v28, %s6541_s18 }
 0x760   :  { %v628_v16 = vpop.xlane.xlu1 %627 }
 0x761   :  { %v635_v17 = vmul.f32 %v628_v16, %v6753_v60 }
 0x763   :  { %v6839_v18 = vsub.f32 %v618_v5, %v635_v17 }
 0x765   :  { %v641_v14 = vmul.f32 %v6839_v18, %v6839_v18 }
 0x767   :  { %v644_v20 = vsel %vm281_vm13, %v641_v14, 0.0 }
 0x768   :  { %v631_v21 = vpop.xlane.xlu2 %630  ;;  %645 = vadd.xlane.f32.xlu1 %v644_v20 }
 0x769   :  { %v636_v22 = vmul.f32 %v631_v21, %v6753_v60 }
 0x76b   :  { %v6845_v23 = vsub.f32 %v621_v9, %v636_v22 }
 0x76d   :  { %v642_v24 = vmul.f32 %v6845_v23, %v6845_v23 }
 0x76f   :  { %v647_v25 = vsel %vm281_vm13, %v642_v24, 0.0 }
 0x770   :  { %v634_v26 = vpop.xlane.xlu0 %633  ;;  %648 = vadd.xlane.f32.xlu2 %v647_v25  ;;  %v807_v31 = vpop.permute.xlu2 %806 }
 0x771   :  { %v637_v34 = vmul.f32 %v634_v26, %v6753_v60  ;;  %5774 = vmatpush.xpose.msk.msra.mxu0 %vm281_vm13, %v807_v31 }
 0x773   :  { %v6852_v35 = vsub.f32 %v624_v12, %v637_v34 }
 0x775   :  { %v643_v36 = vmul.f32 %v6852_v35, %v6852_v35 }
 0x777   :  { %v650_v37 = vsel %vm367_vm15, %v643_v36, 0.0 }
 0x778   :  { %651 = vadd.xlane.f32.xlu1 %v650_v37  ;;  %v805_v39 = vpop.permute.xlu1 %804  ;;  %v803_v41 = vpop.permute.xlu2 %802 }
 0x779   :  { %5775 = vmatpush.xpose.msk.msra.mxu0 %vm281_vm13, %v805_v39 }
 0x77d   :  { %5776 = vmatpush.xpose.msk.msra.mxu0 %vm281_vm13, %v803_v41 }
 0x780   :  { %v797_v46 = vpop.permute.xlu1 %796 }
 0x781   :  { %5777 = vmatmul.msk.f32.vlgmr.msra.gmra.mxu0 %vm281_vm13, %v797_v46 }
 0x788   :  { %798 = vrot.lane.b32.xlu2 %v6683_v29, %s6542_s19 }
 0x791   :  { %800 = vrot.lane.b32.xlu1 %v6687_v30, %s6542_s19 }
 0x7b1   :  { %95 = vadd.xlane.f32.xlu2 %v94_v50 }
 0x7bb   :  { %99 = vadd.xlane.f32.xlu1 %v98_v53 }
 0x7db   :  { %v646_v54 = vpop.xlane.xlu1 %645 }
 0x7dc   :  { %v653_v42 = vmul.f32 %v646_v54, %v6753_v60 }
 0x7de   :  { %v656_v55 = vadd.f32 1e-05, %v653_v42 }
 0x7e0   :  { %6122 = vrsqrt.f32 %v656_v55  ;;  %vm665_vm2 = vweird.f32 %v656_v55 }
 0x7e3   :  { %v649_v56 = vpop.xlane.xlu2 %648 }
 0x7e4   :  { %v654_v57 = vmul.f32 %v649_v56, %v6753_v60 }
 0x7e6   :  { %v6123_v58 = vpop.eup %6122  ;;  %v657_v59 = vadd.f32 1e-05, %v654_v57 }
 0x7e7   :  { %v660_v61 = vmul.f32 %v6123_v58, %v656_v55  ;;  %vm666_vm0 = vweird.f32 %v6123_v58 }
 0x7e8   :  { %6124 = vrsqrt.f32 %v657_v59  ;;  %vm667_vm3 = vmor %vm665_vm2, %vm666_vm0  ;;  %vm675_vm5 = vweird.f32 %v657_v59 }
 0x7e9   :  { %v661_v62 = vmul.f32 %v6123_v58, %v660_v61 }
 0x7eb   :  { %v662_v43 = vmul.f32 0.5, %v661_v62  ;;  %v799_v63 = vpop.permute.xlu2 %798  ;;  %v652_v1 = vpop.xlane.xlu1 %651 }
 0x7ec   :  { %v655_v3 = vmul.f32 %v652_v1, %v6753_v60  ;;  %5778 = vmatmul.msk.f32.gmra.mxu0 %vm281_vm13, %v799_v63 }
 0x7ed   :  { %v663_v5 = vsub.f32 1.5, %v662_v43 }
 0x7ee   :  { %v6125_v7 = vpop.eup %6124  ;;  %v658_v8 = vadd.f32 1e-05, %v655_v3 }
 0x7ef   :  { %v664_v9 = vmul.f32 %v6123_v58, %v663_v5  ;;  %v670_v6 = vmul.f32 %v6125_v7, %v657_v59  ;;  %vm676_vm4 = vweird.f32 %v6125_v7 }
 0x7f0   :  { %6126 = vrsqrt.f32 %v658_v8  ;;  %vm677_vm6 = vmor %vm675_vm5, %vm676_vm4  ;;  %vm685_vm8 = vweird.f32 %v658_v8 }
 0x7f1   :  { %v671_v10 = vmul.f32 %v6125_v7, %v670_v6  ;;  %v668_v12 = vsel %vm667_vm3, %v6123_v58, %v664_v9 }
 0x7f2   :  { %v689_v13 = vmul.f32 %v668_v12, %v6839_v18 }
 0x7f3   :  { %v672_v16 = vmul.f32 0.5, %v671_v10 }
 0x7f4   :  { %v692_v17 = vmul.f32 %v6780_v40, %v689_v13 }
 0x7f5   :  { %v673_v14 = vsub.f32 1.5, %v672_v16 }
 0x7f6   :  { %v6127_v20 = vpop.eup %6126  ;;  %v695_v21 = vadd.f32 %v6786_v49, %v692_v17 }
 0x7f7   :  { %v674_v22 = vmul.f32 %v6125_v7, %v673_v14  ;;  %v680_v24 = vmul.f32 %v6127_v20, %v658_v8  ;;  %vm686_vm7 = vweird.f32 %v6127_v20 }
 0x7f8   :  { %v698_v25 = vsel %vm281_vm13, %v695_v21, -inf  ;;  %vm687_vm9 = vmor %vm685_vm8, %vm686_vm7 }
 0x7f9   :  { %v681_v26 = vmul.f32 %v6127_v20, %v680_v24  ;;  %699 = vmax.xlane.f32.xlu2 %v698_v25  ;;  %v678_v31 = vsel %vm677_vm6, %v6125_v7, %v674_v22 }
 0x7fa   :  { %v690_v34 = vmul.f32 %v678_v31, %v6845_v23 }
 0x7fb   :  { %v682_v18 = vmul.f32 0.5, %v681_v26 }
 0x7fc   :  { %v693_v36 = vmul.f32 %v6780_v40, %v690_v34 }
 0x7fd   :  { %v683_v37 = vsub.f32 1.5, %v682_v18 }
 0x7fe   :  { %v696_v39 = vadd.f32 %v6786_v49, %v693_v36 }
 0x7ff   :  { %v684_v41 = vmul.f32 %v6127_v20, %v683_v37 }
 0x800   :  { %v701_v46 = vsel %vm281_vm13, %v696_v39, -inf }
 0x801   :  { %702 = vmax.xlane.f32.xlu1 %v701_v46  ;;  %v688_v47 = vsel %vm687_vm9, %v6127_v20, %v684_v41 }
 0x802   :  { %v691_v50 = vmul.f32 %v688_v47, %v6852_v35 }
 0x803   :  { %v801_v51 = vpop.permute.xlu1 %800 }
 0x804   :  { %5779 = vmatmul.msk.f32.gmra.mxu0 %vm281_vm13, %v801_v51  ;;  %v694_v23 = vmul.f32 %v6780_v40, %v691_v50 }
 0x806   :  { %v697_v53 = vadd.f32 %v6786_v49, %v694_v23 }
 0x808   :  { %v704_v54 = vsel %vm367_vm15, %v697_v53, -inf }
 0x809   :  { %705 = vmax.xlane.f32.xlu2 %v704_v54 }
 0x824   :  { %v96_v42 = vpop.xlane.xlu2 %95 }
 0x825   :  { %v111_v55 = vmul.f32 %v6629_v27, %v96_v42 }
 0x827   :  { %v116_v56 = vsub.f32 %v6868_v48, %v111_v55 }
 0x829   :  { %v121_v57 = vmul.f32 %v116_v56, %v116_v56 }
 0x82b   :  { %v132_v58 = vsel %vm84_vm1, %v121_v57, 0.0 }
 0x82c   :  { %133 = vadd.xlane.f32.xlu1 %v132_v58 }
 0x82e   :  { %v100_v35 = vpop.xlane.xlu1 %99 }
 0x82f   :  { %v112_v59 = vmul.f32 %v6629_v27, %v100_v35 }
 0x831   :  { %v117_v61 = vsub.f32 %v6876_v52, %v112_v59 }
 0x833   :  { %v122_v62 = vmul.f32 %v117_v61, %v117_v61 }
 0x835   :  { %v135_v43 = vsel %vm97_vm11, %v122_v62, 0.0 }
 0x836   :  { %136 = vadd.xlane.f32.xlu2 %v135_v43 }
 0x86c   :  { %v700_v63 = vpop.xlane.xlu2 %699 }
 0x86d   :  { %v707_v1 = vsub.f32 %v695_v21, %v700_v63 }
 0x86f   :  { %v710_v3 = vmul.f32 1.442695, %v707_v1 }
 0x871   :  { %6128 = vpow2.f32 %v710_v3 }
 0x874   :  { %v703_v5 = vpop.xlane.xlu1 %702 }
 0x875   :  { %v708_v7 = vsub.f32 %v696_v39, %v703_v5 }
 0x877   :  { %v6129_v8 = vpop.eup %6128  ;;  %v712_v9 = vmul.f32 1.442695, %v708_v7 }
 0x878   :  { %v716_v6 = vsel %vm281_vm13, %v6129_v8, 0.0 }
 0x879   :  { %6130 = vpow2.f32 %v712_v9  ;;  %717 = vadd.xlane.f32.xlu0 %v716_v6 }
 0x87c   :  { %v706_v10 = vpop.xlane.xlu2 %705 }
 0x87d   :  { %v709_v12 = vsub.f32 %v697_v53, %v706_v10 }
 0x87f   :  { %v6131_v13 = vpop.eup %6130  ;;  %v714_v16 = vmul.f32 1.442695, %v709_v12  ;;  %v837_v12 = vpop.f32.mrf.mxu0 }
 0x880   :  { %v719_v17 = vsel %vm281_vm13, %v6131_v13, 0.0 }
 0x881   :  { %6132 = vpow2.f32 %v714_v16  ;;  %720 = vadd.xlane.f32.xlu1 %v719_v17 }
 0x887   :  { %v6133_v14 = vpop.eup %6132 }
 0x888   :  { %v722_v20 = vsel %vm367_vm15, %v6133_v14, 0.0 }
 0x889   :  { %723 = vadd.xlane.f32.xlu2 %v722_v20 }
 0x88d   :  { %767 = vrot.lane.b32.xlu0 %v6687_v30, %s6543_s24 }
 0x89a   :  { %6004 = vrot.lane.b32.xlu1 %v6809_v45, %s6543_s24 }
 0x89f   :  { %v134_v21 = vpop.xlane.xlu1 %133 }
 0x8a0   :  { %v141_v22 = vmul.f32 %v134_v21, %v6629_v27 }
 0x8a2   :  { %v146_v24 = vadd.f32 1e-05, %v141_v22 }
 0x8a4   :  { %6134 = vrsqrt.f32 %v146_v24  ;;  %vm184_vm0 = vweird.f32 %v146_v24 }
 0x8a9   :  { %v137_v25 = vpop.xlane.xlu2 %136 }
 0x8aa   :  { %v6135_v26 = vpop.eup %6134  ;;  %v142_v31 = vmul.f32 %v137_v25, %v6629_v27 }
 0x8ab   :  { %v179_v34 = vmul.f32 %v6135_v26, %v146_v24  ;;  %vm185_vm10 = vweird.f32 %v6135_v26 }
 0x8ac   :  { %v147_v18 = vadd.f32 1e-05, %v142_v31  ;;  %vm186_vm2 = vmor %vm184_vm0, %vm185_vm10 }
 0x8ad   :  { %v180_v36 = vmul.f32 %v6135_v26, %v179_v34 }
 0x8ae   :  { %6136 = vrsqrt.f32 %v147_v18  ;;  %vm194_vm4 = vweird.f32 %v147_v18 }
 0x8af   :  { %v181_v37 = vmul.f32 0.5, %v180_v36 }
 0x8b1   :  { %v182_v39 = vsub.f32 1.5, %v181_v37 }
 0x8b3   :  { %v183_v41 = vmul.f32 %v6135_v26, %v182_v39 }
 0x8b4   :  { %v6137_v46 = vpop.eup %6136 }
 0x8b5   :  { %v189_v47 = vmul.f32 %v6137_v46, %v147_v18  ;;  %v187_v50 = vsel %vm186_vm2, %v6135_v26, %v183_v41  ;;  %vm195_vm3 = vweird.f32 %v6137_v46 }
 0x8b6   :  { %v201_v51 = vmul.f32 %v187_v50, %v116_v56  ;;  %vm196_vm5 = vmor %vm194_vm4, %vm195_vm3 }
 0x8b7   :  { %v190_v23 = vmul.f32 %v6137_v46, %v189_v47 }
 0x8b8   :  { %v207_v53 = vmul.f32 %v6662_v0, %v201_v51 }
 0x8b9   :  { %v191_v54 = vmul.f32 0.5, %v190_v23 }
 0x8ba   :  { %v213_v42 = vadd.f32 %v6667_v4, %v207_v53 }
 0x8bb   :  { %v192_v55 = vsub.f32 1.5, %v191_v54 }
 0x8bc   :  { %5748 = vmatmul.msk.f32.gmra.mxu1 %vm84_vm1, %v213_v42 }
 0x8bd   :  { %v193_v57 = vmul.f32 %v6137_v46, %v192_v55 }
 0x8bf   :  { %v197_v58 = vsel %vm196_vm5, %v6137_v46, %v193_v57  ;;  %vm1325_vm5 = vcmask 1046528  }
 0x8c0   :  { %v202_v35 = vmul.f32 %v197_v58, %v117_v61 }
 0x8c2   :  { %v208_v59 = vmul.f32 %v6662_v0, %v202_v35 }
 0x8c4   :  { %v214_v62 = vadd.f32 %v6667_v4, %v208_v59 }
 0x8c6   :  { %5749 = vmatmul.msk.f32.gmra.mxu1 %vm84_vm1, %v214_v62 }
 0x8ec   :  { %v718_v56 = vpop.xlane.xlu0 %717 }
 0x8ed   :  { %6138 = vrcp.f32 %v718_v56 }
 0x8f3   :  { %v6139_v43 = vpop.eup %6138 }
 0x8f4   :  { %v721_v63 = vpop.xlane.xlu1 %720  ;;  %v728_v1 = vmul.f32 %v6139_v43, %v6129_v8 }
 0x8f5   :  { %6140 = vrcp.f32 %v721_v63 }
 0x8f6   :  { %731 = vxpose.xlu2.b32.start [1/3] (short) (narrow) %v728_v1, 8 }
 0x8fb   :  { %v6141_v3 = vpop.eup %6140 }
 0x8fc   :  { %v724_v5 = vpop.xlane.xlu2 %723  ;;  %v729_v7 = vmul.f32 %v6141_v3, %v6131_v13  ;;  %v840_v13 = vpop.f32.mrf.mxu0 }
 0x8fd   :  { %6142 = vrcp.f32 %v724_v5 }
 0x8fe   :  { %732 = vxpose.xlu2.b32.cont [2/3] (short) (narrow) %v729_v7, 8 }
 0x8ff   :  { %v768_v9 = vpop.permute.xlu0 %767 }
 0x900   :  { %5772 = vmatpush.msk.msrb.mxu1 %vm331_vm12, %v768_v9 }
 0x903   :  { %v6143_v0 = vpop.eup %6142 }
 0x904   :  { %v730_v61 = vmul.f32 %v6143_v0, %v6133_v14  ;;  %v843_v16 = vpop.f32.mrf.mxu0 }
 0x906   :  { %733 = vxpose.xlu2.b32.end [3/3] (short) (narrow) %v730_v61, 8 }
 0x90c   :  { %v6005_v4 = vpop.permute.xlu1 %6004 }
 0x90d   :  { %v6006_v6 = vunpack.i.l.bf16 %v6005_v4  ;;  %v6007_v10 = vunpack.i.h.bf16 %v6005_v4 }
 0x90f   :  { %790 = vmatpush.msrb.mxu1 %v6006_v6 }
 0x911   :  { %791 = vmatpush.msrb.mxu1 %v6007_v10 }
 0x913   :  { %5780 = vmatpush.msk.msra.mxu1 %vm331_vm12, %v6697_v32 }
 0x915   :  { %869 = vmatpush.msra.mxu1 %v6703_v33 }
 0x917   :  { %870 = vmatpush.msra.mxu1 %v6727_v38 }
 0x939   :  { %v6927_v17 = vpop.f32.mrf.mxu1 }
 0x943   :  { %v6929_v14 = vpop.f32.mrf.mxu1 }
 0x98f   :  { %v747_v8 = vpop.trf.xlu2 }
 0x990   :  { %5773 = vmatmul.msk.f32.vlgmr.msrb.gmra.mxu1 %vm321_vm14, %v747_v8 }
 0x998   :  { %5781 = vmatmul.msk.f32.vlgmr.msra.gmra.mxu1 %vm321_vm14, %v837_v12 }
 0x9a0   :  { %5782 = vmatmul.msk.f32.gmra.mxu1 %vm321_vm14, %v840_v13 }
 0x9a8   :  { %5783 = vmatmul.msk.f32.gmra.mxu1 %vm321_vm14, %v843_v16 }
 0xa0d   :  { %v6931_v32 = vpop.f32.mrf.mxu1 }
 0xa15   :  { %v872_v33 = vpop.f32.mrf.mxu1 }
 0xa16   :  { %v873_v38 = vadd.f32 %v6741_v44, %v872_v33 }
 0xa18   :  { %v881_v20 = vsel %vm281_vm13, %v873_v38, 0.0 }
 0xa19   :  { %882 = vadd.xlane.f32.xlu0 %v881_v20 }
 0xa1d   :  { %v875_v21 = vpop.f32.mrf.mxu1 }
 0xa1e   :  { %v876_v22 = vadd.f32 %v6741_v44, %v875_v21 }
 0xa20   :  { %v884_v24 = vsel %vm281_vm13, %v876_v22, 0.0 }
 0xa21   :  { %885 = vadd.xlane.f32.xlu1 %v884_v24 }
 0xa25   :  { %v878_v25 = vpop.f32.mrf.mxu1 }
 0xa26   :  { %v879_v26 = vadd.f32 %v6741_v44, %v878_v25 }
 0xa28   :  { %v887_v31 = vsel %vm367_vm15, %v879_v26, 0.0 }
 0xa29   :  { %888 = vadd.xlane.f32.xlu0 %v887_v31 }
 0xa3a   :  { %1059 = vrot.lane.b32.xlu1 %v6683_v29, %s6544_s26 }
 0xa3d   :  { %1061 = vrot.lane.b32.xlu0 %v6687_v30, %s6544_s26 }
 0xa45   :  { %1057 = vrot.lane.b32.xlu0 %v6679_v28, %s6544_s26 }
 0xa4d   :  { %1051 = vrot.lane.b32.xlu0 %v6679_v28, %s6545_s27 }
 0xa8c   :  { %v883_v34 = vpop.xlane.xlu0 %882 }
 0xa8d   :  { %v890_v44 = vmul.f32 %v883_v34, %v6753_v60 }
 0xa8f   :  { %v893_v18 = vsub.f32 %v873_v38, %v890_v44 }
 0xa91   :  { %v896_v36 = vmul.f32 %v893_v18, %v893_v18 }
 0xa93   :  { %v899_v37 = vsel %vm281_vm13, %v896_v36, 0.0 }
 0xa94   :  { %v886_v39 = vpop.xlane.xlu1 %885  ;;  %900 = vadd.xlane.f32.xlu2 %v899_v37 }
 0xa95   :  { %v891_v41 = vmul.f32 %v886_v39, %v6753_v60 }
 0xa97   :  { %v6950_v46 = vsub.f32 %v876_v22, %v891_v41 }
 0xa99   :  { %v897_v47 = vmul.f32 %v6950_v46, %v6950_v46 }
 0xa9b   :  { %v902_v50 = vsel %vm281_vm13, %v897_v47, 0.0 }
 0xa9c   :  { %903 = vadd.xlane.f32.xlu0 %v902_v50  ;;  %v889_v28 = vpop.xlane.xlu0 %888 }
 0xa9d   :  { %v892_v51 = vmul.f32 %v889_v28, %v6753_v60 }
 0xa9f   :  { %v6956_v23 = vsub.f32 %v879_v26, %v892_v51 }
 0xaa1   :  { %v898_v53 = vmul.f32 %v6956_v23, %v6956_v23 }
 0xaa3   :  { %v905_v54 = vsel %vm367_vm15, %v898_v53, 0.0 }
 0xaa4   :  { %906 = vadd.xlane.f32.xlu1 %v905_v54 }
 0xaac   :  { %6009 = vrot.lane.b32.xlu2 %v6809_v45, %s6546_s28  ;;  %v1060_v55 = vpop.permute.xlu1 %1059 }
 0xaaf   :  { %v1062_v42 = vpop.permute.xlu0 %1061 }
 0xab0   :  { %1055 = vrot.lane.b32.xlu0 %v6687_v30, %s6545_s27  ;;  %5786 = vmatpush.xpose.msk.msrb.mxu3 %vm281_vm13, %v1062_v42 }
 0xab4   :  { %5787 = vmatpush.xpose.msk.msrb.mxu3 %vm281_vm13, %v1060_v55 }
 0xab7   :  { %v1058_v57 = vpop.permute.xlu0 %1057 }
 0xab8   :  { %5788 = vmatpush.xpose.msk.msrb.mxu3 %vm281_vm13, %v1058_v57 }
 0xabd   :  { %1053 = vrot.lane.b32.xlu1 %v6683_v29, %s6545_s27 }
 0xabf   :  { %v1052_v58 = vpop.permute.xlu0 %1051 }
 0xac0   :  { %5789 = vmatmul.msk.f32.vlgmr.msrb.gmra.mxu3 %vm281_vm13, %v1052_v58 }
 0xb07   :  { %v901_v35 = vpop.xlane.xlu2 %900 }
 0xb08   :  { %v908_v59 = vmul.f32 %v901_v35, %v6753_v60 }
 0xb0a   :  { %v911_v62 = vadd.f32 1e-05, %v908_v59 }
 0xb0c   :  { %6144 = vrsqrt.f32 %v911_v62  ;;  %vm920_vm7 = vweird.f32 %v911_v62 }
 0xb0f   :  { %v904_v56 = vpop.xlane.xlu0 %903 }
 0xb10   :  { %v909_v43 = vmul.f32 %v904_v56, %v6753_v60 }
 0xb12   :  { %v6145_v63 = vpop.eup %6144  ;;  %v912_v1 = vadd.f32 1e-05, %v909_v43 }
 0xb13   :  { %v915_v3 = vmul.f32 %v6145_v63, %v911_v62  ;;  %vm921_vm6 = vweird.f32 %v6145_v63 }
 0xb14   :  { %6146 = vrsqrt.f32 %v912_v1  ;;  %vm922_vm8 = vmor %vm920_vm7, %vm921_vm6  ;;  %vm930_vm10 = vweird.f32 %v912_v1 }
 0xb15   :  { %v916_v5 = vmul.f32 %v6145_v63, %v915_v3 }
 0xb17   :  { %v917_v7 = vmul.f32 0.5, %v916_v5  ;;  %v907_v9 = vpop.xlane.xlu1 %906 }
 0xb18   :  { %v910_v29 = vmul.f32 %v907_v9, %v6753_v60 }
 0xb19   :  { %v918_v0 = vsub.f32 1.5, %v917_v7 }
 0xb1a   :  { %v6147_v61 = vpop.eup %6146  ;;  %v913_v4 = vadd.f32 1e-05, %v910_v29 }
 0xb1b   :  { %v919_v6 = vmul.f32 %v6145_v63, %v918_v0  ;;  %v925_v10 = vmul.f32 %v6147_v61, %v912_v1  ;;  %vm931_vm9 = vweird.f32 %v6147_v61 }
 0xb1c   :  { %6148 = vrsqrt.f32 %v913_v4  ;;  %vm932_vm0 = vmor %vm930_vm10, %vm931_vm9  ;;  %vm940_vm3 = vweird.f32 %v913_v4 }
 0xb1d   :  { %v926_v8 = vmul.f32 %v6147_v61, %v925_v10  ;;  %v923_v12 = vsel %vm922_vm8, %v6145_v63, %v919_v6 }
 0xb1e   :  { %v944_v13 = vmul.f32 %v923_v12, %v893_v18 }
 0xb1f   :  { %v927_v16 = vmul.f32 0.5, %v926_v8  ;;  %v6010_v8 = vpop.permute.xlu2 %6009 }
 0xb20   :  { %v947_v33 = vmul.f32 %v6780_v40, %v944_v13  ;;  %v6011_v13 = vunpack.i.l.bf16 %v6010_v8 }
 0xb21   :  { %v928_v38 = vsub.f32 1.5, %v927_v16  ;;  %v6012_v16 = vunpack.i.h.bf16 %v6010_v8 }
 0xb22   :  { %v6149_v20 = vpop.eup %6148  ;;  %v950_v21 = vadd.f32 %v6786_v49, %v947_v33  ;;  %v1056_v54 = vpop.permute.xlu0 %1055  ;;  %v6996_v33 = vld [vmem:[%s8613_s3 + $0x10] sm:$0x1] }
 0xb23   :  { %v929_v22 = vmul.f32 %v6147_v61, %v928_v38  ;;  %v935_v24 = vmul.f32 %v6149_v20, %v913_v4  ;;  %vm941_vm2 = vweird.f32 %v6149_v20  ;;  %v7003_v38 = vld [vmem:[%s8613_s3 + $0x8] sm:$0xff] }
 0xb24   :  { %v953_v25 = vsel %vm281_vm13, %v950_v21, -inf  ;;  %vm942_vm4 = vmor %vm940_vm3, %vm941_vm2 }
 0xb25   :  { %v936_v26 = vmul.f32 %v6149_v20, %v935_v24  ;;  %954 = vmax.xlane.f32.xlu1 %v953_v25  ;;  %v933_v31 = vsel %vm932_vm0, %v6147_v61, %v929_v22 }
 0xb26   :  { %v945_v34 = vmul.f32 %v933_v31, %v6950_v46 }
 0xb27   :  { %v937_v44 = vmul.f32 0.5, %v936_v26 }
 0xb28   :  { %v948_v18 = vmul.f32 %v6780_v40, %v945_v34  ;;  %v7021_v34 = vld [vmem:[%s8613_s3 + $0x50] ss:$0 sm:$0xff] }
 0xb29   :  { %v938_v36 = vsub.f32 1.5, %v937_v44 }
 0xb2a   :  { %v951_v37 = vadd.f32 %v6786_v49, %v948_v18 }
 0xb2b   :  { %v939_v39 = vmul.f32 %v6149_v20, %v938_v36 }
 0xb2c   :  { %v956_v41 = vsel %vm281_vm13, %v951_v37, -inf }
 0xb2d   :  { %957 = vmax.xlane.f32.xlu0 %v956_v41  ;;  %v943_v47 = vsel %vm942_vm4, %v6149_v20, %v939_v39  ;;  %v7009_v20 = vld [vmem:[%s8613_s3] sm:$0xff] }
 0xb2e   :  { %v946_v50 = vmul.f32 %v943_v47, %v6956_v23 }
 0xb2f   :  { %v1054_v28 = vpop.permute.xlu1 %1053 }
 0xb30   :  { %5790 = vmatmul.msk.f32.gmra.mxu3 %vm281_vm13, %v1054_v28  ;;  %v949_v46 = vmul.f32 %v6780_v40, %v946_v50  ;;  %v7030_v28 = vrot.slane %v6929_v14, 1 }
 0xb32   :  { %v952_v51 = vadd.f32 %v6786_v49, %v949_v46 }
 0xb34   :  { %v959_v53 = vsel %vm367_vm15, %v952_v51, -inf }
 0xb35   :  { %960 = vmax.xlane.f32.xlu1 %v959_v53 }
 0xb38   :  { %5791 = vmatmul.msk.f32.gmra.mxu3 %vm281_vm13, %v1056_v54 }
 0xb43   :  { %v1092_v22 = vpop.f32.mrf.mxu3 }
 0xb98   :  { %v955_v42 = vpop.xlane.xlu1 %954 }
 0xb99   :  { %v962_v55 = vsub.f32 %v950_v21, %v955_v42 }
 0xb9b   :  { %v965_v57 = vmul.f32 1.442695, %v962_v55 }
 0xb9d   :  { %6150 = vpow2.f32 %v965_v57 }
 0xba0   :  { %v958_v58 = vpop.xlane.xlu0 %957 }
 0xba1   :  { %v963_v35 = vsub.f32 %v951_v37, %v958_v58 }
 0xba3   :  { %v6151_v23 = vpop.eup %6150  ;;  %v967_v59 = vmul.f32 1.442695, %v963_v35 }
 0xba4   :  { %v971_v62 = vsel %vm281_vm13, %v6151_v23, 0.0 }
 0xba5   :  { %6152 = vpow2.f32 %v967_v59  ;;  %972 = vadd.xlane.f32.xlu0 %v971_v62 }
 0xba8   :  { %v961_v40 = vpop.xlane.xlu1 %960 }
 0xba9   :  { %v964_v49 = vsub.f32 %v952_v51, %v961_v40 }
 0xbab   :  { %v6153_v56 = vpop.eup %6152  ;;  %v969_v43 = vmul.f32 1.442695, %v964_v49 }
 0xbac   :  { %v974_v63 = vsel %vm281_vm13, %v6153_v56, 0.0 }
 0xbad   :  { %6154 = vpow2.f32 %v969_v43  ;;  %975 = vadd.xlane.f32.xlu1 %v974_v63  ;;  %v1327_v43 = vrot.slane %v6927_v17, 1  ;;  %v1326_v63 = vrot.slane %v6687_v30, 1 }
 0xbb3   :  { %v6155_v1 = vpop.eup %6154  ;;  %v1095_v24 = vpop.f32.mrf.mxu3 }
 0xbb4   :  { %v977_v3 = vsel %vm367_vm15, %v6155_v1, 0.0 }
 0xbb5   :  { %978 = vadd.xlane.f32.xlu0 %v977_v3  ;;  %v7054_v3 = vsel %vm1325_vm5, %v1327_v43, %v7030_v28 }
 0xbbb   :  { %v1098_v25 = vpop.f32.mrf.mxu3 }
 0xbc6   :  { %1022 = vrot.lane.b32.xlu1 %v6687_v30, %s6546_s28 }
 0xc18   :  { %v973_v5 = vpop.xlane.xlu0 %972 }
 0xc19   :  { %6156 = vrcp.f32 %v973_v5 }
 0xc1f   :  { %v6157_v7 = vpop.eup %6156 }
 0xc20   :  { %v976_v9 = vpop.xlane.xlu1 %975  ;;  %v983_v29 = vmul.f32 %v6157_v7, %v6151_v23 }
 0xc21   :  { %6158 = vrcp.f32 %v976_v9 }
 0xc22   :  { %986 = vxpose.xlu0.b32.start [1/3] (short) (narrow) %v983_v29, 8 }
 0xc27   :  { %v6159_v0 = vpop.eup %6158 }
 0xc28   :  { %v979_v61 = vpop.xlane.xlu0 %978  ;;  %v984_v4 = vmul.f32 %v6159_v0, %v6153_v56 }
 0xc29   :  { %6160 = vrcp.f32 %v979_v61 }
 0xc2a   :  { %987 = vxpose.xlu0.b32.cont [2/3] (short) (narrow) %v984_v4, 8 }
 0xc2f   :  { %v6161_v6 = vpop.eup %6160 }
 0xc30   :  { %v985_v10 = vmul.f32 %v6161_v6, %v6155_v1  ;;  %v7048_v1 = vsel %vm1325_vm5, %v1326_v63, %v1327_v43 }
 0xc32   :  { %988 = vxpose.xlu0.b32.end [3/3] (short) (narrow) %v985_v10, 8 }
 0xc38   :  { %v1023_v12 = vpop.permute.xlu1 %1022 }
 0xc39   :  { %5784 = vmatpush.msk.msra.mxu2 %vm331_vm12, %v1023_v12 }
 0xc3b   :  { %1045 = vmatpush.msra.mxu2 %v6011_v13 }
 0xc3d   :  { %1046 = vmatpush.msra.mxu2 %v6012_v16 }
 0xc3f   :  { %5792 = vmatpush.msk.msrb.mxu2 %vm331_vm12, %v6996_v33 }
 0xc41   :  { %1124 = vmatpush.msrb.mxu2 %v7003_v38 }
 0xc43   :  { %1125 = vmatpush.msrb.mxu2 %v7009_v20 }
 0xcc6   :  { %v1002_v21 = vpop.trf.xlu0 }
 0xcc7   :  { %5785 = vmatmul.msk.f32.vlgmr.msra.gmra.mxu2 %vm321_vm14, %v1002_v21 }
 0xccf   :  { %5793 = vmatmul.msk.f32.vlgmr.msrb.gmra.mxu2 %vm321_vm14, %v1092_v22 }
 0xcd7   :  { %5794 = vmatmul.msk.f32.gmra.mxu2 %vm321_vm14, %v1095_v24 }
 0xcdf   :  { %5795 = vmatmul.msk.f32.gmra.mxu2 %vm321_vm14, %v1098_v25 }
 0xd4a   :  { %v7016_v26 = vpop.f32.mrf.mxu2 }
 0xd52   :  { %v1127_v31 = vpop.f32.mrf.mxu2 }
 0xd53   :  { %v1128_v44 = vadd.f32 %v7021_v34, %v1127_v31 }
 0xd55   :  { %v1136_v18 = vsel %vm281_vm13, %v1128_v44, 0.0 }
 0xd56   :  { %1137 = vadd.xlane.f32.xlu1 %v1136_v18 }
 0xd5a   :  { %v1130_v36 = vpop.f32.mrf.mxu2 }
 0xd5b   :  { %v1131_v37 = vadd.f32 %v7021_v34, %v1130_v36  ;;  %v7064_v36 = vld [vmem:[%s8613_s3 + $0x51] ss:$0 sm:$0xff] }
 0xd5d   :  { %v1139_v39 = vsel %vm281_vm13, %v1131_v37, 0.0 }
 0xd5e   :  { %1140 = vadd.xlane.f32.xlu2 %v1139_v39 }
 0xd62   :  { %v1133_v41 = vpop.f32.mrf.mxu2 }
 0xd63   :  { %v1134_v47 = vadd.f32 %v7021_v34, %v1133_v41 }
 0xd65   :  { %v1142_v50 = vsel %vm367_vm15, %v1134_v47, 0.0 }
 0xd66   :  { %1143 = vadd.xlane.f32.xlu0 %v1142_v50 }
 0xd76   :  { %1335 = vrot.lane.b32.xlu2 %v7030_v28, %s6536_s25 }
 0xdc9   :  { %v1138_v46 = vpop.xlane.xlu1 %1137 }
 0xdca   :  { %v1145_v51 = vmul.f32 %v1138_v46, %v6753_v60 }
 0xdcc   :  { %v1148_v53 = vsub.f32 %v1128_v44, %v1145_v51 }
 0xdce   :  { %v1151_v54 = vmul.f32 %v1148_v53, %v1148_v53 }
 0xdd0   :  { %v1154_v42 = vsel %vm281_vm13, %v1151_v54, 0.0 }
 0xdd1   :  { %v1141_v55 = vpop.xlane.xlu2 %1140  ;;  %1155 = vadd.xlane.f32.xlu1 %v1154_v42 }
 0xdd2   :  { %v1146_v57 = vmul.f32 %v1141_v55, %v6753_v60 }
 0xdd4   :  { %v1149_v58 = vsub.f32 %v1131_v37, %v1146_v57 }
 0xdd6   :  { %v1152_v35 = vmul.f32 %v1149_v58, %v1149_v58 }
 0xdd8   :  { %v1157_v23 = vsel %vm281_vm13, %v1152_v35, 0.0 }
 0xdd9   :  { %v1144_v14 = vpop.xlane.xlu0 %1143  ;;  %1158 = vadd.xlane.f32.xlu2 %v1157_v23  ;;  %v1336_v59 = vpop.permute.xlu2 %1335 }
 0xdda   :  { %v1147_v62 = vmul.f32 %v1144_v14, %v6753_v60  ;;  %5798 = vmatpush.xpose.msk.msrb.mxu1 %vm281_vm13, %v1336_v59 }
 0xddc   :  { %v7040_v40 = vsub.f32 %v1134_v47, %v1147_v62  ;;  %v7070_v47 = vld [vmem:[%s8613_s3 + $0x52] ss:$0 sm:$0xff] }
 0xdde   :  { %v1153_v49 = vmul.f32 %v7040_v40, %v7040_v40 }
 0xde0   :  { %v1160_v56 = vsel %vm367_vm15, %v1153_v49, 0.0 }
 0xde1   :  { %1161 = vadd.xlane.f32.xlu1 %v1160_v56 }
 0xdf1   :  { %1331 = vrot.lane.b32.xlu2 %v7048_v1, %s6536_s25 }
 0xdfa   :  { %1333 = vrot.lane.b32.xlu1 %v7054_v3, %s6536_s25 }
 0xe44   :  { %v1156_v5 = vpop.xlane.xlu1 %1155 }
 0xe45   :  { %v1163_v7 = vmul.f32 %v1156_v5, %v6753_v60 }
 0xe47   :  { %v1166_v17 = vadd.f32 1e-05, %v1163_v7 }
 0xe49   :  { %6162 = vrsqrt.f32 %v1166_v17  ;;  %vm1175_vm7 = vweird.f32 %v1166_v17 }
 0xe4c   :  { %v1159_v9 = vpop.xlane.xlu2 %1158 }
 0xe4d   :  { %v1164_v29 = vmul.f32 %v1159_v9, %v6753_v60 }
 0xe4f   :  { %v6163_v0 = vpop.eup %6162  ;;  %v1167_v61 = vadd.f32 1e-05, %v1164_v29 }
 0xe50   :  { %v1170_v4 = vmul.f32 %v6163_v0, %v1166_v17  ;;  %vm1176_vm6 = vweird.f32 %v6163_v0 }
 0xe51   :  { %6164 = vrsqrt.f32 %v1167_v61  ;;  %vm1177_vm8 = vmor %vm1175_vm7, %vm1176_vm6  ;;  %vm1185_vm10 = vweird.f32 %v1167_v61 }
 0xe52   :  { %v1171_v6 = vmul.f32 %v6163_v0, %v1170_v4 }
 0xe54   :  { %v1172_v10 = vmul.f32 0.5, %v1171_v6  ;;  %v1162_v8 = vpop.xlane.xlu1 %1161  ;;  %v1332_v5 = vpop.permute.xlu2 %1331 }
 0xe55   :  { %v1165_v12 = vmul.f32 %v1162_v8, %v6753_v60 }
 0xe56   :  { %v1173_v13 = vsub.f32 1.5, %v1172_v10 }
 0xe57   :  { %v6165_v16 = vpop.eup %6164  ;;  %v1168_v21 = vadd.f32 1e-05, %v1165_v12 }
 0xe58   :  { %v1174_v22 = vmul.f32 %v6163_v0, %v1173_v13  ;;  %v1180_v24 = vmul.f32 %v6165_v16, %v1167_v61  ;;  %vm1186_vm9 = vweird.f32 %v6165_v16 }
 0xe59   :  { %6166 = vrsqrt.f32 %v1168_v21  ;;  %vm1187_vm0 = vmor %vm1185_vm10, %vm1186_vm9  ;;  %vm1195_vm3 = vweird.f32 %v1168_v21 }
 0xe5a   :  { %v1181_v25 = vmul.f32 %v6165_v16, %v1180_v24  ;;  %v1178_v31 = vsel %vm1177_vm8, %v6163_v0, %v1174_v22 }
 0xe5b   :  { %v1199_v44 = vmul.f32 %v1178_v31, %v1148_v53 }
 0xe5c   :  { %v1182_v18 = vmul.f32 0.5, %v1181_v25 }
 0xe5d   :  { %v1202_v37 = vmul.f32 %v7064_v36, %v1199_v44 }
 0xe5e   :  { %v1183_v39 = vsub.f32 1.5, %v1182_v18 }
 0xe5f   :  { %v6167_v41 = vpop.eup %6166  ;;  %v1205_v50 = vadd.f32 %v7070_v47, %v1202_v37 }
 0xe60   :  { %v1184_v46 = vmul.f32 %v6165_v16, %v1183_v39  ;;  %v1190_v51 = vmul.f32 %v6167_v41, %v1168_v21  ;;  %vm1196_vm2 = vweird.f32 %v6167_v41 }
 0xe61   :  { %v1208_v53 = vsel %vm281_vm13, %v1205_v50, -inf  ;;  %vm1197_vm4 = vmor %vm1195_vm3, %vm1196_vm2 }
 0xe62   :  { %v1191_v54 = vmul.f32 %v6167_v41, %v1190_v51  ;;  %1209 = vmax.xlane.f32.xlu1 %v1208_v53  ;;  %v1188_v42 = vsel %vm1187_vm0, %v6165_v16, %v1184_v46 }
 0xe63   :  { %v1200_v55 = vmul.f32 %v1188_v42, %v1149_v58 }
 0xe64   :  { %v1192_v57 = vmul.f32 0.5, %v1191_v54 }
 0xe65   :  { %v1203_v35 = vmul.f32 %v7064_v36, %v1200_v55 }
 0xe66   :  { %v1193_v23 = vsub.f32 1.5, %v1192_v57 }
 0xe67   :  { %v1206_v14 = vadd.f32 %v7070_v47, %v1203_v35 }
 0xe68   :  { %v1194_v59 = vmul.f32 %v6167_v41, %v1193_v23 }
 0xe69   :  { %v1211_v62 = vsel %vm281_vm13, %v1206_v14, -inf }
 0xe6a   :  { %1212 = vmax.xlane.f32.xlu2 %v1211_v62  ;;  %v1198_v49 = vsel %vm1197_vm4, %v6167_v41, %v1194_v59 }
 0xe6b   :  { %v1201_v56 = vmul.f32 %v1198_v49, %v7040_v40 }
 0xe6c   :  { %v1334_v43 = vpop.permute.xlu1 %1333 }
 0xe6d   :  { %5799 = vmatpush.xpose.msk.msrb.mxu1 %vm281_vm13, %v1334_v43  ;;  %v1204_v58 = vmul.f32 %v7064_v36, %v1201_v56 }
 0xe6f   :  { %v1207_v63 = vadd.f32 %v7070_v47, %v1204_v58 }
 0xe71   :  { %5800 = vmatpush.xpose.msk.msrb.mxu1 %vm281_vm13, %v1332_v5  ;;  %v1214_v7 = vsel %vm367_vm15, %v1207_v63, -inf }
 0xe72   :  { %1215 = vmax.xlane.f32.xlu1 %v1214_v7 }
 0xe74   :  { %5801 = vmatmul.msk.f32.vlgmr.msrb.gmra.mxu1 %vm281_vm13, %v7048_v1 }
 0xe7c   :  { %5802 = vmatmul.msk.f32.gmra.mxu1 %vm281_vm13, %v7054_v3 }
 0xe84   :  { %5803 = vmatmul.msk.f32.gmra.mxu1 %vm281_vm13, %v7030_v28 }
 0xed5   :  { %v1210_v40 = vpop.xlane.xlu1 %1209 }
 0xed6   :  { %v1217_v17 = vsub.f32 %v1205_v50, %v1210_v40 }
 0xed8   :  { %v1220_v9 = vmul.f32 1.442695, %v1217_v17 }
 0xeda   :  { %6168 = vpow2.f32 %v1220_v9 }
 0xedd   :  { %v1213_v29 = vpop.xlane.xlu2 %1212 }
 0xede   :  { %v1218_v0 = vsub.f32 %v1206_v14, %v1213_v29 }
 0xee0   :  { %v6169_v61 = vpop.eup %6168  ;;  %v1222_v4 = vmul.f32 1.442695, %v1218_v0 }
 0xee1   :  { %v1226_v6 = vsel %vm281_vm13, %v6169_v61, 0.0 }
 0xee2   :  { %6170 = vpow2.f32 %v1222_v4  ;;  %1227 = vadd.xlane.f32.xlu2 %v1226_v6 }
 0xee5   :  { %v1216_v10 = vpop.xlane.xlu1 %1215 }
 0xee6   :  { %v1219_v8 = vsub.f32 %v1207_v63, %v1216_v10 }
 0xee8   :  { %v6171_v12 = vpop.eup %6170  ;;  %v1224_v13 = vmul.f32 1.442695, %v1219_v8 }
 0xee9   :  { %v1229_v16 = vsel %vm281_vm13, %v6171_v12, 0.0 }
 0xeea   :  { %6172 = vpow2.f32 %v1224_v13  ;;  %1230 = vadd.xlane.f32.xlu1 %v1229_v16 }
 0xef0   :  { %v6173_v21 = vpop.eup %6172 }
 0xef1   :  { %v1232_v22 = vsel %vm367_vm15, %v6173_v21, 0.0  ;;  %v1366_v54 = vpop.f32.mrf.mxu1 }
 0xef2   :  { %1233 = vadd.xlane.f32.xlu2 %v1232_v22 }
 0xef9   :  { %v1369_v42 = vpop.f32.mrf.mxu1 }
 0xf01   :  { %v1372_v55 = vpop.f32.mrf.mxu1 }
 0xf03   :  { %1277 = vrot.lane.b32.xlu1 %v6687_v30, %s6547_s16 }
 0xf0a   :  { %6014 = vrot.lane.b32.xlu2 %v6809_v45, %s6547_s16 }
 0xf55   :  { %v1228_v24 = vpop.xlane.xlu2 %1227 }
 0xf56   :  { %6174 = vrcp.f32 %v1228_v24 }
 0xf5c   :  { %v6175_v25 = vpop.eup %6174 }
 0xf5d   :  { %v1231_v31 = vpop.xlane.xlu1 %1230  ;;  %v1238_v44 = vmul.f32 %v6175_v25, %v6169_v61 }
 0xf5e   :  { %6176 = vrcp.f32 %v1231_v31 }
 0xf5f   :  { %1241 = vxpose.xlu0.b32.start [1/3] (short) (narrow) %v1238_v44, 8 }
 0xf64   :  { %v6177_v18 = vpop.eup %6176 }
 0xf65   :  { %v1234_v37 = vpop.xlane.xlu2 %1233  ;;  %v1239_v39 = vmul.f32 %v6177_v18, %v6171_v12 }
 0xf66   :  { %6178 = vrcp.f32 %v1234_v37 }
 0xf67   :  { %1242 = vxpose.xlu0.b32.cont [2/3] (short) (narrow) %v1239_v39, 8 }
 0xf6c   :  { %v6179_v41 = vpop.eup %6178 }
 0xf6d   :  { %v1240_v50 = vmul.f32 %v6179_v41, %v6173_v21  ;;  %v6015_v46 = vpop.permute.xlu2 %6014 }
 0xf6e   :  { %v6016_v51 = vunpack.i.l.bf16 %v6015_v46  ;;  %v6017_v45 = vunpack.i.h.bf16 %v6015_v46 }
 0xf6f   :  { %1243 = vxpose.xlu0.b32.end [3/3] (short) (narrow) %v1240_v50, 8 }
 0xf75   :  { %v1278_v30 = vpop.permute.xlu1 %1277 }
 0xf76   :  { %5796 = vmatpush.msk.msrb.mxu0 %vm331_vm12, %v1278_v30 }
 0xf78   :  { %1300 = vmatpush.msrb.mxu0 %v6016_v51 }
 0xf7a   :  { %1301 = vmatpush.msrb.mxu0 %v6017_v45 }
 0xf7c   :  { %5804 = vmatpush.msk.msra.mxu0 %vm331_vm12, %v6996_v33 }
 0xf7e   :  { %1398 = vmatpush.msra.mxu0 %v7003_v38 }
 0xf80   :  { %1399 = vmatpush.msra.mxu0 %v7009_v20 }
0x1003   :  { %v1257_v53 = vpop.trf.xlu0 }
0x1004   :  { %5797 = vmatmul.msk.f32.vlgmr.msrb.gmra.mxu0 %vm321_vm14, %v1257_v53 }
0x100c   :  { %5805 = vmatmul.msk.f32.vlgmr.msra.gmra.mxu0 %vm321_vm14, %v1366_v54 }
0x1014   :  { %5806 = vmatmul.msk.f32.gmra.mxu0 %vm321_vm14, %v1369_v42 }
0x101c   :  { %5807 = vmatmul.msk.f32.gmra.mxu0 %vm321_vm14, %v1372_v55 }
0x1081   :  { %v7105_v57 = vpop.f32.mrf.mxu0 }
0x1089   :  { %v1401_v35 = vpop.f32.mrf.mxu0 }
0x108a   :  { %v1402_v23 = vadd.f32 %v7021_v34, %v1401_v35 }
0x108c   :  { %v1410_v14 = vsel %vm281_vm13, %v1402_v23, 0.0 }
0x108d   :  { %1411 = vadd.xlane.f32.xlu2 %v1410_v14 }
0x1091   :  { %v1404_v59 = vpop.f32.mrf.mxu0 }
0x1092   :  { %v1405_v62 = vadd.f32 %v7021_v34, %v1404_v59 }
0x1094   :  { %v1413_v49 = vsel %vm281_vm13, %v1405_v62, 0.0 }
0x1095   :  { %1414 = vadd.xlane.f32.xlu1 %v1413_v49 }
0x1099   :  { %v1407_v56 = vpop.f32.mrf.mxu0 }
0x109a   :  { %v1408_v43 = vadd.f32 %v7021_v34, %v1407_v56 }
0x109c   :  { %v1416_v58 = vsel %vm367_vm15, %v1408_v43, 0.0 }
0x109d   :  { %1417 = vadd.xlane.f32.xlu2 %v1416_v58 }
0x10b5   :  { %1588 = vrot.lane.b32.xlu2 %v7054_v3, %s6537_s11 }
0x10bd   :  { %1580 = vrot.lane.b32.xlu2 %v7048_v1, %s6539_s12 }
0x1100   :  { %v1412_v63 = vpop.xlane.xlu2 %1411 }
0x1101   :  { %v1419_v5 = vmul.f32 %v1412_v63, %v6753_v60 }
0x1103   :  { %v1422_v7 = vsub.f32 %v1402_v23, %v1419_v5 }
0x1105   :  { %v1425_v40 = vmul.f32 %v1422_v7, %v1422_v7 }
0x1107   :  { %v1428_v17 = vsel %vm281_vm13, %v1425_v40, 0.0 }
0x1108   :  { %v1415_v9 = vpop.xlane.xlu1 %1414  ;;  %1429 = vadd.xlane.f32.xlu1 %v1428_v17 }
0x1109   :  { %v1420_v29 = vmul.f32 %v1415_v9, %v6753_v60 }
0x110b   :  { %v1423_v0 = vsub.f32 %v1405_v62, %v1420_v29 }
0x110d   :  { %v1426_v61 = vmul.f32 %v1423_v0, %v1423_v0 }
0x110f   :  { %v1431_v4 = vsel %vm281_vm13, %v1426_v61, 0.0 }
0x1110   :  { %1432 = vadd.xlane.f32.xlu0 %v1431_v4  ;;  %v1418_v6 = vpop.xlane.xlu2 %1417 }
0x1111   :  { %v1421_v10 = vmul.f32 %v1418_v6, %v6753_v60 }
0x1113   :  { %v7122_v8 = vsub.f32 %v1408_v43, %v1421_v10 }
0x1115   :  { %v1427_v12 = vmul.f32 %v7122_v8, %v7122_v8 }
0x1117   :  { %v1434_v13 = vsel %vm367_vm15, %v1427_v12, 0.0 }
0x1118   :  { %1435 = vadd.xlane.f32.xlu2 %v1434_v13  ;;  %v1589_v16 = vpop.permute.xlu2 %1588 }
0x1120   :  { %v1581_v25 = vpop.permute.xlu2 %1580 }
0x1121   :  { %1590 = vrot.lane.b32.xlu1 %v7030_v28, %s6537_s11 }
0x1129   :  { %1586 = vrot.lane.b32.xlu1 %v7048_v1, %s6537_s11 }
0x1130   :  { %1584 = vrot.lane.b32.xlu2 %v7030_v28, %s6539_s12 }
0x1131   :  { %1582 = vrot.lane.b32.xlu1 %v7054_v3, %s6539_s12 }
0x117b   :  { %v1430_v21 = vpop.xlane.xlu1 %1429 }
0x117c   :  { %v1437_v22 = vmul.f32 %v1430_v21, %v6753_v60 }
0x117e   :  { %v1440_v24 = vadd.f32 1e-05, %v1437_v22 }
0x1180   :  { %6180 = vrsqrt.f32 %v1440_v24  ;;  %vm1449_vm7 = vweird.f32 %v1440_v24 }
0x1183   :  { %v1433_v31 = vpop.xlane.xlu0 %1432 }
0x1184   :  { %v1438_v44 = vmul.f32 %v1433_v31, %v6753_v60 }
0x1186   :  { %v6181_v18 = vpop.eup %6180  ;;  %v1441_v37 = vadd.f32 1e-05, %v1438_v44 }
0x1187   :  { %v1444_v39 = vmul.f32 %v6181_v18, %v1440_v24  ;;  %vm1450_vm6 = vweird.f32 %v6181_v18 }
0x1188   :  { %6182 = vrsqrt.f32 %v1441_v37  ;;  %vm1451_vm8 = vmor %vm1449_vm7, %vm1450_vm6  ;;  %vm1459_vm10 = vweird.f32 %v1441_v37 }
0x1189   :  { %v1445_v41 = vmul.f32 %v6181_v18, %v1444_v39 }
0x118b   :  { %v1446_v50 = vmul.f32 0.5, %v1445_v41  ;;  %v1436_v46 = vpop.xlane.xlu2 %1435 }
0x118c   :  { %v1439_v30 = vmul.f32 %v1436_v46, %v6753_v60 }
0x118d   :  { %v1447_v51 = vsub.f32 1.5, %v1446_v50 }
0x118e   :  { %v6183_v45 = vpop.eup %6182  ;;  %v1442_v53 = vadd.f32 1e-05, %v1439_v30 }
0x118f   :  { %v1448_v54 = vmul.f32 %v6181_v18, %v1447_v51  ;;  %v1454_v42 = vmul.f32 %v6183_v45, %v1441_v37  ;;  %vm1460_vm9 = vweird.f32 %v6183_v45 }
0x1190   :  { %6184 = vrsqrt.f32 %v1442_v53  ;;  %vm1461_vm0 = vmor %vm1459_vm10, %vm1460_vm9  ;;  %vm1469_vm3 = vweird.f32 %v1442_v53 }
0x1191   :  { %v1455_v55 = vmul.f32 %v6183_v45, %v1454_v42  ;;  %v1452_v35 = vsel %vm1451_vm8, %v6181_v18, %v1448_v54 }
0x1192   :  { %v1473_v23 = vmul.f32 %v1452_v35, %v1422_v7 }
0x1193   :  { %v1456_v14 = vmul.f32 0.5, %v1455_v55  ;;  %v1591_v59 = vpop.permute.xlu1 %1590  ;;  %v1585_v31 = vpop.permute.xlu2 %1584  ;;  %v7161_v55 = vpack.i.bf16 %v7048_v1, %v7054_v3 }
0x1194   :  { %5810 = vmatpush.xpose.msk.msra.mxu2 %vm281_vm13, %v1591_v59  ;;  %v1476_v62 = vmul.f32 %v7064_v36, %v1473_v23 }
0x1195   :  { %v1457_v49 = vsub.f32 1.5, %v1456_v14 }
0x1196   :  { %v6185_v56 = vpop.eup %6184  ;;  %v1479_v43 = vadd.f32 %v7070_v47, %v1476_v62 }
0x1197   :  { %v1458_v58 = vmul.f32 %v6183_v45, %v1457_v49  ;;  %v1464_v63 = vmul.f32 %v6185_v56, %v1442_v53  ;;  %vm1470_vm2 = vweird.f32 %v6185_v56 }
0x1198   :  { %5811 = vmatpush.xpose.msk.msra.mxu2 %vm281_vm13, %v1589_v16  ;;  %v1482_v5 = vsel %vm281_vm13, %v1479_v43, -inf  ;;  %vm1471_vm4 = vmor %vm1469_vm3, %vm1470_vm2 }
0x1199   :  { %v1465_v7 = vmul.f32 %v6185_v56, %v1464_v63  ;;  %1483 = vmax.xlane.f32.xlu1 %v1482_v5  ;;  %v1462_v40 = vsel %vm1461_vm0, %v6183_v45, %v1458_v58 }
0x119a   :  { %v1474_v17 = vmul.f32 %v1462_v40, %v1423_v0 }
0x119b   :  { %v1466_v9 = vmul.f32 0.5, %v1465_v7  ;;  %v1587_v29 = vpop.permute.xlu1 %1586 }
0x119c   :  { %5812 = vmatpush.xpose.msk.msra.mxu2 %vm281_vm13, %v1587_v29  ;;  %v1477_v61 = vmul.f32 %v7064_v36, %v1474_v17 }
0x119d   :  { %v1467_v4 = vsub.f32 1.5, %v1466_v9 }
0x119e   :  { %v1480_v6 = vadd.f32 %v7070_v47, %v1477_v61 }
0x119f   :  { %v1468_v10 = vmul.f32 %v6185_v56, %v1467_v4  ;;  %5813 = vmatmul.msk.f32.vlgmr.msra.gmra.mxu2 %vm281_vm13, %v1581_v25 }
0x11a0   :  { %v1485_v12 = vsel %vm281_vm13, %v1480_v6, -inf }
0x11a1   :  { %1486 = vmax.xlane.f32.xlu2 %v1485_v12  ;;  %v1472_v13 = vsel %vm1471_vm4, %v6185_v56, %v1468_v10 }
0x11a2   :  { %v1475_v0 = vmul.f32 %v1472_v13, %v7122_v8 }
0x11a3   :  { %v1583_v21 = vpop.permute.xlu1 %1582 }
0x11a4   :  { %v1478_v16 = vmul.f32 %v7064_v36, %v1475_v0 }
0x11a6   :  { %v1481_v22 = vadd.f32 %v7070_v47, %v1478_v16 }
0x11a7   :  { %5814 = vmatmul.msk.f32.gmra.mxu2 %vm281_vm13, %v1583_v21 }
0x11a8   :  { %v1488_v24 = vsel %vm367_vm15, %v1481_v22, -inf }
0x11a9   :  { %1489 = vmax.xlane.f32.xlu1 %v1488_v24 }
0x11af   :  { %5815 = vmatmul.msk.f32.gmra.mxu2 %vm281_vm13, %v1585_v31 }
0x120c   :  { %v1484_v25 = vpop.xlane.xlu1 %1483 }
0x120d   :  { %v1491_v44 = vsub.f32 %v1479_v43, %v1484_v25 }
0x120f   :  { %v1494_v18 = vmul.f32 1.442695, %v1491_v44 }
0x1211   :  { %6186 = vpow2.f32 %v1494_v18 }
0x1214   :  { %v1487_v37 = vpop.xlane.xlu2 %1486 }
0x1215   :  { %v1492_v39 = vsub.f32 %v1480_v6, %v1487_v37 }
0x1217   :  { %v6187_v8 = vpop.eup %6186  ;;  %v1496_v41 = vmul.f32 1.442695, %v1492_v39 }
0x1218   :  { %v1500_v50 = vsel %vm281_vm13, %v6187_v8, 0.0 }
0x1219   :  { %6188 = vpow2.f32 %v1496_v41  ;;  %1501 = vadd.xlane.f32.xlu2 %v1500_v50 }
0x121c   :  { %v1490_v46 = vpop.xlane.xlu1 %1489 }
0x121d   :  { %v1493_v30 = vsub.f32 %v1481_v22, %v1490_v46 }
0x121f   :  { %v6189_v51 = vpop.eup %6188  ;;  %v1498_v45 = vmul.f32 1.442695, %v1493_v30 }
0x1220   :  { %v1503_v53 = vsel %vm281_vm13, %v6189_v51, 0.0 }
0x1221   :  { %6190 = vpow2.f32 %v1498_v45  ;;  %1504 = vadd.xlane.f32.xlu1 %v1503_v53 }
0x1222   :  { %v1621_v9 = vpop.f32.mrf.mxu2 }
0x1227   :  { %v6191_v54 = vpop.eup %6190 }
0x1228   :  { %v1506_v42 = vsel %vm367_vm15, %v6191_v54, 0.0 }
0x1229   :  { %1507 = vadd.xlane.f32.xlu2 %v1506_v42 }
0x122a   :  { %v1624_v29 = vpop.f32.mrf.mxu2 }
0x1232   :  { %v1627_v61 = vpop.f32.mrf.mxu2 }
0x123a   :  { %1551 = vrot.lane.b32.xlu1 %v7030_v28, %s6540_s17 }
0x1241   :  { %6019 = vrot.lane.b32.xlu2 %v7161_v55, %s6540_s17 }
0x128c   :  { %v1502_v35 = vpop.xlane.xlu2 %1501 }
0x128d   :  { %6192 = vrcp.f32 %v1502_v35 }
0x1293   :  { %v6193_v23 = vpop.eup %6192 }
0x1294   :  { %v1505_v14 = vpop.xlane.xlu1 %1504  ;;  %v1512_v59 = vmul.f32 %v6193_v23, %v6187_v8 }
0x1295   :  { %6194 = vrcp.f32 %v1505_v14 }
0x1296   :  { %1515 = vxpose.xlu0.b32.start [1/3] (short) (narrow) %v1512_v59, 8 }
0x129b   :  { %v6195_v62 = vpop.eup %6194 }
0x129c   :  { %v1508_v49 = vpop.xlane.xlu2 %1507  ;;  %v1513_v56 = vmul.f32 %v6195_v62, %v6189_v51 }
0x129d   :  { %6196 = vrcp.f32 %v1508_v49 }
0x129e   :  { %1516 = vxpose.xlu0.b32.cont [2/3] (short) (narrow) %v1513_v56, 8 }
0x12a3   :  { %v6197_v43 = vpop.eup %6196 }
0x12a4   :  { %v1514_v58 = vmul.f32 %v6197_v43, %v6191_v54  ;;  %v6020_v63 = vpop.permute.xlu2 %6019 }
0x12a5   :  { %v6021_v7 = vunpack.i.l.bf16 %v6020_v63  ;;  %v6022_v40 = vunpack.i.h.bf16 %v6020_v63 }
0x12a6   :  { %1517 = vxpose.xlu0.b32.end [3/3] (short) (narrow) %v1514_v58, 8 }
0x12ac   :  { %v1552_v5 = vpop.permute.xlu1 %1551 }
0x12ad   :  { %5808 = vmatpush.msk.msra.mxu3 %vm331_vm12, %v1552_v5 }
0x12af   :  { %1574 = vmatpush.msra.mxu3 %v6021_v7 }
0x12b1   :  { %1575 = vmatpush.msra.mxu3 %v6022_v40 }
0x12b3   :  { %5816 = vmatpush.msk.msrb.mxu3 %vm331_vm12, %v6996_v33 }
0x12b5   :  { %1653 = vmatpush.msrb.mxu3 %v7003_v38 }
0x12b7   :  { %1654 = vmatpush.msrb.mxu3 %v7009_v20 }
0x133a   :  { %v1531_v17 = vpop.trf.xlu0 }
0x133b   :  { %5809 = vmatmul.msk.f32.vlgmr.msra.gmra.mxu3 %vm321_vm14, %v1531_v17 }
0x1343   :  { %5817 = vmatmul.msk.f32.vlgmr.msrb.gmra.mxu3 %vm321_vm14, %v1621_v9 }
0x134b   :  { %5818 = vmatmul.msk.f32.gmra.mxu3 %vm321_vm14, %v1624_v29 }
0x1353   :  { %5819 = vmatmul.msk.f32.gmra.mxu3 %vm321_vm14, %v1627_v61 }
0x13be   :  { %v7174_v4 = vpop.f32.mrf.mxu3 }
0x13c6   :  { %v1656_v6 = vpop.f32.mrf.mxu3 }
0x13c7   :  { %v1657_v10 = vadd.f32 %v7021_v34, %v1656_v6 }
0x13c9   :  { %v1665_v12 = vsel %vm281_vm13, %v1657_v10, 0.0 }
0x13ca   :  { %1666 = vadd.xlane.f32.xlu1 %v1665_v12 }
0x13ce   :  { %v1659_v13 = vpop.f32.mrf.mxu3 }
0x13cf   :  { %v1660_v0 = vadd.f32 %v7021_v34, %v1659_v13 }
0x13d1   :  { %v1668_v16 = vsel %vm281_vm13, %v1660_v0, 0.0 }
0x13d2   :  { %1669 = vadd.xlane.f32.xlu2 %v1668_v16 }
0x13d6   :  { %v1662_v21 = vpop.f32.mrf.mxu3 }
0x13d7   :  { %v1663_v22 = vadd.f32 %v7021_v34, %v1662_v21 }
0x13d9   :  { %v1671_v24 = vsel %vm367_vm15, %v1663_v22, 0.0 }
0x13da   :  { %1672 = vadd.xlane.f32.xlu0 %v1671_v24 }
0x13e3   :  { %1843 = vrot.lane.b32.xlu1 %v7054_v3, %s6541_s18 }
0x13ea   :  { %1845 = vrot.lane.b32.xlu2 %v7030_v28, %s6541_s18 }
0x13eb   :  { %1835 = vrot.lane.b32.xlu1 %v7048_v1, %s6542_s19 }
0x13ee   :  { %6024 = vrot.lane.b32.xlu0 %v7161_v55, %s6543_s24 }
0x13f2   :  { %1841 = vrot.lane.b32.xlu2 %v7048_v1, %s6541_s18 }
0x143d   :  { %v1667_v31 = vpop.xlane.xlu1 %1666 }
0x143e   :  { %v1674_v25 = vmul.f32 %v1667_v31, %v6753_v60 }
0x1440   :  { %v1677_v44 = vsub.f32 %v1657_v10, %v1674_v25 }
0x1442   :  { %v1680_v18 = vmul.f32 %v1677_v44, %v1677_v44 }
0x1444   :  { %v1683_v37 = vsel %vm281_vm13, %v1680_v18, 0.0 }
0x1445   :  { %v1670_v39 = vpop.xlane.xlu2 %1669  ;;  %1684 = vadd.xlane.f32.xlu1 %v1683_v37 }
0x1446   :  { %v1675_v8 = vmul.f32 %v1670_v39, %v6753_v60 }
0x1448   :  { %v7195_v41 = vsub.f32 %v1660_v0, %v1675_v8 }
0x144a   :  { %v1681_v50 = vmul.f32 %v7195_v41, %v7195_v41 }
0x144c   :  { %v1686_v46 = vsel %vm281_vm13, %v1681_v50, 0.0 }
0x144d   :  { %v1673_v30 = vpop.xlane.xlu0 %1672  ;;  %1687 = vadd.xlane.f32.xlu2 %v1686_v46  ;;  %v1846_v51 = vpop.permute.xlu2 %1845 }
0x144e   :  { %v1676_v45 = vmul.f32 %v1673_v30, %v6753_v60  ;;  %5822 = vmatpush.xpose.msk.msrb.mxu0 %vm281_vm13, %v1846_v51 }
0x1450   :  { %v7202_v53 = vsub.f32 %v1663_v22, %v1676_v45 }
0x1452   :  { %v1682_v54 = vmul.f32 %v7202_v53, %v7202_v53 }
0x1454   :  { %v1689_v42 = vsel %vm367_vm15, %v1682_v54, 0.0 }
0x1455   :  { %1690 = vadd.xlane.f32.xlu1 %v1689_v42  ;;  %v1844_v35 = vpop.permute.xlu1 %1843  ;;  %v1842_v23 = vpop.permute.xlu2 %1841 }
0x1456   :  { %5823 = vmatpush.xpose.msk.msrb.mxu0 %vm281_vm13, %v1844_v35 }
0x145a   :  { %5824 = vmatpush.xpose.msk.msrb.mxu0 %vm281_vm13, %v1842_v23 }
0x145d   :  { %v1836_v14 = vpop.permute.xlu1 %1835 }
0x145e   :  { %5825 = vmatmul.msk.f32.vlgmr.msrb.gmra.mxu0 %vm281_vm13, %v1836_v14 }
0x1465   :  { %1837 = vrot.lane.b32.xlu2 %v7054_v3, %s6542_s19 }
0x146e   :  { %1839 = vrot.lane.b32.xlu1 %v7030_v28, %s6542_s19 }
0x14b8   :  { %v1685_v59 = vpop.xlane.xlu1 %1684 }
0x14b9   :  { %v1692_v62 = vmul.f32 %v1685_v59, %v6753_v60 }
0x14bb   :  { %v1695_v49 = vadd.f32 1e-05, %v1692_v62 }
0x14bd   :  { %6198 = vrsqrt.f32 %v1695_v49  ;;  %vm1704_vm7 = vweird.f32 %v1695_v49 }
0x14c0   :  { %v1688_v56 = vpop.xlane.xlu2 %1687 }
0x14c1   :  { %v1693_v43 = vmul.f32 %v1688_v56, %v6753_v60 }
0x14c3   :  { %v6199_v58 = vpop.eup %6198  ;;  %v1696_v63 = vadd.f32 1e-05, %v1693_v43 }
0x14c4   :  { %v1699_v5 = vmul.f32 %v6199_v58, %v1695_v49  ;;  %vm1705_vm6 = vweird.f32 %v6199_v58 }
0x14c5   :  { %6200 = vrsqrt.f32 %v1696_v63  ;;  %vm1706_vm8 = vmor %vm1704_vm7, %vm1705_vm6  ;;  %vm1714_vm10 = vweird.f32 %v1696_v63 }
0x14c6   :  { %v1700_v7 = vmul.f32 %v6199_v58, %v1699_v5 }
0x14c8   :  { %v1701_v40 = vmul.f32 0.5, %v1700_v7  ;;  %v1838_v17 = vpop.permute.xlu2 %1837  ;;  %v1691_v9 = vpop.xlane.xlu1 %1690 }
0x14c9   :  { %v1694_v29 = vmul.f32 %v1691_v9, %v6753_v60  ;;  %5826 = vmatmul.msk.f32.gmra.mxu0 %vm281_vm13, %v1838_v17 }
0x14ca   :  { %v1702_v61 = vsub.f32 1.5, %v1701_v40 }
0x14cb   :  { %v6201_v6 = vpop.eup %6200  ;;  %v1697_v10 = vadd.f32 1e-05, %v1694_v29 }
0x14cc   :  { %v1703_v12 = vmul.f32 %v6199_v58, %v1702_v61  ;;  %v1709_v13 = vmul.f32 %v6201_v6, %v1696_v63  ;;  %vm1715_vm9 = vweird.f32 %v6201_v6 }
0x14cd   :  { %6202 = vrsqrt.f32 %v1697_v10  ;;  %vm1716_vm0 = vmor %vm1714_vm10, %vm1715_vm9  ;;  %vm1724_vm3 = vweird.f32 %v1697_v10 }
0x14ce   :  { %v1710_v0 = vmul.f32 %v6201_v6, %v1709_v13  ;;  %v1707_v16 = vsel %vm1706_vm8, %v6199_v58, %v1703_v12 }
0x14cf   :  { %v1728_v21 = vmul.f32 %v1707_v16, %v1677_v44 }
0x14d0   :  { %v1711_v22 = vmul.f32 0.5, %v1710_v0 }
0x14d1   :  { %v1731_v24 = vmul.f32 %v7064_v36, %v1728_v21 }
0x14d2   :  { %v1712_v31 = vsub.f32 1.5, %v1711_v22  ;;  %v6025_v22 = vpop.permute.xlu0 %6024 }
0x14d3   :  { %v6203_v25 = vpop.eup %6202  ;;  %v1734_v18 = vadd.f32 %v7070_v47, %v1731_v24 }
0x14d4   :  { %v1713_v37 = vmul.f32 %v6201_v6, %v1712_v31  ;;  %v1719_v39 = vmul.f32 %v6203_v25, %v1697_v10  ;;  %vm1725_vm2 = vweird.f32 %v6203_v25 }
0x14d5   :  { %v1737_v8 = vsel %vm281_vm13, %v1734_v18, -inf  ;;  %vm1726_vm4 = vmor %vm1724_vm3, %vm1725_vm2 }
0x14d6   :  { %v1720_v50 = vmul.f32 %v6203_v25, %v1719_v39  ;;  %1738 = vmax.xlane.f32.xlu2 %v1737_v8  ;;  %v1717_v46 = vsel %vm1716_vm0, %v6201_v6, %v1713_v37  ;;  %v6026_v37 = vunpack.i.l.bf16 %v6025_v22  ;;  %v6027_v39 = vunpack.i.h.bf16 %v6025_v22 }
0x14d7   :  { %v1729_v30 = vmul.f32 %v1717_v46, %v7195_v41 }
0x14d8   :  { %v1721_v44 = vmul.f32 0.5, %v1720_v50 }
0x14d9   :  { %v1732_v51 = vmul.f32 %v7064_v36, %v1729_v30 }
0x14da   :  { %v1722_v45 = vsub.f32 1.5, %v1721_v44 }
0x14db   :  { %v1735_v54 = vadd.f32 %v7070_v47, %v1732_v51  ;;  %v1876_v30 = vpop.f32.mrf.mxu0 }
0x14dc   :  { %v1723_v42 = vmul.f32 %v6203_v25, %v1722_v45 }
0x14dd   :  { %v1740_v35 = vsel %vm281_vm13, %v1735_v54, -inf }
0x14de   :  { %1741 = vmax.xlane.f32.xlu1 %v1740_v35  ;;  %v1727_v23 = vsel %vm1726_vm4, %v6203_v25, %v1723_v42 }
0x14df   :  { %v1730_v14 = vmul.f32 %v1727_v23, %v7202_v53 }
0x14e0   :  { %v1840_v59 = vpop.permute.xlu1 %1839 }
0x14e1   :  { %5827 = vmatmul.msk.f32.gmra.mxu0 %vm281_vm13, %v1840_v59  ;;  %v1733_v41 = vmul.f32 %v7064_v36, %v1730_v14 }
0x14e3   :  { %v1736_v62 = vadd.f32 %v7070_v47, %v1733_v41 }
0x14e5   :  { %v1743_v49 = vsel %vm367_vm15, %v1736_v62, -inf }
0x14e6   :  { %1744 = vmax.xlane.f32.xlu2 %v1743_v49 }
0x1549   :  { %v1739_v56 = vpop.xlane.xlu2 %1738 }
0x154a   :  { %v1746_v43 = vsub.f32 %v1734_v18, %v1739_v56 }
0x154c   :  { %v1749_v58 = vmul.f32 1.442695, %v1746_v43 }
0x154e   :  { %6204 = vpow2.f32 %v1749_v58 }
0x1551   :  { %v1742_v63 = vpop.xlane.xlu1 %1741 }
0x1552   :  { %v1747_v5 = vsub.f32 %v1735_v54, %v1742_v63 }
0x1554   :  { %v6205_v7 = vpop.eup %6204  ;;  %v1751_v40 = vmul.f32 1.442695, %v1747_v5 }
0x1555   :  { %v1755_v53 = vsel %vm281_vm13, %v6205_v7, 0.0 }
0x1556   :  { %6206 = vpow2.f32 %v1751_v40  ;;  %1756 = vadd.xlane.f32.xlu1 %v1755_v53 }
0x1559   :  { %v1745_v17 = vpop.xlane.xlu2 %1744 }
0x155a   :  { %v1748_v9 = vsub.f32 %v1736_v62, %v1745_v17 }
0x155c   :  { %v6207_v29 = vpop.eup %6206  ;;  %v1753_v61 = vmul.f32 1.442695, %v1748_v9 }
0x155d   :  { %v1758_v6 = vsel %vm281_vm13, %v6207_v29, 0.0 }
0x155e   :  { %6208 = vpow2.f32 %v1753_v61  ;;  %1759 = vadd.xlane.f32.xlu2 %v1758_v6 }
0x1564   :  { %v6209_v10 = vpop.eup %6208 }
0x1565   :  { %v1761_v12 = vsel %vm367_vm15, %v6209_v10, 0.0 }
0x1566   :  { %1762 = vadd.xlane.f32.xlu1 %v1761_v12 }
0x1576   :  { %1806 = vrot.lane.b32.xlu2 %v7030_v28, %s6543_s24 }
0x15c9   :  { %v1757_v13 = vpop.xlane.xlu1 %1756 }
0x15ca   :  { %6210 = vrcp.f32 %v1757_v13 }
0x15d0   :  { %v6211_v0 = vpop.eup %6210 }
0x15d1   :  { %v1760_v16 = vpop.xlane.xlu2 %1759  ;;  %v1767_v21 = vmul.f32 %v6211_v0, %v6205_v7 }
0x15d2   :  { %6212 = vrcp.f32 %v1760_v16 }
0x15d3   :  { %1770 = vxpose.xlu1.b32.start [1/3] (short) (narrow) %v1767_v21, 8 }
0x15d8   :  { %v6213_v24 = vpop.eup %6212 }
0x15d9   :  { %v1807_v31 = vpop.permute.xlu2 %1806  ;;  %v1763_v25 = vpop.xlane.xlu1 %1762  ;;  %v1768_v18 = vmul.f32 %v6213_v24, %v6207_v29 }
0x15da   :  { %6214 = vrcp.f32 %v1763_v25  ;;  %5820 = vmatpush.msk.msra.mxu1 %vm331_vm12, %v1807_v31 }
0x15db   :  { %1771 = vxpose.xlu1.b32.cont [2/3] (short) (narrow) %v1768_v18, 8 }
0x15dc   :  { %1829 = vmatpush.msra.mxu1 %v6026_v37 }
0x15de   :  { %1830 = vmatpush.msra.mxu1 %v6027_v39 }
0x15e0   :  { %5828 = vmatpush.msk.msrb.mxu1 %vm331_vm12, %v6996_v33  ;;  %v6215_v8 = vpop.eup %6214  ;;  %v1879_v33 = vpop.f32.mrf.mxu0 }
0x15e1   :  { %v1769_v50 = vmul.f32 %v6215_v8, %v6209_v10 }
0x15e2   :  { %1908 = vmatpush.msrb.mxu1 %v7003_v38 }
0x15e3   :  { %1772 = vxpose.xlu1.b32.end [3/3] (short) (narrow) %v1769_v50, 8 }
0x15e4   :  { %1909 = vmatpush.msrb.mxu1 %v7009_v20 }
0x15e8   :  { %v1882_v44 = vpop.f32.mrf.mxu0 }
0x163d   :  { %2096 = vrot.lane.b32.xlu1 %v7048_v1, %s6544_s26 }
0x1645   :  { %6029 = vrot.lane.b32.xlu1 %v7161_v55, %s6546_s28 }
0x1677   :  { %v1786_v46 = vpop.trf.xlu1 }
0x1678   :  { %5821 = vmatmul.msk.f32.vlgmr.msra.gmra.mxu1 %vm321_vm14, %v1786_v46 }
0x1680   :  { %5829 = vmatmul.msk.f32.vlgmr.msrb.gmra.mxu1 %vm321_vm14, %v1876_v30 }
0x1688   :  { %5830 = vmatmul.msk.f32.gmra.mxu1 %vm321_vm14, %v1879_v33 }
0x1690   :  { %5831 = vmatmul.msk.f32.gmra.mxu1 %vm321_vm14, %v1882_v44 }
0x16af   :  { %v2097_v6 = vpop.permute.xlu1 %2096 }
0x16f5   :  { %v7248_v38 = vpop.f32.mrf.mxu1 }
0x16fd   :  { %v1911_v20 = vpop.f32.mrf.mxu1 }
0x16fe   :  { %v1912_v51 = vadd.f32 %v7021_v34, %v1911_v20 }
0x1700   :  { %v1920_v45 = vsel %vm281_vm13, %v1912_v51, 0.0 }
0x1701   :  { %1921 = vadd.xlane.f32.xlu0 %v1920_v45 }
0x1705   :  { %v1914_v54 = vpop.f32.mrf.mxu1 }
0x1706   :  { %v1915_v42 = vadd.f32 %v7021_v34, %v1914_v54 }
0x1708   :  { %v1923_v35 = vsel %vm281_vm13, %v1915_v42, 0.0 }
0x1709   :  { %1924 = vadd.xlane.f32.xlu2 %v1923_v35 }
0x170d   :  { %v1917_v23 = vpop.f32.mrf.mxu1 }
0x170e   :  { %v1918_v14 = vadd.f32 %v7021_v34, %v1917_v23 }
0x1710   :  { %v1926_v59 = vsel %vm367_vm15, %v1918_v14, 0.0 }
0x1711   :  { %1927 = vadd.xlane.f32.xlu2 %v1926_v59 }
0x1715   :  { %2098 = vrot.lane.b32.xlu0 %v7054_v3, %s6544_s26 }
0x171d   :  { %2090 = vrot.lane.b32.xlu0 %v7048_v1, %s6545_s27 }
0x1729   :  { %2100 = vrot.lane.b32.xlu2 %v7030_v28, %s6544_s26 }
0x1774   :  { %v1922_v41 = vpop.xlane.xlu0 %1921 }
0x1775   :  { %v1929_v62 = vmul.f32 %v1922_v41, %v6753_v60 }
0x1777   :  { %v1932_v49 = vsub.f32 %v1912_v51, %v1929_v62 }
0x1779   :  { %v1935_v56 = vmul.f32 %v1932_v49, %v1932_v49 }
0x177b   :  { %v1938_v43 = vsel %vm281_vm13, %v1935_v56, 0.0 }
0x177c   :  { %v1925_v34 = vpop.xlane.xlu2 %1924  ;;  %1939 = vadd.xlane.f32.xlu0 %v1938_v43 }
0x177d   :  { %v1930_v58 = vmul.f32 %v1925_v34, %v6753_v60 }
0x177f   :  { %v7265_v63 = vsub.f32 %v1915_v42, %v1930_v58 }
0x1781   :  { %v1936_v5 = vmul.f32 %v7265_v63, %v7265_v63 }
0x1783   :  { %v1941_v1 = vsel %vm281_vm13, %v1936_v5, 0.0  ;;  %v7301_v5 = vld [vmem:[%s8613_s3 + $0x52] ss:$0 sm:$0xff] }
0x1784   :  { %1942 = vadd.xlane.f32.xlu2 %v1941_v1  ;;  %v1928_v7 = vpop.xlane.xlu2 %1927 }
0x1785   :  { %v1931_v40 = vmul.f32 %v1928_v7, %v6753_v60 }
0x1787   :  { %v7271_v53 = vsub.f32 %v1918_v14, %v1931_v40  ;;  %v2099_v61 = vpop.permute.xlu0 %2098 }
0x1789   :  { %v1937_v17 = vmul.f32 %v7271_v53, %v7271_v53 }
0x178b   :  { %v1944_v9 = vsel %vm367_vm15, %v1937_v17, 0.0 }
0x178c   :  { %v2101_v29 = vpop.permute.xlu2 %2100  ;;  %1945 = vadd.xlane.f32.xlu0 %v1944_v9 }
0x178d   :  { %5834 = vmatpush.xpose.msk.msra.mxu3 %vm281_vm13, %v2101_v29 }
0x178f   :  { %v2091_v10 = vpop.permute.xlu0 %2090 }
0x1791   :  { %5835 = vmatpush.xpose.msk.msra.mxu3 %vm281_vm13, %v2099_v61 }
0x1795   :  { %5836 = vmatpush.xpose.msk.msra.mxu3 %vm281_vm13, %v2097_v6 }
0x1798   :  { %5837 = vmatmul.msk.f32.vlgmr.msra.gmra.mxu3 %vm281_vm13, %v2091_v10 }
0x179c   :  { %2092 = vrot.lane.b32.xlu2 %v7054_v3, %s6545_s27 }
0x17a0   :  { %2094 = vrot.lane.b32.xlu0 %v7030_v28, %s6545_s27 }
0x17ef   :  { %v1940_v12 = vpop.xlane.xlu0 %1939 }
0x17f0   :  { %v1947_v13 = vmul.f32 %v1940_v12, %v6753_v60 }
0x17f2   :  { %v1950_v0 = vadd.f32 1e-05, %v1947_v13 }
0x17f4   :  { %6216 = vrsqrt.f32 %v1950_v0  ;;  %vm1959_vm7 = vweird.f32 %v1950_v0 }
0x17f7   :  { %v1943_v16 = vpop.xlane.xlu2 %1942 }
0x17f8   :  { %v1948_v21 = vmul.f32 %v1943_v16, %v6753_v60 }
0x17fa   :  { %v6217_v22 = vpop.eup %6216  ;;  %v1951_v24 = vadd.f32 1e-05, %v1948_v21 }
0x17fb   :  { %v1954_v31 = vmul.f32 %v6217_v22, %v1950_v0  ;;  %vm1960_vm6 = vweird.f32 %v6217_v22 }
0x17fc   :  { %6218 = vrsqrt.f32 %v1951_v24  ;;  %vm1961_vm8 = vmor %vm1959_vm7, %vm1960_vm6  ;;  %vm1969_vm10 = vweird.f32 %v1951_v24 }
0x17fd   :  { %v1955_v25 = vmul.f32 %v6217_v22, %v1954_v31 }
0x17ff   :  { %v1956_v18 = vmul.f32 0.5, %v1955_v25  ;;  %v2093_v37 = vpop.permute.xlu2 %2092  ;;  %v1946_v39 = vpop.xlane.xlu0 %1945 }
0x1800   :  { %v1949_v3 = vmul.f32 %v1946_v39, %v6753_v60  ;;  %5838 = vmatmul.msk.f32.gmra.mxu3 %vm281_vm13, %v2093_v37 }
0x1801   :  { %v1957_v8 = vsub.f32 1.5, %v1956_v18 }
0x1802   :  { %v6219_v50 = vpop.eup %6218  ;;  %v1952_v46 = vadd.f32 1e-05, %v1949_v3 }
0x1803   :  { %v1958_v30 = vmul.f32 %v6217_v22, %v1957_v8  ;;  %v1964_v33 = vmul.f32 %v6219_v50, %v1951_v24  ;;  %vm1970_vm9 = vweird.f32 %v6219_v50 }
0x1804   :  { %6220 = vrsqrt.f32 %v1952_v46  ;;  %vm1971_vm0 = vmor %vm1969_vm10, %vm1970_vm9  ;;  %vm1979_vm3 = vweird.f32 %v1952_v46 }
0x1805   :  { %v1965_v44 = vmul.f32 %v6219_v50, %v1964_v33  ;;  %v1962_v20 = vsel %vm1961_vm8, %v6217_v22, %v1958_v30  ;;  %v6030_v30 = vpop.permute.xlu1 %6029 }
0x1806   :  { %v1983_v51 = vmul.f32 %v1962_v20, %v1932_v49 }
0x1807   :  { %v1966_v45 = vmul.f32 0.5, %v1965_v44 }
0x1808   :  { %v1986_v54 = vmul.f32 %v7064_v36, %v1983_v51  ;;  %v7295_v36 = vld [vmem:[%s8613_s3 + $0x51] ss:$0 sm:$0xff] }
0x1809   :  { %v1967_v42 = vsub.f32 1.5, %v1966_v45  ;;  %v6031_v45 = vunpack.i.l.bf16 %v6030_v30 }
0x180a   :  { %v6221_v35 = vpop.eup %6220  ;;  %v1989_v23 = vadd.f32 %v7070_v47, %v1986_v54  ;;  %v6032_v54 = vunpack.i.h.bf16 %v6030_v30 }
0x180b   :  { %v1968_v14 = vmul.f32 %v6219_v50, %v1967_v42  ;;  %v1974_v59 = vmul.f32 %v6221_v35, %v1952_v46  ;;  %vm1980_vm2 = vweird.f32 %v6221_v35  ;;  %v7319_v42 = vld [vmem:[%s8613_s3 + $0x10] sm:$0x1] }
0x180c   :  { %v1992_v41 = vsel %vm281_vm13, %v1989_v23, -inf  ;;  %vm1981_vm4 = vmor %vm1979_vm3, %vm1980_vm2 }
0x180d   :  { %v1975_v62 = vmul.f32 %v6221_v35, %v1974_v59  ;;  %1993 = vmax.xlane.f32.xlu2 %v1992_v41  ;;  %v1972_v56 = vsel %vm1971_vm0, %v6219_v50, %v1968_v14  ;;  %v7326_v14 = vld [vmem:[%s8613_s3 + $0x8] sm:$0xff]  ;;  %v7332_v59 = vld [vmem:[%s8613_s3] sm:$0xff] }
0x180e   :  { %v1984_v43 = vmul.f32 %v1972_v56, %v7265_v63 }
0x180f   :  { %v1976_v49 = vmul.f32 0.5, %v1975_v62 }
0x1810   :  { %v1987_v34 = vmul.f32 %v7295_v36, %v1984_v43 }
0x1811   :  { %v1977_v47 = vsub.f32 1.5, %v1976_v49 }
0x1812   :  { %v2095_v58 = vpop.permute.xlu0 %2094  ;;  %v1990_v1 = vadd.f32 %v7301_v5, %v1987_v34 }
0x1813   :  { %v1978_v7 = vmul.f32 %v6221_v35, %v1977_v47  ;;  %5839 = vmatmul.msk.f32.gmra.mxu3 %vm281_vm13, %v2095_v58  ;;  %v6459_v47 = vld [vmem:[%s8613_s3 + $0x50] ss:$0 sm:$0xff] }
0x1814   :  { %v1995_v63 = vsel %vm281_vm13, %v1990_v1, -inf }
0x1815   :  { %1996 = vmax.xlane.f32.xlu0 %v1995_v63  ;;  %v1982_v40 = vsel %vm1981_vm4, %v6221_v35, %v1978_v7 }
0x1816   :  { %v1985_v17 = vmul.f32 %v1982_v40, %v7271_v53 }
0x1818   :  { %v1988_v9 = vmul.f32 %v7295_v36, %v1985_v17 }
0x181a   :  { %v1991_v29 = vadd.f32 %v7301_v5, %v1988_v9 }
0x181b   :  { %v2131_v62 = vpop.f32.mrf.mxu3 }
0x181c   :  { %v1998_v61 = vsel %vm367_vm15, %v1991_v29, -inf }
0x181d   :  { %1999 = vmax.xlane.f32.xlu2 %v1998_v61 }
0x1880   :  { %v1994_v6 = vpop.xlane.xlu2 %1993 }
0x1881   :  { %v2001_v10 = vsub.f32 %v1989_v23, %v1994_v6 }
0x1883   :  { %v2004_v12 = vmul.f32 1.442695, %v2001_v10  ;;  %v2134_v56 = vpop.f32.mrf.mxu3 }
0x1885   :  { %6222 = vpow2.f32 %v2004_v12 }
0x1888   :  { %v1997_v13 = vpop.xlane.xlu0 %1996 }
0x1889   :  { %v2002_v0 = vsub.f32 %v1990_v1, %v1997_v13 }
0x188b   :  { %v6223_v16 = vpop.eup %6222  ;;  %v2006_v21 = vmul.f32 1.442695, %v2002_v0 }
0x188c   :  { %v2010_v22 = vsel %vm281_vm13, %v6223_v16, 0.0 }
0x188d   :  { %6224 = vpow2.f32 %v2006_v21  ;;  %2011 = vadd.xlane.f32.xlu0 %v2010_v22 }
0x1890   :  { %v2000_v53 = vpop.xlane.xlu2 %1999 }
0x1891   :  { %v2003_v24 = vsub.f32 %v1991_v29, %v2000_v53 }
0x1893   :  { %v6225_v31 = vpop.eup %6224  ;;  %v2008_v25 = vmul.f32 1.442695, %v2003_v24 }
0x1894   :  { %v2013_v18 = vsel %vm281_vm13, %v6225_v31, 0.0 }
0x1895   :  { %6226 = vpow2.f32 %v2008_v25  ;;  %2014 = vadd.xlane.f32.xlu2 %v2013_v18 }
0x1896   :  { %v2137_v43 = vpop.f32.mrf.mxu3 }
0x189b   :  { %v6227_v37 = vpop.eup %6226 }
0x189c   :  { %v2016_v39 = vsel %vm367_vm15, %v6227_v37, 0.0 }
0x189d   :  { %2017 = vadd.xlane.f32.xlu0 %v2016_v39 }
0x18ad   :  { %2061 = vrot.lane.b32.xlu2 %v7030_v28, %s6546_s28 }
0x1900   :  { %v2012_v3 = vpop.xlane.xlu0 %2011 }
0x1901   :  { %6228 = vrcp.f32 %v2012_v3 }
0x1907   :  { %v6229_v8 = vpop.eup %6228 }
0x1908   :  { %v2015_v50 = vpop.xlane.xlu2 %2014  ;;  %v2022_v46 = vmul.f32 %v6229_v8, %v6223_v16 }
0x1909   :  { %6230 = vrcp.f32 %v2015_v50 }
0x190a   :  { %2025 = vxpose.xlu0.b32.start [1/3] (short) (narrow) %v2022_v46, 8 }
0x190f   :  { %v6231_v33 = vpop.eup %6230 }
0x1910   :  { %v2062_v44 = vpop.permute.xlu2 %2061  ;;  %v2018_v20 = vpop.xlane.xlu0 %2017  ;;  %v2023_v51 = vmul.f32 %v6231_v33, %v6225_v31 }
0x1911   :  { %6232 = vrcp.f32 %v2018_v20  ;;  %5832 = vmatpush.msk.msrb.mxu2 %vm331_vm12, %v2062_v44 }
0x1912   :  { %2026 = vxpose.xlu0.b32.cont [2/3] (short) (narrow) %v2023_v51, 8 }
0x1913   :  { %2084 = vmatpush.msrb.mxu2 %v6031_v45 }
0x1915   :  { %2085 = vmatpush.msrb.mxu2 %v6032_v54 }
0x1917   :  { %5840 = vmatpush.msk.msra.mxu2 %vm331_vm12, %v7319_v42  ;;  %v6233_v35 = vpop.eup %6232 }
0x1918   :  { %v2024_v23 = vmul.f32 %v6233_v35, %v6227_v37 }
0x1919   :  { %2163 = vmatpush.msra.mxu2 %v7326_v14 }
0x191a   :  { %2027 = vxpose.xlu0.b32.end [3/3] (short) (narrow) %v2024_v23, 8 }
0x191b   :  { %2164 = vmatpush.msra.mxu2 %v7332_v59 }
0x19ae   :  { %v2041_v41 = vpop.trf.xlu0 }
0x19af   :  { %5833 = vmatmul.msk.f32.vlgmr.msrb.gmra.mxu2 %vm321_vm14, %v2041_v41 }
0x19b7   :  { %5841 = vmatmul.msk.f32.vlgmr.msra.gmra.mxu2 %vm321_vm14, %v2131_v62 }
0x19bf   :  { %5842 = vmatmul.msk.f32.gmra.mxu2 %vm321_vm14, %v2134_v56 }
0x19c7   :  { %5843 = vmatmul.msk.f32.gmra.mxu2 %vm321_vm14, %v2137_v43 }
0x1a32   :  { %v7339_v49 = vpop.f32.mrf.mxu2 }
0x1a3a   :  { %v2166_v34 = vpop.f32.mrf.mxu2 }
0x1a3b   :  { %v2167_v58 = vadd.f32 %v6459_v47, %v2166_v34 }
0x1a3d   :  { %v2175_v1 = vsel %vm281_vm13, %v2167_v58, 0.0 }
0x1a3e   :  { %2176 = vadd.xlane.f32.xlu1 %v2175_v1 }
0x1a42   :  { %v2169_v7 = vpop.f32.mrf.mxu2 }
0x1a43   :  { %v2170_v63 = vadd.f32 %v6459_v47, %v2169_v7 }
0x1a45   :  { %v2178_v40 = vsel %vm281_vm13, %v2170_v63, 0.0 }
0x1a46   :  { %2179 = vadd.xlane.f32.xlu2 %v2178_v40 }
0x1a4a   :  { %v2172_v17 = vpop.f32.mrf.mxu2 }
0x1a4b   :  { %v2173_v9 = vadd.f32 %v6459_v47, %v2172_v17 }
0x1a4d   :  { %v2181_v29 = vsel %vm367_vm15, %v2173_v9, 0.0 }
0x1a4e   :  { %2182 = vadd.xlane.f32.xlu1 %v2181_v29 }
0x1ab1   :  { %v2177_v61 = vpop.xlane.xlu1 %2176 }
0x1ab2   :  { %v2184_v6 = vmul.f32 %v2177_v61, %v6753_v60 }
0x1ab4   :  { %v2187_v10 = vsub.f32 %v2167_v58, %v2184_v6 }
0x1ab6   :  { %v2190_v12 = vmul.f32 %v2187_v10, %v2187_v10 }
0x1ab8   :  { %v2193_v13 = vsel %vm281_vm13, %v2190_v12, 0.0 }
0x1ab9   :  { %v2180_v0 = vpop.xlane.xlu2 %2179  ;;  %2194 = vadd.xlane.f32.xlu1 %v2193_v13 }
0x1aba   :  { %v2185_v16 = vmul.f32 %v2180_v0, %v6753_v60 }
0x1abc   :  { %v2188_v21 = vsub.f32 %v2170_v63, %v2185_v16 }
0x1abe   :  { %v2191_v22 = vmul.f32 %v2188_v21, %v2188_v21 }
0x1ac0   :  { %v2196_v53 = vsel %vm281_vm13, %v2191_v22, 0.0 }
0x1ac1   :  { %2197 = vadd.xlane.f32.xlu0 %v2196_v53  ;;  %v2183_v24 = vpop.xlane.xlu1 %2182 }
0x1ac2   :  { %v2186_v31 = vmul.f32 %v2183_v24, %v6753_v60 }
0x1ac4   :  { %v2189_v25 = vsub.f32 %v2173_v9, %v2186_v31 }
0x1ac6   :  { %v2192_v18 = vmul.f32 %v2189_v25, %v2189_v25 }
0x1ac8   :  { %v2199_v37 = vsel %vm367_vm15, %v2192_v18, 0.0 }
0x1ac9   :  { %2200 = vadd.xlane.f32.xlu2 %v2199_v37 }
0x1b2c   :  { %v2195_v39 = vpop.xlane.xlu1 %2194 }
0x1b2d   :  { %v2202_v3 = vmul.f32 %v2195_v39, %v6753_v60 }
0x1b2f   :  { %v2205_v8 = vadd.f32 1e-05, %v2202_v3 }
0x1b31   :  { %6234 = vrsqrt.f32 %v2205_v8  ;;  %vm2214_vm7 = vweird.f32 %v2205_v8 }
0x1b34   :  { %v2198_v50 = vpop.xlane.xlu0 %2197 }
0x1b35   :  { %v2203_v46 = vmul.f32 %v2198_v50, %v6753_v60 }
0x1b37   :  { %v6235_v30 = vpop.eup %6234  ;;  %v2206_v33 = vadd.f32 1e-05, %v2203_v46 }
0x1b38   :  { %v2209_v44 = vmul.f32 %v6235_v30, %v2205_v8  ;;  %vm2215_vm6 = vweird.f32 %v6235_v30 }
0x1b39   :  { %6236 = vrsqrt.f32 %v2206_v33  ;;  %vm2216_vm8 = vmor %vm2214_vm7, %vm2215_vm6  ;;  %vm2224_vm10 = vweird.f32 %v2206_v33  ;;  %vm1319_vm6 = vcmask 130048   ;;  %vm1321_vm7 = vcmask 195584  }
0x1b3a   :  { %v2210_v20 = vmul.f32 %v6235_v30, %v2209_v44 }
0x1b3c   :  { %v2211_v51 = vmul.f32 0.5, %v2210_v20  ;;  %v2201_v45 = vpop.xlane.xlu2 %2200 }
0x1b3d   :  { %v2204_v54 = vmul.f32 %v2201_v45, %v6753_v60 }
0x1b3e   :  { %v2212_v35 = vsub.f32 1.5, %v2211_v51 }
0x1b3f   :  { %v6237_v23 = vpop.eup %6236  ;;  %v2207_v41 = vadd.f32 1e-05, %v2204_v54 }
0x1b40   :  { %v2213_v62 = vmul.f32 %v6235_v30, %v2212_v35  ;;  %v2219_v56 = vmul.f32 %v6237_v23, %v2206_v33  ;;  %vm2225_vm9 = vweird.f32 %v6237_v23 }
0x1b41   :  { %6238 = vrsqrt.f32 %v2207_v41  ;;  %vm2226_vm0 = vmor %vm2224_vm10, %vm2225_vm9  ;;  %vm2234_vm3 = vweird.f32 %v2207_v41 }
0x1b42   :  { %v2220_v43 = vmul.f32 %v6237_v23, %v2219_v56  ;;  %v2217_v34 = vsel %vm2216_vm8, %v6235_v30, %v2213_v62 }
0x1b43   :  { %v2238_v47 = vmul.f32 %v2217_v34, %v2187_v10 }
0x1b44   :  { %v2221_v58 = vmul.f32 0.5, %v2220_v43 }
0x1b45   :  { %v2241_v1 = vmul.f32 %v7295_v36, %v2238_v47 }
0x1b46   :  { %v2222_v7 = vsub.f32 1.5, %v2221_v58 }
0x1b47   :  { %v6239_v63 = vpop.eup %6238  ;;  %v2244_v40 = vadd.f32 %v7301_v5, %v2241_v1 }
0x1b48   :  { %v2223_v17 = vmul.f32 %v6237_v23, %v2222_v7  ;;  %v2229_v9 = vmul.f32 %v6239_v63, %v2207_v41  ;;  %vm2235_vm2 = vweird.f32 %v6239_v63  ;;  %v6461_v7 = vld [vmem:[%s8611_s1 + $0x10] sm:$0xff] }
0x1b49   :  { %v2247_v29 = vsel %vm281_vm13, %v2244_v40, -inf  ;;  %vm2236_vm4 = vmor %vm2234_vm3, %vm2235_vm2 }
0x1b4a   :  { %v2230_v61 = vmul.f32 %v6239_v63, %v2229_v9  ;;  %2248 = vmax.xlane.f32.xlu1 %v2247_v29  ;;  %v2227_v6 = vsel %vm2226_vm0, %v6237_v23, %v2223_v17 }
0x1b4b   :  { %v2239_v12 = vmul.f32 %v2227_v6, %v2188_v21 }
0x1b4c   :  { %v2231_v13 = vmul.f32 0.5, %v2230_v61 }
0x1b4d   :  { %v2242_v10 = vmul.f32 %v7295_v36, %v2239_v12 }
0x1b4e   :  { %v2232_v0 = vsub.f32 1.5, %v2231_v13 }
0x1b4f   :  { %v2245_v16 = vadd.f32 %v7301_v5, %v2242_v10 }
0x1b50   :  { %v2233_v22 = vmul.f32 %v6239_v63, %v2232_v0 }
0x1b51   :  { %v2250_v53 = vsel %vm281_vm13, %v2245_v16, -inf }
0x1b52   :  { %2251 = vmax.xlane.f32.xlu2 %v2250_v53  ;;  %v2237_v24 = vsel %vm2236_vm4, %v6239_v63, %v2233_v22  ;;  %v6462_v63 = vld [vmem:[%s8611_s1 + $0x8] sm:$0xff] }
0x1b53   :  { %v2240_v31 = vmul.f32 %v2237_v24, %v2189_v25 }
0x1b55   :  { %v2243_v18 = vmul.f32 %v7295_v36, %v2240_v31  ;;  %v2366_v31 = vld [vmem:[%s8613_s3 + $0x20] sm:$0xff] }
0x1b57   :  { %v2246_v37 = vadd.f32 %v7301_v5, %v2243_v18 }
0x1b59   :  { %v2253_v21 = vsel %vm367_vm15, %v2246_v37, -inf }
0x1b5a   :  { %2254 = vmax.xlane.f32.xlu1 %v2253_v21 }
0x1b73   :  { %2316 = vrot.lane.b32.xlu1 %v7030_v28, %s6547_s16 }
0x1bbd   :  { %v2249_v39 = vpop.xlane.xlu1 %2248 }
0x1bbe   :  { %v2256_v3 = vsub.f32 %v2244_v40, %v2249_v39  ;;  %v6463_v40 = vld [vmem:[%s8611_s1] sm:$0xff] }
0x1bc0   :  { %v2259_v8 = vmul.f32 1.442695, %v2256_v3 }
0x1bc2   :  { %6240 = vpow2.f32 %v2259_v8 }
0x1bc5   :  { %v2252_v50 = vpop.xlane.xlu2 %2251 }
0x1bc6   :  { %v2257_v46 = vsub.f32 %v2245_v16, %v2252_v50 }
0x1bc8   :  { %v6241_v30 = vpop.eup %6240  ;;  %v2261_v33 = vmul.f32 1.442695, %v2257_v46  ;;  %v2427_v46 = vld [vmem:[%s8612_s2 + $0xe0] sm:$0xff] }
0x1bc9   :  { %v2265_v25 = vsel %vm281_vm13, %v6241_v30, 0.0 }
0x1bca   :  { %6242 = vpow2.f32 %v2261_v33  ;;  %2266 = vadd.xlane.f32.xlu2 %v2265_v25 }
0x1bcd   :  { %v2255_v36 = vpop.xlane.xlu1 %2254 }
0x1bce   :  { %v2258_v5 = vsub.f32 %v2246_v37, %v2255_v36  ;;  %v2426_v37 = vld [vmem:[%s8612_s2 + $0xd8] sm:$0xff] }
0x1bd0   :  { %v6243_v44 = vpop.eup %6242  ;;  %v2263_v20 = vmul.f32 1.442695, %v2258_v5 }
0x1bd1   :  { %v2268_v51 = vsel %vm281_vm13, %v6243_v44, 0.0 }
0x1bd2   :  { %6244 = vpow2.f32 %v2263_v20  ;;  %2269 = vadd.xlane.f32.xlu1 %v2268_v51 }
0x1bd8   :  { %v6245_v28 = vpop.eup %6244 }
0x1bd9   :  { %v2271_v45 = vsel %vm367_vm15, %v6245_v28, 0.0 }
0x1bda   :  { %2272 = vadd.xlane.f32.xlu2 %v2271_v45 }
0x1be5   :  { %v2317_v54 = vpop.permute.xlu1 %2316 }
0x1be6   :  { %5844 = vmatpush.msk.msrb.mxu2 %vm331_vm12, %v2317_v54 }
0x1bf2   :  { %6034 = vrot.lane.b32.xlu2 %v7161_v55, %s6547_s16 }
0x1bfa   :  { %2346 = vrot.lane.b32.xlu2 %v7248_v38, %s6548_s10 }
0x1c02   :  { %2350 = vrot.lane.b32.xlu2 %v7339_v49, %s6549_s13  ;;  %v6460_v49 = vld [vmem:[%s8611_s1 + $0x18] sm:$0xff] }
0x1c3d   :  { %v2267_v35 = vpop.xlane.xlu2 %2266 }
0x1c3e   :  { %6246 = vrcp.f32 %v2267_v35 }
0x1c44   :  { %v6247_v23 = vpop.eup %6246 }
0x1c45   :  { %v2270_v41 = vpop.xlane.xlu1 %2269  ;;  %v2277_v62 = vmul.f32 %v6247_v23, %v6241_v30 }
0x1c46   :  { %6248 = vrcp.f32 %v2270_v41 }
0x1c47   :  { %2280 = vxpose.xlu1.b32.start [1/3] (short) (narrow) %v2277_v62, 8 }
0x1c4c   :  { %v6249_v56 = vpop.eup %6248 }
0x1c4d   :  { %v2273_v43 = vpop.xlane.xlu2 %2272  ;;  %v2278_v34 = vmul.f32 %v6249_v56, %v6243_v44  ;;  %v2428_v44 = vld [vmem:[%s8612_s2 + $0xe8] sm:$0xff] }
0x1c4e   :  { %6250 = vrcp.f32 %v2273_v43 }
0x1c4f   :  { %2281 = vxpose.xlu1.b32.cont [2/3] (short) (narrow) %v2278_v34, 8 }
0x1c54   :  { %v6251_v55 = vpop.eup %6250 }
0x1c55   :  { %v6035_v47 = vpop.permute.xlu2 %6034  ;;  %v2279_v58 = vmul.f32 %v6251_v55, %v6245_v28 }
0x1c56   :  { %v6036_v38 = vunpack.i.l.bf16 %v6035_v47  ;;  %v6037_v1 = vunpack.i.h.bf16 %v6035_v47 }
0x1c57   :  { %2282 = vxpose.xlu1.b32.end [3/3] (short) (narrow) %v2279_v58, 8 }
0x1c58   :  { %2339 = vmatpush.msrb.mxu2 %v6036_v38 }
0x1c5a   :  { %2340 = vmatpush.msrb.mxu2 %v6037_v1  ;;  %v2563_v1 = vld [vmem:[%s8611_s1 + $0x38] sm:$0xff] }
0x1c5b   :  { %2593 = vmatpush.msra.mxu0 %v2563_v1 }
0x1c5c   :  { %3039 = vmatpush.msra.mxu2 %v6460_v49  ;;  %v2562_v49 = vld [vmem:[%s8611_s1 + $0x30] sm:$0xff] }
0x1c5d   :  { %v2347_v29 = vpop.permute.xlu2 %2346  ;;  %2594 = vmatpush.msra.mxu0 %v2562_v49 }
0x1c5e   :  { %3040 = vmatpush.msra.mxu2 %v6461_v7  ;;  %v2357_v6 = vsel %vm281_vm13, %v7174_v4, %v2347_v29  ;;  %v2365_v4 = vld [vmem:[%s8613_s3 + $0x18] sm:$0xff]  ;;  %v2561_v7 = vld [vmem:[%s8611_s1 + $0x28] sm:$0xff] }
0x1c5f   :  { %2595 = vmatpush.msra.mxu0 %v2561_v7 }
0x1c60   :  { %3041 = vmatpush.msra.mxu2 %v6462_v63 }
0x1c62   :  { %3042 = vmatpush.msra.mxu2 %v6463_v40  ;;  %v2560_v40 = vld [vmem:[%s8611_s1 + $0x20] sm:$0xff] }
0x1c63   :  { %2596 = vmatpush.msra.mxu0 %v2560_v40 }
0x1c65   :  { %v2351_v61 = vpop.permute.xlu2 %2350  ;;  %5870 = vmatpush.msk.msrb.mxu0 %vm331_vm12, %v7319_v42 }
0x1c66   :  { %v2358_v12 = vsel %vm1319_vm6, %v2357_v6, %v2351_v61 }
0x1c67   :  { %3129 = vmatpush.msrb.mxu0 %v7326_v14 }
0x1c69   :  { %3130 = vmatpush.msrb.mxu0 %v7332_v59 }
0x1ceb   :  { %v2296_v17 = vpop.trf.xlu1 }
0x1cec   :  { %5845 = vmatmul.msk.f32.vlgmr.msrb.gmra.mxu2 %vm321_vm14, %v2296_v17 }
0x1d6f   :  { %v2342_v9 = vpop.f32.mrf.mxu2 }
0x1d70   :  { %2354 = vrot.lane.b32.xlu2 %v2342_v9, %s6550_s5 }
0x1d78   :  { %1307 = vrot.lane.b32.xlu2 %v6931_v32, %s6548_s10 }
0x1d80   :  { %1311 = vrot.lane.b32.xlu2 %v7016_v26, %s6549_s13 }
0x1d88   :  { %1315 = vrot.lane.b32.xlu2 %v7105_v57, %s6550_s5 }
0x1dca   :  { %v2355_v13 = vpop.permute.xlu2 %2354 }
0x1dcb   :  { %v2359_v10 = vsel %vm1321_vm7, %v2358_v12, %v2355_v13 }
0x1dcc   :  { %2361 = vrot.lane.b32.xlu2 %v2359_v10, %s6551_s6 }
0x1dd2   :  { %v1308_v32 = vpop.permute.xlu2 %1307 }
0x1dd3   :  { %v1318_v57 = vsel %vm281_vm13, %v6822_v2, %v1308_v32  ;;  %v2367_v2 = vld [vmem:[%s8613_s3 + $0x28] sm:$0x1] }
0x1dda   :  { %v1312_v26 = vpop.permute.xlu2 %1311 }
0x1ddb   :  { %v1320_v16 = vsel %vm1319_vm6, %v1318_v57, %v1312_v26 }
0x1de2   :  { %v1316_v0 = vpop.permute.xlu2 %1315 }
0x1de3   :  { %v1322_v22 = vsel %vm1321_vm7, %v1320_v16, %v1316_v0 }
0x1e26   :  { %v2362_v53 = vpop.permute.xlu2 %2361 }
0x1e27   :  { %v2364_v24 = vsel %vm84_vm1, %v1322_v22, %v2362_v53  ;;  %v2429_v22 = vld [vmem:[%s8612_s2 + $0xf0] sm:$0xff] }
0x1e28   :  { %2392 = vmatpush.msra.mxu1 %v2364_v24 }
0x1e29   :  { %5846 = vmatmul.msk.f32.vlgmr.msra.gmra.mxu1 %vm281_vm13, %v2365_v4 }
0x1e31   :  { %5847 = vmatmul.msk.f32.gmra.mxu1 %vm281_vm13, %v2366_v31 }
0x1e39   :  { %5848 = vmatmul.msk.f32.gmra.mxu1 %vm281_vm13, %v2367_v2 }
0x1ea6   :  { %v2394_v18 = vpop.f32.mrf.mxu1 }
0x1ea7   :  { %v2406_v21 = vrot.slane %v2394_v18, 7  ;;  %v2421_v39 = vadd.f32 %v2394_v18, %v6611_v11 }
0x1ea9   :  { %v7423_v3 = vadd.f32 %v2426_v37, %v2421_v39  ;;  %2411 = vrot.lane.b32.xlu0 %v2406_v21, %s6536_s25 }
0x1eab   :  { %v2438_v8 = vsel %vm84_vm1, %v7423_v3, 0.0 }
0x1eac   :  { %2439 = vadd.xlane.f32.xlu2 %v2438_v8  ;;  %v7500_v8 = vld [vmem:[%s8612_s2 + $0x10d] ss:$0 sm:$0xff] }
0x1eae   :  { %v7428_v50 = vpop.f32.mrf.mxu1 }
0x1eaf   :  { %v2422_v30 = vadd.f32 %v7428_v50, %v6618_v15  ;;  %v2407_v58 = vrot.slane %v7428_v50, 7 }
0x1eb1   :  { %v7435_v33 = vadd.f32 %v2427_v46, %v2422_v30  ;;  %v2408_v38 = vsel %vm331_vm12, %v2406_v21, %v2407_v58 }
0x1eb3   :  { %v2441_v25 = vsel %vm84_vm1, %v7435_v33, 0.0 }
0x1eb4   :  { %2442 = vadd.xlane.f32.xlu1 %v2441_v25 }
0x1eb6   :  { %v7439_v36 = vpop.f32.mrf.mxu1 }
0x1eb7   :  { %v2409_v50 = vrot.slane %v7439_v36, 7 }
0x1f1b   :  { %v2412_v5 = vpop.permute.xlu0 %2411 }
0x1f1c   :  { %v2420_v20 = vsel %vm331_vm12, %v7439_v36, %v2412_v5  ;;  %v7506_v5 = vld [vmem:[%s8612_s2 + $0x10e] ss:$0 sm:$0xff] }
0x1f1d   :  { %v2423_v51 = vadd.f32 %v2420_v20, %v6625_v19 }
0x1f1f   :  { %v7447_v28 = vadd.f32 %v2428_v44, %v2423_v51  ;;  %v2440_v45 = vpop.xlane.xlu2 %2439 }
0x1f20   :  { %v2453_v54 = vmul.f32 %v2440_v45, %v6629_v27  ;;  %v2410_v45 = vsel %vm331_vm12, %v2407_v58, %v2409_v50 }
0x1f21   :  { %v2444_v35 = vsel %vm84_vm1, %v7447_v28, 0.0 }
0x1f22   :  { %v2458_v23 = vsub.f32 %v7423_v3, %v2453_v54  ;;  %2445 = vadd.xlane.f32.xlu0 %v2444_v35 }
0x1f24   :  { %v2463_v41 = vmul.f32 %v2458_v23, %v2458_v23 }
0x1f26   :  { %v2468_v62 = vsel %vm84_vm1, %v2463_v41, 0.0 }
0x1f27   :  { %2469 = vadd.xlane.f32.xlu2 %v2468_v62  ;;  %v2443_v56 = vpop.xlane.xlu1 %2442 }
0x1f28   :  { %v2454_v43 = vmul.f32 %v2443_v56, %v6629_v27 }
0x1f2a   :  { %v7456_v34 = vsub.f32 %v7435_v33, %v2454_v43 }
0x1f2c   :  { %v2464_v55 = vmul.f32 %v7456_v34, %v7456_v34 }
0x1f2e   :  { %v2471_v47 = vsel %vm84_vm1, %v2464_v55, 0.0 }
0x1f2f   :  { %2472 = vadd.xlane.f32.xlu2 %v2471_v47  ;;  %v2430_v47 = vld [vmem:[%s8612_s2 + $0xf8] sm:$0x3] }
0x1f36   :  { %2413 = vrot.lane.b32.xlu0 %v2408_v38, %s6536_s25 }
0x1f95   :  { %v2446_v63 = vpop.xlane.xlu0 %2445 }
0x1f96   :  { %v2455_v17 = vmul.f32 %v2446_v63, %v6629_v27 }
0x1f98   :  { %v7480_v9 = vsub.f32 %v7447_v28, %v2455_v17 }
0x1f9a   :  { %v2470_v29 = vpop.xlane.xlu2 %2469  ;;  %v2465_v61 = vmul.f32 %v7480_v9, %v7480_v9 }
0x1f9b   :  { %v2483_v6 = vmul.f32 %v2470_v29, %v6629_v27 }
0x1f9c   :  { %v2474_v12 = vsel %vm84_vm1, %v2465_v61, 0.0 }
0x1f9d   :  { %v2488_v13 = vadd.f32 1e-05, %v2483_v6  ;;  %2475 = vadd.xlane.f32.xlu2 %v2474_v12 }
0x1f9f   :  { %6252 = vrsqrt.f32 %v2488_v13  ;;  %vm2499_vm9 = vweird.f32 %v2488_v13 }
0x1fa2   :  { %v2473_v10 = vpop.xlane.xlu2 %2472 }
0x1fa3   :  { %v2484_v32 = vmul.f32 %v2473_v10, %v6629_v27 }
0x1fa5   :  { %v6253_v26 = vpop.eup %6252  ;;  %v2489_v0 = vadd.f32 1e-05, %v2484_v32 }
0x1fa6   :  { %v2494_v57 = vmul.f32 %v6253_v26, %v2488_v13  ;;  %vm2500_vm8 = vweird.f32 %v6253_v26 }
0x1fa7   :  { %6254 = vrsqrt.f32 %v2489_v0  ;;  %vm2501_vm10 = vmor %vm2499_vm9, %vm2500_vm8  ;;  %vm2509_vm2 = vweird.f32 %v2489_v0 }
0x1fa8   :  { %v2495_v16 = vmul.f32 %v6253_v26, %v2494_v57  ;;  %v2414_v53 = vpop.permute.xlu0 %2413 }
0x1fa9   :  { %v2424_v4 = vadd.f32 %v2414_v53, %v6868_v48  ;;  %v7549_v53 = vld [vmem:[%s8611_s1 + $0x60] ss:$0 sm:$0xff] }
0x1faa   :  { %v2496_v24 = vmul.f32 0.5, %v2495_v16  ;;  %v2848_v16 = vld [vmem:[%s8612_s2 + $0xd0] sm:$0xff] }
0x1fab   :  { %v7493_v31 = vadd.f32 %v2429_v22, %v2424_v4  ;;  %2851 = vmatpush.msrb.mxu3 %v2848_v16  ;;  %v2847_v22 = vld [vmem:[%s8612_s2 + $0xc8] sm:$0xff]  ;;  %v2845_v4 = vld [vmem:[%s8612_s2 + $0xb8] sm:$0xff] }
0x1fac   :  { %v2497_v2 = vsub.f32 1.5, %v2496_v24  ;;  %v2844_v24 = vld [vmem:[%s8612_s2 + $0xb0] sm:$0xff] }
0x1fad   :  { %v6255_v18 = vpop.eup %6254  ;;  %v2447_v37 = vsel %vm84_vm1, %v7493_v31, 0.0  ;;  %2852 = vmatpush.msrb.mxu3 %v2847_v22 }
0x1fae   :  { %v2498_v21 = vmul.f32 %v6253_v26, %v2497_v2  ;;  %v2504_v39 = vmul.f32 %v6255_v18, %v2489_v0  ;;  %2448 = vadd.xlane.f32.xlu0 %v2447_v37  ;;  %vm2510_vm0 = vweird.f32 %v6255_v18  ;;  %v2843_v37 = vld [vmem:[%s8612_s2 + $0xa8] sm:$0xff] }
0x1faf   :  { %vm2511_vm3 = vmor %vm2509_vm2, %vm2510_vm0 }
0x1fb0   :  { %v2502_v46 = vsel %vm2501_vm10, %v6253_v26, %v2498_v21  ;;  %v2505_v30 = vmul.f32 %v6255_v18, %v2504_v39  ;;  %v2842_v39 = vld [vmem:[%s8612_s2 + $0xa0] sm:$0xff] }
0x1fb1   :  { %v2543_v25 = vmul.f32 %v2502_v46, %v2458_v23  ;;  %v2841_v46 = vld [vmem:[%s8612_s2 + $0x98] sm:$0xff] }
0x1fb2   :  { %v2506_v44 = vmul.f32 0.5, %v2505_v30 }
0x1fb3   :  { %v2549_v20 = vmul.f32 %v7500_v8, %v2543_v25  ;;  %v2840_v25 = vld [vmem:[%s8612_s2 + $0x90] sm:$0xff] }
0x1fb4   :  { %v2507_v51 = vsub.f32 1.5, %v2506_v44 }
0x1fb5   :  { %2415 = vrot.lane.b32.xlu2 %v2410_v45, %s6536_s25  ;;  %v2555_v54 = vadd.f32 %v7506_v5, %v2549_v20 }
0x1fb6   :  { %v2508_v36 = vmul.f32 %v6255_v18, %v2507_v51 }
0x1fb7   :  { %5849 = vmatmul.msk.f32.vlgmr.msra.gmra.mxu0 %vm84_vm1, %v2555_v54  ;;  %v2839_v54 = vld [vmem:[%s8612_s2 + $0x88] sm:$0xff] }
0x1fb8   :  { %v2512_v35 = vsel %vm2511_vm3, %v6255_v18, %v2508_v36 }
0x1fb9   :  { %v2544_v23 = vmul.f32 %v2512_v35, %v7456_v34 }
0x1fbb   :  { %v2550_v41 = vmul.f32 %v7500_v8, %v2544_v23  ;;  %v2838_v23 = vld [vmem:[%s8612_s2 + $0x80] sm:$0xff] }
0x1fbd   :  { %v2556_v62 = vadd.f32 %v7506_v5, %v2550_v41 }
0x1fbf   :  { %5850 = vmatmul.msk.f32.gmra.mxu0 %vm84_vm1, %v2556_v62 }
0x2010   :  { %v2476_v56 = vpop.xlane.xlu2 %2475 }
0x2011   :  { %v2485_v43 = vmul.f32 %v2476_v56, %v6629_v27 }
0x2013   :  { %v2490_v55 = vadd.f32 1e-05, %v2485_v43  ;;  %v2837_v43 = vld [vmem:[%s8612_s2 + $0x78] sm:$0xff] }
0x2015   :  { %6256 = vrsqrt.f32 %v2490_v55  ;;  %vm2519_vm8 = vweird.f32 %v2490_v55 }
0x2018   :  { %v2416_v58 = vpop.permute.xlu2 %2415 }
0x2019   :  { %v2425_v38 = vadd.f32 %v2416_v58, %v6876_v52  ;;  %v2836_v58 = vld [vmem:[%s8612_s2 + $0x70] sm:$0xff] }
0x201b   :  { %v6257_v1 = vpop.eup %6256  ;;  %v7522_v34 = vadd.f32 %v2430_v47, %v2425_v38 }
0x201c   :  { %v2514_v49 = vmul.f32 %v6257_v1, %v2490_v55  ;;  %vm2520_vm4 = vweird.f32 %v6257_v1 }
0x201d   :  { %v2450_v7 = vsel %vm97_vm11, %v7522_v34, 0.0  ;;  %vm2521_vm9 = vmor %vm2519_vm8, %vm2520_vm4 }
0x201e   :  { %v2515_v63 = vmul.f32 %v6257_v1, %v2514_v49  ;;  %2451 = vadd.xlane.f32.xlu2 %v2450_v7  ;;  %v2835_v7 = vld [vmem:[%s8612_s2 + $0x68] sm:$0xff] }
0x2020   :  { %v2516_v40 = vmul.f32 0.5, %v2515_v63 }
0x2021   :  { %v2449_v17 = vpop.xlane.xlu0 %2448 }
0x2022   :  { %v2517_v29 = vsub.f32 1.5, %v2516_v40  ;;  %v2456_v61 = vmul.f32 %v2449_v17, %v6629_v27 }
0x2024   :  { %v2518_v6 = vmul.f32 %v6257_v1, %v2517_v29  ;;  %v7528_v12 = vsub.f32 %v7493_v31, %v2456_v61  ;;  %v2834_v29 = vld [vmem:[%s8612_s2 + $0x60] sm:$0xff] }
0x2026   :  { %v2522_v13 = vsel %vm2521_vm9, %v6257_v1, %v2518_v6  ;;  %v2466_v10 = vmul.f32 %v7528_v12, %v7528_v12 }
0x2027   :  { %v2545_v32 = vmul.f32 %v2522_v13, %v7480_v9  ;;  %v2846_v9 = vld [vmem:[%s8612_s2 + $0xc0] sm:$0xff]  ;;  %v2833_v13 = vld [vmem:[%s8612_s2 + $0x58] sm:$0xff] }
0x2028   :  { %v2477_v26 = vsel %vm84_vm1, %v2466_v10, 0.0  ;;  %2853 = vmatpush.msrb.mxu3 %v2846_v9 }
0x2029   :  { %2478 = vadd.xlane.f32.xlu1 %v2477_v26  ;;  %v2551_v0 = vmul.f32 %v7500_v8, %v2545_v32 }
0x202a   :  { %2854 = vmatpush.msrb.mxu3 %v2845_v4 }
0x202b   :  { %v2557_v57 = vadd.f32 %v7506_v5, %v2551_v0 }
0x202c   :  { %2855 = vmatpush.msrb.mxu3 %v2844_v24 }
0x202d   :  { %5851 = vmatmul.msk.f32.gmra.mxu0 %vm84_vm1, %v2557_v57 }
0x202e   :  { %2856 = vmatpush.msrb.mxu3 %v2843_v37 }
0x2030   :  { %2857 = vmatpush.msrb.mxu3 %v2842_v39 }
0x2032   :  { %2858 = vmatpush.msrb.mxu3 %v2841_v46 }
0x2034   :  { %v2598_v2 = vpop.f32.mrf.mxu0  ;;  %2859 = vmatpush.msrb.mxu3 %v2840_v25 }
0x2035   :  { %v7558_v18 = vadd.f32 %v7549_v53, %v2598_v2 }
0x2036   :  { %2860 = vmatpush.msrb.mxu3 %v2839_v54 }
0x2037   :  { %v7564_v21 = vmul.f32 0.70710677, %v7558_v18 }
0x2038   :  { %2861 = vmatpush.msrb.mxu3 %v2838_v23 }
0x2039   :  { %v2623_v50 = vmul.f32 %v7564_v21, %v7564_v21 }
0x203a   :  { %2862 = vmatpush.msrb.mxu3 %v2837_v43 }
0x203b   :  { %v2624_v30 = vmin.f32 %v2623_v50, 16.0 }
0x203c   :  { %v2601_v44 = vpop.f32.mrf.mxu0  ;;  %2863 = vmatpush.msrb.mxu3 %v2836_v58 }
0x203d   :  { %v2625_v20 = vmul.f32 2.1237322e-06, %v2624_v30  ;;  %v2636_v51 = vmul.f32 3.8918573e-05, %v2624_v30  ;;  %v7578_v45 = vadd.f32 %v7549_v53, %v2601_v44 }
0x203e   :  { %2864 = vmatpush.msrb.mxu3 %v2835_v7 }
0x203f   :  { %v2626_v36 = vadd.f32 0.00028619796, %v2625_v20  ;;  %v2637_v35 = vadd.f32 0.001143296, %v2636_v51  ;;  %v7587_v41 = vmul.f32 0.70710677, %v7578_v45 }
0x2040   :  { %2865 = vmatpush.msrb.mxu3 %v2834_v29 }
0x2041   :  { %v2627_v62 = vmul.f32 %v2626_v36, %v2624_v30  ;;  %v2638_v56 = vmul.f32 %v2637_v35, %v2624_v30  ;;  %v2663_v55 = vmul.f32 %v7587_v41, %v7587_v41 }
0x2042   :  { %2866 = vmatpush.msrb.mxu3 %v2833_v13 }
0x2043   :  { %v2639_v47 = vadd.f32 0.014752088, %v2638_v56  ;;  %v2628_v38 = vadd.f32 0.0036580483, %v2627_v62  ;;  %v2664_v1 = vmin.f32 %v2663_v55, 16.0 }
0x2044   :  { %5882 = vmatpush.msk.msra.mxu3 %vm331_vm12, %v7319_v42 }
0x2045   :  { %v2640_v49 = vmul.f32 %v2639_v47, %v2624_v30  ;;  %v2665_v63 = vmul.f32 2.1237322e-06, %v2664_v1  ;;  %v2676_v40 = vmul.f32 3.8918573e-05, %v2664_v1  ;;  %v2629_v61 = vmul.f32 %v2628_v38, %v2624_v30 }
0x2046   :  { %3384 = vmatpush.msra.mxu3 %v7326_v14 }
0x2047   :  { %v2641_v17 = vadd.f32 0.112945676, %v2640_v49  ;;  %v2666_v6 = vadd.f32 0.00028619796, %v2665_v63  ;;  %v2677_v10 = vadd.f32 0.001143296, %v2676_v40 }
0x2048   :  { %v2630_v16 = vadd.f32 0.05243302, %v2629_v61  ;;  %3385 = vmatpush.msra.mxu3 %v7332_v59 }
0x2049   :  { %v2642_v32 = vmul.f32 %v2641_v17, %v2624_v30  ;;  %v2667_v26 = vmul.f32 %v2666_v6, %v2664_v1  ;;  %v2678_v0 = vmul.f32 %v2677_v10, %v2664_v1 }
0x204a   :  { %v2631_v37 = vmul.f32 %v2630_v16, %v2624_v30 }
0x204b   :  { %v2643_v57 = vadd.f32 0.4994258, %v2642_v32  ;;  %v2679_v22 = vadd.f32 0.014752088, %v2678_v0  ;;  %v2668_v4 = vadd.f32 0.0036580483, %v2667_v26 }
0x204c   :  { %v2632_v25 = vadd.f32 0.18741608, %v2631_v37  ;;  %v2613_v26 = vmul.f32 0.5, %v7558_v18 }
0x204d   :  { %v2644_v9 = vmul.f32 %v2643_v57, %v2624_v30  ;;  %v2680_v24 = vmul.f32 %v2679_v22, %v2664_v1  ;;  %v2669_v50 = vmul.f32 %v2668_v4, %v2664_v1 }
0x204e   :  { %v2633_v54 = vmul.f32 %v2632_v25, %v2624_v30 }
0x204f   :  { %v2645_v2 = vadd.f32 1.0, %v2644_v9  ;;  %v2681_v39 = vadd.f32 0.112945676, %v2680_v24  ;;  %v2670_v20 = vadd.f32 0.05243302, %v2669_v50 }
0x2050   :  { %v2634_v56 = vadd.f32 1.1283791, %v2633_v54 }
0x2051   :  { %6258 = vrcp.f32 %v2645_v2  ;;  %v2682_v46 = vmul.f32 %v2681_v39, %v2664_v1  ;;  %v2671_v23 = vmul.f32 %v2670_v20, %v2664_v1  ;;  %v2657_v14 = vand.u32 2147483648, %v2645_v2 }
0x2052   :  { %v2655_v59 = vand.u32 2147483647, %v2645_v2  ;;  %vm2651_vm0 = vweird.f32 %v2645_v2  ;;  %v2635_v49 = vmul.f32 %v2634_v56, %v7564_v21 }
0x2053   :  { %v2683_v44 = vadd.f32 0.4994258, %v2682_v46  ;;  %v2672_v55 = vadd.f32 0.18741608, %v2671_v23  ;;  %v2658_v58 = vor.u32 1.1754944e-38, %v2657_v14 }
0x2054   :  { %vm2656_vm3 = vcmp.eq.f32.partialorder %v2655_v59, 8.507059e+37 }
0x2055   :  { %v2684_v51 = vmul.f32 %v2683_v44, %v2664_v1  ;;  %v2673_v63 = vmul.f32 %v2672_v55, %v2664_v1 }
0x2057   :  { %v6259_v42 = vpop.eup %6258  ;;  %v2685_v35 = vadd.f32 1.0, %v2684_v51  ;;  %v2674_v13 = vadd.f32 1.1283791, %v2673_v63 }
0x2058   :  { %v2647_v36 = vmul.f32 %v6259_v42, %v2645_v2  ;;  %vm2652_vm10 = vweird.f32 %v6259_v42  ;;  %v2614_v2 = vmul.f32 0.5, %v7578_v45 }
0x2059   :  { %6260 = vrcp.f32 %v2685_v35  ;;  %vm2653_vm2 = vmor %vm2651_vm0, %vm2652_vm10  ;;  %v2697_v6 = vand.u32 2147483648, %v2685_v35  ;;  %v2695_v32 = vand.u32 2147483647, %v2685_v35  ;;  %vm2691_vm8 = vweird.f32 %v2685_v35 }
0x205a   :  { %v2648_v62 = vsub.f32 1.0, %v2647_v36  ;;  %v2675_v22 = vmul.f32 %v2674_v13, %v7587_v41 }
0x205b   :  { %v2698_v21 = vor.u32 1.1754944e-38, %v2697_v6  ;;  %vm2696_vm10 = vcmp.eq.f32.partialorder %v2695_v32, 8.507059e+37 }
0x205c   :  { %v2649_v43 = vmul.f32 %v6259_v42, %v2648_v62 }
0x205e   :  { %v2650_v47 = vadd.f32 %v6259_v42, %v2649_v43 }
0x205f   :  { %v6261_v38 = vpop.eup %6260 }
0x2060   :  { %v2654_v7 = vsel %vm2653_vm2, %v6259_v42, %v2650_v47  ;;  %v2687_v40 = vmul.f32 %v6261_v38, %v2685_v35  ;;  %vm2692_vm4 = vweird.f32 %v6261_v38 }
0x2061   :  { %v2659_v30 = vsel %vm2656_vm3, %v2658_v58, %v2654_v7  ;;  %vm2693_vm9 = vmor %vm2691_vm8, %vm2692_vm4 }
0x2062   :  { %v2660_v17 = vmul.f32 %v2659_v30, %v2635_v49  ;;  %v2688_v29 = vsub.f32 1.0, %v2687_v40 }
0x2064   :  { %v5854_v61 = vclamps-f32 %v2660_v17, 1.0  ;;  %v2689_v10 = vmul.f32 %v6261_v38, %v2688_v29 }
0x2066   :  { %v2823_v0 = vadd.f32 1.0, %v5854_v61  ;;  %v2690_v57 = vadd.f32 %v6261_v38, %v2689_v10 }
0x2068   :  { %v2828_v16 = vmul.f32 %v2823_v0, %v2613_v26  ;;  %v2694_v1 = vsel %vm2693_vm9, %v6261_v38, %v2690_v57 }
0x2069   :  { %v2699_v9 = vsel %vm2696_vm10, %v2698_v21, %v2694_v1 }
0x206a   :  { %2867 = vmatmul.f32.vlgmr.msrb.gmra.mxu3 %v2828_v16  ;;  %v2700_v4 = vmul.f32 %v2699_v9, %v2675_v22 }
0x206c   :  { %v5855_v24 = vclamps-f32 %v2700_v4, 1.0 }
0x206e   :  { %v2824_v37 = vadd.f32 1.0, %v5855_v24 }
0x2070   :  { %v2829_v39 = vmul.f32 %v2824_v37, %v2614_v2 }
0x2072   :  { %2870 = vmatmul.f32.gmra.mxu3 %v2829_v39 }
0x2091   :  { %v2452_v18 = vpop.xlane.xlu2 %2451 }
0x2092   :  { %v2457_v50 = vmul.f32 %v2452_v18, %v6629_v27 }
0x2094   :  { %v7616_v46 = vsub.f32 %v7522_v34, %v2457_v50 }
0x2096   :  { %v2467_v41 = vmul.f32 %v7616_v46, %v7616_v46 }
0x2098   :  { %v2480_v25 = vsel %vm97_vm11, %v2467_v41, 0.0 }
0x2099   :  { %2481 = vadd.xlane.f32.xlu1 %v2480_v25 }
0x209c   :  { %v2479_v44 = vpop.xlane.xlu1 %2478 }
0x209d   :  { %v2486_v20 = vmul.f32 %v2479_v44, %v6629_v27 }
0x209f   :  { %v2491_v51 = vadd.f32 1e-05, %v2486_v20 }
0x20a1   :  { %6262 = vrsqrt.f32 %v2491_v51  ;;  %vm2529_vm2 = vweird.f32 %v2491_v51 }
0x20a7   :  { %v6263_v45 = vpop.eup %6262 }
0x20a8   :  { %v2524_v42 = vmul.f32 %v6263_v45, %v2491_v51  ;;  %vm2530_vm0 = vweird.f32 %v6263_v45 }
0x20a9   :  { %vm2531_vm3 = vmor %vm2529_vm2, %vm2530_vm0 }
0x20aa   :  { %v2525_v54 = vmul.f32 %v6263_v45, %v2524_v42  ;;  %v2604_v36 = vpop.f32.mrf.mxu0 }
0x20ab   :  { %v2605_v35 = vadd.f32 %v7549_v53, %v2604_v36  ;;  %v7630_v36 = vld [vmem:[%s8612_s2 + $0x108] ss:$0 sm:$0xff] }
0x20ac   :  { %v2526_v23 = vmul.f32 0.5, %v2525_v54 }
0x20ad   :  { %v2620_v62 = vmul.f32 0.70710677, %v2605_v35 }
0x20ae   :  { %v2527_v14 = vsub.f32 1.5, %v2526_v23 }
0x20af   :  { %v2703_v56 = vmul.f32 %v2620_v62, %v2620_v62 }
0x20b0   :  { %v2528_v43 = vmul.f32 %v6263_v45, %v2527_v14 }
0x20b1   :  { %v2704_v59 = vmin.f32 %v2703_v56, 16.0 }
0x20b2   :  { %v2532_v55 = vsel %vm2531_vm3, %v6263_v45, %v2528_v43  ;;  %v2615_v45 = vmul.f32 0.5, %v2605_v35 }
0x20b3   :  { %v2705_v47 = vmul.f32 2.1237322e-06, %v2704_v59  ;;  %v2546_v58 = vmul.f32 %v2532_v55, %v7528_v12  ;;  %v2716_v38 = vmul.f32 3.8918573e-05, %v2704_v59 }
0x20b5   :  { %v2706_v49 = vadd.f32 0.00028619796, %v2705_v47  ;;  %v2552_v7 = vmul.f32 %v7500_v8, %v2546_v58  ;;  %v2717_v30 = vadd.f32 0.001143296, %v2716_v38 }
0x20b7   :  { %v2707_v63 = vmul.f32 %v2706_v49, %v2704_v59  ;;  %v2558_v40 = vadd.f32 %v7506_v5, %v2552_v7  ;;  %v2718_v17 = vmul.f32 %v2717_v30, %v2704_v59 }
0x20b9   :  { %5852 = vmatmul.msk.f32.gmra.mxu0 %vm84_vm1, %v2558_v40  ;;  %v2719_v29 = vadd.f32 0.014752088, %v2718_v17  ;;  %v2708_v61 = vadd.f32 0.0036580483, %v2707_v63 }
0x20bb   :  { %v2720_v6 = vmul.f32 %v2719_v29, %v2704_v59  ;;  %v2709_v10 = vmul.f32 %v2708_v61, %v2704_v59 }
0x20bd   :  { %v2721_v13 = vadd.f32 0.112945676, %v2720_v6  ;;  %v2710_v0 = vadd.f32 0.05243302, %v2709_v10 }
0x20bf   :  { %v2722_v32 = vmul.f32 %v2721_v13, %v2704_v59  ;;  %v2711_v16 = vmul.f32 %v2710_v0, %v2704_v59 }
0x20c1   :  { %v2723_v26 = vadd.f32 0.4994258, %v2722_v32  ;;  %v2712_v21 = vadd.f32 0.18741608, %v2711_v16 }
0x20c3   :  { %v2724_v12 = vmul.f32 %v2723_v26, %v2704_v59  ;;  %v2713_v1 = vmul.f32 %v2712_v21, %v2704_v59 }
0x20c5   :  { %v2725_v57 = vadd.f32 1.0, %v2724_v12  ;;  %v2714_v2 = vadd.f32 1.1283791, %v2713_v1 }
0x20c7   :  { %6264 = vrcp.f32 %v2725_v57  ;;  %v2737_v24 = vand.u32 2147483648, %v2725_v57  ;;  %v2735_v39 = vand.u32 2147483647, %v2725_v57  ;;  %vm2731_vm8 = vweird.f32 %v2725_v57 }
0x20c8   :  { %v2715_v41 = vmul.f32 %v2714_v2, %v2620_v62 }
0x20c9   :  { %v2738_v50 = vor.u32 1.1754944e-38, %v2737_v24  ;;  %vm2736_vm10 = vcmp.eq.f32.partialorder %v2735_v39, 8.507059e+37 }
0x20cd   :  { %v6265_v22 = vpop.eup %6264 }
0x20ce   :  { %v2727_v9 = vmul.f32 %v6265_v22, %v2725_v57  ;;  %vm2732_vm4 = vweird.f32 %v6265_v22 }
0x20cf   :  { %vm2733_vm9 = vmor %vm2731_vm8, %vm2732_vm4 }
0x20d0   :  { %v2728_v4 = vsub.f32 1.0, %v2727_v9 }
0x20d2   :  { %v2729_v37 = vmul.f32 %v6265_v22, %v2728_v4 }
0x20d4   :  { %v2730_v18 = vadd.f32 %v6265_v22, %v2729_v37 }
0x20d6   :  { %v2734_v25 = vsel %vm2733_vm9, %v6265_v22, %v2730_v18 }
0x20d7   :  { %v2739_v44 = vsel %vm2736_vm10, %v2738_v50, %v2734_v25 }
0x20d8   :  { %v2740_v20 = vmul.f32 %v2739_v44, %v2715_v41 }
0x20da   :  { %v5856_v51 = vclamps-f32 %v2740_v20, 1.0 }
0x20dc   :  { %v2825_v42 = vadd.f32 1.0, %v5856_v51 }
0x20de   :  { %v2830_v54 = vmul.f32 %v2825_v42, %v2615_v45 }
0x20e0   :  { %2873 = vmatmul.f32.gmra.mxu3 %v2830_v54 }
0x20ed   :  { %v2868_v23 = vpop.f32.mrf.mxu3 }
0x20ee   :  { %v2869_v14 = vadd.f32 %v7630_v36, %v2868_v23 }
0x20f0   :  { %v7634_v56 = vadd.f32 %v2869_v14, %v6611_v11 }
0x20f2   :  { %v2890_v62 = vsel %vm84_vm1, %v7634_v56, 0.0 }
0x20f3   :  { %2891 = vadd.xlane.f32.xlu1 %v2890_v62 }
0x20f5   :  { %v2871_v43 = vpop.f32.mrf.mxu3 }
0x20f6   :  { %v2872_v35 = vadd.f32 %v7630_v36, %v2871_v43 }
0x20f8   :  { %v7640_v59 = vadd.f32 %v2872_v35, %v6618_v15 }
0x20fa   :  { %v2893_v55 = vsel %vm84_vm1, %v7640_v59, 0.0 }
0x20fb   :  { %2894 = vadd.xlane.f32.xlu0 %v2893_v55 }
0x210c   :  { %v2482_v47 = vpop.xlane.xlu1 %2481 }
0x210d   :  { %v2487_v58 = vmul.f32 %v2482_v47, %v6629_v27 }
0x210f   :  { %v2492_v38 = vadd.f32 1e-05, %v2487_v58 }
0x2111   :  { %6266 = vrsqrt.f32 %v2492_v38  ;;  %vm2539_vm2 = vweird.f32 %v2492_v38 }
0x2117   :  { %v6267_v11 = vpop.eup %6266 }
0x2118   :  { %v2534_v49 = vmul.f32 %v6267_v11, %v2492_v38  ;;  %vm2540_vm0 = vweird.f32 %v6267_v11 }
0x2119   :  { %vm2541_vm3 = vmor %vm2539_vm2, %vm2540_vm0 }
0x211a   :  { %v2535_v7 = vmul.f32 %v6267_v11, %v2534_v49 }
0x211c   :  { %v2536_v30 = vmul.f32 0.5, %v2535_v7 }
0x211e   :  { %v2537_v63 = vsub.f32 1.5, %v2536_v30 }
0x2120   :  { %v2538_v40 = vmul.f32 %v6267_v11, %v2537_v63 }
0x2122   :  { %v2542_v15 = vsel %vm2541_vm3, %v6267_v11, %v2538_v40 }
0x2123   :  { %v2547_v17 = vmul.f32 %v2542_v15, %v7616_v46 }
0x2125   :  { %v2553_v29 = vmul.f32 %v7500_v8, %v2547_v17 }
0x2127   :  { %v2559_v61 = vadd.f32 %v7506_v5, %v2553_v29 }
0x2129   :  { %5853 = vmatmul.msk.f32.gmra.mxu0 %vm84_vm1, %v2559_v61 }
0x2136   :  { %v2607_v6 = vpop.f32.mrf.mxu0 }
0x2137   :  { %v2608_v13 = vadd.f32 %v7549_v53, %v2607_v6 }
0x2139   :  { %v2621_v10 = vmul.f32 0.70710677, %v2608_v13  ;;  %v2616_v30 = vmul.f32 0.5, %v2608_v13 }
0x213b   :  { %v2743_v32 = vmul.f32 %v2621_v10, %v2621_v10 }
0x213d   :  { %v2744_v26 = vmin.f32 %v2743_v32, 16.0 }
0x213f   :  { %v2745_v0 = vmul.f32 2.1237322e-06, %v2744_v26  ;;  %v2756_v12 = vmul.f32 3.8918573e-05, %v2744_v26 }
0x2141   :  { %v2746_v57 = vadd.f32 0.00028619796, %v2745_v0  ;;  %v2757_v16 = vadd.f32 0.001143296, %v2756_v12 }
0x2143   :  { %v2747_v21 = vmul.f32 %v2746_v57, %v2744_v26  ;;  %v2758_v22 = vmul.f32 %v2757_v16, %v2744_v26 }
0x2145   :  { %v2759_v1 = vadd.f32 0.014752088, %v2758_v22  ;;  %v2748_v46 = vadd.f32 0.0036580483, %v2747_v21 }
0x2147   :  { %v2760_v9 = vmul.f32 %v2759_v1, %v2744_v26  ;;  %v2749_v4 = vmul.f32 %v2748_v46, %v2744_v26 }
0x2149   :  { %v2761_v8 = vadd.f32 0.112945676, %v2760_v9  ;;  %v2750_v2 = vadd.f32 0.05243302, %v2749_v4 }
0x214b   :  { %v2762_v5 = vmul.f32 %v2761_v8, %v2744_v26  ;;  %v2751_v18 = vmul.f32 %v2750_v2, %v2744_v26 }
0x214d   :  { %v2763_v24 = vadd.f32 0.4994258, %v2762_v5  ;;  %v2752_v50 = vadd.f32 0.18741608, %v2751_v18 }
0x214f   :  { %v2764_v37 = vmul.f32 %v2763_v24, %v2744_v26  ;;  %v2753_v25 = vmul.f32 %v2752_v50, %v2744_v26 }
0x2151   :  { %v2765_v39 = vadd.f32 1.0, %v2764_v37  ;;  %v2754_v45 = vadd.f32 1.1283791, %v2753_v25 }
0x2153   :  { %6268 = vrcp.f32 %v2765_v39  ;;  %v2777_v51 = vand.u32 2147483648, %v2765_v39  ;;  %v2775_v54 = vand.u32 2147483647, %v2765_v39  ;;  %vm2771_vm8 = vweird.f32 %v2765_v39 }
0x2154   :  { %v2755_v62 = vmul.f32 %v2754_v45, %v2621_v10 }
0x2155   :  { %v2778_v14 = vor.u32 1.1754944e-38, %v2777_v51  ;;  %vm2776_vm10 = vcmp.eq.f32.partialorder %v2775_v54, 8.507059e+37 }
0x2159   :  { %v6269_v41 = vpop.eup %6268 }
0x215a   :  { %v2767_v44 = vmul.f32 %v6269_v41, %v2765_v39  ;;  %vm2772_vm4 = vweird.f32 %v6269_v41 }
0x215b   :  { %vm2773_vm9 = vmor %vm2771_vm8, %vm2772_vm4 }
0x215c   :  { %v2768_v20 = vsub.f32 1.0, %v2767_v44 }
0x215e   :  { %v2769_v42 = vmul.f32 %v6269_v41, %v2768_v20 }
0x2160   :  { %v2770_v23 = vadd.f32 %v6269_v41, %v2769_v42 }
0x2162   :  { %v2774_v43 = vsel %vm2773_vm9, %v6269_v41, %v2770_v23 }
0x2163   :  { %v2874_v35 = vpop.f32.mrf.mxu3  ;;  %v2779_v55 = vsel %vm2776_vm10, %v2778_v14, %v2774_v43 }
0x2164   :  { %v2875_v47 = vadd.f32 %v7630_v36, %v2874_v35  ;;  %v2780_v58 = vmul.f32 %v2779_v55, %v2755_v62 }
0x2166   :  { %v7652_v38 = vadd.f32 %v2875_v47, %v6625_v19  ;;  %v2892_v11 = vpop.xlane.xlu1 %2891  ;;  %v5857_v49 = vclamps-f32 %v2780_v58, 1.0 }
0x2167   :  { %v2905_v7 = vmul.f32 %v2892_v11, %v6629_v27 }
0x2168   :  { %v2896_v63 = vsel %vm84_vm1, %v7652_v38, 0.0  ;;  %v2826_v40 = vadd.f32 1.0, %v5857_v49 }
0x2169   :  { %v7658_v15 = vsub.f32 %v7634_v56, %v2905_v7  ;;  %2897 = vadd.xlane.f32.xlu1 %v2896_v63 }
0x216a   :  { %v2831_v17 = vmul.f32 %v2826_v40, %v2616_v30 }
0x216b   :  { %v2915_v29 = vmul.f32 %v7658_v15, %v7658_v15 }
0x216c   :  { %2876 = vmatmul.f32.gmra.mxu3 %v2831_v17 }
0x216d   :  { %v2920_v19 = vsel %vm84_vm1, %v2915_v29, 0.0 }
0x216e   :  { %2921 = vadd.xlane.f32.xlu2 %v2920_v19  ;;  %v2895_v61 = vpop.xlane.xlu0 %2894 }
0x216f   :  { %v2906_v6 = vmul.f32 %v2895_v61, %v6629_v27 }
0x2171   :  { %v7665_v13 = vsub.f32 %v7640_v59, %v2906_v6 }
0x2173   :  { %v2916_v10 = vmul.f32 %v7665_v13, %v7665_v13 }
0x2175   :  { %v2923_v32 = vsel %vm84_vm1, %v2916_v10, 0.0 }
0x2176   :  { %2924 = vadd.xlane.f32.xlu0 %v2923_v32 }
0x21a6   :  { %v2610_v26 = vpop.f32.mrf.mxu0 }
0x21a7   :  { %v2611_v0 = vadd.f32 %v7549_v53, %v2610_v26 }
0x21a9   :  { %v2622_v12 = vmul.f32 0.70710677, %v2611_v0  ;;  %v2617_v49 = vmul.f32 0.5, %v2611_v0 }
0x21ab   :  { %v2783_v57 = vmul.f32 %v2622_v12, %v2622_v12 }
0x21ad   :  { %v2784_v16 = vmin.f32 %v2783_v57, 16.0 }
0x21af   :  { %v2785_v21 = vmul.f32 2.1237322e-06, %v2784_v16  ;;  %v2796_v22 = vmul.f32 3.8918573e-05, %v2784_v16 }
0x21b1   :  { %v2786_v1 = vadd.f32 0.00028619796, %v2785_v21  ;;  %v2797_v46 = vadd.f32 0.001143296, %v2796_v22 }
0x21b3   :  { %v2787_v9 = vmul.f32 %v2786_v1, %v2784_v16  ;;  %v2798_v8 = vmul.f32 %v2797_v46, %v2784_v16 }
0x21b5   :  { %v2799_v59 = vadd.f32 0.014752088, %v2798_v8  ;;  %v2788_v4 = vadd.f32 0.0036580483, %v2787_v9 }
0x21b7   :  { %v2800_v5 = vmul.f32 %v2799_v59, %v2784_v16  ;;  %v2789_v2 = vmul.f32 %v2788_v4, %v2784_v16 }
0x21b9   :  { %v2801_v24 = vadd.f32 0.112945676, %v2800_v5  ;;  %v2790_v18 = vadd.f32 0.05243302, %v2789_v2  ;;  %v7686_v5 = vld [vmem:[%s8612_s2 + $0x10f] ss:$0 sm:$0xff] }
0x21bb   :  { %v2802_v37 = vmul.f32 %v2801_v24, %v2784_v16  ;;  %v2791_v53 = vmul.f32 %v2790_v18, %v2784_v16 }
0x21bd   :  { %v2803_v39 = vadd.f32 0.4994258, %v2802_v37  ;;  %v2792_v25 = vadd.f32 0.18741608, %v2791_v53 }
0x21bf   :  { %v2804_v50 = vmul.f32 %v2803_v39, %v2784_v16  ;;  %v2793_v20 = vmul.f32 %v2792_v25, %v2784_v16 }
0x21c1   :  { %v2805_v41 = vadd.f32 1.0, %v2804_v50  ;;  %v2794_v54 = vadd.f32 1.1283791, %v2793_v20 }
0x21c3   :  { %6270 = vrcp.f32 %v2805_v41  ;;  %v2817_v42 = vand.u32 2147483648, %v2805_v41  ;;  %v2815_v14 = vand.u32 2147483647, %v2805_v41  ;;  %vm2811_vm2 = vweird.f32 %v2805_v41 }
0x21c4   :  { %v2795_v35 = vmul.f32 %v2794_v54, %v2622_v12 }
0x21c5   :  { %v2818_v43 = vor.u32 1.1754944e-38, %v2817_v42  ;;  %vm2816_vm4 = vcmp.eq.f32.partialorder %v2815_v14, 8.507059e+37 }
0x21c9   :  { %v6271_v44 = vpop.eup %6270 }
0x21ca   :  { %v2807_v51 = vmul.f32 %v6271_v44, %v2805_v41  ;;  %vm2812_vm0 = vweird.f32 %v6271_v44 }
0x21cb   :  { %vm2813_vm3 = vmor %vm2811_vm2, %vm2812_vm0 }
0x21cc   :  { %v2808_v45 = vsub.f32 1.0, %v2807_v51 }
0x21ce   :  { %v2809_v23 = vmul.f32 %v6271_v44, %v2808_v45 }
0x21d0   :  { %v2810_v62 = vadd.f32 %v6271_v44, %v2809_v23 }
0x21d2   :  { %v2814_v55 = vsel %vm2813_vm3, %v6271_v44, %v2810_v62 }
0x21d3   :  { %v2819_v47 = vsel %vm2816_vm4, %v2818_v43, %v2814_v55 }
0x21d4   :  { %v2820_v58 = vmul.f32 %v2819_v47, %v2795_v35 }
0x21d6   :  { %v5858_v11 = vclamps-f32 %v2820_v58, 1.0 }
0x21d8   :  { %v2827_v7 = vadd.f32 1.0, %v5858_v11 }
0x21da   :  { %v2832_v30 = vmul.f32 %v2827_v7, %v2617_v49 }
0x21dc   :  { %2879 = vmatmul.f32.gmra.mxu3 %v2832_v30  ;;  %v2898_v63 = vpop.xlane.xlu1 %2897 }
0x21dd   :  { %v2907_v40 = vmul.f32 %v2898_v63, %v6629_v27 }
0x21df   :  { %v7673_v17 = vsub.f32 %v7652_v38, %v2907_v40 }
0x21e1   :  { %v2922_v29 = vpop.xlane.xlu2 %2921  ;;  %v2917_v19 = vmul.f32 %v7673_v17, %v7673_v17 }
0x21e2   :  { %v2935_v61 = vmul.f32 %v2922_v29, %v6629_v27 }
0x21e3   :  { %v2926_v6 = vsel %vm84_vm1, %v2917_v19, 0.0 }
0x21e4   :  { %v2940_v10 = vadd.f32 1e-05, %v2935_v61  ;;  %2927 = vadd.xlane.f32.xlu1 %v2926_v6 }
0x21e6   :  { %6272 = vrsqrt.f32 %v2940_v10  ;;  %vm2951_vm9 = vweird.f32 %v2940_v10 }
0x21e9   :  { %v2925_v32 = vpop.xlane.xlu0 %2924 }
0x21ea   :  { %v2936_v26 = vmul.f32 %v2925_v32, %v6629_v27 }
0x21ec   :  { %v6273_v0 = vpop.eup %6272  ;;  %v2941_v57 = vadd.f32 1e-05, %v2936_v26 }
0x21ed   :  { %v2946_v12 = vmul.f32 %v6273_v0, %v2940_v10  ;;  %vm2952_vm8 = vweird.f32 %v6273_v0 }
0x21ee   :  { %6274 = vrsqrt.f32 %v2941_v57  ;;  %vm2953_vm10 = vmor %vm2951_vm9, %vm2952_vm8  ;;  %vm2961_vm2 = vweird.f32 %v2941_v57 }
0x21ef   :  { %v2947_v16 = vmul.f32 %v6273_v0, %v2946_v12  ;;  %v2877_v21 = vpop.f32.mrf.mxu3 }
0x21f0   :  { %v2878_v22 = vadd.f32 %v7630_v36, %v2877_v21 }
0x21f1   :  { %v2948_v1 = vmul.f32 0.5, %v2947_v16 }
0x21f2   :  { %v2886_v46 = vadd.f32 %v2878_v22, %v6868_v48  ;;  %v7692_v48 = vld [vmem:[%s8612_s2 + $0x110] ss:$0 sm:$0xff] }
0x21f3   :  { %v2949_v9 = vsub.f32 1.5, %v2948_v1 }
0x21f4   :  { %v2899_v8 = vsel %vm84_vm1, %v2886_v46, 0.0  ;;  %v6275_v59 = vpop.eup %6274 }
0x21f5   :  { %v2950_v4 = vmul.f32 %v6273_v0, %v2949_v9  ;;  %2900 = vadd.xlane.f32.xlu2 %v2899_v8  ;;  %v2956_v24 = vmul.f32 %v6275_v59, %v2941_v57  ;;  %vm2962_vm0 = vweird.f32 %v6275_v59 }
0x21f6   :  { %vm2963_vm3 = vmor %vm2961_vm2, %vm2962_vm0 }
0x21f7   :  { %v2954_v2 = vsel %vm2953_vm10, %v6273_v0, %v2950_v4  ;;  %v2957_v39 = vmul.f32 %v6275_v59, %v2956_v24 }
0x21f8   :  { %v2995_v37 = vmul.f32 %v2954_v2, %v7658_v15 }
0x21f9   :  { %v2958_v50 = vmul.f32 0.5, %v2957_v39 }
0x21fa   :  { %v3001_v18 = vmul.f32 %v7686_v5, %v2995_v37 }
0x21fb   :  { %v2959_v41 = vsub.f32 1.5, %v2958_v50 }
0x21fc   :  { %v3007_v53 = vadd.f32 %v7692_v48, %v3001_v18 }
0x21fd   :  { %v2960_v25 = vmul.f32 %v6275_v59, %v2959_v41 }
0x21fe   :  { %5859 = vmatmul.msk.f32.vlgmr.msra.gmra.mxu2 %vm84_vm1, %v3007_v53 }
0x21ff   :  { %v2964_v44 = vsel %vm2963_vm3, %v6275_v59, %v2960_v25 }
0x2200   :  { %v2996_v15 = vmul.f32 %v2964_v44, %v7665_v13 }
0x2202   :  { %v3002_v20 = vmul.f32 %v7686_v5, %v2996_v15 }
0x2204   :  { %v3008_v51 = vadd.f32 %v7692_v48, %v3002_v20 }
0x2206   :  { %5860 = vmatmul.msk.f32.gmra.mxu2 %vm84_vm1, %v3008_v51 }
0x2257   :  { %v2928_v45 = vpop.xlane.xlu1 %2927 }
0x2258   :  { %v2937_v42 = vmul.f32 %v2928_v45, %v6629_v27 }
0x225a   :  { %v2942_v54 = vadd.f32 1e-05, %v2937_v42 }
0x225c   :  { %6276 = vrsqrt.f32 %v2942_v54  ;;  %vm2971_vm8 = vweird.f32 %v2942_v54 }
0x225f   :  { %v2880_v23 = vpop.f32.mrf.mxu3 }
0x2260   :  { %v2881_v14 = vadd.f32 %v7630_v36, %v2880_v23 }
0x2262   :  { %v6277_v62 = vpop.eup %6276  ;;  %v2887_v43 = vadd.f32 %v2881_v14, %v6876_v52 }
0x2263   :  { %v2966_v35 = vmul.f32 %v6277_v62, %v2942_v54  ;;  %vm2972_vm4 = vweird.f32 %v6277_v62 }
0x2264   :  { %v2902_v13 = vsel %vm97_vm11, %v2887_v43, 0.0  ;;  %vm2973_vm9 = vmor %vm2971_vm8, %vm2972_vm4 }
0x2265   :  { %v2967_v55 = vmul.f32 %v6277_v62, %v2966_v35  ;;  %2903 = vadd.xlane.f32.xlu0 %v2902_v13 }
0x2267   :  { %v2968_v47 = vmul.f32 0.5, %v2967_v55 }
0x2268   :  { %v2901_v58 = vpop.xlane.xlu2 %2900 }
0x2269   :  { %v2969_v11 = vsub.f32 1.5, %v2968_v47  ;;  %v2908_v49 = vmul.f32 %v2901_v58, %v6629_v27 }
0x226b   :  { %v2970_v7 = vmul.f32 %v6277_v62, %v2969_v11  ;;  %v2913_v30 = vsub.f32 %v2886_v46, %v2908_v49 }
0x226d   :  { %v2918_v63 = vmul.f32 %v2913_v30, %v2913_v30  ;;  %v2974_v36 = vsel %vm2973_vm9, %v6277_v62, %v2970_v7 }
0x226e   :  { %v2997_v40 = vmul.f32 %v2974_v36, %v7673_v17 }
0x226f   :  { %v2929_v52 = vsel %vm84_vm1, %v2918_v63, 0.0 }
0x2270   :  { %2930 = vadd.xlane.f32.xlu1 %v2929_v52  ;;  %v3003_v29 = vmul.f32 %v7686_v5, %v2997_v40 }
0x2272   :  { %v3009_v19 = vadd.f32 %v7692_v48, %v3003_v29 }
0x2274   :  { %5861 = vmatmul.msk.f32.gmra.mxu2 %vm84_vm1, %v3009_v19  ;;  %v7779_v19 = vld [vmem:[%s8613_s3 + $0x50] ss:$0 sm:$0xff] }
0x2281   :  { %v7711_v61 = vpop.f32.mrf.mxu2 }
0x2289   :  { %v7713_v6 = vpop.f32.mrf.mxu2 }
0x228a   :  { %3064 = vrot.lane.b32.xlu0 %v7713_v6, %s6536_s25 }
0x22d8   :  { %v2904_v10 = vpop.xlane.xlu0 %2903 }
0x22d9   :  { %v2909_v32 = vmul.f32 %v2904_v10, %v6629_v27 }
0x22db   :  { %v2914_v17 = vsub.f32 %v2887_v43, %v2909_v32 }
0x22dd   :  { %v2919_v26 = vmul.f32 %v2914_v17, %v2914_v17 }
0x22df   :  { %v2932_v0 = vsel %vm97_vm11, %v2919_v26, 0.0 }
0x22e0   :  { %2933 = vadd.xlane.f32.xlu2 %v2932_v0 }
0x22e3   :  { %v2931_v12 = vpop.xlane.xlu1 %2930 }
0x22e4   :  { %v2938_v57 = vmul.f32 %v2931_v12, %v6629_v27 }
0x22e6   :  { %v2943_v16 = vadd.f32 1e-05, %v2938_v57 }
0x22e8   :  { %6278 = vrsqrt.f32 %v2943_v16  ;;  %vm2981_vm0 = vweird.f32 %v2943_v16 }
0x22ee   :  { %v6279_v21 = vpop.eup %6278 }
0x22ef   :  { %v2976_v22 = vmul.f32 %v6279_v21, %v2943_v16  ;;  %vm2982_vm10 = vweird.f32 %v6279_v21 }
0x22f0   :  { %vm2983_vm2 = vmor %vm2981_vm0, %vm2982_vm10 }
0x22f1   :  { %v2977_v1 = vmul.f32 %v6279_v21, %v2976_v22 }
0x22f3   :  { %v2978_v46 = vmul.f32 0.5, %v2977_v1 }
0x22f5   :  { %v2979_v9 = vsub.f32 1.5, %v2978_v46 }
0x22f7   :  { %v2980_v8 = vmul.f32 %v6279_v21, %v2979_v9  ;;  %v7720_v59 = vpop.f32.mrf.mxu2 }
0x22f8   :  { %3319 = vrot.lane.b32.xlu2 %v7713_v6, %s6537_s11  ;;  %3066 = vrot.lane.b32.xlu1 %v7720_v59, %s6536_s25 }
0x22f9   :  { %3321 = vrot.lane.b32.xlu0 %v7720_v59, %s6537_s11  ;;  %v2984_v4 = vsel %vm2983_vm2, %v6279_v21, %v2980_v8 }
0x22fa   :  { %v2998_v24 = vmul.f32 %v2984_v4, %v2913_v30 }
0x22fc   :  { %v3004_v2 = vmul.f32 %v7686_v5, %v2998_v24  ;;  %v3065_v44 = vpop.permute.xlu0 %3064 }
0x22fe   :  { %v3010_v37 = vadd.f32 %v7692_v48, %v3004_v2 }
0x2300   :  { %3062 = vrot.lane.b32.xlu2 %v7711_v61, %s6536_s25  ;;  %3311 = vrot.lane.b32.xlu1 %v7711_v61, %s6539_s12 }
0x2301   :  { %3317 = vrot.lane.b32.xlu0 %v7711_v61, %s6537_s11  ;;  %5862 = vmatmul.msk.f32.gmra.mxu2 %vm84_vm1, %v3010_v37 }
0x2308   :  { %3315 = vrot.lane.b32.xlu1 %v7720_v59, %s6539_s12 }
0x2309   :  { %3313 = vrot.lane.b32.xlu0 %v7713_v6, %s6539_s12 }
0x2310   :  { %3576 = vrot.lane.b32.xlu1 %v7720_v59, %s6541_s18 }
0x2311   :  { %3574 = vrot.lane.b32.xlu0 %v7713_v6, %s6541_s18 }
0x2353   :  { %v2934_v39 = vpop.xlane.xlu2 %2933 }
0x2354   :  { %v2939_v18 = vmul.f32 %v2934_v39, %v6629_v27 }
0x2356   :  { %v2944_v50 = vadd.f32 1e-05, %v2939_v18 }
0x2358   :  { %6280 = vrsqrt.f32 %v2944_v50  ;;  %vm2991_vm4 = vweird.f32 %v2944_v50 }
0x235b   :  { %v3320_v45 = vpop.permute.xlu2 %3319 }
0x235e   :  { %v6281_v41 = vpop.eup %6280 }
0x235f   :  { %v2986_v53 = vmul.f32 %v6281_v41, %v2944_v50  ;;  %vm2992_vm3 = vweird.f32 %v6281_v41 }
0x2360   :  { %vm2993_vm8 = vmor %vm2991_vm4, %vm2992_vm3 }
0x2361   :  { %v2987_v25 = vmul.f32 %v6281_v41, %v2986_v53 }
0x2363   :  { %v2988_v15 = vmul.f32 0.5, %v2987_v25  ;;  %v3063_v35 = vpop.permute.xlu2 %3062 }
0x2365   :  { %v2989_v20 = vsub.f32 1.5, %v2988_v15 }
0x2367   :  { %v2990_v51 = vmul.f32 %v6281_v41, %v2989_v20 }
0x2369   :  { %v2994_v42 = vsel %vm2993_vm8, %v6281_v41, %v2990_v51 }
0x236a   :  { %v3067_v54 = vpop.permute.xlu1 %3066  ;;  %v2999_v23 = vmul.f32 %v2994_v42, %v2914_v17 }
0x236b   :  { %v3322_v14 = vpop.permute.xlu0 %3321  ;;  %5864 = vmatpush.xpose.msk.msrb.mxu1 %vm281_vm13, %v3067_v54 }
0x236c   :  { %5876 = vmatpush.xpose.msk.msrb.mxu2 %vm281_vm13, %v3322_v14  ;;  %v3005_v62 = vmul.f32 %v7686_v5, %v2999_v23 }
0x236e   :  { %v3011_v43 = vadd.f32 %v7692_v48, %v3005_v62 }
0x236f   :  { %5865 = vmatpush.xpose.msk.msrb.mxu1 %vm281_vm13, %v3065_v44 }
0x2370   :  { %5877 = vmatpush.xpose.msk.msrb.mxu2 %vm281_vm13, %v3320_v45 }
0x2371   :  { %5863 = vmatmul.msk.f32.gmra.mxu2 %vm84_vm1, %v3011_v43 }
0x2372   :  { %v3312_v13 = vpop.permute.xlu1 %3311 }
0x2373   :  { %v3318_v55 = vpop.permute.xlu0 %3317  ;;  %5866 = vmatpush.xpose.msk.msrb.mxu1 %vm281_vm13, %v3063_v35 }
0x2374   :  { %5878 = vmatpush.xpose.msk.msrb.mxu2 %vm281_vm13, %v3318_v55 }
0x2376   :  { %5867 = vmatmul.msk.f32.vlgmr.msrb.gmra.mxu1 %vm281_vm13, %v7711_v61 }
0x2379   :  { %5879 = vmatmul.msk.f32.vlgmr.msrb.gmra.mxu2 %vm281_vm13, %v3312_v13 }
0x237a   :  { %v3316_v5 = vpop.permute.xlu1 %3315 }
0x237b   :  { %v3314_v48 = vpop.permute.xlu0 %3313 }
0x237e   :  { %5868 = vmatmul.msk.f32.gmra.mxu1 %vm281_vm13, %v7713_v6 }
0x2381   :  { %5880 = vmatmul.msk.f32.gmra.mxu2 %vm281_vm13, %v3314_v48 }
0x2382   :  { %v3577_v47 = vpop.permute.xlu1 %3576 }
0x2383   :  { %5888 = vmatpush.xpose.msk.msra.mxu0 %vm281_vm13, %v3577_v47  ;;  %v3575_v58 = vpop.permute.xlu0 %3574 }
0x2384   :  { %v7766_v11 = vpop.f32.mrf.mxu2 }
0x2386   :  { %5869 = vmatmul.msk.f32.gmra.mxu1 %vm281_vm13, %v7720_v59 }
0x2387   :  { %5889 = vmatpush.xpose.msk.msra.mxu0 %vm281_vm13, %v3575_v58 }
0x2389   :  { %5881 = vmatmul.msk.f32.gmra.mxu2 %vm281_vm13, %v3316_v5 }
0x23f3   :  { %v3097_v49 = vpop.f32.mrf.mxu1 }
0x23f4   :  { %v7768_v7 = vpop.f32.mrf.mxu2  ;;  %5871 = vmatmul.msk.f32.vlgmr.msrb.gmra.mxu0 %vm321_vm14, %v3097_v49 }
0x23fb   :  { %v3100_v30 = vpop.f32.mrf.mxu1 }
0x23fc   :  { %v3352_v63 = vpop.f32.mrf.mxu2  ;;  %5872 = vmatmul.msk.f32.gmra.mxu0 %vm321_vm14, %v3100_v30 }
0x23fd   :  { %5883 = vmatmul.msk.f32.vlgmr.msra.gmra.mxu3 %vm321_vm14, %v3352_v63 }
0x2403   :  { %v3103_v36 = vpop.f32.mrf.mxu1 }
0x2404   :  { %v3355_v40 = vpop.f32.mrf.mxu2  ;;  %5873 = vmatmul.msk.f32.gmra.mxu0 %vm321_vm14, %v3103_v36 }
0x2405   :  { %5884 = vmatmul.msk.f32.gmra.mxu3 %vm321_vm14, %v3355_v40 }
0x240c   :  { %v3358_v52 = vpop.f32.mrf.mxu2 }
0x240d   :  { %5885 = vmatmul.msk.f32.gmra.mxu3 %vm321_vm14, %v3358_v52 }
0x2471   :  { %v3132_v29 = vpop.f32.mrf.mxu0 }
0x2472   :  { %v3133_v10 = vadd.f32 %v7779_v19, %v3132_v29 }
0x2474   :  { %v3141_v32 = vsel %vm281_vm13, %v3133_v10, 0.0 }
0x2475   :  { %3142 = vadd.xlane.f32.xlu2 %v3141_v32 }
0x2479   :  { %v3135_v17 = vpop.f32.mrf.mxu0 }
0x247a   :  { %v3136_v26 = vadd.f32 %v7779_v19, %v3135_v17 }
0x247c   :  { %v3144_v0 = vsel %vm281_vm13, %v3136_v26, 0.0 }
0x247d   :  { %3145 = vadd.xlane.f32.xlu0 %v3144_v0 }
0x2480   :  { %v3387_v12 = vpop.f32.mrf.mxu3 }
0x2481   :  { %v3388_v57 = vadd.f32 %v7779_v19, %v3387_v12  ;;  %v3138_v16 = vpop.f32.mrf.mxu0 }
0x2482   :  { %v3139_v21 = vadd.f32 %v7779_v19, %v3138_v16 }
0x2483   :  { %v3396_v22 = vsel %vm281_vm13, %v3388_v57, 0.0 }
0x2484   :  { %3397 = vadd.xlane.f32.xlu2 %v3396_v22  ;;  %v3147_v1 = vsel %vm367_vm15, %v3139_v21, 0.0 }
0x2485   :  { %3148 = vadd.xlane.f32.xlu1 %v3147_v1 }
0x2488   :  { %v3390_v46 = vpop.f32.mrf.mxu3 }
0x2489   :  { %v3391_v9 = vadd.f32 %v7779_v19, %v3390_v46 }
0x248b   :  { %v3399_v8 = vsel %vm281_vm13, %v3391_v9, 0.0 }
0x248c   :  { %3400 = vadd.xlane.f32.xlu0 %v3399_v8 }
0x2490   :  { %v3393_v4 = vpop.f32.mrf.mxu3 }
0x2491   :  { %v3394_v24 = vadd.f32 %v7779_v19, %v3393_v4 }
0x2493   :  { %v3402_v2 = vsel %vm367_vm15, %v3394_v24, 0.0 }
0x2494   :  { %3403 = vadd.xlane.f32.xlu2 %v3402_v2 }
0x24a0   :  { %3566 = vrot.lane.b32.xlu0 %v7711_v61, %s6542_s19 }
0x24ac   :  { %3572 = vrot.lane.b32.xlu2 %v7711_v61, %s6541_s18 }
0x24e8   :  { %v3143_v37 = vpop.xlane.xlu2 %3142 }
0x24e9   :  { %v3150_v39 = vmul.f32 %v3143_v37, %v6753_v60 }
0x24eb   :  { %v7798_v18 = vsub.f32 %v3133_v10, %v3150_v39 }
0x24ed   :  { %v3156_v50 = vmul.f32 %v7798_v18, %v7798_v18 }
0x24ef   :  { %v3159_v41 = vsel %vm281_vm13, %v3156_v50, 0.0 }
0x24f0   :  { %v3146_v53 = vpop.xlane.xlu0 %3145  ;;  %3160 = vadd.xlane.f32.xlu1 %v3159_v41 }
0x24f1   :  { %v3151_v25 = vmul.f32 %v3146_v53, %v6753_v60 }
0x24f3   :  { %v7804_v44 = vsub.f32 %v3136_v26, %v3151_v25 }
0x24f5   :  { %v3157_v15 = vmul.f32 %v7804_v44, %v7804_v44 }
0x24f7   :  { %v3398_v20 = vpop.xlane.xlu2 %3397  ;;  %v3162_v51 = vsel %vm281_vm13, %v3157_v15, 0.0 }
0x24f8   :  { %v3405_v45 = vmul.f32 %v3398_v20, %v6753_v60  ;;  %3163 = vadd.xlane.f32.xlu0 %v3162_v51  ;;  %v3149_v42 = vpop.xlane.xlu1 %3148 }
0x24f9   :  { %v3152_v54 = vmul.f32 %v3149_v42, %v6753_v60 }
0x24fa   :  { %v7811_v23 = vsub.f32 %v3388_v57, %v3405_v45  ;;  %v7848_v45 = vld [vmem:[%s8613_s3 + $0x51] ss:$0 sm:$0xff] }
0x24fb   :  { %v7813_v14 = vsub.f32 %v3139_v21, %v3152_v54 }
0x24fc   :  { %v3411_v62 = vmul.f32 %v7811_v23, %v7811_v23 }
0x24fd   :  { %v3158_v43 = vmul.f32 %v7813_v14, %v7813_v14 }
0x24fe   :  { %v3414_v35 = vsel %vm281_vm13, %v3411_v62, 0.0 }
0x24ff   :  { %3415 = vadd.xlane.f32.xlu1 %v3414_v35  ;;  %v3401_v13 = vpop.xlane.xlu0 %3400  ;;  %v3165_v55 = vsel %vm367_vm15, %v3158_v43, 0.0 }
0x2500   :  { %v3406_v5 = vmul.f32 %v3401_v13, %v6753_v60  ;;  %3166 = vadd.xlane.f32.xlu2 %v3165_v55 }
0x2502   :  { %v7822_v48 = vsub.f32 %v3391_v9, %v3406_v5 }
0x2504   :  { %v3412_v47 = vmul.f32 %v7822_v48, %v7822_v48 }
0x2506   :  { %v3417_v58 = vsel %vm281_vm13, %v3412_v47, 0.0 }
0x2507   :  { %3418 = vadd.xlane.f32.xlu0 %v3417_v58  ;;  %v3404_v49 = vpop.xlane.xlu2 %3403 }
0x2508   :  { %v3407_v30 = vmul.f32 %v3404_v49, %v6753_v60 }
0x250a   :  { %v7828_v63 = vsub.f32 %v3394_v24, %v3407_v30 }
0x250c   :  { %v3413_v36 = vmul.f32 %v7828_v63, %v7828_v63 }
0x250e   :  { %v3420_v40 = vsel %vm367_vm15, %v3413_v36, 0.0 }
0x250f   :  { %v3573_v52 = vpop.permute.xlu2 %3572  ;;  %3421 = vadd.xlane.f32.xlu2 %v3420_v40 }
0x2510   :  { %5890 = vmatpush.xpose.msk.msra.mxu0 %vm281_vm13, %v3573_v52 }
0x2512   :  { %v3567_v29 = vpop.permute.xlu0 %3566 }
0x2513   :  { %5891 = vmatmul.msk.f32.vlgmr.msra.gmra.mxu0 %vm281_vm13, %v3567_v29 }
0x2518   :  { %3568 = vrot.lane.b32.xlu1 %v7713_v6, %s6542_s19 }
0x2527   :  { %3570 = vrot.lane.b32.xlu2 %v7720_v59, %s6542_s19 }
0x2563   :  { %v3161_v10 = vpop.xlane.xlu1 %3160 }
0x2564   :  { %v3168_v32 = vmul.f32 %v3161_v10, %v6753_v60 }
0x2566   :  { %v3171_v17 = vadd.f32 1e-05, %v3168_v32 }
0x2568   :  { %6282 = vrsqrt.f32 %v3171_v17  ;;  %vm3180_vm10 = vweird.f32 %v3171_v17 }
0x256b   :  { %v3164_v26 = vpop.xlane.xlu0 %3163 }
0x256c   :  { %v3169_v0 = vmul.f32 %v3164_v26, %v6753_v60 }
0x256e   :  { %v6283_v12 = vpop.eup %6282  ;;  %v3172_v57 = vadd.f32 1e-05, %v3169_v0 }
0x256f   :  { %v3175_v16 = vmul.f32 %v6283_v12, %v3171_v17  ;;  %vm3181_vm9 = vweird.f32 %v6283_v12 }
0x2570   :  { %6284 = vrsqrt.f32 %v3172_v57  ;;  %vm3182_vm0 = vmor %vm3180_vm10, %vm3181_vm9  ;;  %vm3190_vm3 = vweird.f32 %v3172_v57 }
0x2571   :  { %v3176_v21 = vmul.f32 %v6283_v12, %v3175_v16 }
0x2572   :  { %v3416_v22 = vpop.xlane.xlu1 %3415 }
0x2573   :  { %v3177_v1 = vmul.f32 0.5, %v3176_v21  ;;  %v3423_v46 = vmul.f32 %v3416_v22, %v6753_v60  ;;  %v3167_v9 = vpop.xlane.xlu2 %3166 }
0x2574   :  { %v3170_v8 = vmul.f32 %v3167_v9, %v6753_v60 }
0x2575   :  { %v3178_v4 = vsub.f32 1.5, %v3177_v1  ;;  %v3426_v24 = vadd.f32 1e-05, %v3423_v46 }
0x2576   :  { %v6285_v2 = vpop.eup %6284  ;;  %v3173_v37 = vadd.f32 1e-05, %v3170_v8 }
0x2577   :  { %v3179_v39 = vmul.f32 %v6283_v12, %v3178_v4  ;;  %v3185_v50 = vmul.f32 %v6285_v2, %v3172_v57  ;;  %6286 = vrsqrt.f32 %v3426_v24  ;;  %vm3191_vm2 = vweird.f32 %v6285_v2 }
0x2578   :  { %6288 = vrsqrt.f32 %v3173_v37  ;;  %vm3192_vm4 = vmor %vm3190_vm3, %vm3191_vm2  ;;  %vm3435_vm10 = vweird.f32 %v3426_v24  ;;  %vm3200_vm2 = vweird.f32 %v3173_v37 }
0x2579   :  { %v3186_v41 = vmul.f32 %v6285_v2, %v3185_v50  ;;  %v3183_v53 = vsel %vm3182_vm0, %v6283_v12, %v3179_v39 }
0x257a   :  { %v3419_v25 = vpop.xlane.xlu0 %3418  ;;  %v3204_v15 = vmul.f32 %v3183_v53, %v7798_v18  ;;  %v7854_v18 = vld [vmem:[%s8613_s3 + $0x52] ss:$0 sm:$0xff] }
0x257b   :  { %v3187_v20 = vmul.f32 0.5, %v3186_v41  ;;  %v3424_v51 = vmul.f32 %v3419_v25, %v6753_v60 }
0x257c   :  { %v3207_v42 = vmul.f32 %v7848_v45, %v3204_v15 }
0x257d   :  { %v6287_v54 = vpop.eup %6286  ;;  %v3188_v62 = vsub.f32 1.5, %v3187_v20  ;;  %v3427_v43 = vadd.f32 1e-05, %v3424_v51 }
0x257e   :  { %v6289_v35 = vpop.eup %6288  ;;  %v3430_v13 = vmul.f32 %v6287_v54, %v3426_v24  ;;  %v7857_v55 = vadd.f32 %v7854_v18, %v3207_v42  ;;  %vm3436_vm8 = vweird.f32 %v6287_v54 }
0x257f   :  { %v3189_v5 = vmul.f32 %v6285_v2, %v3188_v62  ;;  %v3195_v47 = vmul.f32 %v6289_v35, %v3173_v37  ;;  %6290 = vrsqrt.f32 %v3427_v43  ;;  %vm3201_vm9 = vweird.f32 %v6289_v35  ;;  %vm3437_vm0 = vmor %vm3435_vm10, %vm3436_vm8 }
0x2580   :  { %v3431_v58 = vmul.f32 %v6287_v54, %v3430_v13  ;;  %v3213_v49 = vsel %vm281_vm13, %v7857_v55, -inf  ;;  %vm3202_vm3 = vmor %vm3200_vm2, %vm3201_vm9  ;;  %vm3445_vm8 = vweird.f32 %v3427_v43 }
0x2581   :  { %v3196_v30 = vmul.f32 %v6289_v35, %v3195_v47  ;;  %3214 = vmax.xlane.f32.xlu0 %v3213_v49  ;;  %v3193_v36 = vsel %vm3192_vm4, %v6285_v2, %v3189_v5 }
0x2582   :  { %v3432_v40 = vmul.f32 0.5, %v3431_v58  ;;  %v3422_v52 = vpop.xlane.xlu2 %3421  ;;  %v3205_v29 = vmul.f32 %v3193_v36, %v7804_v44 }
0x2583   :  { %v3197_v10 = vmul.f32 0.5, %v3196_v30  ;;  %v3425_v32 = vmul.f32 %v3422_v52, %v6753_v60 }
0x2584   :  { %v3433_v17 = vsub.f32 1.5, %v3432_v40  ;;  %v3208_v26 = vmul.f32 %v7848_v45, %v3205_v29  ;;  %v7888_v29 = vpack.i.bf16 %v7711_v61, %v7713_v6 }
0x2585   :  { %v6291_v0 = vpop.eup %6290  ;;  %v3198_v12 = vsub.f32 1.5, %v3197_v10  ;;  %v3428_v57 = vadd.f32 1e-05, %v3425_v32 }
0x2586   :  { %v3434_v16 = vmul.f32 %v6287_v54, %v3433_v17  ;;  %v3440_v21 = vmul.f32 %v6291_v0, %v3427_v43  ;;  %v3211_v22 = vadd.f32 %v7854_v18, %v3208_v26  ;;  %vm3446_vm4 = vweird.f32 %v6291_v0 }
0x2587   :  { %v3199_v1 = vmul.f32 %v6289_v35, %v3198_v12  ;;  %6292 = vrsqrt.f32 %v3428_v57  ;;  %vm3447_vm9 = vmor %vm3445_vm8, %vm3446_vm4 }
0x2588   :  { %v3441_v44 = vmul.f32 %v6291_v0, %v3440_v21  ;;  %v3216_v46 = vsel %vm281_vm13, %v3211_v22, -inf  ;;  %v3438_v9 = vsel %vm3437_vm0, %v6287_v54, %v3434_v16  ;;  %vm3455_vm0 = vweird.f32 %v3428_v57 }
0x2589   :  { %3217 = vmax.xlane.f32.xlu1 %v3216_v46  ;;  %v3459_v8 = vmul.f32 %v3438_v9, %v7811_v23  ;;  %v3203_v4 = vsel %vm3202_vm3, %v6289_v35, %v3199_v1 }
0x258a   :  { %v3442_v2 = vmul.f32 0.5, %v3441_v44  ;;  %v3569_v39 = vpop.permute.xlu1 %3568  ;;  %v3206_v24 = vmul.f32 %v3203_v4, %v7813_v14  ;;  %v3571_v13 = vpop.permute.xlu2 %3570 }
0x258b   :  { %5892 = vmatmul.msk.f32.gmra.mxu0 %vm281_vm13, %v3569_v39  ;;  %v3462_v50 = vmul.f32 %v7848_v45, %v3459_v8 }
0x258c   :  { %v3443_v41 = vsub.f32 1.5, %v3442_v2  ;;  %v3209_v37 = vmul.f32 %v7848_v45, %v3206_v24 }
0x258d   :  { %v6293_v53 = vpop.eup %6292  ;;  %v3465_v25 = vadd.f32 %v7854_v18, %v3462_v50 }
0x258e   :  { %v3444_v15 = vmul.f32 %v6291_v0, %v3443_v41  ;;  %v3450_v20 = vmul.f32 %v6293_v53, %v3428_v57  ;;  %v3212_v23 = vadd.f32 %v7854_v18, %v3209_v37  ;;  %vm3456_vm10 = vweird.f32 %v6293_v53 }
0x258f   :  { %v3468_v51 = vsel %vm281_vm13, %v3465_v25, -inf  ;;  %vm3457_vm2 = vmor %vm3455_vm0, %vm3456_vm10 }
0x2590   :  { %v3451_v14 = vmul.f32 %v6293_v53, %v3450_v20  ;;  %3469 = vmax.xlane.f32.xlu0 %v3468_v51  ;;  %v3219_v42 = vsel %vm367_vm15, %v3212_v23, -inf  ;;  %v3448_v54 = vsel %vm3447_vm9, %v6291_v0, %v3444_v15 }
0x2591   :  { %3220 = vmax.xlane.f32.xlu2 %v3219_v42  ;;  %v3460_v62 = vmul.f32 %v3448_v54, %v7822_v48 }
0x2592   :  { %v3452_v35 = vmul.f32 0.5, %v3451_v14 }
0x2593   :  { %5893 = vmatmul.msk.f32.gmra.mxu0 %vm281_vm13, %v3571_v13  ;;  %v3463_v43 = vmul.f32 %v7848_v45, %v3460_v62 }
0x2594   :  { %v3453_v5 = vsub.f32 1.5, %v3452_v35 }
0x2595   :  { %v3466_v47 = vadd.f32 %v7854_v18, %v3463_v43 }
0x2596   :  { %v3454_v58 = vmul.f32 %v6293_v53, %v3453_v5 }
0x2597   :  { %v3471_v49 = vsel %vm281_vm13, %v3466_v47, -inf }
0x2598   :  { %3472 = vmax.xlane.f32.xlu1 %v3471_v49  ;;  %v3458_v30 = vsel %vm3457_vm2, %v6293_v53, %v3454_v58 }
0x2599   :  { %v3461_v36 = vmul.f32 %v3458_v30, %v7828_v63 }
0x259b   :  { %v3464_v48 = vmul.f32 %v7848_v45, %v3461_v36 }
0x259d   :  { %v3467_v40 = vadd.f32 %v7854_v18, %v3464_v48 }
0x259f   :  { %v3474_v52 = vsel %vm367_vm15, %v3467_v40, -inf }
0x25a0   :  { %3475 = vmax.xlane.f32.xlu2 %v3474_v52 }
0x25a4   :  { %3282 = vrot.lane.b32.xlu0 %v7720_v59, %s6540_s17 }
0x25b1   :  { %6039 = vrot.lane.b32.xlu1 %v7888_v29, %s6540_s17 }
0x25f4   :  { %v3215_v10 = vpop.xlane.xlu0 %3214 }
0x25f5   :  { %v3222_v63 = vsub.f32 %v7857_v55, %v3215_v10 }
0x25f7   :  { %v3225_v32 = vmul.f32 1.442695, %v3222_v63 }
0x25f9   :  { %6294 = vpow2.f32 %v3225_v32 }
0x25fc   :  { %v3218_v17 = vpop.xlane.xlu1 %3217 }
0x25fd   :  { %v3223_v26 = vsub.f32 %v3211_v22, %v3218_v17 }
0x25ff   :  { %v6295_v0 = vpop.eup %6294  ;;  %v3227_v12 = vmul.f32 1.442695, %v3223_v26 }
0x2600   :  { %v3231_v57 = vsel %vm281_vm13, %v6295_v0, 0.0 }
0x2601   :  { %6296 = vpow2.f32 %v3227_v12  ;;  %3232 = vadd.xlane.f32.xlu0 %v3231_v57 }
0x2603   :  { %v3470_v16 = vpop.xlane.xlu0 %3469 }
0x2604   :  { %v3477_v21 = vsub.f32 %v3465_v25, %v3470_v16  ;;  %v3221_v1 = vpop.xlane.xlu2 %3220 }
0x2605   :  { %v3224_v44 = vsub.f32 %v3212_v23, %v3221_v1 }
0x2606   :  { %v3480_v46 = vmul.f32 1.442695, %v3477_v21 }
0x2607   :  { %v6297_v9 = vpop.eup %6296  ;;  %v3229_v8 = vmul.f32 1.442695, %v3224_v44  ;;  %v7909_v44 = vld [vmem:[%s8613_s3 + $0x10] sm:$0x1] }
0x2608   :  { %6298 = vpow2.f32 %v3480_v46  ;;  %v3234_v55 = vsel %vm281_vm13, %v6297_v9, 0.0  ;;  %v7916_v46 = vld [vmem:[%s8613_s3 + $0x8] sm:$0xff] }
0x2609   :  { %6300 = vpow2.f32 %v3229_v8  ;;  %3235 = vadd.xlane.f32.xlu1 %v3234_v55  ;;  %v3607_v55 = vpop.f32.mrf.mxu0 }
0x260b   :  { %v3473_v4 = vpop.xlane.xlu1 %3472 }
0x260c   :  { %v3478_v22 = vsub.f32 %v3466_v47, %v3473_v4 }
0x260e   :  { %v6299_v2 = vpop.eup %6298  ;;  %v3482_v39 = vmul.f32 1.442695, %v3478_v22 }
0x260f   :  { %v6301_v24 = vpop.eup %6300  ;;  %v3486_v50 = vsel %vm281_vm13, %v6299_v2, 0.0 }
0x2610   :  { %6302 = vpow2.f32 %v3482_v39  ;;  %3487 = vadd.xlane.f32.xlu0 %v3486_v50  ;;  %v3237_v41 = vsel %vm367_vm15, %v6301_v24, 0.0 }
0x2611   :  { %3238 = vadd.xlane.f32.xlu2 %v3237_v41  ;;  %v3610_v4 = vpop.f32.mrf.mxu0 }
0x2613   :  { %v3476_v37 = vpop.xlane.xlu2 %3475 }
0x2614   :  { %v3479_v53 = vsub.f32 %v3467_v40, %v3476_v37 }
0x2616   :  { %v6303_v25 = vpop.eup %6302  ;;  %v3484_v15 = vmul.f32 1.442695, %v3479_v53  ;;  %v3283_v20 = vpop.permute.xlu0 %3282 }
0x2617   :  { %5874 = vmatpush.msk.msra.mxu1 %vm331_vm12, %v3283_v20  ;;  %v3489_v23 = vsel %vm281_vm13, %v6303_v25, 0.0 }
0x2618   :  { %6304 = vpow2.f32 %v3484_v15  ;;  %3490 = vadd.xlane.f32.xlu1 %v3489_v23 }
0x2619   :  { %v3613_v22 = vpop.f32.mrf.mxu0 }
0x261e   :  { %v6305_v51 = vpop.eup %6304 }
0x261f   :  { %v3492_v14 = vsel %vm367_vm15, %v6305_v51, 0.0 }
0x2620   :  { %3493 = vadd.xlane.f32.xlu2 %v3492_v14 }
0x2623   :  { %v6040_v42 = vpop.permute.xlu1 %6039 }
0x2624   :  { %v6041_v54 = vunpack.i.l.bf16 %v6040_v42  ;;  %6044 = vrot.lane.b32.xlu0 %v7888_v29, %s6543_s24  ;;  %v6042_v62 = vunpack.i.h.bf16 %v6040_v42 }
0x2626   :  { %3305 = vmatpush.msra.mxu1 %v6041_v54 }
0x2628   :  { %3306 = vmatpush.msra.mxu1 %v6042_v62 }
0x2638   :  { %3537 = vrot.lane.b32.xlu2 %v7720_v59, %s6543_s24 }
0x2674   :  { %v3233_v35 = vpop.xlane.xlu0 %3232 }
0x2675   :  { %6306 = vrcp.f32 %v3233_v35 }
0x267b   :  { %v6307_v13 = vpop.eup %6306 }
0x267c   :  { %v3236_v43 = vpop.xlane.xlu1 %3235  ;;  %v3243_v5 = vmul.f32 %v6307_v13, %v6295_v0 }
0x267d   :  { %6308 = vrcp.f32 %v3236_v43 }
0x267e   :  { %3246 = vxpose.xlu1.b32.start [1/3] (short) (narrow) %v3243_v5, 8 }
0x2683   :  { %v6309_v47 = vpop.eup %6308  ;;  %v3488_v58 = vpop.xlane.xlu0 %3487 }
0x2684   :  { %6310 = vrcp.f32 %v3488_v58  ;;  %v3239_v49 = vpop.xlane.xlu2 %3238  ;;  %v3244_v30 = vmul.f32 %v6309_v47, %v6297_v9  ;;  %v7922_v9 = vld [vmem:[%s8613_s3] sm:$0xff] }
0x2685   :  { %6312 = vrcp.f32 %v3239_v49 }
0x2686   :  { %3247 = vxpose.xlu1.b32.cont [2/3] (short) (narrow) %v3244_v30, 8 }
0x268a   :  { %v6311_v36 = vpop.eup %6310 }
0x268b   :  { %v6313_v48 = vpop.eup %6312  ;;  %v3491_v40 = vpop.xlane.xlu1 %3490  ;;  %v3498_v52 = vmul.f32 %v6311_v36, %v6299_v2 }
0x268c   :  { %6314 = vrcp.f32 %v3491_v40  ;;  %v3245_v10 = vmul.f32 %v6313_v48, %v6301_v24 }
0x268d   :  { %3501 = vxpose.xlu0.b32.start [1/3] (short) (narrow) %v3498_v52, 8 }
0x268e   :  { %3248 = vxpose.xlu1.b32.end [3/3] (short) (narrow) %v3245_v10, 8 }
0x2692   :  { %v6315_v63 = vpop.eup %6314 }
0x2693   :  { %v3494_v32 = vpop.xlane.xlu2 %3493  ;;  %v3499_v17 = vmul.f32 %v6315_v63, %v6303_v25 }
0x2694   :  { %6316 = vrcp.f32 %v3494_v32 }
0x2695   :  { %3502 = vxpose.xlu0.b32.cont [2/3] (short) (narrow) %v3499_v17, 8 }
0x2696   :  { %v6045_v26 = vpop.permute.xlu0 %6044 }
0x2697   :  { %v6046_v16 = vunpack.i.l.bf16 %v6045_v26  ;;  %v6047_v21 = vunpack.i.h.bf16 %v6045_v26 }
0x269a   :  { %v6317_v0 = vpop.eup %6316 }
0x269b   :  { %v3538_v12 = vpop.permute.xlu2 %3537  ;;  %v3500_v57 = vmul.f32 %v6317_v0, %v6305_v51 }
0x269c   :  { %5886 = vmatpush.msk.msrb.mxu1 %vm331_vm12, %v3538_v12 }
0x269d   :  { %3503 = vxpose.xlu0.b32.end [3/3] (short) (narrow) %v3500_v57, 8 }
0x269e   :  { %3560 = vmatpush.msrb.mxu1 %v6046_v16 }
0x26a0   :  { %3561 = vmatpush.msrb.mxu1 %v6047_v21 }
0x2722   :  { %v3262_v1 = vpop.trf.xlu1 }
0x2723   :  { %5875 = vmatmul.msk.f32.vlgmr.msra.gmra.mxu1 %vm321_vm14, %v3262_v1 }
0x2724   :  { %5894 = vmatpush.msk.msra.mxu1 %vm331_vm12, %v7909_v44 }
0x2726   :  { %3639 = vmatpush.msra.mxu1 %v7916_v46 }
0x2728   :  { %3640 = vmatpush.msra.mxu1 %v7922_v9 }
0x2731   :  { %v3517_v8 = vpop.trf.xlu0 }
0x2732   :  { %5887 = vmatmul.msk.f32.vlgmr.msrb.gmra.mxu1 %vm321_vm14, %v3517_v8 }
0x273a   :  { %5895 = vmatmul.msk.f32.vlgmr.msra.gmra.mxu1 %vm321_vm14, %v3607_v55 }
0x2742   :  { %5896 = vmatmul.msk.f32.gmra.mxu1 %vm321_vm14, %v3610_v4 }
0x274a   :  { %5897 = vmatmul.msk.f32.gmra.mxu1 %vm321_vm14, %v3613_v22 }
0x27a0   :  { %v7929_v2 = vpop.f32.mrf.mxu1 }
0x27af   :  { %v7931_v39 = vpop.f32.mrf.mxu1 }
0x27b7   :  { %v3642_v24 = vpop.f32.mrf.mxu1 }
0x27b8   :  { %v3643_v50 = vadd.f32 %v7779_v19, %v3642_v24 }
0x27ba   :  { %v3651_v41 = vsel %vm281_vm13, %v3643_v50, 0.0 }
0x27bb   :  { %3652 = vadd.xlane.f32.xlu2 %v3651_v41 }
0x27bf   :  { %v3645_v37 = vpop.f32.mrf.mxu1 }
0x27c0   :  { %v3646_v53 = vadd.f32 %v7779_v19, %v3645_v37 }
0x27c2   :  { %v3654_v25 = vsel %vm281_vm13, %v3646_v53, 0.0 }
0x27c3   :  { %3655 = vadd.xlane.f32.xlu2 %v3654_v25 }
0x27c7   :  { %v3648_v15 = vpop.f32.mrf.mxu1 }
0x27c8   :  { %v3649_v20 = vadd.f32 %v7779_v19, %v3648_v15 }
0x27ca   :  { %v3657_v23 = vsel %vm367_vm15, %v3649_v20, 0.0 }
0x27cb   :  { %3658 = vadd.xlane.f32.xlu0 %v3657_v23 }
0x282e   :  { %v3653_v51 = vpop.xlane.xlu2 %3652 }
0x282f   :  { %v3660_v14 = vmul.f32 %v3653_v51, %v6753_v60 }
0x2831   :  { %v3663_v42 = vsub.f32 %v3643_v50, %v3660_v14 }
0x2833   :  { %v3666_v54 = vmul.f32 %v3663_v42, %v3663_v42 }
0x2835   :  { %v3669_v62 = vsel %vm281_vm13, %v3666_v54, 0.0 }
0x2836   :  { %3670 = vadd.xlane.f32.xlu2 %v3669_v62  ;;  %v3656_v35 = vpop.xlane.xlu2 %3655 }
0x2837   :  { %v3661_v13 = vmul.f32 %v3656_v35, %v6753_v60 }
0x2839   :  { %v3664_v43 = vsub.f32 %v3646_v53, %v3661_v13 }
0x283b   :  { %v3667_v5 = vmul.f32 %v3664_v43, %v3664_v43 }
0x283d   :  { %v3672_v47 = vsel %vm281_vm13, %v3667_v5, 0.0 }
0x283e   :  { %v3659_v58 = vpop.xlane.xlu0 %3658  ;;  %3673 = vadd.xlane.f32.xlu2 %v3672_v47 }
0x283f   :  { %v3662_v49 = vmul.f32 %v3659_v58, %v6753_v60 }
0x2841   :  { %v7944_v30 = vsub.f32 %v3649_v20, %v3662_v49 }
0x2843   :  { %v3668_v36 = vmul.f32 %v7944_v30, %v7944_v30 }
0x2845   :  { %v3675_v48 = vsel %vm367_vm15, %v3668_v36, 0.0 }
0x2846   :  { %3676 = vadd.xlane.f32.xlu1 %v3675_v48 }
0x2856   :  { %3831 = vrot.lane.b32.xlu2 %v7720_v59, %s6544_s26 }
0x285e   :  { %3829 = vrot.lane.b32.xlu2 %v7713_v6, %s6544_s26 }
0x2866   :  { %3827 = vrot.lane.b32.xlu2 %v7711_v61, %s6544_s26 }
0x286e   :  { %3821 = vrot.lane.b32.xlu2 %v7711_v61, %s6545_s27 }
0x2876   :  { %3823 = vrot.lane.b32.xlu2 %v7713_v6, %s6545_s27 }
0x287e   :  { %3825 = vrot.lane.b32.xlu2 %v7720_v59, %s6545_s27 }
0x28a9   :  { %v3671_v40 = vpop.xlane.xlu2 %3670 }
0x28aa   :  { %v3678_v52 = vmul.f32 %v3671_v40, %v6753_v60 }
0x28ac   :  { %v3681_v10 = vadd.f32 1e-05, %v3678_v52 }
0x28ae   :  { %6318 = vrsqrt.f32 %v3681_v10  ;;  %vm3690_vm4 = vweird.f32 %v3681_v10 }
0x28b1   :  { %v3674_v63 = vpop.xlane.xlu2 %3673 }
0x28b2   :  { %v3679_v32 = vmul.f32 %v3674_v63, %v6753_v60 }
0x28b4   :  { %v6319_v17 = vpop.eup %6318  ;;  %v3682_v26 = vadd.f32 1e-05, %v3679_v32 }
0x28b5   :  { %v3685_v0 = vmul.f32 %v6319_v17, %v3681_v10  ;;  %vm3691_vm3 = vweird.f32 %v6319_v17 }
0x28b6   :  { %6320 = vrsqrt.f32 %v3682_v26  ;;  %vm3692_vm8 = vmor %vm3690_vm4, %vm3691_vm3  ;;  %vm3700_vm10 = vweird.f32 %v3682_v26 }
0x28b7   :  { %v3686_v12 = vmul.f32 %v6319_v17, %v3685_v0 }
0x28b9   :  { %v3687_v61 = vmul.f32 0.5, %v3686_v12  ;;  %v3677_v57 = vpop.xlane.xlu1 %3676  ;;  %v3832_v16 = vpop.permute.xlu2 %3831 }
0x28ba   :  { %v3680_v6 = vmul.f32 %v3677_v57, %v6753_v60  ;;  %5900 = vmatpush.xpose.msk.msrb.mxu3 %vm281_vm13, %v3832_v16 }
0x28bb   :  { %v3688_v21 = vsub.f32 1.5, %v3687_v61 }
0x28bc   :  { %v6321_v1 = vpop.eup %6320  ;;  %v3683_v8 = vadd.f32 1e-05, %v3680_v6 }
0x28bd   :  { %v3689_v55 = vmul.f32 %v6319_v17, %v3688_v21  ;;  %v3695_v4 = vmul.f32 %v6321_v1, %v3682_v26  ;;  %vm3701_vm9 = vweird.f32 %v6321_v1 }
0x28be   :  { %6322 = vrsqrt.f32 %v3683_v8  ;;  %vm3702_vm0 = vmor %vm3700_vm10, %vm3701_vm9  ;;  %vm3710_vm3 = vweird.f32 %v3683_v8 }
0x28bf   :  { %v3696_v22 = vmul.f32 %v6321_v1, %v3695_v4  ;;  %v3693_v24 = vsel %vm3692_vm8, %v6319_v17, %v3689_v55 }
0x28c0   :  { %v3714_v50 = vmul.f32 %v3693_v24, %v3663_v42 }
0x28c1   :  { %v3697_v41 = vmul.f32 0.5, %v3696_v22  ;;  %v3830_v37 = vpop.permute.xlu2 %3829 }
0x28c2   :  { %5901 = vmatpush.xpose.msk.msrb.mxu3 %vm281_vm13, %v3830_v37  ;;  %v3717_v53 = vmul.f32 %v7848_v45, %v3714_v50 }
0x28c3   :  { %v3698_v25 = vsub.f32 1.5, %v3697_v41 }
0x28c4   :  { %v6323_v15 = vpop.eup %6322  ;;  %v3720_v20 = vadd.f32 %v7854_v18, %v3717_v53 }
0x28c5   :  { %v3699_v23 = vmul.f32 %v6321_v1, %v3698_v25  ;;  %v3705_v51 = vmul.f32 %v6323_v15, %v3683_v8  ;;  %vm3711_vm2 = vweird.f32 %v6323_v15 }
0x28c6   :  { %v3723_v14 = vsel %vm281_vm13, %v3720_v20, -inf  ;;  %vm3712_vm4 = vmor %vm3710_vm3, %vm3711_vm2 }
0x28c7   :  { %v3706_v54 = vmul.f32 %v6323_v15, %v3705_v51  ;;  %3724 = vmax.xlane.f32.xlu2 %v3723_v14  ;;  %v3703_v42 = vsel %vm3702_vm0, %v6321_v1, %v3699_v23 }
0x28c8   :  { %v3715_v62 = vmul.f32 %v3703_v42, %v3664_v43 }
0x28c9   :  { %v3707_v35 = vmul.f32 0.5, %v3706_v54  ;;  %v3828_v13 = vpop.permute.xlu2 %3827 }
0x28ca   :  { %5902 = vmatpush.xpose.msk.msrb.mxu3 %vm281_vm13, %v3828_v13  ;;  %v3718_v5 = vmul.f32 %v7848_v45, %v3715_v62 }
0x28cb   :  { %v3708_v47 = vsub.f32 1.5, %v3707_v35 }
0x28cc   :  { %v3721_v58 = vadd.f32 %v7854_v18, %v3718_v5 }
0x28cd   :  { %v3709_v49 = vmul.f32 %v6323_v15, %v3708_v47 }
0x28ce   :  { %v3726_v36 = vsel %vm281_vm13, %v3721_v58, -inf }
0x28cf   :  { %3727 = vmax.xlane.f32.xlu1 %v3726_v36  ;;  %v3713_v48 = vsel %vm3712_vm4, %v6323_v15, %v3709_v49 }
0x28d0   :  { %v3716_v40 = vmul.f32 %v3713_v48, %v7944_v30 }
0x28d1   :  { %v3822_v43 = vpop.permute.xlu2 %3821 }
0x28d2   :  { %5903 = vmatmul.msk.f32.vlgmr.msrb.gmra.mxu3 %vm281_vm13, %v3822_v43  ;;  %v3719_v52 = vmul.f32 %v7848_v45, %v3716_v40 }
0x28d4   :  { %v3722_v10 = vadd.f32 %v7854_v18, %v3719_v52 }
0x28d6   :  { %v3729_v63 = vsel %vm367_vm15, %v3722_v10, -inf }
0x28d7   :  { %3730 = vmax.xlane.f32.xlu0 %v3729_v63 }
0x28d9   :  { %v3824_v32 = vpop.permute.xlu2 %3823 }
0x28da   :  { %5904 = vmatmul.msk.f32.gmra.mxu3 %vm281_vm13, %v3824_v32 }
0x28e1   :  { %v3826_v17 = vpop.permute.xlu2 %3825 }
0x28e2   :  { %5905 = vmatmul.msk.f32.gmra.mxu3 %vm281_vm13, %v3826_v17 }
0x293a   :  { %v3725_v26 = vpop.xlane.xlu2 %3724 }
0x293b   :  { %v3732_v0 = vsub.f32 %v3720_v20, %v3725_v26 }
0x293d   :  { %v3735_v12 = vmul.f32 1.442695, %v3732_v0 }
0x293f   :  { %6324 = vpow2.f32 %v3735_v12 }
0x2942   :  { %v3728_v30 = vpop.xlane.xlu1 %3727 }
0x2943   :  { %v3733_v61 = vsub.f32 %v3721_v58, %v3728_v30 }
0x2945   :  { %v6325_v57 = vpop.eup %6324  ;;  %v3737_v16 = vmul.f32 1.442695, %v3733_v61 }
0x2946   :  { %v3741_v6 = vsel %vm281_vm13, %v6325_v57, 0.0 }
0x2947   :  { %6326 = vpow2.f32 %v3737_v16  ;;  %3742 = vadd.xlane.f32.xlu1 %v3741_v6 }
0x294a   :  { %v3731_v21 = vpop.xlane.xlu0 %3730 }
0x294b   :  { %v3734_v1 = vsub.f32 %v3722_v10, %v3731_v21 }
0x294d   :  { %v6327_v8 = vpop.eup %6326  ;;  %v3739_v55 = vmul.f32 1.442695, %v3734_v1  ;;  %v4094_v1 = vrot.slane %v7766_v11, 1 }
0x294e   :  { %v3744_v4 = vsel %vm281_vm13, %v6327_v8, 0.0 }
0x294f   :  { %6328 = vpow2.f32 %v3739_v55  ;;  %3745 = vadd.xlane.f32.xlu0 %v3744_v4 }
0x2955   :  { %v6329_v22 = vpop.eup %6328  ;;  %v3862_v13 = vpop.f32.mrf.mxu3 }
0x2956   :  { %v3747_v24 = vsel %vm367_vm15, %v6329_v22, 0.0 }
0x2957   :  { %3748 = vadd.xlane.f32.xlu2 %v3747_v24  ;;  %v4093_v24 = vrot.slane %v7720_v59, 1 }
0x295d   :  { %v3865_v5 = vpop.f32.mrf.mxu3 }
0x2960   :  { %3792 = vrot.lane.b32.xlu1 %v7720_v59, %s6546_s28 }
0x2963   :  { %6049 = vrot.lane.b32.xlu0 %v7888_v29, %s6546_s28 }
0x2965   :  { %v3868_v47 = vpop.f32.mrf.mxu3 }
0x29ba   :  { %v3743_v50 = vpop.xlane.xlu1 %3742 }
0x29bb   :  { %6330 = vrcp.f32 %v3743_v50  ;;  %v8028_v50 = vsel %vm1325_vm5, %v4093_v24, %v4094_v1 }
0x29c1   :  { %v6331_v41 = vpop.eup %6330 }
0x29c2   :  { %v3746_v37 = vpop.xlane.xlu0 %3745  ;;  %v3753_v53 = vmul.f32 %v6331_v41, %v6325_v57 }
0x29c3   :  { %6332 = vrcp.f32 %v3746_v37 }
0x29c4   :  { %3756 = vxpose.xlu2.b32.start [1/3] (short) (narrow) %v3753_v53, 8 }
0x29c9   :  { %v6333_v25 = vpop.eup %6332 }
0x29ca   :  { %v3749_v15 = vpop.xlane.xlu2 %3748  ;;  %v3754_v20 = vmul.f32 %v6333_v25, %v6327_v8 }
0x29cb   :  { %6334 = vrcp.f32 %v3749_v15 }
0x29cc   :  { %3757 = vxpose.xlu2.b32.cont [2/3] (short) (narrow) %v3754_v20, 8 }
0x29d1   :  { %v6335_v23 = vpop.eup %6334 }
0x29d2   :  { %v3793_v51 = vpop.permute.xlu1 %3792  ;;  %v3755_v14 = vmul.f32 %v6335_v23, %v6329_v22 }
0x29d3   :  { %5898 = vmatpush.msk.msra.mxu2 %vm331_vm12, %v3793_v51 }
0x29d4   :  { %3758 = vxpose.xlu2.b32.end [3/3] (short) (narrow) %v3755_v14, 8 }
0x29d5   :  { %v6050_v54 = vpop.permute.xlu0 %6049 }
0x29d6   :  { %v6051_v42 = vunpack.i.l.bf16 %v6050_v54  ;;  %v6052_v62 = vunpack.i.h.bf16 %v6050_v54 }
0x29d8   :  { %3815 = vmatpush.msra.mxu2 %v6051_v42 }
0x29da   :  { %3816 = vmatpush.msra.mxu2 %v6052_v62 }
0x29dc   :  { %5906 = vmatpush.msk.msrb.mxu2 %vm331_vm12, %v7909_v44 }
0x29de   :  { %3894 = vmatpush.msrb.mxu2 %v7916_v46 }
0x29e0   :  { %3895 = vmatpush.msrb.mxu2 %v7922_v9 }
0x2a5d   :  { %v3772_v35 = vpop.trf.xlu2 }
0x2a5e   :  { %5899 = vmatmul.msk.f32.vlgmr.msra.gmra.mxu2 %vm321_vm14, %v3772_v35 }
0x2a66   :  { %5907 = vmatmul.msk.f32.vlgmr.msrb.gmra.mxu2 %vm321_vm14, %v3862_v13 }
0x2a6e   :  { %5908 = vmatmul.msk.f32.gmra.mxu2 %vm321_vm14, %v3865_v5 }
0x2a76   :  { %5909 = vmatmul.msk.f32.gmra.mxu2 %vm321_vm14, %v3868_v47 }
0x2ae1   :  { %v7996_v58 = vpop.f32.mrf.mxu2 }
0x2ae9   :  { %v3897_v49 = vpop.f32.mrf.mxu2 }
0x2aea   :  { %v3898_v36 = vadd.f32 %v7779_v19, %v3897_v49 }
0x2aec   :  { %v3906_v48 = vsel %vm281_vm13, %v3898_v36, 0.0 }
0x2aed   :  { %3907 = vadd.xlane.f32.xlu0 %v3906_v48 }
0x2af1   :  { %v3900_v40 = vpop.f32.mrf.mxu2 }
0x2af2   :  { %v3901_v43 = vadd.f32 %v7779_v19, %v3900_v40 }
0x2af4   :  { %v3909_v52 = vsel %vm281_vm13, %v3901_v43, 0.0 }
0x2af5   :  { %3910 = vadd.xlane.f32.xlu1 %v3909_v52 }
0x2af9   :  { %v3903_v10 = vpop.f32.mrf.mxu2 }
0x2afa   :  { %v3904_v63 = vadd.f32 %v7779_v19, %v3903_v10  ;;  %v8009_v19 = vrot.slane %v7768_v7, 1 }
0x2afc   :  { %v3912_v32 = vsel %vm367_vm15, %v3904_v63, 0.0  ;;  %v8014_v8 = vsel %vm1325_vm5, %v4094_v1, %v8009_v19 }
0x2afd   :  { %3913 = vadd.xlane.f32.xlu2 %v3912_v32 }
0x2b60   :  { %v3908_v17 = vpop.xlane.xlu0 %3907 }
0x2b61   :  { %v3915_v26 = vmul.f32 %v3908_v17, %v6753_v60 }
0x2b63   :  { %v3918_v0 = vsub.f32 %v3898_v36, %v3915_v26 }
0x2b65   :  { %v3921_v12 = vmul.f32 %v3918_v0, %v3918_v0 }
0x2b67   :  { %v3924_v30 = vsel %vm281_vm13, %v3921_v12, 0.0 }
0x2b68   :  { %v3911_v61 = vpop.xlane.xlu1 %3910  ;;  %3925 = vadd.xlane.f32.xlu0 %v3924_v30 }
0x2b69   :  { %v3916_v57 = vmul.f32 %v3911_v61, %v6753_v60 }
0x2b6b   :  { %v3919_v16 = vsub.f32 %v3901_v43, %v3916_v57 }
0x2b6d   :  { %v3922_v6 = vmul.f32 %v3919_v16, %v3919_v16 }
0x2b6f   :  { %v3927_v21 = vsel %vm281_vm13, %v3922_v6, 0.0 }
0x2b70   :  { %3928 = vadd.xlane.f32.xlu1 %v3927_v21  ;;  %v3914_v55 = vpop.xlane.xlu2 %3913 }
0x2b71   :  { %v3917_v4 = vmul.f32 %v3914_v55, %v6753_v60 }
0x2b73   :  { %v8021_v22 = vsub.f32 %v3904_v63, %v3917_v4 }
0x2b75   :  { %v3923_v7 = vmul.f32 %v8021_v22, %v8021_v22 }
0x2b77   :  { %v3930_v11 = vsel %vm367_vm15, %v3923_v7, 0.0 }
0x2b7c   :  { %4100 = vrot.lane.b32.xlu0 %v8014_v8, %s6536_s25 }
0x2b89   :  { %4102 = vrot.lane.b32.xlu1 %v8009_v19, %s6536_s25 }
0x2ba6   :  { %3931 = vadd.xlane.f32.xlu0 %v3930_v11 }
0x2bba   :  { %4098 = vrot.lane.b32.xlu0 %v8028_v50, %s6536_s25 }
0x2bdb   :  { %v3926_v41 = vpop.xlane.xlu0 %3925 }
0x2bdc   :  { %v3933_v37 = vmul.f32 %v3926_v41, %v6753_v60 }
0x2bde   :  { %v3936_v53 = vadd.f32 1e-05, %v3933_v37 }
0x2be0   :  { %6336 = vrsqrt.f32 %v3936_v53  ;;  %vm3945_vm8 = vweird.f32 %v3936_v53 }
0x2be3   :  { %v3929_v25 = vpop.xlane.xlu1 %3928 }
0x2be4   :  { %v3934_v15 = vmul.f32 %v3929_v25, %v6753_v60 }
0x2be6   :  { %v6337_v20 = vpop.eup %6336  ;;  %v3937_v23 = vadd.f32 1e-05, %v3934_v15 }
0x2be7   :  { %v3940_v51 = vmul.f32 %v6337_v20, %v3936_v53  ;;  %vm3946_vm5 = vweird.f32 %v6337_v20 }
0x2be8   :  { %6338 = vrsqrt.f32 %v3937_v23  ;;  %vm3947_vm9 = vmor %vm3945_vm8, %vm3946_vm5  ;;  %vm3955_vm0 = vweird.f32 %v3937_v23 }
0x2be9   :  { %v3941_v14 = vmul.f32 %v6337_v20, %v3940_v51 }
0x2beb   :  { %v3942_v54 = vmul.f32 0.5, %v3941_v14 }
0x2bed   :  { %v3943_v42 = vsub.f32 1.5, %v3942_v54 }
0x2bee   :  { %v6339_v62 = vpop.eup %6338  ;;  %v4101_v12 = vpop.permute.xlu0 %4100 }
0x2bef   :  { %v3944_v35 = vmul.f32 %v6337_v20, %v3943_v42  ;;  %v3950_v13 = vmul.f32 %v6339_v62, %v3937_v23  ;;  %vm3956_vm10 = vweird.f32 %v6339_v62 }
0x2bf0   :  { %vm3957_vm2 = vmor %vm3955_vm0, %vm3956_vm10 }
0x2bf1   :  { %v3951_v5 = vmul.f32 %v6339_v62, %v3950_v13  ;;  %v3948_v47 = vsel %vm3947_vm9, %v6337_v20, %v3944_v35 }
0x2bf2   :  { %v3969_v49 = vmul.f32 %v3948_v47, %v3918_v0 }
0x2bf3   :  { %v3952_v36 = vmul.f32 0.5, %v3951_v5 }
0x2bf4   :  { %v3972_v48 = vmul.f32 %v7848_v45, %v3969_v49 }
0x2bf5   :  { %v3953_v40 = vsub.f32 1.5, %v3952_v36 }
0x2bf6   :  { %v3975_v43 = vadd.f32 %v7854_v18, %v3972_v48 }
0x2bf7   :  { %v3954_v52 = vmul.f32 %v6339_v62, %v3953_v40 }
0x2bf8   :  { %v3978_v10 = vsel %vm281_vm13, %v3975_v43, -inf }
0x2bf9   :  { %3979 = vmax.xlane.f32.xlu1 %v3978_v10  ;;  %v3958_v63 = vsel %vm3957_vm2, %v6339_v62, %v3954_v52 }
0x2bfa   :  { %v3970_v32 = vmul.f32 %v3958_v63, %v3919_v16 }
0x2bfb   :  { %v4103_v17 = vpop.permute.xlu1 %4102 }
0x2bfc   :  { %5912 = vmatpush.xpose.msk.msrb.mxu0 %vm281_vm13, %v4103_v17  ;;  %v3973_v26 = vmul.f32 %v7848_v45, %v3970_v32 }
0x2bfe   :  { %v3976_v0 = vadd.f32 %v7854_v18, %v3973_v26 }
0x2c00   :  { %5913 = vmatpush.xpose.msk.msrb.mxu0 %vm281_vm13, %v4101_v12  ;;  %v3981_v30 = vsel %vm281_vm13, %v3976_v0, -inf }
0x2c01   :  { %3982 = vmax.xlane.f32.xlu0 %v3981_v30 }
0x2c19   :  { %v3932_v61 = vpop.xlane.xlu0 %3931 }
0x2c1a   :  { %v3935_v57 = vmul.f32 %v3932_v61, %v6753_v60 }
0x2c1c   :  { %v3938_v6 = vadd.f32 1e-05, %v3935_v57 }
0x2c1e   :  { %6340 = vrsqrt.f32 %v3938_v6  ;;  %vm3965_vm4 = vweird.f32 %v3938_v6 }
0x2c24   :  { %v6341_v21 = vpop.eup %6340 }
0x2c25   :  { %v3960_v16 = vmul.f32 %v6341_v21, %v3938_v6  ;;  %vm3966_vm3 = vweird.f32 %v6341_v21 }
0x2c26   :  { %vm3967_vm5 = vmor %vm3965_vm4, %vm3966_vm3 }
0x2c27   :  { %v3961_v1 = vmul.f32 %v6341_v21, %v3960_v16 }
0x2c29   :  { %v3962_v55 = vmul.f32 0.5, %v3961_v1 }
0x2c2b   :  { %v3963_v4 = vsub.f32 1.5, %v3962_v55 }
0x2c2c   :  { %v4099_v7 = vpop.permute.xlu0 %4098 }
0x2c2d   :  { %v3964_v11 = vmul.f32 %v6341_v21, %v3963_v4  ;;  %5914 = vmatpush.xpose.msk.msrb.mxu0 %vm281_vm13, %v4099_v7 }
0x2c2f   :  { %v3968_v24 = vsel %vm3967_vm5, %v6341_v21, %v3964_v11  ;;  %v8075_v21 = vld [vmem:[%s8613_s3 + $0x50] ss:$0 sm:$0xff] }
0x2c30   :  { %5915 = vmatmul.msk.f32.vlgmr.msrb.gmra.mxu0 %vm281_vm13, %v8028_v50  ;;  %v3971_v41 = vmul.f32 %v3968_v24, %v8021_v22 }
0x2c32   :  { %v3974_v37 = vmul.f32 %v7848_v45, %v3971_v41 }
0x2c34   :  { %v3977_v53 = vadd.f32 %v7854_v18, %v3974_v37 }
0x2c36   :  { %v3984_v25 = vsel %vm367_vm15, %v3977_v53, -inf }
0x2c37   :  { %3985 = vmax.xlane.f32.xlu1 %v3984_v25 }
0x2c38   :  { %5916 = vmatmul.msk.f32.gmra.mxu0 %vm281_vm13, %v8014_v8 }
0x2c40   :  { %5917 = vmatmul.msk.f32.gmra.mxu0 %vm281_vm13, %v8009_v19 }
0x2c6c   :  { %v3980_v15 = vpop.xlane.xlu1 %3979 }
0x2c6d   :  { %v3987_v20 = vsub.f32 %v3975_v43, %v3980_v15 }
0x2c6f   :  { %v3990_v23 = vmul.f32 1.442695, %v3987_v20 }
0x2c71   :  { %6342 = vpow2.f32 %v3990_v23 }
0x2c74   :  { %v3983_v51 = vpop.xlane.xlu0 %3982 }
0x2c75   :  { %v3988_v14 = vsub.f32 %v3976_v0, %v3983_v51 }
0x2c77   :  { %v6343_v22 = vpop.eup %6342  ;;  %v3992_v54 = vmul.f32 1.442695, %v3988_v14 }
0x2c78   :  { %v3996_v45 = vsel %vm281_vm13, %v6343_v22, 0.0 }
0x2c79   :  { %6344 = vpow2.f32 %v3992_v54  ;;  %3997 = vadd.xlane.f32.xlu0 %v3996_v45 }
0x2c7f   :  { %v6345_v18 = vpop.eup %6344 }
0x2c80   :  { %v3999_v42 = vsel %vm281_vm13, %v6345_v18, 0.0 }
0x2c81   :  { %4000 = vadd.xlane.f32.xlu1 %v3999_v42 }
0x2c9a   :  { %4047 = vrot.lane.b32.xlu1 %v7720_v59, %s6547_s16 }
0x2caa   :  { %v3986_v62 = vpop.xlane.xlu1 %3985 }
0x2cab   :  { %v3989_v35 = vsub.f32 %v3977_v53, %v3986_v62 }
0x2cad   :  { %v3994_v13 = vmul.f32 1.442695, %v3989_v35  ;;  %v4133_v12 = vpop.f32.mrf.mxu0 }
0x2caf   :  { %6346 = vpow2.f32 %v3994_v13 }
0x2cb5   :  { %v6347_v5 = vpop.eup %6346  ;;  %v4136_v30 = vpop.f32.mrf.mxu0 }
0x2cb6   :  { %v4002_v47 = vsel %vm367_vm15, %v6347_v5, 0.0 }
0x2cb7   :  { %4003 = vadd.xlane.f32.xlu0 %v4002_v47 }
0x2cbd   :  { %v4139_v61 = vpop.f32.mrf.mxu0 }
0x2ccb   :  { %6054 = vrot.lane.b32.xlu0 %v7888_v29, %s6547_s16 }
0x2cec   :  { %v3998_v49 = vpop.xlane.xlu0 %3997 }
0x2ced   :  { %6348 = vrcp.f32 %v3998_v49 }
0x2cf3   :  { %v6349_v36 = vpop.eup %6348 }
0x2cf4   :  { %v4001_v48 = vpop.xlane.xlu1 %4000  ;;  %v4008_v40 = vmul.f32 %v6349_v36, %v6343_v22 }
0x2cf5   :  { %6350 = vrcp.f32 %v4001_v48 }
0x2cf6   :  { %4011 = vxpose.xlu2.b32.start [1/3] (short) (narrow) %v4008_v40, 8 }
0x2cfb   :  { %v6351_v43 = vpop.eup %6350 }
0x2cfc   :  { %v4009_v59 = vmul.f32 %v6351_v43, %v6345_v18 }
0x2cfe   :  { %4012 = vxpose.xlu2.b32.cont [2/3] (short) (narrow) %v4009_v59, 8 }
0x2d0c   :  { %v4048_v52 = vpop.permute.xlu1 %4047 }
0x2d0d   :  { %5910 = vmatpush.msk.msrb.mxu1 %vm331_vm12, %v4048_v52 }
0x2d2a   :  { %v4004_v10 = vpop.xlane.xlu0 %4003 }
0x2d2b   :  { %6352 = vrcp.f32 %v4004_v10 }
0x2d31   :  { %v6353_v63 = vpop.eup %6352 }
0x2d32   :  { %v4010_v32 = vmul.f32 %v6353_v63, %v6347_v5 }
0x2d34   :  { %4013 = vxpose.xlu2.b32.end [3/3] (short) (narrow) %v4010_v32, 8 }
0x2d3d   :  { %v6055_v17 = vpop.permute.xlu0 %6054 }
0x2d3e   :  { %v6056_v29 = vunpack.i.l.bf16 %v6055_v17  ;;  %v6057_v26 = vunpack.i.h.bf16 %v6055_v17 }
0x2d40   :  { %4070 = vmatpush.msrb.mxu1 %v6056_v29 }
0x2d42   :  { %4071 = vmatpush.msrb.mxu1 %v6057_v26 }
0x2d44   :  { %5918 = vmatpush.msk.msra.mxu1 %vm331_vm12, %v7909_v44 }
0x2d46   :  { %4165 = vmatpush.msra.mxu1 %v7916_v46 }
0x2d48   :  { %4166 = vmatpush.msra.mxu1 %v7922_v9 }
0x2dbd   :  { %v4027_v0 = vpop.trf.xlu2 }
0x2dbe   :  { %5911 = vmatmul.msk.f32.vlgmr.msrb.gmra.mxu1 %vm321_vm14, %v4027_v0 }
0x2dc6   :  { %5919 = vmatmul.msk.f32.vlgmr.msra.gmra.mxu1 %vm321_vm14, %v4133_v12 }
0x2dce   :  { %5920 = vmatmul.msk.f32.gmra.mxu1 %vm321_vm14, %v4136_v30 }
0x2dd6   :  { %5921 = vmatmul.msk.f32.gmra.mxu1 %vm321_vm14, %v4139_v61 }
0x2e3b   :  { %v8070_v57 = vpop.f32.mrf.mxu1 }
0x2e43   :  { %v4168_v6 = vpop.f32.mrf.mxu1 }
0x2e44   :  { %v4169_v16 = vadd.f32 %v8075_v21, %v4168_v6 }
0x2e46   :  { %v4177_v1 = vsel %vm281_vm13, %v4169_v16, 0.0 }
0x2e47   :  { %4178 = vadd.xlane.f32.xlu1 %v4177_v1 }
0x2e4b   :  { %v4171_v55 = vpop.f32.mrf.mxu1 }
0x2e4c   :  { %v4172_v4 = vadd.f32 %v8075_v21, %v4171_v55  ;;  %v8117_v55 = vld [vmem:[%s8613_s3 + $0x51] ss:$0 sm:$0xff] }
0x2e4e   :  { %v4180_v7 = vsel %vm281_vm13, %v4172_v4, 0.0 }
0x2e4f   :  { %4181 = vadd.xlane.f32.xlu0 %v4180_v7 }
0x2e53   :  { %v4174_v11 = vpop.f32.mrf.mxu1 }
0x2e54   :  { %v4175_v24 = vadd.f32 %v8075_v21, %v4174_v11 }
0x2e56   :  { %v4183_v41 = vsel %vm367_vm15, %v4175_v24, 0.0 }
0x2e57   :  { %4184 = vadd.xlane.f32.xlu1 %v4183_v41  ;;  %v8123_v41 = vld [vmem:[%s8613_s3 + $0x52] ss:$0 sm:$0xff] }
0x2e70   :  { %4355 = vrot.lane.b32.xlu1 %v8014_v8, %s6537_s11 }
0x2eba   :  { %v4179_v37 = vpop.xlane.xlu1 %4178 }
0x2ebb   :  { %v4186_v53 = vmul.f32 %v4179_v37, %v6753_v60 }
0x2ebd   :  { %v4189_v25 = vsub.f32 %v4169_v16, %v4186_v53 }
0x2ebf   :  { %v4192_v15 = vmul.f32 %v4189_v25, %v4189_v25 }
0x2ec1   :  { %v4195_v20 = vsel %vm281_vm13, %v4192_v15, 0.0 }
0x2ec2   :  { %v4182_v23 = vpop.xlane.xlu0 %4181  ;;  %4196 = vadd.xlane.f32.xlu0 %v4195_v20 }
0x2ec3   :  { %v4187_v51 = vmul.f32 %v4182_v23, %v6753_v60 }
0x2ec5   :  { %v8088_v14 = vsub.f32 %v4172_v4, %v4187_v51 }
0x2ec7   :  { %v4193_v22 = vmul.f32 %v8088_v14, %v8088_v14 }
0x2ec9   :  { %v4198_v54 = vsel %vm281_vm13, %v4193_v22, 0.0 }
0x2eca   :  { %4199 = vadd.xlane.f32.xlu2 %v4198_v54  ;;  %v4185_v45 = vpop.xlane.xlu1 %4184 }
0x2ecb   :  { %v4188_v18 = vmul.f32 %v4185_v45, %v6753_v60 }
0x2ecd   :  { %v8094_v42 = vsub.f32 %v4175_v24, %v4188_v18 }
0x2ecf   :  { %v4194_v62 = vmul.f32 %v8094_v42, %v8094_v42 }
0x2ed1   :  { %v4201_v35 = vsel %vm367_vm15, %v4194_v62, 0.0 }
0x2ed2   :  { %4202 = vadd.xlane.f32.xlu1 %v4201_v35 }
0x2ed6   :  { %4357 = vrot.lane.b32.xlu0 %v8009_v19, %s6537_s11 }
0x2ede   :  { %4353 = vrot.lane.b32.xlu0 %v8028_v50, %s6537_s11 }
0x2ee2   :  { %v4356_v49 = vpop.permute.xlu1 %4355 }
0x2ee6   :  { %4347 = vrot.lane.b32.xlu0 %v8028_v50, %s6539_s12 }
0x2eeb   :  { %4349 = vrot.lane.b32.xlu1 %v8014_v8, %s6539_s12 }
0x2eee   :  { %4351 = vrot.lane.b32.xlu0 %v8009_v19, %s6539_s12 }
0x2f35   :  { %v4197_v13 = vpop.xlane.xlu0 %4196 }
0x2f36   :  { %v4204_v5 = vmul.f32 %v4197_v13, %v6753_v60 }
0x2f38   :  { %v4207_v47 = vadd.f32 1e-05, %v4204_v5 }
0x2f3a   :  { %6354 = vrsqrt.f32 %v4207_v47  ;;  %vm4216_vm9 = vweird.f32 %v4207_v47 }
0x2f3d   :  { %v4200_v36 = vpop.xlane.xlu2 %4199 }
0x2f3e   :  { %v4205_v48 = vmul.f32 %v4200_v36, %v6753_v60 }
0x2f40   :  { %v6355_v40 = vpop.eup %6354  ;;  %v4208_v43 = vadd.f32 1e-05, %v4205_v48 }
0x2f41   :  { %v4211_v59 = vmul.f32 %v6355_v40, %v4207_v47  ;;  %vm4217_vm8 = vweird.f32 %v6355_v40 }
0x2f42   :  { %6356 = vrsqrt.f32 %v4208_v43  ;;  %vm4218_vm10 = vmor %vm4216_vm9, %vm4217_vm8  ;;  %vm4226_vm2 = vweird.f32 %v4208_v43 }
0x2f43   :  { %v4212_v52 = vmul.f32 %v6355_v40, %v4211_v59 }
0x2f45   :  { %v4213_v10 = vmul.f32 0.5, %v4212_v52  ;;  %v4203_v63 = vpop.xlane.xlu1 %4202 }
0x2f46   :  { %v4206_v32 = vmul.f32 %v4203_v63, %v6753_v60 }
0x2f47   :  { %v4214_v17 = vsub.f32 1.5, %v4213_v10 }
0x2f48   :  { %v6357_v29 = vpop.eup %6356  ;;  %v4209_v26 = vadd.f32 1e-05, %v4206_v32  ;;  %v4358_v0 = vpop.permute.xlu0 %4357 }
0x2f49   :  { %v4215_v12 = vmul.f32 %v6355_v40, %v4214_v17  ;;  %v4221_v30 = vmul.f32 %v6357_v29, %v4208_v43  ;;  %5924 = vmatpush.xpose.msk.msra.mxu2 %vm281_vm13, %v4358_v0  ;;  %vm4227_vm0 = vweird.f32 %v6357_v29 }
0x2f4a   :  { %6358 = vrsqrt.f32 %v4209_v26  ;;  %vm4228_vm3 = vmor %vm4226_vm2, %vm4227_vm0  ;;  %vm4236_vm5 = vweird.f32 %v4209_v26 }
0x2f4b   :  { %v4222_v61 = vmul.f32 %v6357_v29, %v4221_v30  ;;  %v4219_v6 = vsel %vm4218_vm10, %v6355_v40, %v4215_v12 }
0x2f4c   :  { %v4240_v16 = vmul.f32 %v4219_v6, %v4189_v25 }
0x2f4d   :  { %v4223_v1 = vmul.f32 0.5, %v4222_v61  ;;  %5925 = vmatpush.xpose.msk.msra.mxu2 %vm281_vm13, %v4356_v49 }
0x2f4e   :  { %v4243_v4 = vmul.f32 %v8117_v55, %v4240_v16  ;;  %v8146_v16 = vpack.i.bf16 %v8028_v50, %v8014_v8 }
0x2f4f   :  { %v4224_v7 = vsub.f32 1.5, %v4223_v1 }
0x2f50   :  { %v6359_v11 = vpop.eup %6358  ;;  %v4354_v24 = vpop.permute.xlu0 %4353  ;;  %v4246_v37 = vadd.f32 %v8123_v41, %v4243_v4 }
0x2f51   :  { %v4225_v53 = vmul.f32 %v6357_v29, %v4224_v7  ;;  %v4231_v25 = vmul.f32 %v6359_v11, %v4209_v26  ;;  %5926 = vmatpush.xpose.msk.msra.mxu2 %vm281_vm13, %v4354_v24  ;;  %vm4237_vm4 = vweird.f32 %v6359_v11 }
0x2f52   :  { %v4249_v15 = vsel %vm281_vm13, %v4246_v37, -inf  ;;  %vm4238_vm8 = vmor %vm4236_vm5, %vm4237_vm4 }
0x2f53   :  { %v4232_v20 = vmul.f32 %v6359_v11, %v4231_v25  ;;  %4250 = vmax.xlane.f32.xlu1 %v4249_v15  ;;  %v4229_v23 = vsel %vm4228_vm3, %v6357_v29, %v4225_v53 }
0x2f54   :  { %v4241_v51 = vmul.f32 %v4229_v23, %v8088_v14 }
0x2f55   :  { %v4233_v22 = vmul.f32 0.5, %v4232_v20 }
0x2f56   :  { %v4244_v54 = vmul.f32 %v8117_v55, %v4241_v51 }
0x2f57   :  { %v4234_v45 = vsub.f32 1.5, %v4233_v22 }
0x2f58   :  { %v4348_v18 = vpop.permute.xlu0 %4347  ;;  %v4247_v62 = vadd.f32 %v8123_v41, %v4244_v54 }
0x2f59   :  { %v4235_v35 = vmul.f32 %v6359_v11, %v4234_v45  ;;  %5927 = vmatmul.msk.f32.vlgmr.msra.gmra.mxu2 %vm281_vm13, %v4348_v18 }
0x2f5a   :  { %v4252_v13 = vsel %vm281_vm13, %v4247_v62, -inf }
0x2f5b   :  { %4253 = vmax.xlane.f32.xlu0 %v4252_v13  ;;  %v4239_v5 = vsel %vm4238_vm8, %v6359_v11, %v4235_v35 }
0x2f5c   :  { %v4242_v47 = vmul.f32 %v4239_v5, %v8094_v42 }
0x2f5d   :  { %v4350_v49 = vpop.permute.xlu1 %4349 }
0x2f5e   :  { %v4245_v14 = vmul.f32 %v8117_v55, %v4242_v47 }
0x2f60   :  { %v4248_v36 = vadd.f32 %v8123_v41, %v4245_v14  ;;  %v4352_v40 = vpop.permute.xlu0 %4351 }
0x2f61   :  { %5928 = vmatmul.msk.f32.gmra.mxu2 %vm281_vm13, %v4350_v49 }
0x2f62   :  { %v4255_v48 = vsel %vm367_vm15, %v4248_v36, -inf }
0x2f63   :  { %4256 = vmax.xlane.f32.xlu1 %v4255_v48 }
0x2f69   :  { %5929 = vmatmul.msk.f32.gmra.mxu2 %vm281_vm13, %v4352_v40 }
0x2fc6   :  { %v4251_v43 = vpop.xlane.xlu1 %4250 }
0x2fc7   :  { %v4258_v59 = vsub.f32 %v4246_v37, %v4251_v43 }
0x2fc9   :  { %v4261_v52 = vmul.f32 1.442695, %v4258_v59 }
0x2fcb   :  { %6360 = vpow2.f32 %v4261_v52 }
0x2fce   :  { %v4254_v10 = vpop.xlane.xlu0 %4253 }
0x2fcf   :  { %v4259_v63 = vsub.f32 %v4247_v62, %v4254_v10 }
0x2fd1   :  { %v6361_v42 = vpop.eup %6360  ;;  %v4263_v32 = vmul.f32 1.442695, %v4259_v63 }
0x2fd2   :  { %v4267_v17 = vsel %vm281_vm13, %v6361_v42, 0.0 }
0x2fd3   :  { %6362 = vpow2.f32 %v4263_v32  ;;  %4268 = vadd.xlane.f32.xlu0 %v4267_v17 }
0x2fd6   :  { %v4257_v29 = vpop.xlane.xlu1 %4256 }
0x2fd7   :  { %v4260_v26 = vsub.f32 %v4248_v36, %v4257_v29 }
0x2fd9   :  { %v6363_v0 = vpop.eup %6362  ;;  %v4265_v12 = vmul.f32 1.442695, %v4260_v26 }
0x2fda   :  { %v4270_v30 = vsel %vm281_vm13, %v6363_v0, 0.0 }
0x2fdb   :  { %6364 = vpow2.f32 %v4265_v12  ;;  %4271 = vadd.xlane.f32.xlu1 %v4270_v30 }
0x2fdc   :  { %v4388_v45 = vpop.f32.mrf.mxu2 }
0x2fe1   :  { %v6365_v61 = vpop.eup %6364 }
0x2fe2   :  { %v4273_v6 = vsel %vm367_vm15, %v6365_v61, 0.0 }
0x2fe3   :  { %4274 = vadd.xlane.f32.xlu0 %v4273_v6 }
0x2fe4   :  { %v4391_v18 = vpop.f32.mrf.mxu2 }
0x2fec   :  { %v4394_v62 = vpop.f32.mrf.mxu2 }
0x2ff4   :  { %4318 = vrot.lane.b32.xlu1 %v8009_v19, %s6540_s17 }
0x2ff7   :  { %6059 = vrot.lane.b32.xlu0 %v8146_v16, %s6540_s17 }
0x3046   :  { %v4269_v1 = vpop.xlane.xlu0 %4268 }
0x3047   :  { %6366 = vrcp.f32 %v4269_v1 }
0x304d   :  { %v6367_v4 = vpop.eup %6366 }
0x304e   :  { %v4272_v7 = vpop.xlane.xlu1 %4271  ;;  %v4279_v11 = vmul.f32 %v6367_v4, %v6361_v42 }
0x304f   :  { %6368 = vrcp.f32 %v4272_v7 }
0x3050   :  { %4282 = vxpose.xlu2.b32.start [1/3] (short) (narrow) %v4279_v11, 8 }
0x3055   :  { %v6369_v24 = vpop.eup %6368 }
0x3056   :  { %v4275_v37 = vpop.xlane.xlu0 %4274  ;;  %v4280_v53 = vmul.f32 %v6369_v24, %v6363_v0 }
0x3057   :  { %6370 = vrcp.f32 %v4275_v37 }
0x3058   :  { %4283 = vxpose.xlu2.b32.cont [2/3] (short) (narrow) %v4280_v53, 8 }
0x305d   :  { %v6371_v25 = vpop.eup %6370 }
0x305e   :  { %v4281_v15 = vmul.f32 %v6371_v25, %v6365_v61 }
0x3060   :  { %4284 = vxpose.xlu2.b32.end [3/3] (short) (narrow) %v4281_v15, 8 }
0x3066   :  { %v4319_v20 = vpop.permute.xlu1 %4318 }
0x3067   :  { %5922 = vmatpush.msk.msra.mxu3 %vm331_vm12, %v4319_v20 }
0x3069   :  { %v6060_v23 = vpop.permute.xlu0 %6059 }
0x306a   :  { %v6061_v51 = vunpack.i.l.bf16 %v6060_v23  ;;  %v6062_v22 = vunpack.i.h.bf16 %v6060_v23 }
0x306c   :  { %4341 = vmatpush.msra.mxu3 %v6061_v51 }
0x306e   :  { %4342 = vmatpush.msra.mxu3 %v6062_v22 }
0x3070   :  { %5930 = vmatpush.msk.msrb.mxu3 %vm331_vm12, %v7909_v44 }
0x3072   :  { %4420 = vmatpush.msrb.mxu3 %v7916_v46 }
0x3074   :  { %4421 = vmatpush.msrb.mxu3 %v7922_v9 }
0x30e9   :  { %v4298_v54 = vpop.trf.xlu2 }
0x30ea   :  { %5923 = vmatmul.msk.f32.vlgmr.msra.gmra.mxu3 %vm321_vm14, %v4298_v54 }
0x30f2   :  { %5931 = vmatmul.msk.f32.vlgmr.msrb.gmra.mxu3 %vm321_vm14, %v4388_v45 }
0x30fa   :  { %5932 = vmatmul.msk.f32.gmra.mxu3 %vm321_vm14, %v4391_v18 }
0x3102   :  { %5933 = vmatmul.msk.f32.gmra.mxu3 %vm321_vm14, %v4394_v62 }
0x316d   :  { %v8159_v35 = vpop.f32.mrf.mxu3 }
0x3175   :  { %v4423_v13 = vpop.f32.mrf.mxu3 }
0x3176   :  { %v4424_v44 = vadd.f32 %v8075_v21, %v4423_v13 }
0x3178   :  { %v4432_v46 = vsel %vm281_vm13, %v4424_v44, 0.0 }
0x3179   :  { %4433 = vadd.xlane.f32.xlu0 %v4432_v46 }
0x317d   :  { %v4426_v9 = vpop.f32.mrf.mxu3 }
0x317e   :  { %v4427_v5 = vadd.f32 %v8075_v21, %v4426_v9 }
0x3180   :  { %v4435_v47 = vsel %vm281_vm13, %v4427_v5, 0.0 }
0x3181   :  { %4436 = vadd.xlane.f32.xlu1 %v4435_v47 }
0x3185   :  { %v4429_v14 = vpop.f32.mrf.mxu3 }
0x3186   :  { %v4430_v49 = vadd.f32 %v8075_v21, %v4429_v14 }
0x3188   :  { %v4438_v36 = vsel %vm367_vm15, %v4430_v49, 0.0 }
0x3189   :  { %4439 = vadd.xlane.f32.xlu2 %v4438_v36 }
0x318d   :  { %4610 = vrot.lane.b32.xlu0 %v8014_v8, %s6541_s18 }
0x319a   :  { %4612 = vrot.lane.b32.xlu1 %v8009_v19, %s6541_s18 }
0x31a2   :  { %4608 = vrot.lane.b32.xlu1 %v8028_v50, %s6541_s18 }
0x31ec   :  { %v4434_v48 = vpop.xlane.xlu0 %4433 }
0x31ed   :  { %v4441_v40 = vmul.f32 %v4434_v48, %v6753_v60 }
0x31ef   :  { %v4444_v43 = vsub.f32 %v4424_v44, %v4441_v40 }
0x31f1   :  { %v4447_v59 = vmul.f32 %v4444_v43, %v4444_v43 }
0x31f3   :  { %v4450_v52 = vsel %vm281_vm13, %v4447_v59, 0.0 }
0x31f4   :  { %v4437_v10 = vpop.xlane.xlu1 %4436  ;;  %4451 = vadd.xlane.f32.xlu0 %v4450_v52 }
0x31f5   :  { %v4442_v63 = vmul.f32 %v4437_v10, %v6753_v60 }
0x31f7   :  { %v4445_v42 = vsub.f32 %v4427_v5, %v4442_v63 }
0x31f9   :  { %v4448_v32 = vmul.f32 %v4445_v42, %v4445_v42 }
0x31fb   :  { %v4453_v17 = vsel %vm281_vm13, %v4448_v32, 0.0 }
0x31fc   :  { %v4440_v29 = vpop.xlane.xlu2 %4439  ;;  %4454 = vadd.xlane.f32.xlu1 %v4453_v17 }
0x31fd   :  { %v4443_v26 = vmul.f32 %v4440_v29, %v6753_v60 }
0x31ff   :  { %v8178_v0 = vsub.f32 %v4430_v49, %v4443_v26  ;;  %v4611_v6 = vpop.permute.xlu0 %4610 }
0x3201   :  { %v4449_v12 = vmul.f32 %v8178_v0, %v8178_v0 }
0x3203   :  { %v4456_v30 = vsel %vm367_vm15, %v4449_v12, 0.0 }
0x3204   :  { %4457 = vadd.xlane.f32.xlu0 %v4456_v30 }
0x320c   :  { %v4613_v61 = vpop.permute.xlu1 %4612 }
0x320d   :  { %5936 = vmatpush.xpose.msk.msrb.mxu1 %vm281_vm13, %v4613_v61 }
0x3211   :  { %5937 = vmatpush.xpose.msk.msrb.mxu1 %vm281_vm13, %v4611_v6 }
0x3214   :  { %v4609_v1 = vpop.permute.xlu1 %4608 }
0x3215   :  { %4604 = vrot.lane.b32.xlu1 %v8014_v8, %s6542_s19  ;;  %5938 = vmatpush.xpose.msk.msrb.mxu1 %vm281_vm13, %v4609_v1 }
0x3218   :  { %4602 = vrot.lane.b32.xlu0 %v8028_v50, %s6542_s19 }
0x3220   :  { %4606 = vrot.lane.b32.xlu0 %v8009_v19, %s6542_s19 }
0x3267   :  { %v4452_v4 = vpop.xlane.xlu0 %4451 }
0x3268   :  { %v4459_v7 = vmul.f32 %v4452_v4, %v6753_v60 }
0x326a   :  { %v4462_v11 = vadd.f32 1e-05, %v4459_v7 }
0x326c   :  { %6372 = vrsqrt.f32 %v4462_v11  ;;  %vm4471_vm10 = vweird.f32 %v4462_v11 }
0x326f   :  { %v4455_v24 = vpop.xlane.xlu1 %4454 }
0x3270   :  { %v4460_v37 = vmul.f32 %v4455_v24, %v6753_v60 }
0x3272   :  { %v6373_v53 = vpop.eup %6372  ;;  %v4463_v25 = vadd.f32 1e-05, %v4460_v37 }
0x3273   :  { %v4466_v15 = vmul.f32 %v6373_v53, %v4462_v11  ;;  %vm4472_vm9 = vweird.f32 %v6373_v53 }
0x3274   :  { %6374 = vrsqrt.f32 %v4463_v25  ;;  %vm4473_vm0 = vmor %vm4471_vm10, %vm4472_vm9  ;;  %vm4481_vm3 = vweird.f32 %v4463_v25 }
0x3275   :  { %v4467_v20 = vmul.f32 %v6373_v53, %v4466_v15 }
0x3277   :  { %v4468_v23 = vmul.f32 0.5, %v4467_v20  ;;  %v4458_v51 = vpop.xlane.xlu0 %4457 }
0x3278   :  { %v4461_v22 = vmul.f32 %v4458_v51, %v6753_v60 }
0x3279   :  { %v4469_v54 = vsub.f32 1.5, %v4468_v23 }
0x327a   :  { %v6375_v45 = vpop.eup %6374  ;;  %v4464_v18 = vadd.f32 1e-05, %v4461_v22 }
0x327b   :  { %v4470_v62 = vmul.f32 %v6373_v53, %v4469_v54  ;;  %v4476_v13 = vmul.f32 %v6375_v45, %v4463_v25  ;;  %vm4482_vm2 = vweird.f32 %v6375_v45 }
0x327c   :  { %6376 = vrsqrt.f32 %v4464_v18  ;;  %vm4483_vm4 = vmor %vm4481_vm3, %vm4482_vm2  ;;  %vm4491_vm8 = vweird.f32 %v4464_v18 }
0x327d   :  { %v4477_v44 = vmul.f32 %v6375_v45, %v4476_v13  ;;  %v4474_v46 = vsel %vm4473_vm0, %v6373_v53, %v4470_v62 }
0x327e   :  { %v4495_v9 = vmul.f32 %v4474_v46, %v4444_v43 }
0x327f   :  { %v4478_v5 = vmul.f32 0.5, %v4477_v44 }
0x3280   :  { %v4498_v47 = vmul.f32 %v8117_v55, %v4495_v9 }
0x3281   :  { %v4479_v14 = vsub.f32 1.5, %v4478_v5 }
0x3282   :  { %v6377_v49 = vpop.eup %6376  ;;  %v4501_v36 = vadd.f32 %v8123_v41, %v4498_v47 }
0x3283   :  { %v4480_v48 = vmul.f32 %v6375_v45, %v4479_v14  ;;  %v4486_v40 = vmul.f32 %v6377_v49, %v4464_v18  ;;  %vm4492_vm5 = vweird.f32 %v6377_v49 }
0x3284   :  { %v4504_v59 = vsel %vm281_vm13, %v4501_v36, -inf  ;;  %vm4493_vm9 = vmor %vm4491_vm8, %vm4492_vm5 }
0x3285   :  { %v4487_v52 = vmul.f32 %v6377_v49, %v4486_v40  ;;  %4505 = vmax.xlane.f32.xlu1 %v4504_v59  ;;  %v4484_v10 = vsel %vm4483_vm4, %v6375_v45, %v4480_v48 }
0x3286   :  { %v4496_v63 = vmul.f32 %v4484_v10, %v4445_v42 }
0x3287   :  { %v4488_v32 = vmul.f32 0.5, %v4487_v52  ;;  %v4605_v1 = vpop.permute.xlu1 %4604 }
0x3288   :  { %v4499_v43 = vmul.f32 %v8117_v55, %v4496_v63  ;;  %v8219_v63 = vld [vmem:[%s8613_s3 + $0x10] sm:$0x1] }
0x3289   :  { %v4489_v17 = vsub.f32 1.5, %v4488_v32  ;;  %v8226_v32 = vld [vmem:[%s8613_s3 + $0x8] sm:$0xff] }
0x328a   :  { %v4603_v29 = vpop.permute.xlu0 %4602  ;;  %v4502_v26 = vadd.f32 %v8123_v41, %v4499_v43  ;;  %v8232_v43 = vld [vmem:[%s8613_s3] sm:$0xff] }
0x328b   :  { %v4490_v12 = vmul.f32 %v6377_v49, %v4489_v17  ;;  %5939 = vmatmul.msk.f32.vlgmr.msrb.gmra.mxu1 %vm281_vm13, %v4603_v29 }
0x328c   :  { %v4507_v30 = vsel %vm281_vm13, %v4502_v26, -inf }
0x328d   :  { %4508 = vmax.xlane.f32.xlu0 %v4507_v30  ;;  %v4494_v61 = vsel %vm4493_vm9, %v6377_v49, %v4490_v12 }
0x328e   :  { %v4497_v6 = vmul.f32 %v4494_v61, %v8178_v0 }
0x3290   :  { %v4500_v42 = vmul.f32 %v8117_v55, %v4497_v6 }
0x3292   :  { %v4503_v4 = vadd.f32 %v8123_v41, %v4500_v42  ;;  %v4607_v11 = vpop.permute.xlu0 %4606 }
0x3293   :  { %5940 = vmatmul.msk.f32.gmra.mxu1 %vm281_vm13, %v4605_v1 }
0x3294   :  { %v4510_v7 = vsel %vm367_vm15, %v4503_v4, -inf }
0x3295   :  { %4511 = vmax.xlane.f32.xlu1 %v4510_v7 }
0x329b   :  { %5941 = vmatmul.msk.f32.gmra.mxu1 %vm281_vm13, %v4607_v11 }
0x32f8   :  { %v4506_v24 = vpop.xlane.xlu1 %4505 }
0x32f9   :  { %v4513_v37 = vsub.f32 %v4501_v36, %v4506_v24 }
0x32fb   :  { %v4516_v53 = vmul.f32 1.442695, %v4513_v37 }
0x32fd   :  { %6378 = vpow2.f32 %v4516_v53 }
0x3300   :  { %v4509_v25 = vpop.xlane.xlu0 %4508 }
0x3301   :  { %v4514_v15 = vsub.f32 %v4502_v26, %v4509_v25 }
0x3303   :  { %v6379_v0 = vpop.eup %6378  ;;  %v4518_v20 = vmul.f32 1.442695, %v4514_v15 }
0x3304   :  { %v4522_v23 = vsel %vm281_vm13, %v6379_v0, 0.0 }
0x3305   :  { %6380 = vpow2.f32 %v4518_v20  ;;  %4523 = vadd.xlane.f32.xlu0 %v4522_v23 }
0x3308   :  { %v4512_v51 = vpop.xlane.xlu1 %4511  ;;  %v4643_v29 = vpop.f32.mrf.mxu1 }
0x3309   :  { %v4515_v22 = vsub.f32 %v4503_v4, %v4512_v51 }
0x330b   :  { %v6381_v54 = vpop.eup %6380  ;;  %v4520_v45 = vmul.f32 1.442695, %v4515_v22 }
0x330c   :  { %v4525_v18 = vsel %vm281_vm13, %v6381_v54, 0.0 }
0x330d   :  { %6382 = vpow2.f32 %v4520_v45  ;;  %4526 = vadd.xlane.f32.xlu1 %v4525_v18 }
0x3310   :  { %v4646_v26 = vpop.f32.mrf.mxu1 }
0x3313   :  { %v6383_v62 = vpop.eup %6382 }
0x3314   :  { %v4528_v13 = vsel %vm367_vm15, %v6383_v62, 0.0 }
0x3315   :  { %4529 = vadd.xlane.f32.xlu0 %v4528_v13 }
0x3318   :  { %v4649_v12 = vpop.f32.mrf.mxu1 }
0x3326   :  { %4573 = vrot.lane.b32.xlu1 %v8009_v19, %s6543_s24 }
0x3329   :  { %6064 = vrot.lane.b32.xlu0 %v8146_v16, %s6543_s24  ;;  %s6552_s24 = smov [#allocation2]  }
0x332a   :  { %s5729_s7 = sshll.u32 %s6552_s24, 4  ;;  %s5730_s7 = int_to_ptr.vmem [resolvable:$true] %s5729_s7 }
0x3378   :  { %v4524_v44 = vpop.xlane.xlu0 %4523 }
0x3379   :  { %6384 = vrcp.f32 %v4524_v44 }
0x337f   :  { %v6385_v46 = vpop.eup %6384 }
0x3380   :  { %v4527_v9 = vpop.xlane.xlu1 %4526  ;;  %v4534_v5 = vmul.f32 %v6385_v46, %v6379_v0 }
0x3381   :  { %6386 = vrcp.f32 %v4527_v9 }
0x3382   :  { %4537 = vxpose.xlu2.b32.start [1/3] (short) (narrow) %v4534_v5, 8 }
0x3387   :  { %v6387_v47 = vpop.eup %6386 }
0x3388   :  { %v4530_v14 = vpop.xlane.xlu0 %4529  ;;  %v4535_v49 = vmul.f32 %v6387_v47, %v6381_v54  ;;  %v6476_v47 = vld [vmem:[%s8612_s2 + $0xd0] sm:$0xff] }
0x3389   :  { %6388 = vrcp.f32 %v4530_v14 }
0x338a   :  { %4538 = vxpose.xlu2.b32.cont [2/3] (short) (narrow) %v4535_v49, 8  ;;  %v6477_v49 = vld [vmem:[%s8612_s2 + $0xc8] sm:$0xff] }
0x338f   :  { %v6389_v36 = vpop.eup %6388 }
0x3390   :  { %v4536_v48 = vmul.f32 %v6389_v36, %v6383_v62  ;;  %v6479_v36 = vld [vmem:[%s8612_s2 + $0xb8] sm:$0xff] }
0x3392   :  { %4539 = vxpose.xlu2.b32.end [3/3] (short) (narrow) %v4536_v48, 8  ;;  %v6480_v48 = vld [vmem:[%s8612_s2 + $0xb0] sm:$0xff] }
0x3398   :  { %v4574_v40 = vpop.permute.xlu1 %4573 }
0x3399   :  { %5934 = vmatpush.msk.msra.mxu0 %vm331_vm12, %v4574_v40  ;;  %v6481_v40 = vld [vmem:[%s8612_s2 + $0xa8] sm:$0xff] }
0x339b   :  { %v6065_v59 = vpop.permute.xlu0 %6064 }
0x339c   :  { %v6066_v52 = vunpack.i.l.bf16 %v6065_v59  ;;  %v6067_v10 = vunpack.i.h.bf16 %v6065_v59  ;;  %v6482_v59 = vld [vmem:[%s8612_s2 + $0xa0] sm:$0xff] }
0x339e   :  { %4596 = vmatpush.msra.mxu0 %v6066_v52  ;;  %v6483_v52 = vld [vmem:[%s8612_s2 + $0x98] sm:$0xff] }
0x33a0   :  { %4597 = vmatpush.msra.mxu0 %v6067_v10  ;;  %v6484_v10 = vld [vmem:[%s8612_s2 + $0x90] sm:$0xff] }
0x33a2   :  { %5942 = vmatpush.msk.msrb.mxu0 %vm331_vm12, %v8219_v63 }
0x33a4   :  { %4675 = vmatpush.msrb.mxu0 %v8226_v32 }
0x33a6   :  { %4676 = vmatpush.msrb.mxu0 %v8232_v43 }
0x341b   :  { %v4553_v17 = vpop.trf.xlu2 }
0x341c   :  { %5935 = vmatmul.msk.f32.vlgmr.msra.gmra.mxu0 %vm321_vm14, %v4553_v17  ;;  %v6485_v17 = vld [vmem:[%s8612_s2 + $0x88] sm:$0xff] }
0x3424   :  { %5943 = vmatmul.msk.f32.vlgmr.msrb.gmra.mxu0 %vm321_vm14, %v4643_v29  ;;  %v6486_v29 = vld [vmem:[%s8612_s2 + $0x80] sm:$0xff] }
0x342c   :  { %5944 = vmatmul.msk.f32.gmra.mxu0 %vm321_vm14, %v4646_v26  ;;  %v6487_v26 = vld [vmem:[%s8612_s2 + $0x78] sm:$0xff] }
0x3434   :  { %5945 = vmatmul.msk.f32.gmra.mxu0 %vm321_vm14, %v4649_v12  ;;  %v6488_v12 = vld [vmem:[%s8612_s2 + $0x70] sm:$0xff] }
0x3499   :  { %v8239_v30 = vpop.f32.mrf.mxu0 }
0x34a1   :  { %v4678_v61 = vpop.f32.mrf.mxu0 }
0x34a2   :  { %v4679_v6 = vadd.f32 %v8075_v21, %v4678_v61  ;;  %v6489_v61 = vld [vmem:[%s8612_s2 + $0x68] sm:$0xff] }
0x34a4   :  { %v4687_v42 = vsel %vm281_vm13, %v4679_v6, 0.0 }
0x34a5   :  { %4688 = vadd.xlane.f32.xlu0 %v4687_v42  ;;  %v6491_v42 = vld [vmem:[%s8612_s2 + $0x58] sm:$0xff] }
0x34a9   :  { %v4681_v1 = vpop.f32.mrf.mxu0 }
0x34aa   :  { %v4682_v4 = vadd.f32 %v8075_v21, %v4681_v1 }
0x34ac   :  { %v4690_v7 = vsel %vm281_vm13, %v4682_v4, 0.0 }
0x34ad   :  { %4691 = vadd.xlane.f32.xlu1 %v4690_v7 }
0x34b1   :  { %v4684_v11 = vpop.f32.mrf.mxu0 }
0x34b2   :  { %v4685_v24 = vadd.f32 %v8075_v21, %v4684_v11 }
0x34b4   :  { %v4693_v37 = vsel %vm367_vm15, %v4685_v24, 0.0 }
0x34b5   :  { %4694 = vadd.xlane.f32.xlu2 %v4693_v37 }
0x34b9   :  { %4865 = vrot.lane.b32.xlu0 %v8014_v8, %s6544_s26 }
0x34c1   :  { %4857 = vrot.lane.b32.xlu0 %v8028_v50, %s6545_s27 }
0x34c6   :  { %4867 = vrot.lane.b32.xlu1 %v8009_v19, %s6544_s26 }
0x34ce   :  { %4863 = vrot.lane.b32.xlu1 %v8028_v50, %s6544_s26 }
0x3518   :  { %v4689_v53 = vpop.xlane.xlu0 %4688 }
0x3519   :  { %v4696_v25 = vmul.f32 %v4689_v53, %v6753_v60 }
0x351b   :  { %v8256_v15 = vsub.f32 %v4679_v6, %v4696_v25  ;;  %v6490_v6 = vld [vmem:[%s8612_s2 + $0x60] sm:$0xff] }
0x351d   :  { %v4702_v0 = vmul.f32 %v8256_v15, %v8256_v15 }
0x351f   :  { %v4705_v20 = vsel %vm281_vm13, %v4702_v0, 0.0 }
0x3520   :  { %v4692_v23 = vpop.xlane.xlu1 %4691  ;;  %4706 = vadd.xlane.f32.xlu0 %v4705_v20 }
0x3521   :  { %v4697_v51 = vmul.f32 %v4692_v23, %v6753_v60 }
0x3523   :  { %v8262_v22 = vsub.f32 %v4682_v4, %v4697_v51 }
0x3525   :  { %v4703_v54 = vmul.f32 %v8262_v22, %v8262_v22 }
0x3527   :  { %v4708_v50 = vsel %vm281_vm13, %v4703_v54, 0.0 }
0x3528   :  { %v4695_v45 = vpop.xlane.xlu2 %4694  ;;  %4709 = vadd.xlane.f32.xlu1 %v4708_v50 }
0x3529   :  { %v4698_v18 = vmul.f32 %v4695_v45, %v6753_v60 }
0x352b   :  { %v8268_v62 = vsub.f32 %v4685_v24, %v4698_v18  ;;  %v4866_v9 = vpop.permute.xlu0 %4865 }
0x352d   :  { %v4704_v13 = vmul.f32 %v8268_v62, %v8268_v62 }
0x352f   :  { %v4711_v44 = vsel %vm367_vm15, %v4704_v13, 0.0 }
0x3530   :  { %4712 = vadd.xlane.f32.xlu0 %v4711_v44 }
0x3533   :  { %v4858_v14 = vpop.permute.xlu0 %4857 }
0x3538   :  { %v4868_v46 = vpop.permute.xlu1 %4867 }
0x3539   :  { %5948 = vmatpush.xpose.msk.msra.mxu3 %vm281_vm13, %v4868_v46 }
0x353d   :  { %5949 = vmatpush.xpose.msk.msra.mxu3 %vm281_vm13, %v4866_v9 }
0x3540   :  { %v4864_v5 = vpop.permute.xlu1 %4863 }
0x3541   :  { %4859 = vrot.lane.b32.xlu1 %v8014_v8, %s6545_s27  ;;  %5950 = vmatpush.xpose.msk.msra.mxu3 %vm281_vm13, %v4864_v5  ;;  %v6478_v8 = vld [vmem:[%s8612_s2 + $0xc0] sm:$0xff] }
0x3544   :  { %4861 = vrot.lane.b32.xlu0 %v8009_v19, %s6545_s27  ;;  %5951 = vmatmul.msk.f32.vlgmr.msra.gmra.mxu3 %vm281_vm13, %v4858_v14 }
0x3545   :  { %5577 = vmatpush.msrb.mxu3 %v6476_v47 }
0x3547   :  { %5578 = vmatpush.msrb.mxu3 %v6477_v49 }
0x3549   :  { %5579 = vmatpush.msrb.mxu3 %v6478_v8 }
0x354b   :  { %5580 = vmatpush.msrb.mxu3 %v6479_v36 }
0x354d   :  { %5581 = vmatpush.msrb.mxu3 %v6480_v48 }
0x354f   :  { %5582 = vmatpush.msrb.mxu3 %v6481_v40 }
0x3551   :  { %5583 = vmatpush.msrb.mxu3 %v6482_v59 }
0x3553   :  { %5584 = vmatpush.msrb.mxu3 %v6483_v52 }
0x3555   :  { %5585 = vmatpush.msrb.mxu3 %v6484_v10 }
0x3557   :  { %5586 = vmatpush.msrb.mxu3 %v6485_v17 }
0x3559   :  { %5587 = vmatpush.msrb.mxu3 %v6486_v29 }
0x355b   :  { %5588 = vmatpush.msrb.mxu3 %v6487_v26 }
0x355d   :  { %5589 = vmatpush.msrb.mxu3 %v6488_v12 }
0x355f   :  { %5590 = vmatpush.msrb.mxu3 %v6489_v61 }
0x3561   :  { %5591 = vmatpush.msrb.mxu3 %v6490_v6 }
0x3563   :  { %5592 = vmatpush.msrb.mxu3 %v6491_v42 }
0x3593   :  { %v4707_v1 = vpop.xlane.xlu0 %4706 }
0x3594   :  { %v4714_v4 = vmul.f32 %v4707_v1, %v6753_v60 }
0x3596   :  { %v4717_v7 = vadd.f32 1e-05, %v4714_v4 }
0x3598   :  { %6390 = vrsqrt.f32 %v4717_v7  ;;  %vm4726_vm0 = vweird.f32 %v4717_v7 }
0x359b   :  { %v4710_v11 = vpop.xlane.xlu1 %4709 }
0x359c   :  { %v4715_v24 = vmul.f32 %v4710_v11, %v6753_v60 }
0x359e   :  { %v6391_v37 = vpop.eup %6390  ;;  %v4718_v53 = vadd.f32 1e-05, %v4715_v24 }
0x359f   :  { %v4721_v25 = vmul.f32 %v6391_v37, %v4717_v7  ;;  %vm4727_vm10 = vweird.f32 %v6391_v37 }
0x35a0   :  { %6392 = vrsqrt.f32 %v4718_v53  ;;  %vm4728_vm2 = vmor %vm4726_vm0, %vm4727_vm10  ;;  %vm4736_vm4 = vweird.f32 %v4718_v53 }
0x35a1   :  { %v4722_v0 = vmul.f32 %v6391_v37, %v4721_v25 }
0x35a3   :  { %v4723_v20 = vmul.f32 0.5, %v4722_v0  ;;  %v4713_v23 = vpop.xlane.xlu0 %4712 }
0x35a4   :  { %v4716_v51 = vmul.f32 %v4713_v23, %v6753_v60 }
0x35a5   :  { %v4724_v54 = vsub.f32 1.5, %v4723_v20 }
0x35a6   :  { %v6393_v50 = vpop.eup %6392  ;;  %v4719_v45 = vadd.f32 1e-05, %v4716_v51 }
0x35a7   :  { %v4725_v18 = vmul.f32 %v6391_v37, %v4724_v54  ;;  %v4731_v13 = vmul.f32 %v6393_v50, %v4718_v53  ;;  %vm4737_vm3 = vweird.f32 %v6393_v50 }
0x35a8   :  { %6394 = vrsqrt.f32 %v4719_v45  ;;  %vm4738_vm5 = vmor %vm4736_vm4, %vm4737_vm3  ;;  %vm4746_vm9 = vweird.f32 %v4719_v45 }
0x35a9   :  { %v4732_v44 = vmul.f32 %v6393_v50, %v4731_v13  ;;  %v4729_v46 = vsel %vm4728_vm2, %v6391_v37, %v4725_v18 }
0x35aa   :  { %v4750_v9 = vmul.f32 %v4729_v46, %v8256_v15 }
0x35ab   :  { %v4733_v5 = vmul.f32 0.5, %v4732_v44 }
0x35ac   :  { %v4753_v47 = vmul.f32 %v8117_v55, %v4750_v9 }
0x35ad   :  { %v4734_v14 = vsub.f32 1.5, %v4733_v5 }
0x35ae   :  { %v6395_v49 = vpop.eup %6394  ;;  %v4756_v8 = vadd.f32 %v8123_v41, %v4753_v47 }
0x35af   :  { %v4735_v36 = vmul.f32 %v6393_v50, %v4734_v14  ;;  %v4741_v48 = vmul.f32 %v6395_v49, %v4719_v45  ;;  %vm4747_vm8 = vweird.f32 %v6395_v49 }
0x35b0   :  { %v4759_v40 = vsel %vm281_vm13, %v4756_v8, -inf  ;;  %vm4748_vm10 = vmor %vm4746_vm9, %vm4747_vm8 }
0x35b1   :  { %v4742_v59 = vmul.f32 %v6395_v49, %v4741_v48  ;;  %4760 = vmax.xlane.f32.xlu1 %v4759_v40  ;;  %v4739_v52 = vsel %vm4738_vm5, %v6393_v50, %v4735_v36 }
0x35b2   :  { %v4751_v10 = vmul.f32 %v4739_v52, %v8262_v22 }
0x35b3   :  { %v4743_v15 = vmul.f32 0.5, %v4742_v59  ;;  %v4860_v17 = vpop.permute.xlu1 %4859 }
0x35b4   :  { %5952 = vmatmul.msk.f32.gmra.mxu3 %vm281_vm13, %v4860_v17  ;;  %v4754_v29 = vmul.f32 %v8117_v55, %v4751_v10 }
0x35b5   :  { %v4744_v26 = vsub.f32 1.5, %v4743_v15 }
0x35b6   :  { %v4757_v12 = vadd.f32 %v8123_v41, %v4754_v29  ;;  %v4862_v22 = vpop.permute.xlu0 %4861 }
0x35b7   :  { %v4745_v61 = vmul.f32 %v6395_v49, %v4744_v26 }
0x35b8   :  { %v4762_v6 = vsel %vm281_vm13, %v4757_v12, -inf }
0x35b9   :  { %4763 = vmax.xlane.f32.xlu0 %v4762_v6  ;;  %v4749_v42 = vsel %vm4748_vm10, %v6395_v49, %v4745_v61 }
0x35ba   :  { %v4752_v1 = vmul.f32 %v4749_v42, %v8268_v62 }
0x35bc   :  { %5953 = vmatmul.msk.f32.gmra.mxu3 %vm281_vm13, %v4862_v22  ;;  %v4755_v4 = vmul.f32 %v8117_v55, %v4752_v1  ;;  %v6492_v22 = vld [vmem:[%s8613_s3 + $0x50] ss:$0 sm:$0xff] }
0x35be   :  { %v4758_v7 = vadd.f32 %v8123_v41, %v4755_v4 }
0x35c0   :  { %v4765_v11 = vsel %vm367_vm15, %v4758_v7, -inf }
0x35c1   :  { %4766 = vmax.xlane.f32.xlu1 %v4765_v11 }
0x35c7   :  { %v4898_v17 = vpop.f32.mrf.mxu3 }
0x3624   :  { %v4761_v24 = vpop.xlane.xlu1 %4760 }
0x3625   :  { %v4768_v37 = vsub.f32 %v4756_v8, %v4761_v24 }
0x3627   :  { %v4771_v53 = vmul.f32 1.442695, %v4768_v37 }
0x3629   :  { %6396 = vpow2.f32 %v4771_v53 }
0x362c   :  { %v4764_v25 = vpop.xlane.xlu0 %4763 }
0x362d   :  { %v4769_v0 = vsub.f32 %v4757_v12, %v4764_v25 }
0x362f   :  { %v6397_v20 = vpop.eup %6396  ;;  %v4773_v23 = vmul.f32 1.442695, %v4769_v0 }
0x3630   :  { %v4777_v62 = vsel %vm281_vm13, %v6397_v20, 0.0 }
0x3631   :  { %6398 = vpow2.f32 %v4773_v23  ;;  %4778 = vadd.xlane.f32.xlu0 %v4777_v62 }
0x3634   :  { %v4767_v51 = vpop.xlane.xlu1 %4766 }
0x3635   :  { %v4770_v54 = vsub.f32 %v4758_v7, %v4767_v51 }
0x3637   :  { %v6399_v50 = vpop.eup %6398  ;;  %v4775_v45 = vmul.f32 1.442695, %v4770_v54  ;;  %v4901_v29 = vpop.f32.mrf.mxu3 }
0x3638   :  { %v4780_v18 = vsel %vm281_vm13, %v6399_v50, 0.0 }
0x3639   :  { %6400 = vpow2.f32 %v4775_v45  ;;  %4781 = vadd.xlane.f32.xlu1 %v4780_v18 }
0x363f   :  { %v6401_v13 = vpop.eup %6400  ;;  %v4904_v26 = vpop.f32.mrf.mxu3 }
0x3640   :  { %v4783_v44 = vsel %vm367_vm15, %v6401_v13, 0.0 }
0x3641   :  { %4784 = vadd.xlane.f32.xlu0 %v4783_v44 }
0x3652   :  { %4828 = vrot.lane.b32.xlu1 %v8009_v19, %s6546_s28 }
0x3655   :  { %6069 = vrot.lane.b32.xlu0 %v8146_v16, %s6546_s28 }
0x36a4   :  { %v4779_v46 = vpop.xlane.xlu0 %4778 }
0x36a5   :  { %6402 = vrcp.f32 %v4779_v46 }
0x36ab   :  { %v6403_v9 = vpop.eup %6402 }
0x36ac   :  { %v4782_v5 = vpop.xlane.xlu1 %4781  ;;  %v4789_v47 = vmul.f32 %v6403_v9, %v6397_v20 }
0x36ad   :  { %6404 = vrcp.f32 %v4782_v5 }
0x36ae   :  { %4792 = vxpose.xlu2.b32.start [1/3] (short) (narrow) %v4789_v47, 8 }
0x36b3   :  { %v6405_v14 = vpop.eup %6404 }
0x36b4   :  { %v4785_v49 = vpop.xlane.xlu0 %4784  ;;  %v4790_v8 = vmul.f32 %v6405_v14, %v6399_v50 }
0x36b5   :  { %6406 = vrcp.f32 %v4785_v49 }
0x36b6   :  { %4793 = vxpose.xlu2.b32.cont [2/3] (short) (narrow) %v4790_v8, 8 }
0x36bb   :  { %v6407_v36 = vpop.eup %6406 }
0x36bc   :  { %v4791_v48 = vmul.f32 %v6407_v36, %v6401_v13 }
0x36be   :  { %4794 = vxpose.xlu2.b32.end [3/3] (short) (narrow) %v4791_v48, 8 }
0x36c4   :  { %v4829_v40 = vpop.permute.xlu1 %4828 }
0x36c5   :  { %5946 = vmatpush.msk.msrb.mxu2 %vm331_vm12, %v4829_v40 }
0x36c7   :  { %v6070_v59 = vpop.permute.xlu0 %6069 }
0x36c8   :  { %v6071_v52 = vunpack.i.l.bf16 %v6070_v59  ;;  %v6072_v10 = vunpack.i.h.bf16 %v6070_v59 }
0x36ca   :  { %4851 = vmatpush.msrb.mxu2 %v6071_v52 }
0x36cc   :  { %4852 = vmatpush.msrb.mxu2 %v6072_v10 }
0x36ce   :  { %5954 = vmatpush.msk.msra.mxu2 %vm331_vm12, %v8219_v63 }
0x36d0   :  { %4930 = vmatpush.msra.mxu2 %v8226_v32 }
0x36d2   :  { %4931 = vmatpush.msra.mxu2 %v8232_v43 }
0x3747   :  { %v4808_v15 = vpop.trf.xlu2 }
0x3748   :  { %5947 = vmatmul.msk.f32.vlgmr.msrb.gmra.mxu2 %vm321_vm14, %v4808_v15 }
0x3750   :  { %5955 = vmatmul.msk.f32.vlgmr.msra.gmra.mxu2 %vm321_vm14, %v4898_v17 }
0x3758   :  { %5956 = vmatmul.msk.f32.gmra.mxu2 %vm321_vm14, %v4901_v29 }
0x3760   :  { %5957 = vmatmul.msk.f32.gmra.mxu2 %vm321_vm14, %v4904_v26 }
0x37cb   :  { %v8362_v12 = vpop.f32.mrf.mxu2 }
0x37d3   :  { %v4933_v61 = vpop.f32.mrf.mxu2 }
0x37d4   :  { %v4934_v63 = vadd.f32 %v8075_v21, %v4933_v61 }
0x37d6   :  { %v4942_v32 = vsel %vm281_vm13, %v4934_v63, 0.0 }
0x37d7   :  { %4943 = vadd.xlane.f32.xlu0 %v4942_v32 }
0x37db   :  { %v4936_v43 = vpop.f32.mrf.mxu2 }
0x37dc   :  { %v4937_v6 = vadd.f32 %v8075_v21, %v4936_v43 }
0x37de   :  { %v4945_v42 = vsel %vm281_vm13, %v4937_v6, 0.0 }
0x37df   :  { %4946 = vadd.xlane.f32.xlu1 %v4945_v42 }
0x37e3   :  { %v4939_v1 = vpop.f32.mrf.mxu2 }
0x37e4   :  { %v4940_v4 = vadd.f32 %v6492_v22, %v4939_v1 }
0x37e6   :  { %v4948_v7 = vsel %vm367_vm15, %v4940_v4, 0.0 }
0x37e7   :  { %4949 = vadd.xlane.f32.xlu2 %v4948_v7 }
0x384a   :  { %v4944_v11 = vpop.xlane.xlu0 %4943 }
0x384b   :  { %v4951_v24 = vmul.f32 %v4944_v11, %v6753_v60 }
0x384d   :  { %v4954_v37 = vsub.f32 %v4934_v63, %v4951_v24 }
0x384f   :  { %v4957_v53 = vmul.f32 %v4954_v37, %v4954_v37 }
0x3851   :  { %v4960_v25 = vsel %vm281_vm13, %v4957_v53, 0.0 }
0x3852   :  { %v4947_v21 = vpop.xlane.xlu1 %4946  ;;  %4961 = vadd.xlane.f32.xlu0 %v4960_v25 }
0x3853   :  { %v4952_v0 = vmul.f32 %v4947_v21, %v6753_v60 }
0x3855   :  { %v4955_v20 = vsub.f32 %v4937_v6, %v4952_v0 }
0x3857   :  { %v4958_v23 = vmul.f32 %v4955_v20, %v4955_v20 }
0x3859   :  { %v4963_v62 = vsel %vm281_vm13, %v4958_v23, 0.0 }
0x385a   :  { %v4950_v51 = vpop.xlane.xlu2 %4949  ;;  %4964 = vadd.xlane.f32.xlu1 %v4963_v62 }
0x385b   :  { %v4953_v54 = vmul.f32 %v4950_v51, %v6753_v60  ;;  %v6493_v51 = vld [vmem:[%s8613_s3 + $0x51] ss:$0 sm:$0xff] }
0x385d   :  { %v4956_v50 = vsub.f32 %v4940_v4, %v4953_v54 }
0x385f   :  { %v4959_v45 = vmul.f32 %v4956_v50, %v4956_v50 }
0x3861   :  { %v4966_v18 = vsel %vm367_vm15, %v4959_v45, 0.0 }
0x3862   :  { %4967 = vadd.xlane.f32.xlu0 %v4966_v18 }
0x38c5   :  { %v4962_v13 = vpop.xlane.xlu0 %4961 }
0x38c6   :  { %v4969_v44 = vmul.f32 %v4962_v13, %v6753_v60 }
0x38c8   :  { %v4972_v46 = vadd.f32 1e-05, %v4969_v44 }
0x38ca   :  { %6408 = vrsqrt.f32 %v4972_v46  ;;  %vm4981_vm2 = vweird.f32 %v4972_v46 }
0x38cd   :  { %v4965_v9 = vpop.xlane.xlu1 %4964 }
0x38ce   :  { %v4970_v5 = vmul.f32 %v4965_v9, %v6753_v60 }
0x38d0   :  { %v6409_v47 = vpop.eup %6408  ;;  %v4973_v14 = vadd.f32 1e-05, %v4970_v5 }
0x38d1   :  { %v4976_v49 = vmul.f32 %v6409_v47, %v4972_v46  ;;  %vm4982_vm0 = vweird.f32 %v6409_v47 }
0x38d2   :  { %6410 = vrsqrt.f32 %v4973_v14  ;;  %vm4983_vm3 = vmor %vm4981_vm2, %vm4982_vm0  ;;  %vm4991_vm5 = vweird.f32 %v4973_v14 }
0x38d3   :  { %v4977_v8 = vmul.f32 %v6409_v47, %v4976_v49 }
0x38d5   :  { %v4978_v36 = vmul.f32 0.5, %v4977_v8  ;;  %v4968_v48 = vpop.xlane.xlu0 %4967 }
0x38d6   :  { %v4971_v40 = vmul.f32 %v4968_v48, %v6753_v60 }
0x38d7   :  { %v4979_v59 = vsub.f32 1.5, %v4978_v36 }
0x38d8   :  { %v6411_v52 = vpop.eup %6410  ;;  %v4974_v10 = vadd.f32 1e-05, %v4971_v40 }
0x38d9   :  { %v4980_v15 = vmul.f32 %v6409_v47, %v4979_v59  ;;  %v4986_v17 = vmul.f32 %v6411_v52, %v4973_v14  ;;  %vm4992_vm4 = vweird.f32 %v6411_v52 }
0x38da   :  { %6412 = vrsqrt.f32 %v4974_v10  ;;  %vm4993_vm8 = vmor %vm4991_vm5, %vm4992_vm4  ;;  %vm5001_vm10 = vweird.f32 %v4974_v10 }
0x38db   :  { %v4987_v29 = vmul.f32 %v6411_v52, %v4986_v17  ;;  %v4984_v26 = vsel %vm4983_vm3, %v6409_v47, %v4980_v15 }
0x38dc   :  { %v5005_v61 = vmul.f32 %v4984_v26, %v4954_v37  ;;  %v6495_v26 = vld [vmem:[%s8611_s1 + $0x38] sm:$0xff] }
0x38dd   :  { %v4988_v63 = vmul.f32 0.5, %v4987_v29 }
0x38de   :  { %v5008_v32 = vmul.f32 %v8117_v55, %v5005_v61  ;;  %v6496_v61 = vld [vmem:[%s8611_s1 + $0x30] sm:$0xff] }
0x38df   :  { %v4989_v43 = vsub.f32 1.5, %v4988_v63  ;;  %v6497_v63 = vld [vmem:[%s8611_s1 + $0x28] sm:$0xff] }
0x38e0   :  { %v6413_v6 = vpop.eup %6412  ;;  %v5011_v60 = vadd.f32 %v8123_v41, %v5008_v32  ;;  %v6498_v32 = vld [vmem:[%s8611_s1 + $0x20] sm:$0xff] }
0x38e1   :  { %v4990_v42 = vmul.f32 %v6411_v52, %v4989_v43  ;;  %v4996_v1 = vmul.f32 %v6413_v6, %v4974_v10  ;;  %vm5002_vm9 = vweird.f32 %v6413_v6 }
0x38e2   :  { %v5014_v22 = vsel %vm281_vm13, %v5011_v60, -inf  ;;  %vm5003_vm0 = vmor %vm5001_vm10, %vm5002_vm9 }
0x38e3   :  { %v4997_v4 = vmul.f32 %v6413_v6, %v4996_v1  ;;  %5015 = vmax.xlane.f32.xlu1 %v5014_v22  ;;  %v4994_v7 = vsel %vm4993_vm8, %v6411_v52, %v4990_v42 }
0x38e4   :  { %v5006_v11 = vmul.f32 %v4994_v7, %v4955_v20 }
0x38e5   :  { %v4998_v24 = vmul.f32 0.5, %v4997_v4 }
0x38e6   :  { %v5009_v37 = vmul.f32 %v8117_v55, %v5006_v11  ;;  %v6494_v55 = vld [vmem:[%s8613_s3 + $0x52] ss:$0 sm:$0xff] }
0x38e7   :  { %v4999_v53 = vsub.f32 1.5, %v4998_v24 }
0x38e8   :  { %v5012_v25 = vadd.f32 %v8123_v41, %v5009_v37 }
0x38e9   :  { %v5000_v21 = vmul.f32 %v6413_v6, %v4999_v53 }
0x38ea   :  { %v5017_v0 = vsel %vm281_vm13, %v5012_v25, -inf }
0x38eb   :  { %5018 = vmax.xlane.f32.xlu0 %v5017_v0  ;;  %v5004_v23 = vsel %vm5003_vm0, %v6413_v6, %v5000_v21 }
0x38ec   :  { %v5007_v62 = vmul.f32 %v5004_v23, %v4956_v50  ;;  %v6499_v23 = vld [vmem:[%s8613_s3 + $0x18] sm:$0xff] }
0x38ee   :  { %v5010_v20 = vmul.f32 %v6493_v51, %v5007_v62  ;;  %v6500_v62 = vld [vmem:[%s8613_s3 + $0x20] sm:$0xff] }
0x38f0   :  { %v5013_v54 = vadd.f32 %v6494_v55, %v5010_v20 }
0x38f2   :  { %v5020_v41 = vsel %vm367_vm15, %v5013_v54, -inf }
0x38f3   :  { %5021 = vmax.xlane.f32.xlu1 %v5020_v41 }
0x3956   :  { %v5016_v45 = vpop.xlane.xlu1 %5015 }
0x3957   :  { %v5023_v18 = vsub.f32 %v5011_v60, %v5016_v45 }
0x3959   :  { %v5026_v13 = vmul.f32 1.442695, %v5023_v18 }
0x395b   :  { %6414 = vpow2.f32 %v5026_v13 }
0x395e   :  { %v5019_v44 = vpop.xlane.xlu0 %5018 }
0x395f   :  { %v5024_v46 = vsub.f32 %v5012_v25, %v5019_v44  ;;  %v6503_v44 = vld [vmem:[%s8612_s2 + $0xe0] sm:$0xff] }
0x3961   :  { %v6415_v50 = vpop.eup %6414  ;;  %v5028_v9 = vmul.f32 1.442695, %v5024_v46 }
0x3962   :  { %v5032_v5 = vsel %vm281_vm13, %v6415_v50, 0.0 }
0x3963   :  { %6416 = vpow2.f32 %v5028_v9  ;;  %5033 = vadd.xlane.f32.xlu0 %v5032_v5 }
0x3966   :  { %v5022_v49 = vpop.xlane.xlu1 %5021 }
0x3967   :  { %v5025_v8 = vsub.f32 %v5013_v54, %v5022_v49  ;;  %v6502_v54 = vld [vmem:[%s8612_s2 + $0xd8] sm:$0xff] }
0x3969   :  { %v6417_v47 = vpop.eup %6416  ;;  %v5030_v36 = vmul.f32 1.442695, %v5025_v8 }
0x396a   :  { %v5035_v14 = vsel %vm281_vm13, %v6417_v47, 0.0 }
0x396b   :  { %5036 = vadd.xlane.f32.xlu1 %v5035_v14  ;;  %6418 = vpow2.f32 %v5030_v36  ;;  %v6504_v14 = vld [vmem:[%s8612_s2 + $0xe8] sm:$0xff] }
0x3971   :  { %v6419_v48 = vpop.eup %6418 }
0x3972   :  { %v5038_v40 = vsel %vm367_vm15, %v6419_v48, 0.0 }
0x3977   :  { %6074 = vrot.lane.b32.xlu0 %v8146_v16, %s6547_s16 }
0x3984   :  { %5083 = vrot.lane.b32.xlu1 %v8009_v19, %s6547_s16 }
0x398c   :  { %5113 = vrot.lane.b32.xlu1 %v8239_v30, %s6548_s10 }
0x3994   :  { %5117 = vrot.lane.b32.xlu1 %v8362_v12, %s6549_s13 }
0x39a1   :  { %5039 = vadd.xlane.f32.xlu0 %v5038_v40 }
0x39d6   :  { %v5034_v59 = vpop.xlane.xlu0 %5033 }
0x39d7   :  { %6420 = vrcp.f32 %v5034_v59 }
0x39dd   :  { %v6421_v16 = vpop.eup %6420 }
0x39de   :  { %v5037_v52 = vpop.xlane.xlu1 %5036  ;;  %v5044_v10 = vmul.f32 %v6421_v16, %v6415_v50 }
0x39df   :  { %6422 = vrcp.f32 %v5037_v52 }
0x39e0   :  { %5047 = vxpose.xlu0.b32.start [1/3] (short) (narrow) %v5044_v10, 8 }
0x39e5   :  { %v6423_v19 = vpop.eup %6422 }
0x39e6   :  { %v5045_v15 = vmul.f32 %v6423_v19, %v6417_v47 }
0x39e8   :  { %5048 = vxpose.xlu0.b32.cont [2/3] (short) (narrow) %v5045_v15, 8 }
0x39e9   :  { %v6075_v30 = vpop.permute.xlu0 %6074 }
0x39ea   :  { %v6076_v29 = vunpack.i.l.bf16 %v6075_v30  ;;  %v6077_v12 = vunpack.i.h.bf16 %v6075_v30 }
0x39f6   :  { %v5084_v17 = vpop.permute.xlu1 %5083 }
0x39f7   :  { %5958 = vmatpush.msk.msra.mxu1 %vm331_vm12, %v5084_v17 }
0x39f9   :  { %5106 = vmatpush.msra.mxu1 %v6076_v29 }
0x39fb   :  { %5107 = vmatpush.msra.mxu1 %v6077_v12 }
0x39fd   :  { %5337 = vmatpush.msrb.mxu1 %v6495_v26 }
0x39fe   :  { %v5114_v22 = vpop.permute.xlu1 %5113 }
0x39ff   :  { %5338 = vmatpush.msrb.mxu1 %v6496_v61  ;;  %v5124_v7 = vsel %vm281_vm13, %v8159_v35, %v5114_v22 }
0x3a01   :  { %5339 = vmatpush.msrb.mxu1 %v6497_v63 }
0x3a03   :  { %5340 = vmatpush.msrb.mxu1 %v6498_v32 }
0x3a06   :  { %v5118_v4 = vpop.permute.xlu1 %5117 }
0x3a07   :  { %v5125_v11 = vsel %vm1319_vm6, %v5124_v7, %v5118_v4  ;;  %v8489_v7 = vld [vmem:[%s8612_s2 + $0x111] ss:$0 sm:$0xff] }
0x3a14   :  { %v5040_v43 = vpop.xlane.xlu0 %5039 }
0x3a15   :  { %6424 = vrcp.f32 %v5040_v43 }
0x3a1b   :  { %v6425_v6 = vpop.eup %6424 }
0x3a1c   :  { %v5046_v60 = vmul.f32 %v6425_v6, %v6419_v48 }
0x3a1e   :  { %5049 = vxpose.xlu0.b32.end [3/3] (short) (narrow) %v5046_v60, 8 }
0x3ab2   :  { %v5063_v42 = vpop.trf.xlu0 }
0x3ab3   :  { %5959 = vmatmul.msk.f32.vlgmr.msra.gmra.mxu1 %vm321_vm14, %v5063_v42 }
0x3b30   :  { %v5109_v1 = vpop.f32.mrf.mxu1 }
0x3b31   :  { %5121 = vrot.lane.b32.xlu1 %v5109_v1, %s6550_s5 }
0x3b39   :  { %4077 = vrot.lane.b32.xlu1 %v7931_v39, %s6548_s10 }
0x3b41   :  { %4081 = vrot.lane.b32.xlu1 %v7996_v58, %s6549_s13 }
0x3b49   :  { %4085 = vrot.lane.b32.xlu1 %v8070_v57, %s6550_s5 }
0x3ba3   :  { %v5122_v24 = vpop.permute.xlu1 %5121 }
0x3ba4   :  { %v5126_v37 = vsel %vm1321_vm7, %v5125_v11, %v5122_v24 }
0x3ba5   :  { %5128 = vrot.lane.b32.xlu2 %v5126_v37, %s6551_s6  ;;  %v8494_v37 = vld [vmem:[%s8612_s2 + $0x112] ss:$0 sm:$0xff] }
0x3bab   :  { %v4078_v53 = vpop.permute.xlu1 %4077 }
0x3bac   :  { %v4088_v58 = vsel %vm281_vm13, %v7929_v2, %v4078_v53  ;;  %v6501_v2 = vld [vmem:[%s8613_s3 + $0x28] sm:$0x1] }
0x3bb3   :  { %v4082_v39 = vpop.permute.xlu1 %4081 }
0x3bb4   :  { %v4089_v57 = vsel %vm1319_vm6, %v4088_v58, %v4082_v39 }
0x3bbb   :  { %v4086_v25 = vpop.permute.xlu1 %4085 }
0x3bbc   :  { %v4090_v21 = vsel %vm1321_vm7, %v4089_v57, %v4086_v25 }
0x3bff   :  { %v5129_v0 = vpop.permute.xlu2 %5128 }
0x3c00   :  { %v5131_v35 = vsel %vm84_vm1, %v4090_v21, %v5129_v0 }
0x3c01   :  { %5147 = vmatpush.msra.mxu0 %v5131_v35 }
0x3c02   :  { %5960 = vmatmul.msk.f32.vlgmr.msra.gmra.mxu0 %vm281_vm13, %v6499_v23 }
0x3c0a   :  { %5961 = vmatmul.msk.f32.gmra.mxu0 %vm281_vm13, %v6500_v62 }
0x3c12   :  { %5962 = vmatmul.msk.f32.gmra.mxu0 %vm281_vm13, %v6501_v2 }
0x3c7f   :  { %v5149_v51 = vpop.f32.mrf.mxu0 }
0x3c80   :  { %v5161_v20 = vrot.slane %v5149_v51, 7  ;;  %v5176_v55 = vadd.f32 %v5149_v51, %v7423_v3 }
0x3c82   :  { %v8452_v41 = vadd.f32 %v6502_v54, %v5176_v55  ;;  %5166 = vrot.lane.b32.xlu1 %v5161_v20, %s6536_s25 }
0x3c84   :  { %v5188_v45 = vsel %vm84_vm1, %v8452_v41, 0.0 }
0x3c85   :  { %5189 = vadd.xlane.f32.xlu0 %v5188_v45 }
0x3c87   :  { %v5152_v18 = vpop.f32.mrf.mxu0 }
0x3c88   :  { %v5177_v13 = vadd.f32 %v5152_v18, %v7435_v33  ;;  %v5162_v15 = vrot.slane %v5152_v18, 7 }
0x3c8a   :  { %v5182_v3 = vadd.f32 %v6503_v44, %v5177_v13  ;;  %v5163_v30 = vsel %vm331_vm12, %v5161_v20, %v5162_v15  ;;  %v6505_v44 = vld [vmem:[%s8612_s2 + $0xf0] sm:$0xff] }
0x3c8c   :  { %v5191_v46 = vsel %vm84_vm1, %v5182_v3, 0.0 }
0x3c8f   :  { %v5155_v9 = vpop.f32.mrf.mxu0 }
0x3c90   :  { %v5164_v11 = vrot.slane %v5155_v9, 7 }
0x3c92   :  { %v5165_v25 = vsel %vm331_vm12, %v5162_v15, %v5164_v11 }
0x3cac   :  { %5192 = vadd.xlane.f32.xlu1 %v5191_v46 }
0x3cf4   :  { %v5167_v50 = vpop.permute.xlu1 %5166 }
0x3cf5   :  { %v5175_v5 = vsel %vm331_vm12, %v5155_v9, %v5167_v50 }
0x3cf6   :  { %v5178_v47 = vadd.f32 %v5175_v5, %v7447_v28 }
0x3cf8   :  { %v8467_v49 = vadd.f32 %v6504_v14, %v5178_v47  ;;  %v5190_v33 = vpop.xlane.xlu0 %5189 }
0x3cf9   :  { %v5203_v8 = vmul.f32 %v5190_v33, %v6629_v27 }
0x3cfa   :  { %v5194_v36 = vsel %vm84_vm1, %v8467_v49, 0.0 }
0x3cfb   :  { %v5208_v48 = vsub.f32 %v8452_v41, %v5203_v8  ;;  %5195 = vadd.xlane.f32.xlu2 %v5194_v36  ;;  %v6506_v8 = vld [vmem:[%s8612_s2 + $0xf8] sm:$0x3] }
0x3cfd   :  { %v5213_v40 = vmul.f32 %v5208_v48, %v5208_v48 }
0x3cff   :  { %v5218_v59 = vsel %vm84_vm1, %v5213_v40, 0.0 }
0x3d00   :  { %5219 = vadd.xlane.f32.xlu1 %v5218_v59 }
0x3d1f   :  { %v5193_v28 = vpop.xlane.xlu1 %5192 }
0x3d20   :  { %v5204_v16 = vmul.f32 %v5193_v28, %v6629_v27 }
0x3d22   :  { %v5209_v52 = vsub.f32 %v5182_v3, %v5204_v16 }
0x3d24   :  { %v5214_v10 = vmul.f32 %v5209_v52, %v5209_v52 }
0x3d26   :  { %v5221_v19 = vsel %vm84_vm1, %v5214_v10, 0.0 }
0x3d27   :  { %5222 = vadd.xlane.f32.xlu1 %v5221_v19 }
0x3d40   :  { %5168 = vrot.lane.b32.xlu1 %v5163_v30, %s6536_s25 }
0x3d6e   :  { %v5196_v17 = vpop.xlane.xlu2 %5195 }
0x3d6f   :  { %v5205_v29 = vmul.f32 %v5196_v17, %v6629_v27  ;;  %v8526_v17 = vld [vmem:[%s8611_s1 + $0x60] ss:$0 sm:$0xff] }
0x3d71   :  { %v8480_v12 = vsub.f32 %v8467_v49, %v5205_v29 }
0x3d73   :  { %v5220_v26 = vpop.xlane.xlu1 %5219  ;;  %v5215_v61 = vmul.f32 %v8480_v12, %v8480_v12 }
0x3d74   :  { %v5233_v63 = vmul.f32 %v5220_v26, %v6629_v27 }
0x3d75   :  { %v5224_v32 = vsel %vm84_vm1, %v5215_v61, 0.0 }
0x3d76   :  { %v5238_v43 = vadd.f32 1e-05, %v5233_v63  ;;  %5225 = vadd.xlane.f32.xlu2 %v5224_v32 }
0x3d78   :  { %6426 = vrsqrt.f32 %v5238_v43  ;;  %vm5249_vm15 = vweird.f32 %v5238_v43 }
0x3d7e   :  { %v6427_v6 = vpop.eup %6426 }
0x3d7f   :  { %v5244_v60 = vmul.f32 %v6427_v6, %v5238_v43  ;;  %vm5250_vm14 = vweird.f32 %v6427_v6 }
0x3d80   :  { %vm5251_vm6 = vmor %vm5249_vm15, %vm5250_vm14 }
0x3d81   :  { %v5245_v42 = vmul.f32 %v6427_v6, %v5244_v60 }
0x3d83   :  { %v5246_v1 = vmul.f32 0.5, %v5245_v42 }
0x3d85   :  { %v5247_v22 = vsub.f32 1.5, %v5246_v1 }
0x3d87   :  { %v5248_v4 = vmul.f32 %v6427_v6, %v5247_v22 }
0x3d89   :  { %v5252_v24 = vsel %vm5251_vm6, %v6427_v6, %v5248_v4 }
0x3d8a   :  { %v5293_v53 = vmul.f32 %v5252_v24, %v5208_v48 }
0x3d8c   :  { %v5299_v39 = vmul.f32 %v8489_v7, %v5293_v53 }
0x3d8e   :  { %v5305_v58 = vadd.f32 %v8494_v37, %v5299_v39  ;;  %5170 = vrot.lane.b32.xlu2 %v5165_v25, %s6536_s25 }
0x3d90   :  { %5963 = vmatmul.msk.f32.vlgmr.msrb.gmra.mxu1 %vm84_vm1, %v5305_v58 }
0x3d9a   :  { %v5223_v57 = vpop.xlane.xlu1 %5222 }
0x3d9b   :  { %v5234_v21 = vmul.f32 %v5223_v57, %v6629_v27 }
0x3d9d   :  { %v5239_v0 = vadd.f32 1e-05, %v5234_v21 }
0x3d9f   :  { %6428 = vrsqrt.f32 %v5239_v0  ;;  %vm5259_vm2 = vweird.f32 %v5239_v0 }
0x3da5   :  { %v6429_v35 = vpop.eup %6428 }
0x3da6   :  { %v5254_v23 = vmul.f32 %v6429_v35, %v5239_v0  ;;  %vm5260_vm7 = vweird.f32 %v6429_v35 }
0x3da7   :  { %vm5261_vm3 = vmor %vm5259_vm2, %vm5260_vm7 }
0x3da8   :  { %v5255_v62 = vmul.f32 %v6429_v35, %v5254_v23 }
0x3daa   :  { %v5256_v2 = vmul.f32 0.5, %v5255_v62 }
0x3dac   :  { %v5257_v51 = vsub.f32 1.5, %v5256_v2 }
0x3dae   :  { %v5258_v20 = vmul.f32 %v6429_v35, %v5257_v51 }
0x3db0   :  { %v5262_v55 = vsel %vm5261_vm3, %v6429_v35, %v5258_v20 }
0x3db1   :  { %v5294_v54 = vmul.f32 %v5262_v55, %v5209_v52 }
0x3db2   :  { %v5169_v45 = vpop.permute.xlu1 %5168 }
0x3db3   :  { %v5179_v18 = vadd.f32 %v5169_v45, %v7493_v31  ;;  %v5300_v13 = vmul.f32 %v8489_v7, %v5294_v54 }
0x3db5   :  { %v5184_v3 = vadd.f32 %v6505_v44, %v5179_v18  ;;  %v5306_v46 = vadd.f32 %v8494_v37, %v5300_v13 }
0x3db7   :  { %5964 = vmatmul.msk.f32.gmra.mxu1 %vm84_vm1, %v5306_v46  ;;  %v5197_v50 = vsel %vm84_vm1, %v5184_v3, 0.0 }
0x3db8   :  { %5198 = vadd.xlane.f32.xlu1 %v5197_v50 }
0x3de9   :  { %v5226_v9 = vpop.xlane.xlu2 %5225 }
0x3dea   :  { %v5235_v5 = vmul.f32 %v5226_v9, %v6629_v27 }
0x3dec   :  { %v5240_v47 = vadd.f32 1e-05, %v5235_v5 }
0x3dee   :  { %6430 = vrsqrt.f32 %v5240_v47  ;;  %vm5269_vm5 = vweird.f32 %v5240_v47 }
0x3df1   :  { %v5171_v31 = vpop.permute.xlu2 %5170 }
0x3df2   :  { %v5180_v14 = vadd.f32 %v5171_v31, %v7522_v34 }
0x3df4   :  { %v6431_v33 = vpop.eup %6430  ;;  %v8515_v36 = vadd.f32 %v6506_v8, %v5180_v14 }
0x3df5   :  { %v5264_v48 = vmul.f32 %v6431_v33, %v5240_v47  ;;  %vm5270_vm4 = vweird.f32 %v6431_v33 }
0x3df6   :  { %v5200_v40 = vsel %vm97_vm11, %v8515_v36, 0.0  ;;  %vm5271_vm8 = vmor %vm5269_vm5, %vm5270_vm4 }
0x3df7   :  { %v5265_v59 = vmul.f32 %v6431_v33, %v5264_v48  ;;  %5201 = vadd.xlane.f32.xlu2 %v5200_v40 }
0x3df9   :  { %v5266_v28 = vmul.f32 0.5, %v5265_v59 }
0x3dfb   :  { %v5267_v16 = vsub.f32 1.5, %v5266_v28 }
0x3dfd   :  { %v5268_v52 = vmul.f32 %v6431_v33, %v5267_v16 }
0x3dff   :  { %v5272_v34 = vsel %vm5271_vm8, %v6431_v33, %v5268_v52 }
0x3e00   :  { %v5295_v10 = vmul.f32 %v5272_v34, %v8480_v12 }
0x3e02   :  { %v5301_v19 = vmul.f32 %v8489_v7, %v5295_v10 }
0x3e04   :  { %v5307_v15 = vadd.f32 %v8494_v37, %v5301_v19 }
0x3e06   :  { %5965 = vmatmul.msk.f32.gmra.mxu1 %vm84_vm1, %v5307_v15 }
0x3e0d   :  { %v5342_v30 = vpop.f32.mrf.mxu1 }
0x3e0e   :  { %v5343_v29 = vadd.f32 %v8526_v17, %v5342_v30 }
0x3e10   :  { %v5362_v26 = vmul.f32 0.70710677, %v5343_v29  ;;  %v5357_v52 = vmul.f32 0.5, %v5343_v29 }
0x3e12   :  { %v5367_v61 = vmul.f32 %v5362_v26, %v5362_v26 }
0x3e14   :  { %v5368_v63 = vmin.f32 %v5367_v61, 16.0 }
0x3e16   :  { %v5369_v32 = vmul.f32 2.1237322e-06, %v5368_v63  ;;  %v5380_v43 = vmul.f32 3.8918573e-05, %v5368_v63 }
0x3e18   :  { %v5370_v12 = vadd.f32 0.00028619796, %v5369_v32  ;;  %v5381_v6 = vadd.f32 0.001143296, %v5380_v43 }
0x3e1a   :  { %v5371_v60 = vmul.f32 %v5370_v12, %v5368_v63  ;;  %v5382_v42 = vmul.f32 %v5381_v6, %v5368_v63 }
0x3e1c   :  { %v5372_v1 = vadd.f32 0.0036580483, %v5371_v60  ;;  %v5383_v22 = vadd.f32 0.014752088, %v5382_v42 }
0x3e1e   :  { %v5384_v4 = vmul.f32 %v5383_v22, %v5368_v63  ;;  %v5373_v11 = vmul.f32 %v5372_v1, %v5368_v63 }
0x3e20   :  { %v5385_v24 = vadd.f32 0.112945676, %v5384_v4  ;;  %v5374_v39 = vadd.f32 0.05243302, %v5373_v11 }
0x3e22   :  { %v5386_v53 = vmul.f32 %v5385_v24, %v5368_v63  ;;  %v5375_v57 = vmul.f32 %v5374_v39, %v5368_v63 }
0x3e24   :  { %v5387_v25 = vadd.f32 0.4994258, %v5386_v53  ;;  %v5376_v35 = vadd.f32 0.18741608, %v5375_v57 }
0x3e26   :  { %v5388_v58 = vmul.f32 %v5387_v25, %v5368_v63  ;;  %v5377_v51 = vmul.f32 %v5376_v35, %v5368_v63 }
0x3e28   :  { %v5389_v21 = vadd.f32 1.0, %v5388_v58  ;;  %v5378_v18 = vadd.f32 1.1283791, %v5377_v51 }
0x3e2a   :  { %6432 = vrcp.f32 %v5389_v21  ;;  %v5401_v13 = vand.u32 2147483648, %v5389_v21  ;;  %v5399_v50 = vand.u32 2147483647, %v5389_v21  ;;  %vm5395_vm10 = vweird.f32 %v5389_v21 }
0x3e2b   :  { %v5199_v0 = vpop.xlane.xlu1 %5198  ;;  %v5379_v31 = vmul.f32 %v5378_v18, %v5362_v26 }
0x3e2c   :  { %v5206_v23 = vmul.f32 %v5199_v0, %v6629_v27  ;;  %v5402_v47 = vor.u32 1.1754944e-38, %v5401_v13  ;;  %vm5400_vm14 = vcmp.eq.f32.partialorder %v5399_v50, 8.507059e+37 }
0x3e2e   :  { %v8530_v62 = vsub.f32 %v5184_v3, %v5206_v23 }
0x3e30   :  { %v6433_v2 = vpop.eup %6432  ;;  %v5216_v20 = vmul.f32 %v8530_v62, %v8530_v62 }
0x3e31   :  { %v5391_v55 = vmul.f32 %v6433_v2, %v5389_v21  ;;  %vm5396_vm9 = vweird.f32 %v6433_v2 }
0x3e32   :  { %v5227_v54 = vsel %vm84_vm1, %v5216_v20, 0.0  ;;  %vm5397_vm0 = vmor %vm5395_vm10, %vm5396_vm9 }
0x3e33   :  { %v5392_v45 = vsub.f32 1.0, %v5391_v55  ;;  %5228 = vadd.xlane.f32.xlu0 %v5227_v54 }
0x3e34   :  { %v5345_v44 = vpop.f32.mrf.mxu1 }
0x3e35   :  { %v5393_v46 = vmul.f32 %v6433_v2, %v5392_v45  ;;  %v5346_v9 = vadd.f32 %v8526_v17, %v5345_v44 }
0x3e37   :  { %v5394_v3 = vadd.f32 %v6433_v2, %v5393_v46  ;;  %v5363_v5 = vmul.f32 0.70710677, %v5346_v9  ;;  %v5358_v54 = vmul.f32 0.5, %v5346_v9 }
0x3e39   :  { %v5398_v14 = vsel %vm5397_vm0, %v6433_v2, %v5394_v3  ;;  %v5407_v33 = vmul.f32 %v5363_v5, %v5363_v5 }
0x3e3a   :  { %v5403_v8 = vsel %vm5400_vm14, %v5402_v47, %v5398_v14 }
0x3e3b   :  { %v5404_v48 = vmul.f32 %v5403_v8, %v5379_v31  ;;  %v5408_v40 = vmin.f32 %v5407_v33, 16.0 }
0x3e3d   :  { %v5968_v59 = vclamps-f32 %v5404_v48, 1.0  ;;  %v5409_v28 = vmul.f32 2.1237322e-06, %v5408_v40  ;;  %v5420_v16 = vmul.f32 3.8918573e-05, %v5408_v40 }
0x3e3f   :  { %v5567_v34 = vadd.f32 1.0, %v5968_v59  ;;  %v5410_v10 = vadd.f32 0.00028619796, %v5409_v28  ;;  %v5421_v19 = vadd.f32 0.001143296, %v5420_v16 }
0x3e41   :  { %v5572_v15 = vmul.f32 %v5567_v34, %v5357_v52  ;;  %v5411_v30 = vmul.f32 %v5410_v10, %v5408_v40  ;;  %v5422_v61 = vmul.f32 %v5421_v19, %v5408_v40 }
0x3e43   :  { %v5423_v63 = vadd.f32 0.014752088, %v5422_v61  ;;  %5593 = vmatmul.f32.vlgmr.msrb.gmra.mxu3 %v5572_v15  ;;  %v5412_v32 = vadd.f32 0.0036580483, %v5411_v30 }
0x3e45   :  { %v5424_v26 = vmul.f32 %v5423_v63, %v5408_v40  ;;  %v5413_v12 = vmul.f32 %v5412_v32, %v5408_v40 }
0x3e47   :  { %v5425_v43 = vadd.f32 0.112945676, %v5424_v26  ;;  %v5414_v42 = vadd.f32 0.05243302, %v5413_v12 }
0x3e49   :  { %v5426_v6 = vmul.f32 %v5425_v43, %v5408_v40  ;;  %v5415_v4 = vmul.f32 %v5414_v42, %v5408_v40 }
0x3e4b   :  { %v5427_v60 = vadd.f32 0.4994258, %v5426_v6  ;;  %v5416_v29 = vadd.f32 0.18741608, %v5415_v4 }
0x3e4d   :  { %v5428_v1 = vmul.f32 %v5427_v60, %v5408_v40  ;;  %v5417_v24 = vmul.f32 %v5416_v29, %v5408_v40 }
0x3e4f   :  { %v5429_v22 = vadd.f32 1.0, %v5428_v1  ;;  %v5418_v58 = vadd.f32 1.1283791, %v5417_v24 }
0x3e51   :  { %6434 = vrcp.f32 %v5429_v22  ;;  %v5441_v25 = vand.u32 2147483648, %v5429_v22  ;;  %v5439_v21 = vand.u32 2147483647, %v5429_v22  ;;  %vm5435_vm6 = vweird.f32 %v5429_v22 }
0x3e52   :  { %v5419_v23 = vmul.f32 %v5418_v58, %v5363_v5 }
0x3e53   :  { %v5442_v35 = vor.u32 1.1754944e-38, %v5441_v25  ;;  %vm5440_vm2 = vcmp.eq.f32.partialorder %v5439_v21, 8.507059e+37 }
0x3e57   :  { %v6435_v11 = vpop.eup %6434 }
0x3e58   :  { %v5431_v53 = vmul.f32 %v6435_v11, %v5429_v22  ;;  %vm5436_vm15 = vweird.f32 %v6435_v11 }
0x3e59   :  { %vm5437_vm7 = vmor %vm5435_vm6, %vm5436_vm15 }
0x3e5a   :  { %v5432_v39 = vsub.f32 1.0, %v5431_v53 }
0x3e5c   :  { %v5433_v57 = vmul.f32 %v6435_v11, %v5432_v39 }
0x3e5e   :  { %v5434_v0 = vadd.f32 %v6435_v11, %v5433_v57 }
0x3e60   :  { %v5438_v2 = vsel %vm5437_vm7, %v6435_v11, %v5434_v0 }
0x3e61   :  { %v5443_v51 = vsel %vm5440_vm2, %v5442_v35, %v5438_v2 }
0x3e62   :  { %v5444_v20 = vmul.f32 %v5443_v51, %v5419_v23 }
0x3e64   :  { %v5969_v55 = vclamps-f32 %v5444_v20, 1.0 }
0x3e66   :  { %v5568_v45 = vadd.f32 1.0, %v5969_v55 }
0x3e68   :  { %v5573_v18 = vmul.f32 %v5568_v45, %v5358_v54 }
0x3e6a   :  { %5596 = vmatmul.f32.gmra.mxu3 %v5573_v18  ;;  %v5202_v13 = vpop.xlane.xlu2 %5201 }
0x3e6b   :  { %v5207_v44 = vmul.f32 %v5202_v13, %v6629_v27 }
0x3e6d   :  { %v8538_v46 = vsub.f32 %v8515_v36, %v5207_v44 }
0x3e6f   :  { %v5217_v50 = vmul.f32 %v8538_v46, %v8538_v46 }
0x3e71   :  { %v5230_v3 = vsel %vm97_vm11, %v5217_v50, 0.0 }
0x3e72   :  { %5231 = vadd.xlane.f32.xlu0 %v5230_v3 }
0x3e83   :  { %v5348_v5 = vpop.f32.mrf.mxu1 }
0x3e84   :  { %v5349_v47 = vadd.f32 %v8526_v17, %v5348_v5 }
0x3e86   :  { %v5364_v31 = vmul.f32 0.70710677, %v5349_v47  ;;  %v5359_v51 = vmul.f32 0.5, %v5349_v47 }
0x3e88   :  { %v5447_v9 = vmul.f32 %v5364_v31, %v5364_v31 }
0x3e8a   :  { %v5448_v14 = vmin.f32 %v5447_v9, 16.0 }
0x3e8c   :  { %v5449_v33 = vmul.f32 2.1237322e-06, %v5448_v14  ;;  %v5460_v8 = vmul.f32 3.8918573e-05, %v5448_v14 }
0x3e8e   :  { %v5450_v48 = vadd.f32 0.00028619796, %v5449_v33  ;;  %v5461_v40 = vadd.f32 0.001143296, %v5460_v8 }
0x3e90   :  { %v5451_v59 = vmul.f32 %v5450_v48, %v5448_v14  ;;  %v5462_v28 = vmul.f32 %v5461_v40, %v5448_v14 }
0x3e92   :  { %v5452_v36 = vadd.f32 0.0036580483, %v5451_v59  ;;  %v5463_v16 = vadd.f32 0.014752088, %v5462_v28 }
0x3e94   :  { %v5464_v52 = vmul.f32 %v5463_v16, %v5448_v14  ;;  %v5453_v34 = vmul.f32 %v5452_v36, %v5448_v14 }
0x3e96   :  { %v5465_v10 = vadd.f32 0.112945676, %v5464_v52  ;;  %v5454_v15 = vadd.f32 0.05243302, %v5453_v34  ;;  %v5616_v34 = vld [vmem:[%s8613_s3 + $0x48] sm:$0xff] }
0x3e97   :  { %5632 = vmatpush.msrb.mxu2 %v5616_v34 }
0x3e98   :  { %v5466_v19 = vmul.f32 %v5465_v10, %v5448_v14  ;;  %v5455_v63 = vmul.f32 %v5454_v15, %v5448_v14  ;;  %v5615_v10 = vld [vmem:[%s8613_s3 + $0x40] sm:$0xff] }
0x3e99   :  { %5633 = vmatpush.msrb.mxu2 %v5615_v10 }
0x3e9a   :  { %v5467_v30 = vadd.f32 0.4994258, %v5466_v19  ;;  %v5456_v26 = vadd.f32 0.18741608, %v5455_v63 }
0x3e9c   :  { %v5468_v61 = vmul.f32 %v5467_v30, %v5448_v14  ;;  %v5457_v12 = vmul.f32 %v5456_v26, %v5448_v14 }
0x3e9e   :  { %v5469_v32 = vadd.f32 1.0, %v5468_v61  ;;  %v5458_v4 = vadd.f32 1.1283791, %v5457_v12 }
0x3ea0   :  { %6436 = vrcp.f32 %v5469_v32  ;;  %v5481_v29 = vand.u32 2147483648, %v5469_v32  ;;  %v5479_v24 = vand.u32 2147483647, %v5469_v32  ;;  %vm5475_vm4 = vweird.f32 %v5469_v32 }
0x3ea1   :  { %v5459_v25 = vmul.f32 %v5458_v4, %v5364_v31 }
0x3ea2   :  { %v5482_v39 = vor.u32 1.1754944e-38, %v5481_v29  ;;  %vm5480_vm8 = vcmp.eq.f32.partialorder %v5479_v24, 8.507059e+37 }
0x3ea6   :  { %v6437_v43 = vpop.eup %6436  ;;  %v5229_v6 = vpop.xlane.xlu0 %5228 }
0x3ea7   :  { %v5471_v60 = vmul.f32 %v6437_v43, %v5469_v32  ;;  %v5236_v42 = vmul.f32 %v5229_v6, %v6629_v27  ;;  %vm5476_vm3 = vweird.f32 %v6437_v43 }
0x3ea8   :  { %vm5477_vm5 = vmor %vm5475_vm4, %vm5476_vm3 }
0x3ea9   :  { %v5472_v1 = vsub.f32 1.0, %v5471_v60  ;;  %v5241_v22 = vadd.f32 1e-05, %v5236_v42 }
0x3eab   :  { %v5473_v11 = vmul.f32 %v6437_v43, %v5472_v1  ;;  %6438 = vrsqrt.f32 %v5241_v22  ;;  %vm5279_vm10 = vweird.f32 %v5241_v22 }
0x3ead   :  { %v5474_v53 = vadd.f32 %v6437_v43, %v5473_v11 }
0x3eaf   :  { %v5478_v58 = vsel %vm5477_vm5, %v6437_v43, %v5474_v53 }
0x3eb0   :  { %v5483_v57 = vsel %vm5480_vm8, %v5482_v39, %v5478_v58 }
0x3eb1   :  { %v6439_v21 = vpop.eup %6438  ;;  %v5484_v0 = vmul.f32 %v5483_v57, %v5459_v25 }
0x3eb2   :  { %v5274_v35 = vmul.f32 %v6439_v21, %v5241_v22  ;;  %vm5280_vm9 = vweird.f32 %v6439_v21 }
0x3eb3   :  { %v5970_v23 = vclamps-f32 %v5484_v0, 1.0  ;;  %vm5281_vm0 = vmor %vm5279_vm10, %vm5280_vm9 }
0x3eb4   :  { %v5275_v2 = vmul.f32 %v6439_v21, %v5274_v35 }
0x3eb5   :  { %v5569_v20 = vadd.f32 1.0, %v5970_v23 }
0x3eb6   :  { %v5276_v55 = vmul.f32 0.5, %v5275_v2 }
0x3eb7   :  { %v5574_v54 = vmul.f32 %v5569_v20, %v5359_v51 }
0x3eb8   :  { %v5277_v45 = vsub.f32 1.5, %v5276_v55 }
0x3eb9   :  { %5598 = vmatmul.f32.gmra.mxu3 %v5574_v54 }
0x3eba   :  { %v5278_v18 = vmul.f32 %v6439_v21, %v5277_v45 }
0x3ebc   :  { %v5282_v13 = vsel %vm5281_vm0, %v6439_v21, %v5278_v18 }
0x3ebd   :  { %v5296_v44 = vmul.f32 %v5282_v13, %v8530_v62 }
0x3ebf   :  { %v5302_v50 = vmul.f32 %v8489_v7, %v5296_v44 }
0x3ec1   :  { %v5308_v3 = vadd.f32 %v8494_v37, %v5302_v50 }
0x3ec3   :  { %5966 = vmatmul.msk.f32.gmra.mxu1 %vm84_vm1, %v5308_v3 }
0x3ec6   :  { %v5594_v5 = vpop.f32.mrf.mxu3 }
0x3ee5   :  { %v5232_v47 = vpop.xlane.xlu0 %5231 }
0x3ee6   :  { %v5237_v31 = vmul.f32 %v5232_v47, %v6629_v27 }
0x3ee8   :  { %v5242_v9 = vadd.f32 1e-05, %v5237_v31 }
0x3eea   :  { %6440 = vrsqrt.f32 %v5242_v9  ;;  %vm5289_vm15 = vweird.f32 %v5242_v9 }
0x3eed   :  { %v5597_v14 = vpop.f32.mrf.mxu3 }
0x3ef0   :  { %v6441_v33 = vpop.eup %6440 }
0x3ef1   :  { %v5284_v8 = vmul.f32 %v6441_v33, %v5242_v9  ;;  %vm5290_vm14 = vweird.f32 %v6441_v33 }
0x3ef2   :  { %vm5291_vm6 = vmor %vm5289_vm15, %vm5290_vm14 }
0x3ef3   :  { %v5285_v48 = vmul.f32 %v6441_v33, %v5284_v8 }
0x3ef5   :  { %v5286_v40 = vmul.f32 0.5, %v5285_v48 }
0x3ef7   :  { %v5287_v59 = vsub.f32 1.5, %v5286_v40 }
0x3ef9   :  { %v5288_v62 = vmul.f32 %v6441_v33, %v5287_v59 }
0x3efb   :  { %v5292_v28 = vsel %vm5291_vm6, %v6441_v33, %v5288_v62 }
0x3efc   :  { %v5297_v36 = vmul.f32 %v5292_v28, %v8538_v46  ;;  %v5614_v46 = vld [vmem:[%s8613_s3 + $0x38] sm:$0xff] }
0x3efd   :  { %5634 = vmatpush.msrb.mxu2 %v5614_v46 }
0x3efe   :  { %v5303_v16 = vmul.f32 %v8489_v7, %v5297_v36  ;;  %v5613_v7 = vld [vmem:[%s8613_s3 + $0x30] sm:$0xff] }
0x3eff   :  { %5635 = vmatpush.msrb.mxu2 %v5613_v7 }
0x3f00   :  { %v5309_v52 = vadd.f32 %v8494_v37, %v5303_v16  ;;  %v6508_v37 = vld [vmem:[%s8612_s2 + $0x108] ss:$0 sm:$0xff] }
0x3f01   :  { %v5595_v19 = vadd.f32 %v6508_v37, %v5594_v5 }
0x3f02   :  { %5967 = vmatmul.msk.f32.gmra.mxu1 %vm84_vm1, %v5309_v52 }
0x3f03   :  { %v5606_v15 = vadd.f32 %v5595_v19, %v7634_v56 }
0x3f05   :  { %v5608_v63 = vadd.f32 %v5606_v15, %v8452_v41 }
0x3f07   :  { %v5610_v6 = vmul.f32 0.5, %v5608_v63 }
0x3f3c   :  { %v5599_v30 = vpop.f32.mrf.mxu3 }
0x3f3d   :  { %v5600_v61 = vadd.f32 %v6508_v37, %v5599_v30 }
0x3f3f   :  { %v5607_v32 = vadd.f32 %v5600_v61, %v7652_v38 }
0x3f40   :  { %v5351_v26 = vpop.f32.mrf.mxu1 }
0x3f41   :  { %v5609_v43 = vadd.f32 %v5607_v32, %v8467_v49  ;;  %v5352_v12 = vadd.f32 %v8526_v17, %v5351_v26 }
0x3f43   :  { %v5611_v60 = vmul.f32 0.5, %v5609_v43  ;;  %v5365_v42 = vmul.f32 0.70710677, %v5352_v12  ;;  %v5360_v8 = vmul.f32 0.5, %v5352_v12 }
0x3f45   :  { %v5487_v1 = vmul.f32 %v5365_v42, %v5365_v42  ;;  %v5612_v22 = vsel %vm331_vm12, %v5610_v6, %v5611_v60 }
0x3f46   :  { %5973 = vmatmul.msk.f32.vlgmr.msrb.gmra.mxu2 %vm84_vm1, %v5612_v22 }
0x3f47   :  { %v5488_v56 = vmin.f32 %v5487_v1, 16.0 }
0x3f49   :  { %v5489_v4 = vmul.f32 2.1237322e-06, %v5488_v56  ;;  %v5500_v29 = vmul.f32 3.8918573e-05, %v5488_v56 }
0x3f4b   :  { %v5490_v11 = vadd.f32 0.00028619796, %v5489_v4  ;;  %v5501_v41 = vadd.f32 0.001143296, %v5500_v29 }
0x3f4d   :  { %v5491_v24 = vmul.f32 %v5490_v11, %v5488_v56  ;;  %v5502_v38 = vmul.f32 %v5501_v41, %v5488_v56 }
0x3f4f   :  { %v5503_v53 = vadd.f32 0.014752088, %v5502_v38  ;;  %v5492_v39 = vadd.f32 0.0036580483, %v5491_v24 }
0x3f51   :  { %v5504_v49 = vmul.f32 %v5503_v53, %v5488_v56  ;;  %v5493_v58 = vmul.f32 %v5492_v39, %v5488_v56  ;;  %v5641_v53 = vld [vmem:[%s8612_s2 + $0x100] sm:$0xff] }
0x3f52   :  { %5660 = vmatpush.msrb.mxu0 %v5641_v53 }
0x3f53   :  { %v5505_v25 = vadd.f32 0.112945676, %v5504_v49  ;;  %v5494_v0 = vadd.f32 0.05243302, %v5493_v58 }
0x3f55   :  { %v5506_v57 = vmul.f32 %v5505_v25, %v5488_v56  ;;  %v5495_v2 = vmul.f32 %v5494_v0, %v5488_v56 }
0x3f57   :  { %v5507_v21 = vadd.f32 0.4994258, %v5506_v57  ;;  %v5496_v51 = vadd.f32 0.18741608, %v5495_v2 }
0x3f59   :  { %v5508_v35 = vmul.f32 %v5507_v21, %v5488_v56  ;;  %v5497_v55 = vmul.f32 %v5496_v51, %v5488_v56 }
0x3f5b   :  { %v5509_v23 = vadd.f32 1.0, %v5508_v35  ;;  %v5498_v13 = vadd.f32 1.1283791, %v5497_v55 }
0x3f5d   :  { %6442 = vrcp.f32 %v5509_v23  ;;  %v5521_v18 = vand.u32 2147483648, %v5509_v23  ;;  %v5519_v50 = vand.u32 2147483647, %v5509_v23  ;;  %vm5515_vm7 = vweird.f32 %v5509_v23 }
0x3f5e   :  { %v5499_v47 = vmul.f32 %v5498_v13, %v5365_v42 }
0x3f5f   :  { %v5522_v5 = vor.u32 1.1754944e-38, %v5521_v18  ;;  %vm5520_vm3 = vcmp.eq.f32.partialorder %v5519_v50, 8.507059e+37 }
0x3f63   :  { %v6443_v20 = vpop.eup %6442 }
0x3f64   :  { %v5511_v54 = vmul.f32 %v6443_v20, %v5509_v23  ;;  %vm5516_vm12 = vweird.f32 %v6443_v20 }
0x3f65   :  { %vm5517_vm2 = vmor %vm5515_vm7, %vm5516_vm12 }
0x3f66   :  { %v5512_v45 = vsub.f32 1.0, %v5511_v54 }
0x3f68   :  { %v5513_v44 = vmul.f32 %v6443_v20, %v5512_v45 }
0x3f6a   :  { %v5514_v3 = vadd.f32 %v6443_v20, %v5513_v44 }
0x3f6c   :  { %v5518_v31 = vsel %vm5517_vm2, %v6443_v20, %v5514_v3 }
0x3f6d   :  { %v5523_v9 = vsel %vm5520_vm3, %v5522_v5, %v5518_v31  ;;  %v5697_v5 = vld [vmem:[%s8611_s1 + $0x58] sm:$0xff]  ;;  %v5695_v31 = vld [vmem:[%s8611_s1 + $0x48] sm:$0xff] }
0x3f6e   :  { %v5524_v14 = vmul.f32 %v5523_v9, %v5499_v47  ;;  %5715 = vmatpush.msra.mxu2 %v5697_v5  ;;  %v5696_v47 = vld [vmem:[%s8611_s1 + $0x50] sm:$0xff]  ;;  %v5694_v9 = vld [vmem:[%s8611_s1 + $0x40] sm:$0xff] }
0x3f70   :  { %v5971_v33 = vclamps-f32 %v5524_v14, 1.0  ;;  %5716 = vmatpush.msra.mxu2 %v5696_v47 }
0x3f72   :  { %v5570_v48 = vadd.f32 1.0, %v5971_v33  ;;  %5717 = vmatpush.msra.mxu2 %v5695_v31 }
0x3f74   :  { %v5575_v40 = vmul.f32 %v5570_v48, %v5360_v8  ;;  %5718 = vmatpush.msra.mxu2 %v5694_v9 }
0x3f76   :  { %5601 = vmatmul.f32.gmra.mxu3 %v5575_v40 }
0x3f7f   :  { %v5354_v59 = vpop.f32.mrf.mxu1 }
0x3f80   :  { %v5355_v62 = vadd.f32 %v8526_v17, %v5354_v59 }
0x3f82   :  { %v5366_v28 = vmul.f32 0.70710677, %v5355_v62  ;;  %v5361_v21 = vmul.f32 0.5, %v5355_v62 }
0x3f84   :  { %v5527_v36 = vmul.f32 %v5366_v28, %v5366_v28 }
0x3f86   :  { %v5528_v16 = vmin.f32 %v5527_v36, 16.0 }
0x3f88   :  { %v5529_v52 = vmul.f32 2.1237322e-06, %v5528_v16  ;;  %v5540_v34 = vmul.f32 3.8918573e-05, %v5528_v16 }
0x3f8a   :  { %v5530_v10 = vadd.f32 0.00028619796, %v5529_v52  ;;  %v5541_v46 = vadd.f32 0.001143296, %v5540_v34 }
0x3f8c   :  { %v5531_v7 = vmul.f32 %v5530_v10, %v5528_v16  ;;  %v5542_v37 = vmul.f32 %v5541_v46, %v5528_v16 }
0x3f8e   :  { %v5543_v19 = vadd.f32 0.014752088, %v5542_v37  ;;  %v5532_v15 = vadd.f32 0.0036580483, %v5531_v7  ;;  %v6093_v7 = vld [vmem:[%s8611_s1 + $0x61] ss:$0 sm:$0xff] }
0x3f90   :  { %v5544_v30 = vmul.f32 %v5543_v19, %v5528_v16  ;;  %v5533_v63 = vmul.f32 %v5532_v15, %v5528_v16 }
0x3f92   :  { %v5545_v61 = vadd.f32 0.112945676, %v5544_v30  ;;  %v5534_v43 = vadd.f32 0.05243302, %v5533_v63 }
0x3f94   :  { %v5546_v32 = vmul.f32 %v5545_v61, %v5528_v16  ;;  %v5535_v17 = vmul.f32 %v5534_v43, %v5528_v16 }
0x3f96   :  { %v5547_v26 = vadd.f32 0.4994258, %v5546_v32  ;;  %v5536_v60 = vadd.f32 0.18741608, %v5535_v17 }
0x3f98   :  { %v5548_v12 = vmul.f32 %v5547_v26, %v5528_v16  ;;  %v5537_v1 = vmul.f32 %v5536_v60, %v5528_v16  ;;  %v6091_v16 = vld [vmem:[%s8612_s2 + $0x109] ss:$0 sm:$0xff] }
0x3f9a   :  { %v5549_v6 = vadd.f32 1.0, %v5548_v12  ;;  %v5538_v29 = vadd.f32 1.1283791, %v5537_v1 }
0x3f9c   :  { %6444 = vrcp.f32 %v5549_v6  ;;  %v5561_v4 = vand.u32 2147483648, %v5549_v6  ;;  %v5559_v41 = vand.u32 2147483647, %v5549_v6  ;;  %vm5555_vm5 = vweird.f32 %v5549_v6 }
0x3f9d   :  { %v5539_v39 = vmul.f32 %v5538_v29, %v5366_v28 }
0x3f9e   :  { %v5562_v38 = vor.u32 1.1754944e-38, %v5561_v4  ;;  %vm5560_vm9 = vcmp.eq.f32.partialorder %v5559_v41, 8.507059e+37 }
0x3fa2   :  { %v6445_v42 = vpop.eup %6444 }
0x3fa3   :  { %v5551_v22 = vmul.f32 %v6445_v42, %v5549_v6  ;;  %vm5556_vm4 = vweird.f32 %v6445_v42 }
0x3fa4   :  { %vm5557_vm8 = vmor %vm5555_vm5, %vm5556_vm4 }
0x3fa5   :  { %v5552_v56 = vsub.f32 1.0, %v5551_v22 }
0x3fa7   :  { %v5553_v11 = vmul.f32 %v6445_v42, %v5552_v56 }
0x3fa9   :  { %v5554_v24 = vadd.f32 %v6445_v42, %v5553_v11 }
0x3fab   :  { %v5558_v49 = vsel %vm5557_vm8, %v6445_v42, %v5554_v24 }
0x3fac   :  { %v5563_v25 = vsel %vm5560_vm9, %v5562_v38, %v5558_v49 }
0x3fad   :  { %v5564_v58 = vmul.f32 %v5563_v25, %v5539_v39 }
0x3faf   :  { %v5972_v57 = vclamps-f32 %v5564_v58, 1.0 }
0x3fb1   :  { %v5571_v0 = vadd.f32 1.0, %v5972_v57 }
0x3fb3   :  { %v5576_v35 = vmul.f32 %v5571_v0, %v5361_v21 }
0x3fb5   :  { %5603 = vmatmul.f32.gmra.mxu3 %v5576_v35 }
0x3fc9   :  { %v5637_v23 = vpop.f32.mrf.mxu2 }
0x3fca   :  { %v5640_v2 = vmax.f32 %v5637_v23, 0.0 }
0x3fcc   :  { %5974 = vmatmul.msk.f32.vlgmr.msrb.gmra.mxu0 %vm281_vm13, %v5640_v2 }
0x3ff9   :  { %v5602_v51 = vpop.f32.mrf.mxu3 }
0x4038   :  { %v5604_v20 = vpop.f32.mrf.mxu3 }
0x4049   :  { %v5662_v55 = vpop.f32.mrf.mxu0 }
0x404a   :  { %v5665_v54 = vmax.f32 %v5662_v55, 0.0 }
0x404c   :  { %v5668_v45 = vsel %vm97_vm11, %v5665_v54, 0.0 }
0x404d   :  { %5669 = vadd.xlane.f32.xlu0 %v5668_v45 }
0x40c0   :  { %v5670_v18 = vpop.xlane.xlu0 %5669 }
0x40c1   :  { %v5671_v13 = vmul.f32 %v5670_v18, %v6629_v27 }
0x40c3   :  { %v5672_v44 = vsub.f32 %v5665_v54, %v5671_v13 }
0x40c5   :  { %v5673_v50 = vmul.f32 %v5672_v44, %v5672_v44 }
0x40c7   :  { %v5674_v3 = vsel %vm97_vm11, %v5673_v50, 0.0 }
0x40c8   :  { %5675 = vadd.xlane.f32.xlu1 %v5674_v3 }
0x413b   :  { %v5676_v14 = vpop.xlane.xlu1 %5675 }
0x413c   :  { %v5677_v33 = vmul.f32 %v5676_v14, %v6629_v27  ;;  %v6092_v27 = vld [vmem:[%s8612_s2 + $0x10a] ss:$0 sm:$0xff] }
0x413e   :  { %v5678_v8 = vadd.f32 1e-05, %v5677_v33 }
0x4140   :  { %6446 = vrsqrt.f32 %v5678_v8  ;;  %vm5685_vm11 = vweird.f32 %v5678_v8 }
0x4146   :  { %v6447_v48 = vpop.eup %6446 }
0x4147   :  { %v5680_v40 = vmul.f32 %v6447_v48, %v5678_v8  ;;  %vm5686_vm13 = vweird.f32 %v6447_v48 }
0x4148   :  { %vm5687_vm10 = vmor %vm5685_vm11, %vm5686_vm13 }
0x4149   :  { %v5681_v59 = vmul.f32 %v6447_v48, %v5680_v40 }
0x414b   :  { %v5682_v62 = vmul.f32 0.5, %v5681_v59 }
0x414d   :  { %v5683_v28 = vsub.f32 1.5, %v5682_v62 }
0x414f   :  { %v5684_v36 = vmul.f32 %v6447_v48, %v5683_v28 }
0x4151   :  { %v5688_v52 = vsel %vm5687_vm10, %v6447_v48, %v5684_v36 }
0x4152   :  { %v5689_v34 = vmul.f32 %v5688_v52, %v5672_v44 }
0x4154   :  { %v5691_v10 = vmul.f32 %v6091_v16, %v5689_v34 }
0x4156   :  { %v5693_v46 = vadd.f32 %v6092_v27, %v5691_v10 }
0x4158   :  { %5975 = vmatmul.msk.f32.vlgmr.msra.gmra.mxu2 %vm84_vm1, %v5693_v46 }
0x41db   :  { %v5720_v37 = vpop.f32.mrf.mxu2 }
0x41dc   :  { %v5721_v19 = vadd.f32 %v6093_v7, %v5720_v37 }
0x41de   :  { %5723 = vst [vmem:[#allocation2] sm:$0x3] %v5721_v19 }
0x41df   :  { %5734 = dma.vmem_to_hbm [thread:$0]  %s5730_s7, 32, %s5732_s9, [#allocation3]  }
0x41e0   :  { %6533 = dma.done.wait [#allocation3], 32  }
0x41e1   :  { %6534 = vsyncadd [#allocation3], 4294967264 }
0x41e2   :  { %5739 = vsyncpa [#allocation3], 1 }

</bundles_post_ra>
